<compile_context>
chip_gen: v6e
topology: v6e:2x2x1
jax: 0.10.0
libtpu: 0.0.40
codegen_flags: <defaults>
</compile_context>

<pallas_src>
import functools

import jax
import jax.numpy as jnp
from jax.experimental import pallas as pl
from jax.experimental.pallas import tpu as pltpu

N_RES_BLOCKS = 2
N_CLASSES = 10
N_CHANNELS = 128          # FeatureExtractor outputs 128 channels
DIM_QUESTION = 11
BN_EPS = 1e-5

# (cin, cout, k, stride, pad) for FeatureExtractor
FE_SPECS = [(3, 128, 5, 2, 2), (128, 128, 3, 2, 1), (128, 128, 3, 2, 1),
            (128, 128, 3, 1, 1), (128, 128, 3, 1, 1)]


# ---------------------------------------------------------------------------
# Pallas kernels
# ---------------------------------------------------------------------------
def _conv_gemm_kernel(a_ref, w_ref, v_ref, o_ref):
    """y = bn(relu(a @ w + b)); (bias, bn_scale, bn_shift) packed as v_ref rows."""
    y = jnp.dot(a_ref[...], w_ref[...], preferred_element_type=jnp.float32)
    y = jnp.maximum(y + v_ref[0:1, :], 0.0)
    y = y * v_ref[1:2, :] + v_ref[2:3, :]
    o_ref[...] = y.astype(o_ref.dtype)


def conv_gemm(a, w, bias, scale, shift):
    """a: (M, K) im2col patches (batch folded into M), w: (K, N). Returns (M, N) bf16."""
    M, K = a.shape
    N = w.shape[1]
    # Split the GEMM over the grid only when it is large enough to be worth a second
    # step (v7x megacore); the small FE GEMMs stay single-step (v5e/v6e are 1-TC).
    nb = 2 if (M >= 512 and (M // 2) % 8 == 0) else 1
    TM = M // nb
    v = jnp.stack([bias, scale, shift]).astype(jnp.float32)          # (3, N)
    return pl.pallas_call(
        _conv_gemm_kernel,
        out_shape=jax.ShapeDtypeStruct((M, N), jnp.bfloat16),
        grid=(nb,),
        in_specs=[
            pl.BlockSpec((TM, K), lambda m: (m, 0)),
            pl.BlockSpec((K, N), lambda m: (0, 0)),
            pl.BlockSpec((3, N), lambda m: (0, 0)),
        ],
        out_specs=pl.BlockSpec((TM, N), lambda m: (m, 0)),
        compiler_params=pltpu.CompilerParams(dimension_semantics=("parallel",)),
    )(a.astype(jnp.bfloat16), w.astype(jnp.bfloat16), v)


def _taps_3x3(h, mask_ref, shifts, bm):
    """Build the (BM, 9C) im2col operand of a 3x3/s1/p1 conv from an in-VMEM f32
    activation via sublane rolls (XLU) + precomputed 0/1 masks (VPU). No matmuls."""
    cols = []
    for t, s in enumerate(shifts):
        tap = h if s == 0 else pltpu.roll(h, shift=(-s) % bm, axis=0)
        cols.append(tap * mask_ref[t])                               # mask: (BM, 1)
    return jnp.concatenate(cols, axis=-1).astype(jnp.bfloat16)       # (BM, 9C)


def _fe_tail_kernel(x_ref, w4_ref, w5_ref, v_ref, mask_ref, o_ref, *, shifts, bm):
    """FeatureExtractor conv4 + conv5 (3x3/s1/p1 -> ReLU -> BN, twice), fused in VMEM.
    v_ref rows: [b4, s4, t4, b5, s5, t5]."""
    h = x_ref[...].astype(jnp.float32)
    for layer, w_ref in enumerate((w4_ref, w5_ref)):
        taps = _taps_3x3(h, mask_ref, shifts, bm)
        y = jnp.dot(taps, w_ref[...], preferred_element_type=jnp.float32)
        y = jnp.maximum(y + v_ref[3 * layer:3 * layer + 1, :], 0.0)
        h = (y * v_ref[3 * layer + 1:3 * layer + 2, :]
             + v_ref[3 * layer + 2:3 * layer + 3, :])
    o_ref[...] = h.astype(o_ref.dtype)


def _res_block_kernel(x_ref, w1_ref, cb_ref, mask_ref, w2_ref, ss_ref, o_ref,
                      *, shifts, bm):
    """Whole ResBlock with batch folded into rows, fully resident in VMEM.

    conv1(1x1; coord channels + bias pre-folded into cb) -> ReLU -> conv2(3x3 as one
    GEMM on rolled taps) -> fused (bias + BatchNorm + FiLM) FMA -> ReLU -> + identity.
    """
    h = jnp.dot(x_ref[...], w1_ref[...],
                preferred_element_type=jnp.float32) + cb_ref[...]
    h = jnp.maximum(h, 0.0)                              # identity for the residual
    taps = _taps_3x3(h, mask_ref, shifts, bm)
    y = jnp.dot(taps, w2_ref[...], preferred_element_type=jnp.float32)
    y = y * ss_ref[0] + ss_ref[1]                        # b2 + BN + FiLM, one FMA
    o_ref[...] = (jnp.maximum(y, 0.0) + h).astype(o_ref.dtype)


def _classifier_kernel(x_ref, wc_ref, bc_ref, w1_ref, b1_ref, w2_ref, b2_ref,
                       w3_ref, b3_ref, feat_ref, logits_ref, *, batch, m):
    """1x1 conv (feature out) -> per-image global max pool -> 3-layer MLP.
    Batch folded into rows so every weight is streamed from HBM exactly once."""
    feat = jnp.dot(x_ref[...], wc_ref[...],
                   preferred_element_type=jnp.float32) + bc_ref[...]
    feat_ref[...] = feat
    pooled = jnp.concatenate(
        [jnp.max(feat[b * m:(b + 1) * m], axis=0, keepdims=True) for b in range(batch)],
        axis=0)                                          # (B, 512)  AdaptiveMaxPool2d
    h = jnp.dot(pooled.astype(jnp.bfloat16), w1_ref[...],
                preferred_element_type=jnp.float32) + b1_ref[...]
    h = jnp.maximum(h, 0.0)
    h = jnp.dot(h.astype(jnp.bfloat16), w2_ref[...],
                preferred_element_type=jnp.float32) + b2_ref[...]
    h = jnp.maximum(h, 0.0)
    logits_ref[...] = jnp.dot(h.astype(jnp.bfloat16), w3_ref[...],
                              preferred_element_type=jnp.float32) + b3_ref[...]


# ---------------------------------------------------------------------------
# Wrappers
# ---------------------------------------------------------------------------
def fe_tail_fused(x_flat, prm4, prm5, mask, shifts):
    bm, C = x_flat.shape
    v = jnp.stack([prm4["b"], prm4["bn_scale"], prm4["bn_shift"],
                   prm5["b"], prm5["bn_scale"], prm5["bn_shift"]]).astype(jnp.float32)
    kernel = functools.partial(_fe_tail_kernel, shifts=shifts, bm=bm)
    return pl.pallas_call(
        kernel,
        out_shape=jax.ShapeDtypeStruct((bm, C), jnp.bfloat16),
    )(x_flat.astype(jnp.bfloat16),
      prm4["w"].astype(jnp.bfloat16), prm5["w"].astype(jnp.bfloat16), v, mask)


def res_block_fused(x_flat, prm, cb, mask, shifts, film_mult, film_add, m):
    """x_flat: (B*M, C) bf16; cb: (B*M, C) coord/bias plane; film_*: (B, C)."""
    bm, C = x_flat.shape
    # Fold conv2 bias + BatchNorm + FiLM into one per-row scale/shift pair:
    # ((acc + b2)*bn_s + bn_t)*mult + add == acc*scale + shift
    scale = prm["bn_scale"] * film_mult                                      # (B, C)
    shift = (prm["b2"] * prm["bn_scale"] + prm["bn_shift"]) * film_mult + film_add
    ss = jnp.stack([jnp.repeat(scale, m, axis=0),
                    jnp.repeat(shift, m, axis=0)]).astype(jnp.float32)       # (2,BM,C)
    kernel = functools.partial(_res_block_kernel, shifts=shifts, bm=bm)
    return pl.pallas_call(
        kernel,
        out_shape=jax.ShapeDtypeStruct((bm, C), jnp.bfloat16),
    )(x_flat.astype(jnp.bfloat16),
      prm["w1"][:C].astype(jnp.bfloat16),      # main 1x1 channels
      cb, mask,
      prm["w2"].astype(jnp.bfloat16),          # (9C, C) flat 3x3 weights
      ss)


def classifier_fused(x_flat, params, batch, m):
    """x_flat: (B*M, C). Returns (logits (B, n_classes), feature (B*M, 512) f32)."""
    bm, C = x_flat.shape
    wc, bc = params["wc"], params["bc"]
    w1, b1 = params["wl1"], params["bl1"]
    w2, b2 = params["wl2"], params["bl2"]
    w3, b3 = params["wl3"], params["bl3"]
    F, H1, H2, NC = wc.shape[1], w1.shape[1], w2.shape[1], w3.shape[1]
    kernel = functools.partial(_classifier_kernel, batch=batch, m=m)
    feat, logits = pl.pallas_call(
        kernel,
        out_shape=(jax.ShapeDtypeStruct((bm, F), jnp.float32),
                   jax.ShapeDtypeStruct((batch, NC), jnp.float32)),
    )(x_flat.astype(jnp.bfloat16),
      wc.astype(jnp.bfloat16), bc.reshape(1, F).astype(jnp.float32),
      w1.astype(jnp.bfloat16), b1.reshape(1, H1).astype(jnp.float32),
      w2.astype(jnp.bfloat16), b2.reshape(1, H2).astype(jnp.float32),
      w3.astype(jnp.bfloat16), b3.reshape(1, NC).astype(jnp.float32))
    return logits, feat


# ---------------------------------------------------------------------------
# JAX glue: im2col, tap geometry, parameter init
# ---------------------------------------------------------------------------
def im2col(x, k, s, p):
    """x: (B, H, W, C) NHWC -> patches (B*Ho*Wo, k*k*C), Ho, Wo."""
    B, H, W, C = x.shape
    xp = jnp.pad(x, ((0, 0), (p, p), (p, p), (0, 0)))
    Ho = (H + 2 * p - k) // s + 1
    Wo = (W + 2 * p - k) // s + 1
    cols = [xp[:, i:i + s * Ho:s, j:j + s * Wo:s, :] for i in range(k) for j in range(k)]
    patches = jnp.concatenate(cols, axis=-1)
    return patches.reshape(B * Ho * Wo, k * k * C), Ho, Wo


def conv_block(x, prm, k, s, p):
    """conv -> ReLU -> BatchNorm (FeatureExtractor's `conv` helper), NHWC in/out."""
    B = x.shape[0]
    patches, Ho, Wo = im2col(x.astype(jnp.bfloat16), k, s, p)   # bf16 before pad/concat
    K = patches.shape[1]
    w = prm["w"]
    Kp = ((K + 127) // 128) * 128            # pad K (e.g. 75 -> 128) for clean lanes
    if Kp != K:
        patches = jnp.pad(patches, ((0, 0), (0, Kp - K)))
        w = jnp.pad(w, ((0, Kp - K), (0, 0)))
    y = conv_gemm(patches, w, prm["b"], prm["bn_scale"], prm["bn_shift"])
    return y.reshape(B, Ho, Wo, w.shape[1])


def tap_geometry(d, batch):
    """Static row shifts + validity masks for a 3x3/s1/p1 conv on a flattened
    (batch*d*d, C) NHWC activation (row = b*d*d + h*d + w). Tap order matches the
    (kh, kw, cin) im2col weight layout: t = (di+1)*3 + (dj+1)."""
    M = d * d
    r = jnp.arange(M)
    hh, ww = r // d, r % d
    shifts, masks = [], []
    for di in (-1, 0, 1):
        for dj in (-1, 0, 1):
            shifts.append(di * d + dj)
            valid = ((hh + di >= 0) & (hh + di < d) & (ww + dj >= 0) & (ww + dj < d))
            masks.append(jnp.tile(valid.astype(jnp.float32), batch))
    mask = jnp.stack(masks).reshape(9, batch * M, 1)
    return tuple(shifts), mask


def init_conv(key, cin, cout, k):
    kw, kb = jax.random.split(key)
    fan_in = cin * k * k
    w = jax.random.normal(kw, (k, k, cin, cout), jnp.float32) / jnp.sqrt(fan_in)
    b = 0.01 * jax.random.normal(kb, (cout,), jnp.float32)
    return w.reshape(k * k * cin, cout), b   # (kh, kw, cin) ordering matches im2col


def init_linear(key, fin, fout):
    kw, kb = jax.random.split(key)
    w = jax.random.normal(kw, (fin, fout), jnp.float32) / jnp.sqrt(fin)
    b = 0.01 * jax.random.normal(kb, (fout,), jnp.float32)
    return w, b


def init_bn(key, c):
    # TODO(synk): BatchNorm implemented in eval mode (running stats folded into an
    # affine); training-mode batch statistics are not implemented.
    k1, k2, k3, k4 = jax.random.split(key, 4)
    weight = 1.0 + 0.1 * jax.random.normal(k1, (c,), jnp.float32)
    bias = 0.1 * jax.random.normal(k2, (c,), jnp.float32)
    running_mean = 0.1 * jax.random.normal(k3, (c,), jnp.float32)
    running_var = 1.0 + 0.1 * jax.random.uniform(k4, (c,), jnp.float32)
    scale = weight / jnp.sqrt(running_var + BN_EPS)
    shift = bias - running_mean * scale
    return scale, shift


def init_params(key):
    keys = iter(jax.random.split(key, 32))
    params = {"fe": [], "res": []}
    for (cin, cout, k, s, p) in FE_SPECS:
        w, b = init_conv(next(keys), cin, cout, k)
        bn_s, bn_t = init_bn(next(keys), cout)
        params["fe"].append({"w": w, "b": b, "bn_scale": bn_s, "bn_shift": bn_t})
    params["wf"], params["bf"] = init_linear(next(keys), DIM_QUESTION,
                                             2 * N_RES_BLOCKS * N_CHANNELS)
    for _ in range(N_RES_BLOCKS):
        w1, b1 = init_conv(next(keys), N_CHANNELS + 2, N_CHANNELS, 1)
        w2, b2 = init_conv(next(keys), N_CHANNELS, N_CHANNELS, 3)
        bn_s, bn_t = init_bn(next(keys), N_CHANNELS)
        params["res"].append({"w1": w1, "b1": b1, "w2": w2, "b2": b2,
                              "bn_scale": bn_s, "bn_shift": bn_t})
    params["wc"], params["bc"] = init_conv(next(keys), N_CHANNELS, 512, 1)
    params["wl1"], params["bl1"] = init_linear(next(keys), 512, 1024)
    params["wl2"], params["bl2"] = init_linear(next(keys), 1024, 1024)
    params["wl3"], params["bl3"] = init_linear(next(keys), 1024, N_CLASSES)
    return params


# ---------------------------------------------------------------------------
# FiLM forward (matches the PyTorch module's semantics; debug prints omitted)
# ---------------------------------------------------------------------------
def film_forward(params, x_nchw, question):
    x = jnp.transpose(x_nchw, (0, 2, 3, 1))                  # NCHW -> NHWC
    B = x.shape[0]

    # FeatureExtractor: conv1..conv3 as im2col GEMMs, conv4+conv5 fused in one kernel
    for li in range(3):
        _, _, k, s, p = FE_SPECS[li]
        x = conv_block(x, params["fe"][li], k, s, p)
    _, d, _, C = x.shape
    M = d * d
    shifts, mask = tap_geometry(d, B)
    x_flat = x.reshape(B * M, C)
    x_flat = fe_tail_fused(x_flat, params["fe"][3], params["fe"][4], mask, shifts)

    # film_generator: (B,11)x(11,512) is tiny -- plain XLA, not worth a pallas_call
    film_vec = question.astype(jnp.float32) @ params["wf"] + params["bf"]
    film_vec = film_vec.reshape(B, N_RES_BLOCKS, 2, C)

    # coordinate = torch.arange(-1, 1 + 1e-5, 2/(d-1)) == linspace(-1, 1, d);
    # coordinate_x varies along W, coordinate_y along H (matches the torch expands).
    coordinate = jnp.linspace(-1.0, 1.0, d, dtype=jnp.float32)
    cx = jnp.tile(coordinate, d).reshape(M, 1)
    cy = jnp.repeat(coordinate, d).reshape(M, 1)

    for i in range(N_RES_BLOCKS):
        prm = params["res"][i]
        w1 = prm["w1"]
        # batch-independent 1x1-conv contribution of the coord channels + bias
        cb = cx @ w1[C:C + 1] + cy @ w1[C + 1:C + 2] + prm["b1"][None, :]
        cb = jnp.tile(cb, (B, 1)).astype(jnp.float32)         # (B*M, C)
        # Reproduce the reference's FiLMBlock argument swap: multiply by slot 0,
        # add slot 1.
        film_mult = film_vec[:, i, 0, :]
        film_add = film_vec[:, i, 1, :]
        x_flat = res_block_fused(x_flat, prm, cb, mask, shifts, film_mult, film_add, M)

    # Classifier: 1x1 conv -> global max pool -> MLP (once at M=B), all in one kernel.
    logits, feat = classifier_fused(x_flat, params, B, M)
    feature_nchw = jnp.transpose(feat.reshape(B, d, d, -1), (0, 3, 1, 2))
    return logits, feature_nchw


if __name__ == "__main__":
    key = jax.random.PRNGKey(0)
    kp, kx, kq = jax.random.split(key, 3)
    params = init_params(kp)
    x = jax.random.normal(kx, (2, 3, 32, 32), jnp.float32)    # NCHW like PyTorch
    question = jax.random.normal(kq, (2, DIM_QUESTION), jnp.float32)

    fwd = jax.jit(film_forward)
    logits, feature = fwd(params, x, question)
    jax.block_until_ready((logits, feature))
    assert logits.shape == (2, N_CLASSES), logits.shape
    assert feature.shape == (2, 512, 4, 4), feature.shape
    assert bool(jnp.all(jnp.isfinite(logits)))
    assert bool(jnp.all(jnp.isfinite(feature)))
    print("KERNEL_OK")
</pallas_src>

<mosaic_0001>
module attributes {stable_mosaic.version = 11 : i64} {
  func.func @_conv_gemm_kernel(%arg0: i32, %arg1: memref<256x128xbf16, #tpu.memory_space<vmem>>, %arg2: memref<128x128xbf16, #tpu.memory_space<vmem>>, %arg3: memref<3x128xf32, #tpu.memory_space<vmem>>, %arg4: memref<256x128xbf16, #tpu.memory_space<vmem>>) attributes {dimension_semantics = [#tpu.dimension_semantics<parallel>], iteration_bounds = array<i64: 2>, scalar_prefetch = 0 : i64, scratch_operands = 0 : i64, tpu.core_type = #tpu.core_type<tc>, window_params = [{transform_indices = @transform_0, window_bounds = array<i64: 256, 128>}, {pipeline_mode = #tpu.pipeline_mode<synchronous>, transform_indices = @transform_1, window_bounds = array<i64: 128, 128>}, {pipeline_mode = #tpu.pipeline_mode<synchronous>, transform_indices = @transform_2, window_bounds = array<i64: 3, 128>}, {transform_indices = @transform_3, window_bounds = array<i64: 256, 128>}]} {
    %c0 = arith.constant 0 : index
    %c0_0 = arith.constant 0 : index
    %0 = vector.load %arg1[%c0, %c0_0] : memref<256x128xbf16, #tpu.memory_space<vmem>>, vector<256x128xbf16>
    %c0_1 = arith.constant 0 : index
    %c0_2 = arith.constant 0 : index
    %1 = vector.load %arg2[%c0_1, %c0_2] : memref<128x128xbf16, #tpu.memory_space<vmem>>, vector<128x128xbf16>
    %cst = arith.constant dense<0.000000e+00> : vector<256x128xf32>
    %2 = tpu.matmul %0, %1, %cst {dimension_numbers = #tpu.dot_dimension_numbers<[1], [0], [0], [1], [0, 0, 1, 1], [], []>} : vector<256x128xbf16>, vector<128x128xbf16>, vector<256x128xf32> -> vector<256x128xf32>
    %c0_3 = arith.constant 0 : index
    %c0_4 = arith.constant 0 : index
    %3 = vector.load %arg3[%c0_3, %c0_4] : memref<3x128xf32, #tpu.memory_space<vmem>>, vector<1x128xf32>
    %4 = vector.broadcast %3 : vector<1x128xf32> to vector<256x128xf32>
    %5 = arith.addf %2, %4 : vector<256x128xf32>
    %cst_5 = arith.constant 0.000000e+00 : f32
    %6 = vector.broadcast %cst_5 : f32 to vector<256x128xf32>
    %7 = arith.maximumf %5, %6 : vector<256x128xf32>
    %c1 = arith.constant 1 : index
    %c0_6 = arith.constant 0 : index
    %8 = vector.load %arg3[%c1, %c0_6] : memref<3x128xf32, #tpu.memory_space<vmem>>, vector<1x128xf32>
    %9 = vector.broadcast %8 : vector<1x128xf32> to vector<256x128xf32>
    %10 = arith.mulf %7, %9 : vector<256x128xf32>
    %c2 = arith.constant 2 : index
    %c0_7 = arith.constant 0 : index
    %11 = vector.load %arg3[%c2, %c0_7] : memref<3x128xf32, #tpu.memory_space<vmem>>, vector<1x128xf32>
    %12 = vector.broadcast %11 : vector<1x128xf32> to vector<256x128xf32>
    %13 = arith.addf %10, %12 : vector<256x128xf32>
    %14 = arith.truncf %13 : vector<256x128xf32> to vector<256x128xbf16>
    %c0_8 = arith.constant 0 : index
    %c0_9 = arith.constant 0 : index
    %15 = vector.load %arg4[%c0_8, %c0_9] : memref<256x128xbf16, #tpu.memory_space<vmem>>, vector<256x128xbf16>
    tpu.vector_store %arg4[%c0_8, %c0_9], %14 {strides = array<i32>} : memref<256x128xbf16, #tpu.memory_space<vmem>>, vector<256x128xbf16>,
    return
  }
  func.func @transform_0(%arg0: i32) -> (i32, i32) {
    %c0_i32 = arith.constant 0 : i32
    %c0_i32_0 = arith.constant 0 : i32
    return %arg0, %c0_i32 : i32, i32
  }
  func.func @transform_1(%arg0: i32) -> (i32, i32) {
    %c0_i32 = arith.constant 0 : i32
    %c0_i32_0 = arith.constant 0 : i32
    %c0_i32_1 = arith.constant 0 : i32
    return %c0_i32, %c0_i32_0 : i32, i32
  }
  func.func @transform_2(%arg0: i32) -> (i32, i32) {
    %c0_i32 = arith.constant 0 : i32
    %c0_i32_0 = arith.constant 0 : i32
    %c0_i32_1 = arith.constant 0 : i32
    return %c0_i32, %c0_i32_0 : i32, i32
  }
  func.func @transform_3(%arg0: i32) -> (i32, i32) {
    %c0_i32 = arith.constant 0 : i32
    %c0_i32_0 = arith.constant 0 : i32
    return %arg0, %c0_i32 : i32, i32
  }
}

module attributes {stable_mosaic.version = 11 : i64} {
  func.func @_conv_gemm_kernel(%arg0: i32, %arg1: memref<128x1152xbf16, #tpu.memory_space<vmem>>, %arg2: memref<1152x128xbf16, #tpu.memory_space<vmem>>, %arg3: memref<3x128xf32, #tpu.memory_space<vmem>>, %arg4: memref<128x128xbf16, #tpu.memory_space<vmem>>) attributes {dimension_semantics = [#tpu.dimension_semantics<parallel>], iteration_bounds = array<i64: 1>, scalar_prefetch = 0 : i64, scratch_operands = 0 : i64, tpu.core_type = #tpu.core_type<tc>, window_params = [{transform_indices = @transform_0, window_bounds = array<i64: 128, 1152>}, {pipeline_mode = #tpu.pipeline_mode<synchronous>, transform_indices = @transform_1, window_bounds = array<i64: 1152, 128>}, {pipeline_mode = #tpu.pipeline_mode<synchronous>, transform_indices = @transform_2, window_bounds = array<i64: 3, 128>}, {transform_indices = @transform_3, window_bounds = array<i64: 128, 128>}]} {
    %c0 = arith.constant 0 : index
    %c0_0 = arith.constant 0 : index
    %0 = vector.load %arg1[%c0, %c0_0] : memref<128x1152xbf16, #tpu.memory_space<vmem>>, vector<128x1152xbf16>
    %c0_1 = arith.constant 0 : index
    %c0_2 = arith.constant 0 : index
    %1 = vector.load %arg2[%c0_1, %c0_2] : memref<1152x128xbf16, #tpu.memory_space<vmem>>, vector<1152x128xbf16>
    %cst = arith.constant dense<0.000000e+00> : vector<128x128xf32>
    %2 = tpu.matmul %0, %1, %cst {dimension_numbers = #tpu.dot_dimension_numbers<[1], [0], [0], [1], [0, 0, 1, 1], [], []>} : vector<128x1152xbf16>, vector<1152x128xbf16>, vector<128x128xf32> -> vector<128x128xf32>
    %c0_3 = arith.constant 0 : index
    %c0_4 = arith.constant 0 : index
    %3 = vector.load %arg3[%c0_3, %c0_4] : memref<3x128xf32, #tpu.memory_space<vmem>>, vector<1x128xf32>
    %4 = vector.broadcast %3 : vector<1x128xf32> to vector<128x128xf32>
    %5 = arith.addf %2, %4 : vector<128x128xf32>
    %cst_5 = arith.constant 0.000000e+00 : f32
    %6 = vector.broadcast %cst_5 : f32 to vector<128x128xf32>
    %7 = arith.maximumf %5, %6 : vector<128x128xf32>
    %c1 = arith.constant 1 : index
    %c0_6 = arith.constant 0 : index
    %8 = vector.load %arg3[%c1, %c0_6] : memref<3x128xf32, #tpu.memory_space<vmem>>, vector<1x128xf32>
    %9 = vector.broadcast %8 : vector<1x128xf32> to vector<128x128xf32>
    %10 = arith.mulf %7, %9 : vector<128x128xf32>
    %c2 = arith.constant 2 : index
    %c0_7 = arith.constant 0 : index
    %11 = vector.load %arg3[%c2, %c0_7] : memref<3x128xf32, #tpu.memory_space<vmem>>, vector<1x128xf32>
    %12 = vector.broadcast %11 : vector<1x128xf32> to vector<128x128xf32>
    %13 = arith.addf %10, %12 : vector<128x128xf32>
    %14 = arith.truncf %13 : vector<128x128xf32> to vector<128x128xbf16>
    %c0_8 = arith.constant 0 : index
    %c0_9 = arith.constant 0 : index
    %15 = vector.load %arg4[%c0_8, %c0_9] : memref<128x128xbf16, #tpu.memory_space<vmem>>, vector<128x128xbf16>
    tpu.vector_store %arg4[%c0_8, %c0_9], %14 {strides = array<i32>} : memref<128x128xbf16, #tpu.memory_space<vmem>>, vector<128x128xbf16>,
    return
  }
  func.func @transform_0(%arg0: i32) -> (i32, i32) {
    %c0_i32 = arith.constant 0 : i32
    %c0_i32_0 = arith.constant 0 : i32
    return %arg0, %c0_i32 : i32, i32
  }
  func.func @transform_1(%arg0: i32) -> (i32, i32) {
    %c0_i32 = arith.constant 0 : i32
    %c0_i32_0 = arith.constant 0 : i32
    %c0_i32_1 = arith.constant 0 : i32
    return %c0_i32, %c0_i32_0 : i32, i32
  }
  func.func @transform_2(%arg0: i32) -> (i32, i32) {
    %c0_i32 = arith.constant 0 : i32
    %c0_i32_0 = arith.constant 0 : i32
    %c0_i32_1 = arith.constant 0 : i32
    return %c0_i32, %c0_i32_0 : i32, i32
  }
  func.func @transform_3(%arg0: i32) -> (i32, i32) {
    %c0_i32 = arith.constant 0 : i32
    %c0_i32_0 = arith.constant 0 : i32
    return %arg0, %c0_i32 : i32, i32
  }
}

module attributes {stable_mosaic.version = 11 : i64} {
  func.func @_conv_gemm_kernel(%arg0: i32, %arg1: memref<32x1152xbf16, #tpu.memory_space<vmem>>, %arg2: memref<1152x128xbf16, #tpu.memory_space<vmem>>, %arg3: memref<3x128xf32, #tpu.memory_space<vmem>>, %arg4: memref<32x128xbf16, #tpu.memory_space<vmem>>) attributes {dimension_semantics = [#tpu.dimension_semantics<parallel>], iteration_bounds = array<i64: 1>, scalar_prefetch = 0 : i64, scratch_operands = 0 : i64, tpu.core_type = #tpu.core_type<tc>, window_params = [{transform_indices = @transform_0, window_bounds = array<i64: 32, 1152>}, {pipeline_mode = #tpu.pipeline_mode<synchronous>, transform_indices = @transform_1, window_bounds = array<i64: 1152, 128>}, {pipeline_mode = #tpu.pipeline_mode<synchronous>, transform_indices = @transform_2, window_bounds = array<i64: 3, 128>}, {transform_indices = @transform_3, window_bounds = array<i64: 32, 128>}]} {
    %c0 = arith.constant 0 : index
    %c0_0 = arith.constant 0 : index
    %0 = vector.load %arg1[%c0, %c0_0] : memref<32x1152xbf16, #tpu.memory_space<vmem>>, vector<32x1152xbf16>
    %c0_1 = arith.constant 0 : index
    %c0_2 = arith.constant 0 : index
    %1 = vector.load %arg2[%c0_1, %c0_2] : memref<1152x128xbf16, #tpu.memory_space<vmem>>, vector<1152x128xbf16>
    %cst = arith.constant dense<0.000000e+00> : vector<32x128xf32>
    %2 = tpu.matmul %0, %1, %cst {dimension_numbers = #tpu.dot_dimension_numbers<[1], [0], [0], [1], [0, 0, 1, 1], [], []>} : vector<32x1152xbf16>, vector<1152x128xbf16>, vector<32x128xf32> -> vector<32x128xf32>
    %c0_3 = arith.constant 0 : index
    %c0_4 = arith.constant 0 : index
    %3 = vector.load %arg3[%c0_3, %c0_4] : memref<3x128xf32, #tpu.memory_space<vmem>>, vector<1x128xf32>
    %4 = vector.broadcast %3 : vector<1x128xf32> to vector<32x128xf32>
    %5 = arith.addf %2, %4 : vector<32x128xf32>
    %cst_5 = arith.constant 0.000000e+00 : f32
    %6 = vector.broadcast %cst_5 : f32 to vector<32x128xf32>
    %7 = arith.maximumf %5, %6 : vector<32x128xf32>
    %c1 = arith.constant 1 : index
    %c0_6 = arith.constant 0 : index
    %8 = vector.load %arg3[%c1, %c0_6] : memref<3x128xf32, #tpu.memory_space<vmem>>, vector<1x128xf32>
    %9 = vector.broadcast %8 : vector<1x128xf32> to vector<32x128xf32>
    %10 = arith.mulf %7, %9 : vector<32x128xf32>
    %c2 = arith.constant 2 : index
    %c0_7 = arith.constant 0 : index
    %11 = vector.load %arg3[%c2, %c0_7] : memref<3x128xf32, #tpu.memory_space<vmem>>, vector<1x128xf32>
    %12 = vector.broadcast %11 : vector<1x128xf32> to vector<32x128xf32>
    %13 = arith.addf %10, %12 : vector<32x128xf32>
    %14 = arith.truncf %13 : vector<32x128xf32> to vector<32x128xbf16>
    %c0_8 = arith.constant 0 : index
    %c0_9 = arith.constant 0 : index
    %15 = vector.load %arg4[%c0_8, %c0_9] : memref<32x128xbf16, #tpu.memory_space<vmem>>, vector<32x128xbf16>
    tpu.vector_store %arg4[%c0_8, %c0_9], %14 {strides = array<i32>} : memref<32x128xbf16, #tpu.memory_space<vmem>>, vector<32x128xbf16>,
    return
  }
  func.func @transform_0(%arg0: i32) -> (i32, i32) {
    %c0_i32 = arith.constant 0 : i32
    %c0_i32_0 = arith.constant 0 : i32
    return %arg0, %c0_i32 : i32, i32
  }
  func.func @transform_1(%arg0: i32) -> (i32, i32) {
    %c0_i32 = arith.constant 0 : i32
    %c0_i32_0 = arith.constant 0 : i32
    %c0_i32_1 = arith.constant 0 : i32
    return %c0_i32, %c0_i32_0 : i32, i32
  }
  func.func @transform_2(%arg0: i32) -> (i32, i32) {
    %c0_i32 = arith.constant 0 : i32
    %c0_i32_0 = arith.constant 0 : i32
    %c0_i32_1 = arith.constant 0 : i32
    return %c0_i32, %c0_i32_0 : i32, i32
  }
  func.func @transform_3(%arg0: i32) -> (i32, i32) {
    %c0_i32 = arith.constant 0 : i32
    %c0_i32_0 = arith.constant 0 : i32
    return %arg0, %c0_i32 : i32, i32
  }
}

module attributes {stable_mosaic.version = 11 : i64} {
  func.func @_fe_tail_kernel(%arg0: memref<32x128xbf16, #tpu.memory_space<vmem>>, %arg1: memref<1152x128xbf16, #tpu.memory_space<vmem>>, %arg2: memref<1152x128xbf16, #tpu.memory_space<vmem>>, %arg3: memref<6x128xf32, #tpu.memory_space<vmem>>, %arg4: memref<9x32x1xf32, #tpu.memory_space<vmem>>, %arg5: memref<32x128xbf16, #tpu.memory_space<vmem>>) attributes {dimension_semantics = [], scalar_prefetch = 0 : i64, scratch_operands = 0 : i64, tpu.core_type = #tpu.core_type<tc>} {
    %c0 = arith.constant 0 : index
    %c0_0 = arith.constant 0 : index
    %0 = vector.load %arg0[%c0, %c0_0] : memref<32x128xbf16, #tpu.memory_space<vmem>>, vector<32x128xbf16>
    %1 = arith.extf %0 : vector<32x128xbf16> to vector<32x128xf32>
    %c5_i32 = arith.constant 5 : i32
    %2 = tpu.dynamic_rotate %1 by %c5_i32 dim 0 : vector<32x128xf32>, i32 -> vector<32x128xf32>
    %c0_1 = arith.constant 0 : index
    %c0_2 = arith.constant 0 : index
    %c0_3 = arith.constant 0 : index
    %3 = vector.load %arg4[%c0_1, %c0_2, %c0_3] : memref<9x32x1xf32, #tpu.memory_space<vmem>>, vector<1x32x1xf32>
    %4 = vector.shape_cast %3 : vector<1x32x1xf32> to vector<32x1xf32>
    %5 = vector.broadcast %4 : vector<32x1xf32> to vector<32x128xf32>
    %6 = arith.mulf %2, %5 : vector<32x128xf32>
    %c4_i32 = arith.constant 4 : i32
    %7 = tpu.dynamic_rotate %1 by %c4_i32 dim 0 : vector<32x128xf32>, i32 -> vector<32x128xf32>
    %c1 = arith.constant 1 : index
    %c0_4 = arith.constant 0 : index
    %c0_5 = arith.constant 0 : index
    %8 = vector.load %arg4[%c1, %c0_4, %c0_5] : memref<9x32x1xf32, #tpu.memory_space<vmem>>, vector<1x32x1xf32>
    %9 = vector.shape_cast %8 : vector<1x32x1xf32> to vector<32x1xf32>
    %10 = vector.broadcast %9 : vector<32x1xf32> to vector<32x128xf32>
    %11 = arith.mulf %7, %10 : vector<32x128xf32>
    %c3_i32 = arith.constant 3 : i32
    %12 = tpu.dynamic_rotate %1 by %c3_i32 dim 0 : vector<32x128xf32>, i32 -> vector<32x128xf32>
    %c2 = arith.constant 2 : index
    %c0_6 = arith.constant 0 : index
    %c0_7 = arith.constant 0 : index
    %13 = vector.load %arg4[%c2, %c0_6, %c0_7] : memref<9x32x1xf32, #tpu.memory_space<vmem>>, vector<1x32x1xf32>
    %14 = vector.shape_cast %13 : vector<1x32x1xf32> to vector<32x1xf32>
    %15 = vector.broadcast %14 : vector<32x1xf32> to vector<32x128xf32>
    %16 = arith.mulf %12, %15 : vector<32x128xf32>
    %c1_i32 = arith.constant 1 : i32
    %17 = tpu.dynamic_rotate %1 by %c1_i32 dim 0 : vector<32x128xf32>, i32 -> vector<32x128xf32>
    %c3 = arith.constant 3 : index
    %c0_8 = arith.constant 0 : index
    %c0_9 = arith.constant 0 : index
    %18 = vector.load %arg4[%c3, %c0_8, %c0_9] : memref<9x32x1xf32, #tpu.memory_space<vmem>>, vector<1x32x1xf32>
    %19 = vector.shape_cast %18 : vector<1x32x1xf32> to vector<32x1xf32>
    %20 = vector.broadcast %19 : vector<32x1xf32> to vector<32x128xf32>
    %21 = arith.mulf %17, %20 : vector<32x128xf32>
    %c4 = arith.constant 4 : index
    %c0_10 = arith.constant 0 : index
    %c0_11 = arith.constant 0 : index
    %22 = vector.load %arg4[%c4, %c0_10, %c0_11] : memref<9x32x1xf32, #tpu.memory_space<vmem>>, vector<1x32x1xf32>
    %23 = vector.shape_cast %22 : vector<1x32x1xf32> to vector<32x1xf32>
    %24 = vector.broadcast %23 : vector<32x1xf32> to vector<32x128xf32>
    %25 = arith.mulf %1, %24 : vector<32x128xf32>
    %c31_i32 = arith.constant 31 : i32
    %26 = tpu.dynamic_rotate %1 by %c31_i32 dim 0 : vector<32x128xf32>, i32 -> vector<32x128xf32>
    %c5 = arith.constant 5 : index
    %c0_12 = arith.constant 0 : index
    %c0_13 = arith.constant 0 : index
    %27 = vector.load %arg4[%c5, %c0_12, %c0_13] : memref<9x32x1xf32, #tpu.memory_space<vmem>>, vector<1x32x1xf32>
    %28 = vector.shape_cast %27 : vector<1x32x1xf32> to vector<32x1xf32>
    %29 = vector.broadcast %28 : vector<32x1xf32> to vector<32x128xf32>
    %30 = arith.mulf %26, %29 : vector<32x128xf32>
    %c29_i32 = arith.constant 29 : i32
    %31 = tpu.dynamic_rotate %1 by %c29_i32 dim 0 : vector<32x128xf32>, i32 -> vector<32x128xf32>
    %c6 = arith.constant 6 : index
    %c0_14 = arith.constant 0 : index
    %c0_15 = arith.constant 0 : index
    %32 = vector.load %arg4[%c6, %c0_14, %c0_15] : memref<9x32x1xf32, #tpu.memory_space<vmem>>, vector<1x32x1xf32>
    %33 = vector.shape_cast %32 : vector<1x32x1xf32> to vector<32x1xf32>
    %34 = vector.broadcast %33 : vector<32x1xf32> to vector<32x128xf32>
    %35 = arith.mulf %31, %34 : vector<32x128xf32>
    %c28_i32 = arith.constant 28 : i32
    %36 = tpu.dynamic_rotate %1 by %c28_i32 dim 0 : vector<32x128xf32>, i32 -> vector<32x128xf32>
    %c7 = arith.constant 7 : index
    %c0_16 = arith.constant 0 : index
    %c0_17 = arith.constant 0 : index
    %37 = vector.load %arg4[%c7, %c0_16, %c0_17] : memref<9x32x1xf32, #tpu.memory_space<vmem>>, vector<1x32x1xf32>
    %38 = vector.shape_cast %37 : vector<1x32x1xf32> to vector<32x1xf32>
    %39 = vector.broadcast %38 : vector<32x1xf32> to vector<32x128xf32>
    %40 = arith.mulf %36, %39 : vector<32x128xf32>
    %c27_i32 = arith.constant 27 : i32
    %41 = tpu.dynamic_rotate %1 by %c27_i32 dim 0 : vector<32x128xf32>, i32 -> vector<32x128xf32>
    %c8 = arith.constant 8 : index
    %c0_18 = arith.constant 0 : index
    %c0_19 = arith.constant 0 : index
    %42 = vector.load %arg4[%c8, %c0_18, %c0_19] : memref<9x32x1xf32, #tpu.memory_space<vmem>>, vector<1x32x1xf32>
    %43 = vector.shape_cast %42 : vector<1x32x1xf32> to vector<32x1xf32>
    %44 = vector.broadcast %43 : vector<32x1xf32> to vector<32x128xf32>
    %45 = arith.mulf %41, %44 : vector<32x128xf32>
    %46 = tpu.concatenate %6, %11, %16, %21, %25, %30, %35, %40, %45 in 1 : vector<32x128xf32>, vector<32x128xf32>, vector<32x128xf32>, vector<32x128xf32>, vector<32x128xf32>, vector<32x128xf32>, vector<32x128xf32>, vector<32x128xf32>, vector<32x128xf32> -> vector<32x1152xf32>
    %47 = arith.truncf %46 : vector<32x1152xf32> to vector<32x1152xbf16>
    %c0_20 = arith.constant 0 : index
    %c0_21 = arith.constant 0 : index
    %48 = vector.load %arg1[%c0_20, %c0_21] : memref<1152x128xbf16, #tpu.memory_space<vmem>>, vector<1152x128xbf16>
    %cst = arith.constant dense<0.000000e+00> : vector<32x128xf32>
    %49 = tpu.matmul %47, %48, %cst {dimension_numbers = #tpu.dot_dimension_numbers<[1], [0], [0], [1], [0, 0, 1, 1], [], []>} : vector<32x1152xbf16>, vector<1152x128xbf16>, vector<32x128xf32> -> vector<32x128xf32>
    %c0_22 = arith.constant 0 : index
    %c0_23 = arith.constant 0 : index
    %50 = vector.load %arg3[%c0_22, %c0_23] : memref<6x128xf32, #tpu.memory_space<vmem>>, vector<1x128xf32>
    %51 = vector.broadcast %50 : vector<1x128xf32> to vector<32x128xf32>
    %52 = arith.addf %49, %51 : vector<32x128xf32>
    %cst_24 = arith.constant 0.000000e+00 : f32
    %53 = vector.broadcast %cst_24 : f32 to vector<32x128xf32>
    %54 = arith.maximumf %52, %53 : vector<32x128xf32>
    %c1_25 = arith.constant 1 : index
    %c0_26 = arith.constant 0 : index
    %55 = vector.load %arg3[%c1_25, %c0_26] : memref<6x128xf32, #tpu.memory_space<vmem>>, vector<1x128xf32>
    %56 = vector.broadcast %55 : vector<1x128xf32> to vector<32x128xf32>
    %57 = arith.mulf %54, %56 : vector<32x128xf32>
    %c2_27 = arith.constant 2 : index
    %c0_28 = arith.constant 0 : index
    %58 = vector.load %arg3[%c2_27, %c0_28] : memref<6x128xf32, #tpu.memory_space<vmem>>, vector<1x128xf32>
    %59 = vector.broadcast %58 : vector<1x128xf32> to vector<32x128xf32>
    %60 = arith.addf %57, %59 : vector<32x128xf32>
    %c5_i32_29 = arith.constant 5 : i32
    %61 = tpu.dynamic_rotate %60 by %c5_i32_29 dim 0 : vector<32x128xf32>, i32 -> vector<32x128xf32>
    %c0_30 = arith.constant 0 : index
    %c0_31 = arith.constant 0 : index
    %c0_32 = arith.constant 0 : index
    %62 = vector.load %arg4[%c0_30, %c0_31, %c0_32] : memref<9x32x1xf32, #tpu.memory_space<vmem>>, vector<1x32x1xf32>
    %63 = vector.shape_cast %62 : vector<1x32x1xf32> to vector<32x1xf32>
    %64 = vector.broadcast %63 : vector<32x1xf32> to vector<32x128xf32>
    %65 = arith.mulf %61, %64 : vector<32x128xf32>
    %c4_i32_33 = arith.constant 4 : i32
    %66 = tpu.dynamic_rotate %60 by %c4_i32_33 dim 0 : vector<32x128xf32>, i32 -> vector<32x128xf32>
    %c1_34 = arith.constant 1 : index
    %c0_35 = arith.constant 0 : index
    %c0_36 = arith.constant 0 : index
    %67 = vector.load %arg4[%c1_34, %c0_35, %c0_36] : memref<9x32x1xf32, #tpu.memory_space<vmem>>, vector<1x32x1xf32>
    %68 = vector.shape_cast %67 : vector<1x32x1xf32> to vector<32x1xf32>
    %69 = vector.broadcast %68 : vector<32x1xf32> to vector<32x128xf32>
    %70 = arith.mulf %66, %69 : vector<32x128xf32>
    %c3_i32_37 = arith.constant 3 : i32
    %71 = tpu.dynamic_rotate %60 by %c3_i32_37 dim 0 : vector<32x128xf32>, i32 -> vector<32x128xf32>
    %c2_38 = arith.constant 2 : index
    %c0_39 = arith.constant 0 : index
    %c0_40 = arith.constant 0 : index
    %72 = vector.load %arg4[%c2_38, %c0_39, %c0_40] : memref<9x32x1xf32, #tpu.memory_space<vmem>>, vector<1x32x1xf32>
    %73 = vector.shape_cast %72 : vector<1x32x1xf32> to vector<32x1xf32>
    %74 = vector.broadcast %73 : vector<32x1xf32> to vector<32x128xf32>
    %75 = arith.mulf %71, %74 : vector<32x128xf32>
    %c1_i32_41 = arith.constant 1 : i32
    %76 = tpu.dynamic_rotate %60 by %c1_i32_41 dim 0 : vector<32x128xf32>, i32 -> vector<32x128xf32>
    %c3_42 = arith.constant 3 : index
    %c0_43 = arith.constant 0 : index
    %c0_44 = arith.constant 0 : index
    %77 = vector.load %arg4[%c3_42, %c0_43, %c0_44] : memref<9x32x1xf32, #tpu.memory_space<vmem>>, vector<1x32x1xf32>
    %78 = vector.shape_cast %77 : vector<1x32x1xf32> to vector<32x1xf32>
    %79 = vector.broadcast %78 : vector<32x1xf32> to vector<32x128xf32>
    %80 = arith.mulf %76, %79 : vector<32x128xf32>
    %c4_45 = arith.constant 4 : index
    %c0_46 = arith.constant 0 : index
    %c0_47 = arith.constant 0 : index
    %81 = vector.load %arg4[%c4_45, %c0_46, %c0_47] : memref<9x32x1xf32, #tpu.memory_space<vmem>>, vector<1x32x1xf32>
    %82 = vector.shape_cast %81 : vector<1x32x1xf32> to vector<32x1xf32>
    %83 = vector.broadcast %82 : vector<32x1xf32> to vector<32x128xf32>
    %84 = arith.mulf %60, %83 : vector<32x128xf32>
    %c31_i32_48 = arith.constant 31 : i32
    %85 = tpu.dynamic_rotate %60 by %c31_i32_48 dim 0 : vector<32x128xf32>, i32 -> vector<32x128xf32>
    %c5_49 = arith.constant 5 : index
    %c0_50 = arith.constant 0 : index
    %c0_51 = arith.constant 0 : index
    %86 = vector.load %arg4[%c5_49, %c0_50, %c0_51] : memref<9x32x1xf32, #tpu.memory_space<vmem>>, vector<1x32x1xf32>
    %87 = vector.shape_cast %86 : vector<1x32x1xf32> to vector<32x1xf32>
    %88 = vector.broadcast %87 : vector<32x1xf32> to vector<32x128xf32>
    %89 = arith.mulf %85, %88 : vector<32x128xf32>
    %c29_i32_52 = arith.constant 29 : i32
    %90 = tpu.dynamic_rotate %60 by %c29_i32_52 dim 0 : vector<32x128xf32>, i32 -> vector<32x128xf32>
    %c6_53 = arith.constant 6 : index
    %c0_54 = arith.constant 0 : index
    %c0_55 = arith.constant 0 : index
    %91 = vector.load %arg4[%c6_53, %c0_54, %c0_55] : memref<9x32x1xf32, #tpu.memory_space<vmem>>, vector<1x32x1xf32>
    %92 = vector.shape_cast %91 : vector<1x32x1xf32> to vector<32x1xf32>
    %93 = vector.broadcast %92 : vector<32x1xf32> to vector<32x128xf32>
    %94 = arith.mulf %90, %93 : vector<32x128xf32>
    %c28_i32_56 = arith.constant 28 : i32
    %95 = tpu.dynamic_rotate %60 by %c28_i32_56 dim 0 : vector<32x128xf32>, i32 -> vector<32x128xf32>
    %c7_57 = arith.constant 7 : index
    %c0_58 = arith.constant 0 : index
    %c0_59 = arith.constant 0 : index
    %96 = vector.load %arg4[%c7_57, %c0_58, %c0_59] : memref<9x32x1xf32, #tpu.memory_space<vmem>>, vector<1x32x1xf32>
    %97 = vector.shape_cast %96 : vector<1x32x1xf32> to vector<32x1xf32>
    %98 = vector.broadcast %97 : vector<32x1xf32> to vector<32x128xf32>
    %99 = arith.mulf %95, %98 : vector<32x128xf32>
    %c27_i32_60 = arith.constant 27 : i32
    %100 = tpu.dynamic_rotate %60 by %c27_i32_60 dim 0 : vector<32x128xf32>, i32 -> vector<32x128xf32>
    %c8_61 = arith.constant 8 : index
    %c0_62 = arith.constant 0 : index
    %c0_63 = arith.constant 0 : index
    %101 = vector.load %arg4[%c8_61, %c0_62, %c0_63] : memref<9x32x1xf32, #tpu.memory_space<vmem>>, vector<1x32x1xf32>
    %102 = vector.shape_cast %101 : vector<1x32x1xf32> to vector<32x1xf32>
    %103 = vector.broadcast %102 : vector<32x1xf32> to vector<32x128xf32>
    %104 = arith.mulf %100, %103 : vector<32x128xf32>
    %105 = tpu.concatenate %65, %70, %75, %80, %84, %89, %94, %99, %104 in 1 : vector<32x128xf32>, vector<32x128xf32>, vector<32x128xf32>, vector<32x128xf32>, vector<32x128xf32>, vector<32x128xf32>, vector<32x128xf32>, vector<32x128xf32>, vector<32x128xf32> -> vector<32x1152xf32>
    %106 = arith.truncf %105 : vector<32x1152xf32> to vector<32x1152xbf16>
    %c0_64 = arith.constant 0 : index
    %c0_65 = arith.constant 0 : index
    %107 = vector.load %arg2[%c0_64, %c0_65] : memref<1152x128xbf16, #tpu.memory_space<vmem>>, vector<1152x128xbf16>
    %cst_66 = arith.constant dense<0.000000e+00> : vector<32x128xf32>
    %108 = tpu.matmul %106, %107, %cst_66 {dimension_numbers = #tpu.dot_dimension_numbers<[1], [0], [0], [1], [0, 0, 1, 1], [], []>} : vector<32x1152xbf16>, vector<1152x128xbf16>, vector<32x128xf32> -> vector<32x128xf32>
    %c3_67 = arith.constant 3 : index
    %c0_68 = arith.constant 0 : index
    %109 = vector.load %arg3[%c3_67, %c0_68] : memref<6x128xf32, #tpu.memory_space<vmem>>, vector<1x128xf32>
    %110 = vector.broadcast %109 : vector<1x128xf32> to vector<32x128xf32>
    %111 = arith.addf %108, %110 : vector<32x128xf32>
    %cst_69 = arith.constant 0.000000e+00 : f32
    %112 = vector.broadcast %cst_69 : f32 to vector<32x128xf32>
    %113 = arith.maximumf %111, %112 : vector<32x128xf32>
    %c4_70 = arith.constant 4 : index
    %c0_71 = arith.constant 0 : index
    %114 = vector.load %arg3[%c4_70, %c0_71] : memref<6x128xf32, #tpu.memory_space<vmem>>, vector<1x128xf32>
    %115 = vector.broadcast %114 : vector<1x128xf32> to vector<32x128xf32>
    %116 = arith.mulf %113, %115 : vector<32x128xf32>
    %c5_72 = arith.constant 5 : index
    %c0_73 = arith.constant 0 : index
    %117 = vector.load %arg3[%c5_72, %c0_73] : memref<6x128xf32, #tpu.memory_space<vmem>>, vector<1x128xf32>
    %118 = vector.broadcast %117 : vector<1x128xf32> to vector<32x128xf32>
    %119 = arith.addf %116, %118 : vector<32x128xf32>
    %120 = arith.truncf %119 : vector<32x128xf32> to vector<32x128xbf16>
    %c0_74 = arith.constant 0 : index
    %c0_75 = arith.constant 0 : index
    %121 = vector.load %arg5[%c0_74, %c0_75] : memref<32x128xbf16, #tpu.memory_space<vmem>>, vector<32x128xbf16>
    tpu.vector_store %arg5[%c0_74, %c0_75], %120 {strides = array<i32>} : memref<32x128xbf16, #tpu.memory_space<vmem>>, vector<32x128xbf16>,
    return
  }
}

module attributes {stable_mosaic.version = 11 : i64} {
  func.func @_res_block_kernel(%arg0: memref<32x128xbf16, #tpu.memory_space<vmem>>, %arg1: memref<128x128xbf16, #tpu.memory_space<vmem>>, %arg2: memref<32x128xf32, #tpu.memory_space<vmem>>, %arg3: memref<9x32x1xf32, #tpu.memory_space<vmem>>, %arg4: memref<1152x128xbf16, #tpu.memory_space<vmem>>, %arg5: memref<2x32x128xf32, #tpu.memory_space<vmem>>, %arg6: memref<32x128xbf16, #tpu.memory_space<vmem>>) attributes {dimension_semantics = [], scalar_prefetch = 0 : i64, scratch_operands = 0 : i64, tpu.core_type = #tpu.core_type<tc>} {
    %c0 = arith.constant 0 : index
    %c0_0 = arith.constant 0 : index
    %0 = vector.load %arg0[%c0, %c0_0] : memref<32x128xbf16, #tpu.memory_space<vmem>>, vector<32x128xbf16>
    %c0_1 = arith.constant 0 : index
    %c0_2 = arith.constant 0 : index
    %1 = vector.load %arg1[%c0_1, %c0_2] : memref<128x128xbf16, #tpu.memory_space<vmem>>, vector<128x128xbf16>
    %cst = arith.constant dense<0.000000e+00> : vector<32x128xf32>
    %2 = tpu.matmul %0, %1, %cst {dimension_numbers = #tpu.dot_dimension_numbers<[1], [0], [0], [1], [0, 0, 1, 1], [], []>} : vector<32x128xbf16>, vector<128x128xbf16>, vector<32x128xf32> -> vector<32x128xf32>
    %c0_3 = arith.constant 0 : index
    %c0_4 = arith.constant 0 : index
    %3 = vector.load %arg2[%c0_3, %c0_4] : memref<32x128xf32, #tpu.memory_space<vmem>>, vector<32x128xf32>
    %4 = arith.addf %2, %3 : vector<32x128xf32>
    %cst_5 = arith.constant 0.000000e+00 : f32
    %5 = vector.broadcast %cst_5 : f32 to vector<32x128xf32>
    %6 = arith.maximumf %4, %5 : vector<32x128xf32>
    %c5_i32 = arith.constant 5 : i32
    %7 = tpu.dynamic_rotate %6 by %c5_i32 dim 0 : vector<32x128xf32>, i32 -> vector<32x128xf32>
    %c0_6 = arith.constant 0 : index
    %c0_7 = arith.constant 0 : index
    %c0_8 = arith.constant 0 : index
    %8 = vector.load %arg3[%c0_6, %c0_7, %c0_8] : memref<9x32x1xf32, #tpu.memory_space<vmem>>, vector<1x32x1xf32>
    %9 = vector.shape_cast %8 : vector<1x32x1xf32> to vector<32x1xf32>
    %10 = vector.broadcast %9 : vector<32x1xf32> to vector<32x128xf32>
    %11 = arith.mulf %7, %10 : vector<32x128xf32>
    %c4_i32 = arith.constant 4 : i32
    %12 = tpu.dynamic_rotate %6 by %c4_i32 dim 0 : vector<32x128xf32>, i32 -> vector<32x128xf32>
    %c1 = arith.constant 1 : index
    %c0_9 = arith.constant 0 : index
    %c0_10 = arith.constant 0 : index
    %13 = vector.load %arg3[%c1, %c0_9, %c0_10] : memref<9x32x1xf32, #tpu.memory_space<vmem>>, vector<1x32x1xf32>
    %14 = vector.shape_cast %13 : vector<1x32x1xf32> to vector<32x1xf32>
    %15 = vector.broadcast %14 : vector<32x1xf32> to vector<32x128xf32>
    %16 = arith.mulf %12, %15 : vector<32x128xf32>
    %c3_i32 = arith.constant 3 : i32
    %17 = tpu.dynamic_rotate %6 by %c3_i32 dim 0 : vector<32x128xf32>, i32 -> vector<32x128xf32>
    %c2 = arith.constant 2 : index
    %c0_11 = arith.constant 0 : index
    %c0_12 = arith.constant 0 : index
    %18 = vector.load %arg3[%c2, %c0_11, %c0_12] : memref<9x32x1xf32, #tpu.memory_space<vmem>>, vector<1x32x1xf32>
    %19 = vector.shape_cast %18 : vector<1x32x1xf32> to vector<32x1xf32>
    %20 = vector.broadcast %19 : vector<32x1xf32> to vector<32x128xf32>
    %21 = arith.mulf %17, %20 : vector<32x128xf32>
    %c1_i32 = arith.constant 1 : i32
    %22 = tpu.dynamic_rotate %6 by %c1_i32 dim 0 : vector<32x128xf32>, i32 -> vector<32x128xf32>
    %c3 = arith.constant 3 : index
    %c0_13 = arith.constant 0 : index
    %c0_14 = arith.constant 0 : index
    %23 = vector.load %arg3[%c3, %c0_13, %c0_14] : memref<9x32x1xf32, #tpu.memory_space<vmem>>, vector<1x32x1xf32>
    %24 = vector.shape_cast %23 : vector<1x32x1xf32> to vector<32x1xf32>
    %25 = vector.broadcast %24 : vector<32x1xf32> to vector<32x128xf32>
    %26 = arith.mulf %22, %25 : vector<32x128xf32>
    %c4 = arith.constant 4 : index
    %c0_15 = arith.constant 0 : index
    %c0_16 = arith.constant 0 : index
    %27 = vector.load %arg3[%c4, %c0_15, %c0_16] : memref<9x32x1xf32, #tpu.memory_space<vmem>>, vector<1x32x1xf32>
    %28 = vector.shape_cast %27 : vector<1x32x1xf32> to vector<32x1xf32>
    %29 = vector.broadcast %28 : vector<32x1xf32> to vector<32x128xf32>
    %30 = arith.mulf %6, %29 : vector<32x128xf32>
    %c31_i32 = arith.constant 31 : i32
    %31 = tpu.dynamic_rotate %6 by %c31_i32 dim 0 : vector<32x128xf32>, i32 -> vector<32x128xf32>
    %c5 = arith.constant 5 : index
    %c0_17 = arith.constant 0 : index
    %c0_18 = arith.constant 0 : index
    %32 = vector.load %arg3[%c5, %c0_17, %c0_18] : memref<9x32x1xf32, #tpu.memory_space<vmem>>, vector<1x32x1xf32>
    %33 = vector.shape_cast %32 : vector<1x32x1xf32> to vector<32x1xf32>
    %34 = vector.broadcast %33 : vector<32x1xf32> to vector<32x128xf32>
    %35 = arith.mulf %31, %34 : vector<32x128xf32>
    %c29_i32 = arith.constant 29 : i32
    %36 = tpu.dynamic_rotate %6 by %c29_i32 dim 0 : vector<32x128xf32>, i32 -> vector<32x128xf32>
    %c6 = arith.constant 6 : index
    %c0_19 = arith.constant 0 : index
    %c0_20 = arith.constant 0 : index
    %37 = vector.load %arg3[%c6, %c0_19, %c0_20] : memref<9x32x1xf32, #tpu.memory_space<vmem>>, vector<1x32x1xf32>
    %38 = vector.shape_cast %37 : vector<1x32x1xf32> to vector<32x1xf32>
    %39 = vector.broadcast %38 : vector<32x1xf32> to vector<32x128xf32>
    %40 = arith.mulf %36, %39 : vector<32x128xf32>
    %c28_i32 = arith.constant 28 : i32
    %41 = tpu.dynamic_rotate %6 by %c28_i32 dim 0 : vector<32x128xf32>, i32 -> vector<32x128xf32>
    %c7 = arith.constant 7 : index
    %c0_21 = arith.constant 0 : index
    %c0_22 = arith.constant 0 : index
    %42 = vector.load %arg3[%c7, %c0_21, %c0_22] : memref<9x32x1xf32, #tpu.memory_space<vmem>>, vector<1x32x1xf32>
    %43 = vector.shape_cast %42 : vector<1x32x1xf32> to vector<32x1xf32>
    %44 = vector.broadcast %43 : vector<32x1xf32> to vector<32x128xf32>
    %45 = arith.mulf %41, %44 : vector<32x128xf32>
    %c27_i32 = arith.constant 27 : i32
    %46 = tpu.dynamic_rotate %6 by %c27_i32 dim 0 : vector<32x128xf32>, i32 -> vector<32x128xf32>
    %c8 = arith.constant 8 : index
    %c0_23 = arith.constant 0 : index
    %c0_24 = arith.constant 0 : index
    %47 = vector.load %arg3[%c8, %c0_23, %c0_24] : memref<9x32x1xf32, #tpu.memory_space<vmem>>, vector<1x32x1xf32>
    %48 = vector.shape_cast %47 : vector<1x32x1xf32> to vector<32x1xf32>
    %49 = vector.broadcast %48 : vector<32x1xf32> to vector<32x128xf32>
    %50 = arith.mulf %46, %49 : vector<32x128xf32>
    %51 = tpu.concatenate %11, %16, %21, %26, %30, %35, %40, %45, %50 in 1 : vector<32x128xf32>, vector<32x128xf32>, vector<32x128xf32>, vector<32x128xf32>, vector<32x128xf32>, vector<32x128xf32>, vector<32x128xf32>, vector<32x128xf32>, vector<32x128xf32> -> vector<32x1152xf32>
    %52 = arith.truncf %51 : vector<32x1152xf32> to vector<32x1152xbf16>
    %c0_25 = arith.constant 0 : index
    %c0_26 = arith.constant 0 : index
    %53 = vector.load %arg4[%c0_25, %c0_26] : memref<1152x128xbf16, #tpu.memory_space<vmem>>, vector<1152x128xbf16>
    %cst_27 = arith.constant dense<0.000000e+00> : vector<32x128xf32>
    %54 = tpu.matmul %52, %53, %cst_27 {dimension_numbers = #tpu.dot_dimension_numbers<[1], [0], [0], [1], [0, 0, 1, 1], [], []>} : vector<32x1152xbf16>, vector<1152x128xbf16>, vector<32x128xf32> -> vector<32x128xf32>
    %c0_28 = arith.constant 0 : index
    %c0_29 = arith.constant 0 : index
    %c0_30 = arith.constant 0 : index
    %55 = vector.load %arg5[%c0_28, %c0_29, %c0_30] : memref<2x32x128xf32, #tpu.memory_space<vmem>>, vector<1x32x128xf32>
    %56 = vector.shape_cast %55 : vector<1x32x128xf32> to vector<32x128xf32>
    %57 = arith.mulf %54, %56 : vector<32x128xf32>
    %c1_31 = arith.constant 1 : index
    %c0_32 = arith.constant 0 : index
    %c0_33 = arith.constant 0 : index
    %58 = vector.load %arg5[%c1_31, %c0_32, %c0_33] : memref<2x32x128xf32, #tpu.memory_space<vmem>>, vector<1x32x128xf32>
    %59 = vector.shape_cast %58 : vector<1x32x128xf32> to vector<32x128xf32>
    %60 = arith.addf %57, %59 : vector<32x128xf32>
    %cst_34 = arith.constant 0.000000e+00 : f32
    %61 = vector.broadcast %cst_34 : f32 to vector<32x128xf32>
    %62 = arith.maximumf %60, %61 : vector<32x128xf32>
    %63 = arith.addf %62, %6 : vector<32x128xf32>
    %64 = arith.truncf %63 : vector<32x128xf32> to vector<32x128xbf16>
    %c0_35 = arith.constant 0 : index
    %c0_36 = arith.constant 0 : index
    %65 = vector.load %arg6[%c0_35, %c0_36] : memref<32x128xbf16, #tpu.memory_space<vmem>>, vector<32x128xbf16>
    tpu.vector_store %arg6[%c0_35, %c0_36], %64 {strides = array<i32>} : memref<32x128xbf16, #tpu.memory_space<vmem>>, vector<32x128xbf16>,
    return
  }
}

module attributes {stable_mosaic.version = 11 : i64} {
  func.func @_classifier_kernel(%arg0: memref<32x128xbf16, #tpu.memory_space<vmem>>, %arg1: memref<128x512xbf16, #tpu.memory_space<vmem>>, %arg2: memref<1x512xf32, #tpu.memory_space<vmem>>, %arg3: memref<512x1024xbf16, #tpu.memory_space<vmem>>, %arg4: memref<1x1024xf32, #tpu.memory_space<vmem>>, %arg5: memref<1024x1024xbf16, #tpu.memory_space<vmem>>, %arg6: memref<1x1024xf32, #tpu.memory_space<vmem>>, %arg7: memref<1024x10xbf16, #tpu.memory_space<vmem>>, %arg8: memref<1x10xf32, #tpu.memory_space<vmem>>, %arg9: memref<32x512xf32, #tpu.memory_space<vmem>>, %arg10: memref<2x10xf32, #tpu.memory_space<vmem>>) attributes {dimension_semantics = [], scalar_prefetch = 0 : i64, scratch_operands = 0 : i64, tpu.core_type = #tpu.core_type<tc>} {
    %c0 = arith.constant 0 : index
    %c0_0 = arith.constant 0 : index
    %0 = vector.load %arg0[%c0, %c0_0] : memref<32x128xbf16, #tpu.memory_space<vmem>>, vector<32x128xbf16>
    %c0_1 = arith.constant 0 : index
    %c0_2 = arith.constant 0 : index
    %1 = vector.load %arg1[%c0_1, %c0_2] : memref<128x512xbf16, #tpu.memory_space<vmem>>, vector<128x512xbf16>
    %cst = arith.constant dense<0.000000e+00> : vector<32x512xf32>
    %2 = tpu.matmul %0, %1, %cst {dimension_numbers = #tpu.dot_dimension_numbers<[1], [0], [0], [1], [0, 0, 1, 1], [], []>} : vector<32x128xbf16>, vector<128x512xbf16>, vector<32x512xf32> -> vector<32x512xf32>
    %c0_3 = arith.constant 0 : index
    %c0_4 = arith.constant 0 : index
    %3 = vector.load %arg2[%c0_3, %c0_4] : memref<1x512xf32, #tpu.memory_space<vmem>>, vector<1x512xf32>
    %4 = vector.broadcast %3 : vector<1x512xf32> to vector<32x512xf32>
    %5 = arith.addf %2, %4 : vector<32x512xf32>
    %c0_5 = arith.constant 0 : index
    %c0_6 = arith.constant 0 : index
    %6 = vector.load %arg9[%c0_5, %c0_6] : memref<32x512xf32, #tpu.memory_space<vmem>>, vector<32x512xf32>
    tpu.vector_store %arg9[%c0_5, %c0_6], %5 {strides = array<i32>} : memref<32x512xf32, #tpu.memory_space<vmem>>, vector<32x512xf32>,
    %7 = vector.extract_strided_slice %5 {offsets = [0, 0], sizes = [16, 512], strides = [1, 1]} : vector<32x512xf32> to vector<16x512xf32>
    %cst_7 = arith.constant dense<0xFF800000> : vector<512xf32>
    %8 = vector.multi_reduction <maximumf>, %7, %cst_7 [0] : vector<16x512xf32> to vector<512xf32>
    %9 = vector.shape_cast %8 : vector<512xf32> to vector<1x512xf32>
    %10 = vector.extract_strided_slice %5 {offsets = [16, 0], sizes = [16, 512], strides = [1, 1]} : vector<32x512xf32> to vector<16x512xf32>
    %cst_8 = arith.constant dense<0xFF800000> : vector<512xf32>
    %11 = vector.multi_reduction <maximumf>, %10, %cst_8 [0] : vector<16x512xf32> to vector<512xf32>
    %12 = vector.shape_cast %11 : vector<512xf32> to vector<1x512xf32>
    %13 = tpu.concatenate %9, %12 in 0 : vector<1x512xf32>, vector<1x512xf32> -> vector<2x512xf32>
    %14 = arith.truncf %13 : vector<2x512xf32> to vector<2x512xbf16>
    %c0_9 = arith.constant 0 : index
    %c0_10 = arith.constant 0 : index
    %15 = vector.load %arg3[%c0_9, %c0_10] : memref<512x1024xbf16, #tpu.memory_space<vmem>>, vector<512x1024xbf16>
    %cst_11 = arith.constant dense<0.000000e+00> : vector<2x1024xf32>
    %16 = tpu.matmul %14, %15, %cst_11 {dimension_numbers = #tpu.dot_dimension_numbers<[1], [0], [0], [1], [0, 0, 1, 1], [], []>} : vector<2x512xbf16>, vector<512x1024xbf16>, vector<2x1024xf32> -> vector<2x1024xf32>
    %c0_12 = arith.constant 0 : index
    %c0_13 = arith.constant 0 : index
    %17 = vector.load %arg4[%c0_12, %c0_13] : memref<1x1024xf32, #tpu.memory_space<vmem>>, vector<1x1024xf32>
    %18 = vector.broadcast %17 : vector<1x1024xf32> to vector<2x1024xf32>
    %19 = arith.addf %16, %18 : vector<2x1024xf32>
    %cst_14 = arith.constant 0.000000e+00 : f32
    %20 = vector.broadcast %cst_14 : f32 to vector<2x1024xf32>
    %21 = arith.maximumf %19, %20 : vector<2x1024xf32>
    %22 = arith.truncf %21 : vector<2x1024xf32> to vector<2x1024xbf16>
    %c0_15 = arith.constant 0 : index
    %c0_16 = arith.constant 0 : index
    %23 = vector.load %arg5[%c0_15, %c0_16] : memref<1024x1024xbf16, #tpu.memory_space<vmem>>, vector<1024x1024xbf16>
    %cst_17 = arith.constant dense<0.000000e+00> : vector<2x1024xf32>
    %24 = tpu.matmul %22, %23, %cst_17 {dimension_numbers = #tpu.dot_dimension_numbers<[1], [0], [0], [1], [0, 0, 1, 1], [], []>} : vector<2x1024xbf16>, vector<1024x1024xbf16>, vector<2x1024xf32> -> vector<2x1024xf32>
    %c0_18 = arith.constant 0 : index
    %c0_19 = arith.constant 0 : index
    %25 = vector.load %arg6[%c0_18, %c0_19] : memref<1x1024xf32, #tpu.memory_space<vmem>>, vector<1x1024xf32>
    %26 = vector.broadcast %25 : vector<1x1024xf32> to vector<2x1024xf32>
    %27 = arith.addf %24, %26 : vector<2x1024xf32>
    %cst_20 = arith.constant 0.000000e+00 : f32
    %28 = vector.broadcast %cst_20 : f32 to vector<2x1024xf32>
    %29 = arith.maximumf %27, %28 : vector<2x1024xf32>
    %30 = arith.truncf %29 : vector<2x1024xf32> to vector<2x1024xbf16>
    %c0_21 = arith.constant 0 : index
    %c0_22 = arith.constant 0 : index
    %31 = vector.load %arg7[%c0_21, %c0_22] : memref<1024x10xbf16, #tpu.memory_space<vmem>>, vector<1024x10xbf16>
    %cst_23 = arith.constant dense<0.000000e+00> : vector<2x10xf32>
    %32 = tpu.matmul %30, %31, %cst_23 {dimension_numbers = #tpu.dot_dimension_numbers<[1], [0], [0], [1], [0, 0, 1, 1], [], []>} : vector<2x1024xbf16>, vector<1024x10xbf16>, vector<2x10xf32> -> vector<2x10xf32>
    %c0_24 = arith.constant 0 : index
    %c0_25 = arith.constant 0 : index
    %33 = vector.load %arg8[%c0_24, %c0_25] : memref<1x10xf32, #tpu.memory_space<vmem>>, vector<1x10xf32>
    %34 = vector.broadcast %33 : vector<1x10xf32> to vector<2x10xf32>
    %35 = arith.addf %32, %34 : vector<2x10xf32>
    %c0_26 = arith.constant 0 : index
    %c0_27 = arith.constant 0 : index
    %36 = vector.load %arg10[%c0_26, %c0_27] : memref<2x10xf32, #tpu.memory_space<vmem>>, vector<2x10xf32>
    tpu.vector_store %arg10[%c0_26, %c0_27], %35 {strides = array<i32>} : memref<2x10xf32, #tpu.memory_space<vmem>>, vector<2x10xf32>,
    return
  }
}

</mosaic_0001>

<bundles_post_ra>
// kernel: film_forward.7
= control target key start
LH: loop header
LB: loop body
LE: loop exit
PB: predicated region body
PF: predicated region fallthrough
CT: control target
= control target key end

     0   :  { %s1200_s12 = smov 0   ;;  %s1395_s0 = inlined_call_operand.vmem [shape: bf16[512,128], index: 0, kind: input, shape index: {}]   ;;  %s1396_s1 = inlined_call_operand.vmem [shape: bf16[128,128], index: 1, kind: input, shape index: {}]   ;;  %s1397_s2 = inlined_call_operand.vmem [shape: f32[3,128], index: 2, kind: input, shape index: {}]   ;;  %s1398_s3 = inlined_call_operand.vmem [shape: bf16[512,128], index: 3, kind: output, shape index: {}]  }
   0x1 LB: > { %s855_s13 = sadd.s32 4294967295, %s1178_s12   ;;  %p859_p0 = scmp.ge.s32.totalorder %s1178_s12, 1  ;;  %s1178_s12 = sphi %s1200_s12, %s13_s12  }
   0x2   : > { %p138_p1 = scmp.lt.s32.totalorder %s1178_s12, 3 }
   0x4   : > { %p139_p2 = pnand %p859_p0, %p138_p1 }
   0x5   : > { %s860_s16 = sshll.u32 (!%p139_p2), %s855_s13, 5 }
   0x6   : > { %142 = sbr.rel (%p139_p2) target bundleno = 281 (0x119), region = 32  ;;  %p163_p3 = scmp.lt.s32.totalorder (!%p139_p2), %s860_s16, 63 }
   0xb   : > { %v1148_v0 = vld [vmem:[%s1396_s1 + $0x38] sm:$0xff]   ;;  %v1149_v1 = vld [vmem:[%s1396_s1 + $0x30] sm:$0xff]   ;;  %s1400_s16 = smov (!%p163_p3, %s860_s16), 63  ;;  %v1150_v2 = vld [vmem:[%s1396_s1 + $0x28] sm:$0xff]  }
   0xc   : > { %1076 = vmatprep.subr.bf16.mxu0 %v1148_v0  ;;  %1124 = vmatprep.subr.bf16.mxu1 %v1148_v0  ;;  %s861_s21 = sshll.u32 %s1400_s16, 2  ;;  %v1151_v3 = vld [vmem:[%s1396_s1 + $0x20] sm:$0xff]   ;;  %v1152_v6 = vld [vmem:[%s1396_s1 + $0x18] sm:$0xff]   ;;  %v1153_v7 = vld [vmem:[%s1396_s1 + $0x10] sm:$0xff]  }
   0xd   : > { %1077 = vmatpush3.bf16.msra.mxu0 %v1148_v0  ;;  %1132 = vmatpush3.bf16.msra.mxu1 %v1148_v0  ;;  %s1225_s24 = scalar_lea.vmem %s1395_s0, %s861_s21  ;;  %v1154_v8 = vld [vmem:[%s1396_s1 + $0x8] sm:$0xff]   ;;  %v1155_v9 = vld [vmem:[%s1396_s1] sm:$0xff]   ;;  %s1304_s18 = scalar_lea.vmem %s1398_s3, %s861_s21 }
   0xe   : > { %1078 = vmatprep.subr.bf16.mxu0 %v1149_v1  ;;  %1125 = vmatprep.subr.bf16.mxu1 %v1149_v1  ;;  %v1156_v4 = vld [vmem:[%s1225_s24] sm:$0xff]   ;;  %v1158_v10 = vld [vmem:[%s1225_s24 + $0x8] sm:$0xff]   ;;  %v1160_v12 = vld [vmem:[%s1225_s24 + $0x10] sm:$0xff]  }
   0xf   : > { %v1157_v5 = vld [vmem:[%s1225_s24 + $0x40] sm:$0xff]   ;;  %1092 = vmatprep.mubr.bf16.mxu0 %v1156_v4  ;;  %v1159_v11 = vld [vmem:[%s1225_s24 + $0x48] sm:$0xff]   ;;  %v1161_v13 = vld [vmem:[%s1225_s24 + $0x50] sm:$0xff]  }
  0x10   : > { %1108 = vmatprep.mubr.bf16.mxu1 %v1157_v5  ;;  %v1162_v14 = vld [vmem:[%s1225_s24 + $0x18] sm:$0xff]   ;;  %v1164_v16 = vld [vmem:[%s1225_s24 + $0x20] sm:$0xff]   ;;  %v1166_v18 = vld [vmem:[%s1225_s24 + $0x28] sm:$0xff]  }
  0x11   : > { %1079 = vmatpush3.bf16.msra.mxu0 %v1149_v1  ;;  %1133 = vmatpush3.bf16.msra.mxu1 %v1149_v1  ;;  %v1163_v15 = vld [vmem:[%s1225_s24 + $0x58] sm:$0xff]   ;;  %v1165_v17 = vld [vmem:[%s1225_s24 + $0x60] sm:$0xff]   ;;  %v1167_v19 = vld [vmem:[%s1225_s24 + $0x68] sm:$0xff]  }
  0x12   : > { %1080 = vmatprep.subr.bf16.mxu0 %v1150_v2  ;;  %1126 = vmatprep.subr.bf16.mxu1 %v1150_v2  ;;  %v1168_v20 = vld [vmem:[%s1225_s24 + $0x30] sm:$0xff]   ;;  %v1170_v22 = vld [vmem:[%s1225_s24 + $0x38] sm:$0xff]   ;;  %v1261_v24 = vld [vmem:[%s1397_s2] ss:$0 sm:$0xff] }
  0x13   : > { %v1169_v21 = vld [vmem:[%s1225_s24 + $0x70] sm:$0xff]   ;;  %v1171_v23 = vld [vmem:[%s1225_s24 + $0x78] sm:$0xff]   ;;  %v1268_v29 = vld [vmem:[%s1397_s2 + $0x1] ss:$0 sm:$0xff] }
  0x14   : > { %v1275_v36 = vld [vmem:[%s1397_s2 + $0x2] ss:$0 sm:$0xff] }
  0x15   : > { %1081 = vmatpush3.bf16.msra.mxu0 %v1150_v2  ;;  %1134 = vmatpush3.bf16.msra.mxu1 %v1150_v2 }
  0x16   : > { %1082 = vmatprep.subr.bf16.mxu0 %v1151_v3  ;;  %1127 = vmatprep.subr.bf16.mxu1 %v1151_v3 }
  0x19   : > { %1083 = vmatpush3.bf16.msra.mxu0 %v1151_v3  ;;  %1135 = vmatpush3.bf16.msra.mxu1 %v1151_v3 }
  0x1a   : > { %1084 = vmatprep.subr.bf16.mxu0 %v1152_v6  ;;  %1128 = vmatprep.subr.bf16.mxu1 %v1152_v6 }
  0x1d   : > { %1085 = vmatpush3.bf16.msra.mxu0 %v1152_v6  ;;  %1136 = vmatpush3.bf16.msra.mxu1 %v1152_v6 }
  0x1e   : > { %1086 = vmatprep.subr.bf16.mxu0 %v1153_v7  ;;  %1129 = vmatprep.subr.bf16.mxu1 %v1153_v7 }
  0x21   : > { %1087 = vmatpush3.bf16.msra.mxu0 %v1153_v7  ;;  %1137 = vmatpush3.bf16.msra.mxu1 %v1153_v7 }
  0x22   : > { %1088 = vmatprep.subr.bf16.mxu0 %v1154_v8  ;;  %1130 = vmatprep.subr.bf16.mxu1 %v1154_v8 }
  0x25   : > { %1089 = vmatpush3.bf16.msra.mxu0 %v1154_v8  ;;  %1138 = vmatpush3.bf16.msra.mxu1 %v1154_v8 }
  0x26   : > { %1090 = vmatprep.subr.bf16.mxu0 %v1155_v9  ;;  %1131 = vmatprep.subr.bf16.mxu1 %v1155_v9 }
  0x29   : > { %1091 = vmatpush3.bf16.msra.mxu0 %v1155_v9  ;;  %1139 = vmatpush3.bf16.msra.mxu1 %v1155_v9 }
  0x2c   : > { %1093 = vmatmul.mubr.bf16.vlgmr.msra.gmra.mxu0 %v1158_v10  ;;  %1109 = vmatmul.mubr.bf16.vlgmr.msra.gmra.mxu1 %v1159_v11 }
  0x2d   : > { %1096 = vmatprep.mubr.bf16.mxu0 %v1160_v12  ;;  %1112 = vmatprep.mubr.bf16.mxu1 %v1161_v13 }
  0x34   : > { %1097 = vmatmul.mubr.bf16.gmra.mxu0 %v1162_v14  ;;  %1113 = vmatmul.mubr.bf16.gmra.mxu1 %v1163_v15 }
  0x35   : > { %1100 = vmatprep.mubr.bf16.mxu0 %v1164_v16  ;;  %1116 = vmatprep.mubr.bf16.mxu1 %v1165_v17 }
  0x3c   : > { %1101 = vmatmul.mubr.bf16.gmra.mxu0 %v1166_v18  ;;  %1117 = vmatmul.mubr.bf16.gmra.mxu1 %v1167_v19 }
  0x3d   : > { %1104 = vmatprep.mubr.bf16.mxu0 %v1168_v20  ;;  %1120 = vmatprep.mubr.bf16.mxu1 %v1169_v21 }
  0x44   : > { %1105 = vmatmul.mubr.bf16.gmra.mxu0 %v1170_v22  ;;  %1121 = vmatmul.mubr.bf16.gmra.mxu1 %v1171_v23 }
  0xec   : > { %v1094_v25 = vpop.f32.mrf.mxu0  ;;  %v1110_v26 = vpop.f32.mrf.mxu1 }
  0xed   : > { %v415_v27 = vadd.f32 %v1094_v25, %v1261_v24  ;;  %v479_v28 = vadd.f32 %v1110_v26, %v1261_v24 }
  0xee   : > { %v406_v30 = vpop.f32.mrf.mxu0  ;;  %v470_v31 = vpop.f32.mrf.mxu1 }
  0xef   : > { %v535_v32 = vmax.f32 %v415_v27, 0.0  ;;  %v551_v33 = vmax.f32 %v479_v28, 0.0  ;;  %v407_v34 = vadd.f32 %v1261_v24, %v406_v30  ;;  %v471_v35 = vadd.f32 %v1261_v24, %v470_v31 }
  0xf0   : > { %v1095_v37 = vpop.f32.mrf.mxu0  ;;  %v1111_v38 = vpop.f32.mrf.mxu1 }
  0xf1   : > { %v572_v39 = vmul.f32 %v1268_v29, %v535_v32  ;;  %v588_v40 = vmul.f32 %v1268_v29, %v551_v33  ;;  %v533_v41 = vmax.f32 %v407_v34, 0.0  ;;  %v549_v42 = vmax.f32 %v471_v35, 0.0 }
  0xf2   : > { %v418_v43 = vadd.f32 %v1095_v37, %v1261_v24  ;;  %v482_v44 = vadd.f32 %v1111_v38, %v1261_v24  ;;  %v409_v45 = vpop.f32.mrf.mxu0  ;;  %v473_v46 = vpop.f32.mrf.mxu1 }
  0xf3   : > { %v609_v47 = vadd.f32 %v1275_v36, %v572_v39  ;;  %v625_v48 = vadd.f32 %v1275_v36, %v588_v40  ;;  %v410_v51 = vadd.f32 %v1261_v24, %v409_v45  ;;  %v474_v52 = vadd.f32 %v1261_v24, %v473_v46 }
  0xf4   : > { %v536_v49 = vmax.f32 %v418_v43, 0.0  ;;  %v552_v50 = vmax.f32 %v482_v44, 0.0  ;;  %v1098_v53 = vpop.f32.mrf.mxu0  ;;  %v1114_v54 = vpop.f32.mrf.mxu1  ;;  %v570_v55 = vmul.f32 %v1268_v29, %v533_v41  ;;  %v586_v56 = vmul.f32 %v1268_v29, %v549_v42 }
  0xf5   : > { %v431_v57 = vadd.f32 %v1098_v53, %v1261_v24  ;;  %v495_v58 = vadd.f32 %v1114_v54, %v1261_v24  ;;  %v534_v61 = vmax.f32 %v410_v51, 0.0  ;;  %v550_v62 = vmax.f32 %v474_v52, 0.0 }
  0xf6   : > { %v573_v59 = vmul.f32 %v1268_v29, %v536_v49  ;;  %v589_v60 = vmul.f32 %v1268_v29, %v552_v50  ;;  %v422_v63 = vpop.f32.mrf.mxu0  ;;  %v486_v0 = vpop.f32.mrf.mxu1  ;;  %v607_v11 = vadd.f32 %v1275_v36, %v570_v55  ;;  %v623_v12 = vadd.f32 %v1275_v36, %v586_v56 }
  0xf7   : > { %v539_v1 = vmax.f32 %v431_v57, 0.0  ;;  %v555_v2 = vmax.f32 %v495_v58, 0.0  ;;  %v423_v3 = vadd.f32 %v1261_v24, %v422_v63  ;;  %v487_v4 = vadd.f32 %v1261_v24, %v486_v0 }
  0xf8   : > { %v610_v5 = vadd.f32 %v1275_v36, %v573_v59  ;;  %v626_v6 = vadd.f32 %v1275_v36, %v589_v60  ;;  %v571_v7 = vmul.f32 %v1268_v29, %v534_v61  ;;  %v587_v8 = vmul.f32 %v1268_v29, %v550_v62  ;;  %v1099_v9 = vpop.f32.mrf.mxu0  ;;  %v1115_v10 = vpop.f32.mrf.mxu1 }
  0xf9   : > { %v537_v13 = vmax.f32 %v423_v3, 0.0  ;;  %v553_v14 = vmax.f32 %v487_v4, 0.0  ;;  %v576_v21 = vmul.f32 %v1268_v29, %v539_v1  ;;  %v592_v22 = vmul.f32 %v1268_v29, %v555_v2 }
  0xfa   : > { %v965_v15 = vpack.c.bf16 %v610_v5, %v609_v47  ;;  %v1005_v16 = vpack.c.bf16 %v626_v6, %v625_v48  ;;  %v608_v17 = vadd.f32 %v1275_v36, %v571_v7  ;;  %v624_v18 = vadd.f32 %v1275_v36, %v587_v8  ;;  %v425_v19 = vpop.f32.mrf.mxu0  ;;  %v489_v20 = vpop.f32.mrf.mxu1 }
  0xfb   : > { %v434_v26 = vadd.f32 %v1099_v9, %v1261_v24  ;;  %v498_v27 = vadd.f32 %v1115_v10, %v1261_v24  ;;  %v574_v31 = vmul.f32 %v1268_v29, %v537_v13  ;;  %v590_v32 = vmul.f32 %v1268_v29, %v553_v14 }
  0xfc   : > { %1037 = vst [vmem:[%s1304_s18 + $0x8] sm:$0xff] %v965_v15   ;;  %1045 = vst [vmem:[%s1304_s18 + $0x48] sm:$0xff] %v1005_v16   ;;  %v960_v23 = vpack.c.bf16 %v608_v17, %v607_v11  ;;  %v1000_v25 = vpack.c.bf16 %v624_v18, %v623_v12  ;;  %v1102_v28 = vpop.f32.mrf.mxu0  ;;  %v1118_v30 = vpop.f32.mrf.mxu1  ;;  %v426_v33 = vadd.f32 %v1261_v24, %v425_v19 }
  0xfd   : > { %v490_v34 = vadd.f32 %v1261_v24, %v489_v20  ;;  %v540_v35 = vmax.f32 %v434_v26, 0.0  ;;  %v556_v37 = vmax.f32 %v498_v27, 0.0  ;;  %v447_v38 = vadd.f32 %v1102_v28, %v1261_v24 }
  0xfe   : > { %961 = vst [vmem:[%s1304_s18] sm:$0xff] %v960_v23   ;;  %1044 = vst [vmem:[%s1304_s18 + $0x40] sm:$0xff] %v1000_v25   ;;  %v511_v39 = vadd.f32 %v1118_v30, %v1261_v24  ;;  %v438_v40 = vpop.f32.mrf.mxu0  ;;  %v502_v41 = vpop.f32.mrf.mxu1  ;;  %v538_v42 = vmax.f32 %v426_v33, 0.0  ;;  %v613_v56 = vadd.f32 %v1275_v36, %v576_v21  ;;  %v629_v57 = vadd.f32 %v1275_v36, %v592_v22 }
  0xff   : > { %v554_v43 = vmax.f32 %v490_v34, 0.0  ;;  %v439_v44 = vadd.f32 %v1261_v24, %v438_v40  ;;  %v503_v45 = vadd.f32 %v1261_v24, %v502_v41  ;;  %v577_v46 = vmul.f32 %v1268_v29, %v540_v35 }
 0x100   : > { %v593_v47 = vmul.f32 %v1268_v29, %v556_v37  ;;  %v543_v48 = vmax.f32 %v447_v38, 0.0  ;;  %v559_v49 = vmax.f32 %v511_v39, 0.0  ;;  %v1103_v50 = vpop.f32.mrf.mxu0  ;;  %v1119_v51 = vpop.f32.mrf.mxu1  ;;  %v575_v52 = vmul.f32 %v1268_v29, %v538_v42 }
 0x101   : > { %v591_v53 = vmul.f32 %v1268_v29, %v554_v43  ;;  %v541_v54 = vmax.f32 %v439_v44, 0.0  ;;  %v557_v55 = vmax.f32 %v503_v45, 0.0  ;;  %v614_v58 = vadd.f32 %v1275_v36, %v577_v46 }
 0x102   : > { %v630_v59 = vadd.f32 %v1275_v36, %v593_v47  ;;  %v441_v60 = vpop.f32.mrf.mxu0  ;;  %v505_v61 = vpop.f32.mrf.mxu1  ;;  %v611_v62 = vadd.f32 %v1275_v36, %v574_v31  ;;  %v627_v63 = vadd.f32 %v1275_v36, %v590_v32  ;;  %v612_v0 = vadd.f32 %v1275_v36, %v575_v52 }
 0x103   : > { %v628_v1 = vadd.f32 %v1275_v36, %v591_v53  ;;  %v975_v2 = vpack.c.bf16 %v614_v58, %v613_v56  ;;  %v580_v4 = vmul.f32 %v1268_v29, %v543_v48  ;;  %v596_v5 = vmul.f32 %v1268_v29, %v559_v49 }
 0x104   : > { %v1015_v3 = vpack.c.bf16 %v630_v59, %v629_v57  ;;  %v1106_v6 = vpop.f32.mrf.mxu0  ;;  %v1122_v7 = vpop.f32.mrf.mxu1  ;;  %v970_v8 = vpack.c.bf16 %v612_v0, %v611_v62  ;;  %v578_v10 = vmul.f32 %v1268_v29, %v541_v54  ;;  %v594_v11 = vmul.f32 %v1268_v29, %v557_v55 }
 0x105   : > { %v1010_v9 = vpack.c.bf16 %v628_v1, %v627_v63  ;;  %1039 = vst [vmem:[%s1304_s18 + $0x18] sm:$0xff] %v975_v2   ;;  %v450_v12 = vadd.f32 %v1103_v50, %v1261_v24  ;;  %v514_v13 = vadd.f32 %v1119_v51, %v1261_v24  ;;  %v442_v14 = vadd.f32 %v1261_v24, %v441_v60 }
 0x106   : > { %1047 = vst [vmem:[%s1304_s18 + $0x58] sm:$0xff] %v1015_v3   ;;  %v506_v15 = vadd.f32 %v1261_v24, %v505_v61  ;;  %v454_v16 = vpop.f32.mrf.mxu0  ;;  %v518_v17 = vpop.f32.mrf.mxu1  ;;  %1038 = vst [vmem:[%s1304_s18 + $0x10] sm:$0xff] %v970_v8   ;;  %v463_v18 = vadd.f32 %v1106_v6, %v1261_v24  ;;  %v527_v19 = vadd.f32 %v1122_v7, %v1261_v24 }
 0x107   : > { %1046 = vst [vmem:[%s1304_s18 + $0x50] sm:$0xff] %v1010_v9   ;;  %v455_v20 = vadd.f32 %v1261_v24, %v454_v16  ;;  %v519_v21 = vadd.f32 %v1261_v24, %v518_v17  ;;  %v544_v22 = vmax.f32 %v450_v12, 0.0  ;;  %v560_v23 = vmax.f32 %v514_v13, 0.0 }
 0x108   : > { %v542_v25 = vmax.f32 %v442_v14, 0.0  ;;  %v558_v26 = vmax.f32 %v506_v15, 0.0  ;;  %v1107_v27 = vpop.f32.mrf.mxu0  ;;  %v1123_v28 = vpop.f32.mrf.mxu1  ;;  %v617_v30 = vadd.f32 %v1275_v36, %v580_v4  ;;  %v633_v31 = vadd.f32 %v1275_v36, %v596_v5 }
 0x109   : > { %v615_v32 = vadd.f32 %v1275_v36, %v578_v10  ;;  %v631_v33 = vadd.f32 %v1275_v36, %v594_v11  ;;  %v581_v34 = vmul.f32 %v1268_v29, %v544_v22  ;;  %v597_v35 = vmul.f32 %v1268_v29, %v560_v23 }
 0x10a   : > { %v579_v37 = vmul.f32 %v1268_v29, %v542_v25  ;;  %v595_v38 = vmul.f32 %v1268_v29, %v558_v26  ;;  %v547_v39 = vmax.f32 %v463_v18, 0.0  ;;  %v563_v40 = vmax.f32 %v527_v19, 0.0  ;;  %v457_v47 = vpop.f32.mrf.mxu0  ;;  %v521_v48 = vpop.f32.mrf.mxu1 }
 0x10b   : > { %v545_v41 = vmax.f32 %v455_v20, 0.0  ;;  %v561_v42 = vmax.f32 %v519_v21, 0.0  ;;  %v618_v43 = vadd.f32 %v1275_v36, %v581_v34  ;;  %v634_v44 = vadd.f32 %v1275_v36, %v597_v35 }
 0x10c   : > { %v616_v45 = vadd.f32 %v1275_v36, %v579_v37  ;;  %v632_v46 = vadd.f32 %v1275_v36, %v595_v38  ;;  %v466_v53 = vadd.f32 %v1107_v27, %v1261_v24  ;;  %v530_v54 = vadd.f32 %v1123_v28, %v1261_v24 }
 0x10d   : > { %v985_v49 = vpack.c.bf16 %v618_v43, %v617_v30  ;;  %v1025_v50 = vpack.c.bf16 %v634_v44, %v633_v31  ;;  %v458_v55 = vadd.f32 %v1261_v24, %v457_v47  ;;  %v522_v56 = vadd.f32 %v1261_v24, %v521_v48 }
 0x10e   : > { %v980_v51 = vpack.c.bf16 %v616_v45, %v615_v32  ;;  %v1020_v52 = vpack.c.bf16 %v632_v46, %v631_v33  ;;  %v584_v57 = vmul.f32 %v1268_v29, %v547_v39  ;;  %v600_v58 = vmul.f32 %v1268_v29, %v563_v40 }
 0x10f   : > { %1041 = vst [vmem:[%s1304_s18 + $0x28] sm:$0xff] %v985_v49   ;;  %1049 = vst [vmem:[%s1304_s18 + $0x68] sm:$0xff] %v1025_v50   ;;  %v582_v59 = vmul.f32 %v1268_v29, %v545_v41  ;;  %v598_v60 = vmul.f32 %v1268_v29, %v561_v42  ;;  %v548_v61 = vmax.f32 %v466_v53, 0.0  ;;  %v564_v62 = vmax.f32 %v530_v54, 0.0 }
 0x110   : > { %1040 = vst [vmem:[%s1304_s18 + $0x20] sm:$0xff] %v980_v51   ;;  %1048 = vst [vmem:[%s1304_s18 + $0x60] sm:$0xff] %v1020_v52   ;;  %v546_v63 = vmax.f32 %v458_v55, 0.0  ;;  %v562_v0 = vmax.f32 %v522_v56, 0.0  ;;  %v621_v4 = vadd.f32 %v1275_v36, %v584_v57  ;;  %v637_v5 = vadd.f32 %v1275_v36, %v600_v58 }
 0x111   : > { %v585_v1 = vmul.f32 %v1268_v29, %v548_v61  ;;  %v601_v24 = vmul.f32 %v1268_v29, %v564_v62  ;;  %v619_v6 = vadd.f32 %v1275_v36, %v582_v59  ;;  %v635_v7 = vadd.f32 %v1275_v36, %v598_v60 }
 0x112   : > { %v583_v2 = vmul.f32 %v1268_v29, %v546_v63  ;;  %v599_v3 = vmul.f32 %v1268_v29, %v562_v0 }
 0x113   : > { %v622_v8 = vadd.f32 %v1275_v36, %v585_v1  ;;  %v638_v9 = vadd.f32 %v1275_v36, %v601_v24 }
 0x114   : > { %v620_v10 = vadd.f32 %v1275_v36, %v583_v2  ;;  %v636_v11 = vadd.f32 %v1275_v36, %v599_v3 }
 0x115   : > { %v995_v12 = vpack.c.bf16 %v622_v8, %v621_v4  ;;  %v1035_v13 = vpack.c.bf16 %v638_v9, %v637_v5 }
 0x116   : > { %v990_v29 = vpack.c.bf16 %v620_v10, %v619_v6  ;;  %v1030_v14 = vpack.c.bf16 %v636_v11, %v635_v7 }
 0x117   : > { %1043 = vst [vmem:[%s1304_s18 + $0x38] sm:$0xff] %v995_v12   ;;  %1051 = vst [vmem:[%s1304_s18 + $0x78] sm:$0xff] %v1035_v13  }
 0x118   : > { %1042 = vst [vmem:[%s1304_s18 + $0x30] sm:$0xff] %v990_v29   ;;  %1050 = vst [vmem:[%s1304_s18 + $0x70] sm:$0xff] %v1030_v14  }
 0x119 PF: > { %s13_s12 = sadd.s32 1, %s1178_s12  }
 0x11a   : > { %p10_p4 = scmp.ge.s32.totalorder %s13_s12, 4  }
 0x11c   :  { %12 = sbr.rel (!%p10_p4) target bundleno = 1 (0x1), region = 62 }

// kernel: tile.79
= control target key start
LH: loop header
LB: loop body
LE: loop exit
PB: predicated region body
PF: predicated region fallthrough
CT: control target
= control target key end

     0   :  { %s22_s0 = inlined_call_operand.vmem [shape: f32[16], index: 0, kind: input, shape index: {}]   ;;  %s23_s1 = inlined_call_operand.vmem [shape: f32[2,16], index: 1, kind: output, shape index: {}]  }
   0x1   :  { %v4_v0 = vld [vmem:[%s22_s0] ss:$0 sm:$0xff] }
   0x2   :  { %5 = vst [vmem:[%s23_s1] sm:$0x3] %v4_v0 }

// kernel: tile.100
= control target key start
LH: loop header
LB: loop body
LE: loop exit
PB: predicated region body
PF: predicated region fallthrough
CT: control target
= control target key end

     0   :  { %vm8_vm0 = vcmask 130048   ;;  %vm14_vm1 = vcmask 261248   ;;  %s42_s0 = inlined_call_operand.vmem [shape: f32[2,16], index: 0, kind: input, shape index: {}]   ;;  %s43_s1 = inlined_call_operand.vmem [shape: f32[1,32], index: 1, kind: output, shape index: {}]  }
   0x1   :  { %v5_v0 = vld [vmem:[%s42_s0] sm:$0x3]  ;;  %s25_s0 = smov 16  }
   0x2   :  { %6 = vst [vmem:[#allocation1] sm:$0x3] %v5_v0 }
   0x9   :  { %v11_v1 = vld [vmem:[#allocation1 + $0x1] sm:$0x1]   ;;  %v7_v2 = vld [vmem:[#allocation1] sm:$0x1]  }
   0xa   :  { %12 = vrot.lane.b32.xlu0 %v11_v1, %s25_s0  ;;  %9 = vst.msk [vmem:[#allocation0] sm:$0x1] %vm8_vm0, %v7_v2  }
  0x7c   :  { %v13_v3 = vpop.permute.xlu0 %12  }
  0x7d   :  { %15 = vst.msk [vmem:[#allocation0] sm:$0x1] %vm14_vm1, %v13_v3  }
  0x84   :  { %v20_v4 = vld [vmem:[#allocation0] sm:$0x1] }
  0x85   :  { %23 = vst [vmem:[%s43_s1] sm:$0x1] %v20_v4 }

// kernel: film_forward.8
= control target key start
LH: loop header
LB: loop body
LE: loop exit
PB: predicated region body
PF: predicated region fallthrough
CT: control target
= control target key end

     0   :  { %s3016_s1 = inlined_call_operand.vmem [shape: bf16[1152,128], index: 1, kind: input, shape index: {}]   ;;  %s3017_s0 = inlined_call_operand.vmem [shape: bf16[128,1152], index: 0, kind: input, shape index: {}]   ;;  %s3018_s2 = inlined_call_operand.vmem [shape: f32[3,128], index: 2, kind: input, shape index: {}]   ;;  %s3019_s3 = inlined_call_operand.vmem [shape: bf16[128,128], index: 3, kind: output, shape index: {}]  }
   0x1   :  { %v2217_v0 = vld [vmem:[%s3016_s1 + $0x78] sm:$0xff]   ;;  %v2221_v4 = vld [vmem:[%s3016_s1 + $0x70] sm:$0xff]   ;;  %v2225_v8 = vld [vmem:[%s3016_s1 + $0x68] sm:$0xff]  }
   0x2   :  { %v2218_v1 = vld [vmem:[%s3016_s1 + $0xf8] sm:$0xff]   ;;  %1897 = vmatprep.subr.bf16.mxu0 %v2217_v0  ;;  %v2222_v5 = vld [vmem:[%s3016_s1 + $0xf0] sm:$0xff]   ;;  %v2226_v9 = vld [vmem:[%s3016_s1 + $0xe8] sm:$0xff]  }
   0x3   :  { %v2219_v2 = vld [vmem:[%s3016_s1 + $0x38] sm:$0xff]   ;;  %1961 = vmatprep.subr.bf16.mxu1 %v2218_v1  ;;  %v2223_v6 = vld [vmem:[%s3016_s1 + $0x30] sm:$0xff]   ;;  %v2227_v10 = vld [vmem:[%s3016_s1 + $0x28] sm:$0xff]  }
   0x4   :  { %v2220_v3 = vld [vmem:[%s3016_s1 + $0xb8] sm:$0xff]   ;;  %1898 = vmatpush3.bf16.msra.mxu0 %v2219_v2  ;;  %v2224_v7 = vld [vmem:[%s3016_s1 + $0xb0] sm:$0xff]   ;;  %v2228_v11 = vld [vmem:[%s3016_s1 + $0xa8] sm:$0xff]  }
   0x5   :  { %1962 = vmatpush3.bf16.msra.mxu1 %v2220_v3  ;;  %1899 = vmatprep.subr.bf16.mxu0 %v2221_v4  ;;  %v2229_v12 = vld [vmem:[%s3016_s1 + $0x60] sm:$0xff]   ;;  %v2233_v16 = vld [vmem:[%s3016_s1 + $0x58] sm:$0xff]   ;;  %v2237_v20 = vld [vmem:[%s3016_s1 + $0x50] sm:$0xff]  }
   0x6   :  { %1963 = vmatprep.subr.bf16.mxu1 %v2222_v5  ;;  %v2230_v13 = vld [vmem:[%s3016_s1 + $0xe0] sm:$0xff]   ;;  %v2234_v17 = vld [vmem:[%s3016_s1 + $0xd8] sm:$0xff]   ;;  %v2238_v21 = vld [vmem:[%s3016_s1 + $0xd0] sm:$0xff]  }
   0x7   :  { %v2231_v14 = vld [vmem:[%s3016_s1 + $0x20] sm:$0xff]   ;;  %v2235_v18 = vld [vmem:[%s3016_s1 + $0x18] sm:$0xff]   ;;  %v2239_v22 = vld [vmem:[%s3016_s1 + $0x10] sm:$0xff]  }
   0x8   :  { %1900 = vmatpush3.bf16.msra.mxu0 %v2223_v6  ;;  %v2232_v15 = vld [vmem:[%s3016_s1 + $0xa0] sm:$0xff]   ;;  %v2236_v19 = vld [vmem:[%s3016_s1 + $0x98] sm:$0xff]   ;;  %v2240_v23 = vld [vmem:[%s3016_s1 + $0x90] sm:$0xff]  }
   0x9   :  { %1964 = vmatpush3.bf16.msra.mxu1 %v2224_v7  ;;  %1901 = vmatprep.subr.bf16.mxu0 %v2225_v8  ;;  %v2241_v24 = vld [vmem:[%s3016_s1 + $0x48] sm:$0xff]   ;;  %v2245_v28 = vld [vmem:[%s3016_s1 + $0x40] sm:$0xff]   ;;  %v2255_v36 = vld [vmem:[%s3016_s1 + $0x178] sm:$0xff]  }
   0xa   :  { %1965 = vmatprep.subr.bf16.mxu1 %v2226_v9  ;;  %v2242_v25 = vld [vmem:[%s3016_s1 + $0xc8] sm:$0xff]   ;;  %v2246_v29 = vld [vmem:[%s3016_s1 + $0xc0] sm:$0xff]   ;;  %v2256_v37 = vld [vmem:[%s3016_s1 + $0x1f8] sm:$0xff]  }
   0xb   :  { %v2243_v26 = vld [vmem:[%s3016_s1 + $0x8] sm:$0xff]   ;;  %v2247_v30 = vld [vmem:[%s3016_s1] sm:$0xff]   ;;  %v2257_v38 = vld [vmem:[%s3016_s1 + $0x138] sm:$0xff]  }
   0xc   :  { %1902 = vmatpush3.bf16.msra.mxu0 %v2227_v10  ;;  %v2244_v27 = vld [vmem:[%s3016_s1 + $0x88] sm:$0xff]   ;;  %v2248_v31 = vld [vmem:[%s3016_s1 + $0x80] sm:$0xff]   ;;  %v2258_v39 = vld [vmem:[%s3016_s1 + $0x1b8] sm:$0xff]  }
   0xd   :  { %1966 = vmatpush3.bf16.msra.mxu1 %v2228_v11  ;;  %1903 = vmatprep.subr.bf16.mxu0 %v2229_v12  ;;  %v2249_v32 = vld [vmem:[%s3017_s0] ss:$36 sps:$4 sm:$0xff]   ;;  %v2252_v34 = vld [vmem:[%s3017_s0 + $0x8] ss:$36 sps:$4 sm:$0xff]   ;;  %v2261_v41 = vld [vmem:[%s3017_s0 + $0x54] ss:$36 sps:$4 sm:$0xff]  }
   0xe   :  { %1967 = vmatprep.subr.bf16.mxu1 %v2230_v13  ;;  %v2251_v33 = vld [vmem:[%s3017_s0 + $0x4] ss:$36 sps:$4 sm:$0xff]   ;;  %v2254_v35 = vld [vmem:[%s3017_s0 + $0xc] ss:$36 sps:$4 sm:$0xff]   ;;  %v2269_v48 = vld [vmem:[%s3017_s0 + $0x94] ss:$36 sps:$4 sm:$0xff]  }
   0xf   :  { %1076 = vmatprep.mubr.bf16.mxu0 %v2251_v33  ;;  %1173 = vmatprep.mubr.bf16.mxu1 %v2254_v35  ;;  %v2259_v40 = vld [vmem:[%s3017_s0 + $0x4c] ss:$36 sps:$4 sm:$0xff]   ;;  %v2271_v49 = vld [vmem:[%s3017_s0 + $0x9c] ss:$36 sps:$4 sm:$0xff]   ;;  %v2281_v57 = vld [vmem:[%s3017_s0 + $0xe4] ss:$36 sps:$4 sm:$0xff]  }
  0x10   :  { %1904 = vmatpush3.bf16.msra.mxu0 %v2231_v14  ;;  %v2263_v42 = vld [vmem:[%s3017_s0 + $0x48] ss:$36 sps:$4 sm:$0xff]   ;;  %v2264_v43 = vld [vmem:[%s3017_s0 + $0x50] ss:$36 sps:$4 sm:$0xff]   ;;  %v2274_v51 = vld [vmem:[%s3017_s0 + $0x98] ss:$36 sps:$4 sm:$0xff]  }
  0x11   :  { %1968 = vmatpush3.bf16.msra.mxu1 %v2232_v15  ;;  %1905 = vmatprep.subr.bf16.mxu0 %v2233_v16  ;;  %v2265_v44 = vld [vmem:[%s3016_s1 + $0x170] sm:$0xff]   ;;  %v2275_v52 = vld [vmem:[%s3016_s1 + $0x168] sm:$0xff]   ;;  %v2279_v56 = vld [vmem:[%s3017_s0 + $0xdc] ss:$36 sps:$4 sm:$0xff]  }
  0x12   :  { %1969 = vmatprep.subr.bf16.mxu1 %v2234_v17  ;;  %v2266_v45 = vld [vmem:[%s3016_s1 + $0x1f0] sm:$0xff]   ;;  %v2276_v53 = vld [vmem:[%s3016_s1 + $0x1e8] sm:$0xff]   ;;  %v2283_v58 = vld [vmem:[%s3017_s0 + $0xd8] ss:$36 sps:$4 sm:$0xff]  }
  0x13   :  { %v2267_v46 = vld [vmem:[%s3016_s1 + $0x130] sm:$0xff]   ;;  %v2277_v54 = vld [vmem:[%s3016_s1 + $0x128] sm:$0xff]   ;;  %v2284_v59 = vld [vmem:[%s3017_s0 + $0xe0] ss:$36 sps:$4 sm:$0xff]  }
  0x14   :  { %1906 = vmatpush3.bf16.msra.mxu0 %v2235_v18  ;;  %v2268_v47 = vld [vmem:[%s3016_s1 + $0x1b0] sm:$0xff]   ;;  %v2278_v55 = vld [vmem:[%s3016_s1 + $0x1a8] sm:$0xff]   ;;  %v2285_v60 = vld [vmem:[%s3016_s1 + $0x160] sm:$0xff]  }
  0x15   :  { %1970 = vmatpush3.bf16.msra.mxu1 %v2236_v19  ;;  %1907 = vmatprep.subr.bf16.mxu0 %v2237_v20  ;;  %v2273_v50 = vld [vmem:[%s3017_s0 + $0x90] ss:$36 sps:$4 sm:$0xff]   ;;  %v2286_v61 = vld [vmem:[%s3016_s1 + $0x1e0] sm:$0xff]   ;;  %v2295_v3 = vld [vmem:[%s3016_s1 + $0x158] sm:$0xff]  }
  0x16   :  { %1971 = vmatprep.subr.bf16.mxu1 %v2238_v21  ;;  %v2287_v62 = vld [vmem:[%s3016_s1 + $0x120] sm:$0xff]   ;;  %v2291_v1 = vld [vmem:[%s3017_s0 + $0x12c] ss:$36 sps:$4 sm:$0xff]   ;;  %v2296_v5 = vld [vmem:[%s3016_s1 + $0x1d8] sm:$0xff]  }
  0x17   :  { %v2288_v63 = vld [vmem:[%s3016_s1 + $0x1a0] sm:$0xff]   ;;  %v2294_v4 = vld [vmem:[%s3017_s0 + $0x128] ss:$36 sps:$4 sm:$0xff]   ;;  %v2297_v6 = vld [vmem:[%s3016_s1 + $0x118] sm:$0xff]  }
  0x18   :  { %1908 = vmatpush3.bf16.msra.mxu0 %v2239_v22  ;;  %v2289_v0 = vld [vmem:[%s3017_s0 + $0x124] ss:$36 sps:$4 sm:$0xff]   ;;  %v2298_v7 = vld [vmem:[%s3016_s1 + $0x198] sm:$0xff]   ;;  %v2299_v8 = vld [vmem:[%s3017_s0 + $0x16c] ss:$36 sps:$4 sm:$0xff]  }
  0x19   :  { %1972 = vmatpush3.bf16.msra.mxu1 %v2240_v23  ;;  %1909 = vmatprep.subr.bf16.mxu0 %v2241_v24  ;;  %v2293_v2 = vld [vmem:[%s3017_s0 + $0x120] ss:$36 sps:$4 sm:$0xff]   ;;  %v2301_v9 = vld [vmem:[%s3017_s0 + $0x174] ss:$36 sps:$4 sm:$0xff]   ;;  %v2303_v12 = vld [vmem:[%s3017_s0 + $0x168] ss:$36 sps:$4 sm:$0xff]  }
  0x1a   :  { %1973 = vmatprep.subr.bf16.mxu1 %v2242_v25  ;;  %v2305_v10 = vld [vmem:[%s3016_s1 + $0x150] sm:$0xff]   ;;  %v2311_v17 = vld [vmem:[%s3017_s0 + $0x1bc] ss:$36 sps:$4 sm:$0xff]   ;;  %v2315_v18 = vld [vmem:[%s3016_s1 + $0x148] sm:$0xff]  }
  0x1b   :  { %v2306_v11 = vld [vmem:[%s3016_s1 + $0x1d0] sm:$0xff]   ;;  %v2316_v19 = vld [vmem:[%s3016_s1 + $0x1c8] sm:$0xff]   ;;  %v2314_v23 = vld [vmem:[%s3017_s0 + $0x1b8] ss:$36 sps:$4 sm:$0xff]  }
  0x1c   :  { %1910 = vmatpush3.bf16.msra.mxu0 %v2243_v26  ;;  %v2307_v13 = vld [vmem:[%s3016_s1 + $0x110] sm:$0xff]   ;;  %v2317_v20 = vld [vmem:[%s3016_s1 + $0x108] sm:$0xff]   ;;  %v2319_v24 = vld [vmem:[%s3017_s0 + $0x1fc] ss:$36 sps:$4 sm:$0xff]  }
  0x1d   :  { %1974 = vmatpush3.bf16.msra.mxu1 %v2244_v27  ;;  %1911 = vmatprep.subr.bf16.mxu0 %v2245_v28  ;;  %v2308_v14 = vld [vmem:[%s3016_s1 + $0x190] sm:$0xff]   ;;  %v2318_v21 = vld [vmem:[%s3016_s1 + $0x188] sm:$0xff]   ;;  %v2325_v26 = vld [vmem:[%s3016_s1 + $0x140] sm:$0xff]  }
  0x1e   :  { %1975 = vmatprep.subr.bf16.mxu1 %v2246_v29  ;;  %v2304_v15 = vld [vmem:[%s3017_s0 + $0x170] ss:$36 sps:$4 sm:$0xff]   ;;  %v2321_v25 = vld [vmem:[%s3017_s0 + $0x204] ss:$36 sps:$4 sm:$0xff]  }
  0x1f   :  { %v2309_v16 = vld [vmem:[%s3017_s0 + $0x1b4] ss:$36 sps:$4 sm:$0xff]   ;;  %v2326_v27 = vld [vmem:[%s3016_s1 + $0x1c0] sm:$0xff]  }
  0x20   :  { %1912 = vmatpush3.bf16.msra.mxu0 %v2247_v30  ;;  %v2313_v22 = vld [vmem:[%s3017_s0 + $0x1b0] ss:$36 sps:$4 sm:$0xff]   ;;  %v2327_v28 = vld [vmem:[%s3016_s1 + $0x100] sm:$0xff]   ;;  %v2323_v30 = vld [vmem:[%s3017_s0 + $0x1f8] ss:$36 sps:$4 sm:$0xff]  }
  0x21   :  { %1976 = vmatpush3.bf16.msra.mxu1 %v2248_v31  ;;  %2025 = vmatprep.subr.bf16.mxu0 %v2255_v36  ;;  %v2328_v29 = vld [vmem:[%s3016_s1 + $0x180] sm:$0xff]   ;;  %v2331_v33 = vld [vmem:[%s3017_s0 + $0x14] ss:$36 sps:$4 sm:$0xff]  }
  0x22   :  { %2089 = vmatprep.subr.bf16.mxu1 %v2256_v37  ;;  %v2324_v31 = vld [vmem:[%s3017_s0 + $0x200] ss:$36 sps:$4 sm:$0xff]   ;;  %v2329_v35 = vld [vmem:[%s3017_s0 + $0x10] ss:$36 sps:$4 sm:$0xff]   ;;  %v2332_v36 = vld [vmem:[%s3017_s0 + $0x18] ss:$36 sps:$4 sm:$0xff]  }
  0x23   :  { %1077 = vmatmul.mubr.bf16.vlgmr.msra.gmra.mxu0 %v2249_v32  ;;  %v2335_v32 = vld [vmem:[%s3016_s1 + $0x238] sm:$0xff]  }
  0x24   :  { %1174 = vmatmul.mubr.bf16.vlgmr.msra.gmra.mxu1 %v2252_v34  ;;  %2026 = vmatpush3.bf16.msra.mxu0 %v2257_v38  ;;  %v2334_v34 = vld [vmem:[%s3017_s0 + $0x1c] ss:$36 sps:$4 sm:$0xff]   ;;  %v2338_v38 = vld [vmem:[%s3017_s0 + $0x64] ss:$36 sps:$4 sm:$0xff]  }
  0x25   :  { %2090 = vmatpush3.bf16.msra.mxu1 %v2258_v39  ;;  %1084 = vmatprep.mubr.bf16.mxu0 %v2259_v40  ;;  %v2336_v37 = vld [vmem:[%s3017_s0 + $0x5c] ss:$36 sps:$4 sm:$0xff]   ;;  %v2342_v39 = vld [vmem:[%s3016_s1 + $0x230] sm:$0xff]   ;;  %v2349_v40 = vld [vmem:[%s3016_s1 + $0x228] sm:$0xff]  }
  0x26   :  { %1181 = vmatprep.mubr.bf16.mxu1 %v2261_v41  ;;  %2027 = vmatprep.subr.bf16.mxu0 %v2265_v44  ;;  %v2340_v41 = vld [vmem:[%s3017_s0 + $0x58] ss:$36 sps:$4 sm:$0xff]   ;;  %v2345_v44 = vld [vmem:[%s3017_s0 + $0xac] ss:$36 sps:$4 sm:$0xff]  }
  0x27   :  { %2091 = vmatprep.subr.bf16.mxu1 %v2266_v45  ;;  %v2356_v45 = vld [vmem:[%s3016_s1 + $0x220] sm:$0xff]  }
  0x28   :  { %2028 = vmatpush3.bf16.msra.mxu0 %v2267_v46  ;;  %v2363_v46 = vld [vmem:[%s3016_s1 + $0x218] sm:$0xff]  }
  0x29   :  { %2092 = vmatpush3.bf16.msra.mxu1 %v2268_v47  ;;  %2029 = vmatprep.subr.bf16.mxu0 %v2275_v52  ;;  %v2347_v47 = vld [vmem:[%s3017_s0 + $0xa0] ss:$36 sps:$4 sm:$0xff]   ;;  %v2354_v52 = vld [vmem:[%s3017_s0 + $0xe8] ss:$36 sps:$4 sm:$0xff]  }
  0x2a   :  { %2093 = vmatprep.subr.bf16.mxu1 %v2276_v53  ;;  %v2377_v53 = vld [vmem:[%s3016_s1 + $0x208] sm:$0xff]  }
  0x2b   :  { %1085 = vmatmul.mubr.bf16.gmra.mxu0 %v2263_v42  ;;  %v2341_v42 = vld [vmem:[%s3017_s0 + $0x60] ss:$36 sps:$4 sm:$0xff]  }
  0x2c   :  { %1182 = vmatmul.mubr.bf16.gmra.mxu1 %v2264_v43  ;;  %1092 = vmatprep.mubr.bf16.mxu0 %v2269_v48  ;;  %v2343_v43 = vld [vmem:[%s3017_s0 + $0xa4] ss:$36 sps:$4 sm:$0xff]  }
  0x2d   :  { %1189 = vmatprep.mubr.bf16.mxu1 %v2271_v49  ;;  %2030 = vmatpush3.bf16.msra.mxu0 %v2277_v54  ;;  %v2348_v48 = vld [vmem:[%s3017_s0 + $0xa8] ss:$36 sps:$4 sm:$0xff]   ;;  %v2355_v54 = vld [vmem:[%s3017_s0 + $0xf0] ss:$36 sps:$4 sm:$0xff]  }
  0x2e   :  { %2094 = vmatpush3.bf16.msra.mxu1 %v2278_v55  ;;  %2031 = vmatprep.subr.bf16.mxu0 %v2285_v60  ;;  %v2350_v49 = vld [vmem:[%s3017_s0 + $0xec] ss:$36 sps:$4 sm:$0xff]   ;;  %v2357_v55 = vld [vmem:[%s3017_s0 + $0x134] ss:$36 sps:$4 sm:$0xff]   ;;  %v2364_v60 = vld [vmem:[%s3017_s0 + $0x17c] ss:$36 sps:$4 sm:$0xff]  }
  0x2f   :  { %2095 = vmatprep.subr.bf16.mxu1 %v2286_v61  ;;  %v2366_v61 = vld [vmem:[%s3017_s0 + $0x184] ss:$36 sps:$4 sm:$0xff]  }
  0x31   :  { %2032 = vmatpush3.bf16.msra.mxu0 %v2287_v62  ;;  %v2368_v62 = vld [vmem:[%s3017_s0 + $0x178] ss:$36 sps:$4 sm:$0xff]  }
  0x32   :  { %2096 = vmatpush3.bf16.msra.mxu1 %v2288_v63  ;;  %2033 = vmatprep.subr.bf16.mxu0 %v2295_v3  ;;  %v2369_v63 = vld [vmem:[%s3017_s0 + $0x180] ss:$36 sps:$4 sm:$0xff]   ;;  %v2376_v3 = vld [vmem:[%s3017_s0 + $0x1c8] ss:$36 sps:$4 sm:$0xff]  }
  0x33   :  { %1093 = vmatmul.mubr.bf16.gmra.mxu0 %v2273_v50  ;;  %2097 = vmatprep.subr.bf16.mxu1 %v2296_v5  ;;  %v2352_v50 = vld [vmem:[%s3017_s0 + $0xf4] ss:$36 sps:$4 sm:$0xff]  }
  0x34   :  { %1190 = vmatmul.mubr.bf16.gmra.mxu1 %v2274_v51  ;;  %1100 = vmatprep.mubr.bf16.mxu0 %v2279_v56  ;;  %v2370_v51 = vld [vmem:[%s3016_s1 + $0x210] sm:$0xff]   ;;  %v2359_v56 = vld [vmem:[%s3017_s0 + $0x13c] ss:$36 sps:$4 sm:$0xff]  }
  0x35   :  { %1197 = vmatprep.mubr.bf16.mxu1 %v2281_v57  ;;  %2034 = vmatpush3.bf16.msra.mxu0 %v2297_v6  ;;  %v2384_v57 = vld [vmem:[%s3016_s1 + $0x200] sm:$0xff]   ;;  %v2380_v5 = vld [vmem:[%s3017_s0 + $0x214] ss:$36 sps:$4 sm:$0xff]   ;;  %v2382_v6 = vld [vmem:[%s3017_s0 + $0x208] ss:$36 sps:$4 sm:$0xff]  }
  0x36   :  { %2098 = vmatpush3.bf16.msra.mxu1 %v2298_v7  ;;  %2035 = vmatprep.subr.bf16.mxu0 %v2305_v10  ;;  %v2383_v7 = vld [vmem:[%s3017_s0 + $0x210] ss:$36 sps:$4 sm:$0xff]   ;;  %v2387_v10 = vld [vmem:[%s3017_s0 + $0x68] ss:$36 sps:$4 sm:$0xff]  }
  0x37   :  { %2099 = vmatprep.subr.bf16.mxu1 %v2306_v11  ;;  %v2388_v11 = vld [vmem:[%s3017_s0 + $0x188] ss:$36 sps:$4 sm:$0xff]  }
  0x39   :  { %2036 = vmatpush3.bf16.msra.mxu0 %v2307_v13  ;;  %v2390_v13 = vld [vmem:[%s3017_s0 + $0x1d0] ss:$36 sps:$4 sm:$0xff]  }
  0x3a   :  { %2100 = vmatpush3.bf16.msra.mxu1 %v2308_v14  ;;  %2037 = vmatprep.subr.bf16.mxu0 %v2315_v18  ;;  %v2391_v14 = vld [vmem:[%s3017_s0 + $0xf8] ss:$36 sps:$4 sm:$0xff]   ;;  %v2848_v18 = vld [vmem:[%s3018_s2] ss:$0 sm:$0xff] }
  0x3b   :  { %1101 = vmatmul.mubr.bf16.gmra.mxu0 %v2283_v58  ;;  %2101 = vmatprep.subr.bf16.mxu1 %v2316_v19  ;;  %v2361_v58 = vld [vmem:[%s3017_s0 + $0x130] ss:$36 sps:$4 sm:$0xff]  }
  0x3c   :  { %1198 = vmatmul.mubr.bf16.gmra.mxu1 %v2284_v59  ;;  %1108 = vmatprep.mubr.bf16.mxu0 %v2289_v0  ;;  %v2362_v59 = vld [vmem:[%s3017_s0 + $0x138] ss:$36 sps:$4 sm:$0xff]   ;;  %v2371_v0 = vld [vmem:[%s3017_s0 + $0x1c4] ss:$36 sps:$4 sm:$0xff]  }
  0x3d   :  { %1205 = vmatprep.mubr.bf16.mxu1 %v2291_v1  ;;  %2038 = vmatpush3.bf16.msra.mxu0 %v2317_v20  ;;  %v2373_v1 = vld [vmem:[%s3017_s0 + $0x1cc] ss:$36 sps:$4 sm:$0xff]  }
  0x3e   :  { %2102 = vmatpush3.bf16.msra.mxu1 %v2318_v21  ;;  %2039 = vmatprep.subr.bf16.mxu0 %v2325_v26 }
  0x3f   :  { %2103 = vmatprep.subr.bf16.mxu1 %v2326_v27 }
  0x41   :  { %2040 = vmatpush3.bf16.msra.mxu0 %v2327_v28 }
  0x42   :  { %2104 = vmatpush3.bf16.msra.mxu1 %v2328_v29  ;;  %2169 = vmatprep.subr.bf16.mxu0 %v2335_v32 }
  0x43   :  { %1109 = vmatmul.mubr.bf16.gmra.mxu0 %v2293_v2  ;;  %2201 = vmatprep.subr.bf16.mxu1 %v2335_v32  ;;  %v2375_v2 = vld [vmem:[%s3017_s0 + $0x1c0] ss:$36 sps:$4 sm:$0xff]  }
  0x44   :  { %1206 = vmatmul.mubr.bf16.gmra.mxu1 %v2294_v4  ;;  %1116 = vmatprep.mubr.bf16.mxu0 %v2299_v8  ;;  %v2378_v4 = vld [vmem:[%s3017_s0 + $0x20c] ss:$36 sps:$4 sm:$0xff]   ;;  %v2385_v8 = vld [vmem:[%s3017_s0 + $0x20] ss:$36 sps:$4 sm:$0xff]  }
  0x45   :  { %1213 = vmatprep.mubr.bf16.mxu1 %v2301_v9  ;;  %v2386_v9 = vld [vmem:[%s3017_s0 + $0x140] ss:$36 sps:$4 sm:$0xff]  }
  0x4b   :  { %1117 = vmatmul.mubr.bf16.gmra.mxu0 %v2303_v12  ;;  %v2389_v12 = vld [vmem:[%s3017_s0 + $0xb0] ss:$36 sps:$4 sm:$0xff]  }
  0x4c   :  { %1214 = vmatmul.mubr.bf16.gmra.mxu1 %v2304_v15  ;;  %1124 = vmatprep.mubr.bf16.mxu0 %v2309_v16  ;;  %v2392_v15 = vld [vmem:[%s3017_s0 + $0x218] ss:$36 sps:$4 sm:$0xff]  }
  0x4d   :  { %1221 = vmatprep.mubr.bf16.mxu1 %v2311_v17 }
  0x53   :  { %1125 = vmatmul.mubr.bf16.gmra.mxu0 %v2313_v22 }
  0x54   :  { %1222 = vmatmul.mubr.bf16.gmra.mxu1 %v2314_v23  ;;  %1132 = vmatprep.mubr.bf16.mxu0 %v2319_v24 }
  0x55   :  { %1229 = vmatprep.mubr.bf16.mxu1 %v2321_v25 }
  0x5b   :  { %1133 = vmatmul.mubr.bf16.gmra.mxu0 %v2323_v30 }
  0x5c   :  { %1230 = vmatmul.mubr.bf16.gmra.mxu1 %v2324_v31  ;;  %1270 = vmatprep.mubr.bf16.mxu0 %v2331_v33 }
  0x5d   :  { %1367 = vmatprep.mubr.bf16.mxu1 %v2334_v34 }
  0x63   :  { %1271 = vmatmul.mubr.bf16.vlgmr.msra.gmra.mxu0 %v2329_v35 }
  0x64   :  { %1368 = vmatmul.mubr.bf16.vlgmr.msra.gmra.mxu1 %v2332_v36  ;;  %2170 = vmatpush3.bf16.msra.mxu0 %v2335_v32 }
  0x65   :  { %2209 = vmatpush3.bf16.msra.mxu1 %v2335_v32  ;;  %1278 = vmatprep.mubr.bf16.mxu0 %v2336_v37 }
  0x66   :  { %1375 = vmatprep.mubr.bf16.mxu1 %v2338_v38  ;;  %2171 = vmatprep.subr.bf16.mxu0 %v2342_v39 }
  0x67   :  { %2202 = vmatprep.subr.bf16.mxu1 %v2342_v39 }
  0x68   :  { %2172 = vmatpush3.bf16.msra.mxu0 %v2342_v39 }
  0x69   :  { %2210 = vmatpush3.bf16.msra.mxu1 %v2342_v39  ;;  %2173 = vmatprep.subr.bf16.mxu0 %v2349_v40 }
  0x6a   :  { %2203 = vmatprep.subr.bf16.mxu1 %v2349_v40 }
  0x6b   :  { %1279 = vmatmul.mubr.bf16.gmra.mxu0 %v2340_v41 }
  0x6c   :  { %1376 = vmatmul.mubr.bf16.gmra.mxu1 %v2341_v42  ;;  %1286 = vmatprep.mubr.bf16.mxu0 %v2343_v43 }
  0x6d   :  { %1383 = vmatprep.mubr.bf16.mxu1 %v2345_v44  ;;  %2174 = vmatpush3.bf16.msra.mxu0 %v2349_v40 }
  0x6e   :  { %2211 = vmatpush3.bf16.msra.mxu1 %v2349_v40  ;;  %2175 = vmatprep.subr.bf16.mxu0 %v2356_v45 }
  0x6f   :  { %2204 = vmatprep.subr.bf16.mxu1 %v2356_v45 }
  0x71   :  { %2176 = vmatpush3.bf16.msra.mxu0 %v2356_v45 }
  0x72   :  { %2212 = vmatpush3.bf16.msra.mxu1 %v2356_v45  ;;  %2177 = vmatprep.subr.bf16.mxu0 %v2363_v46 }
  0x73   :  { %1287 = vmatmul.mubr.bf16.gmra.mxu0 %v2347_v47  ;;  %2205 = vmatprep.subr.bf16.mxu1 %v2363_v46 }
  0x74   :  { %1384 = vmatmul.mubr.bf16.gmra.mxu1 %v2348_v48  ;;  %1294 = vmatprep.mubr.bf16.mxu0 %v2350_v49 }
  0x75   :  { %1391 = vmatprep.mubr.bf16.mxu1 %v2352_v50  ;;  %2178 = vmatpush3.bf16.msra.mxu0 %v2363_v46 }
  0x76   :  { %2213 = vmatpush3.bf16.msra.mxu1 %v2363_v46  ;;  %2179 = vmatprep.subr.bf16.mxu0 %v2370_v51 }
  0x77   :  { %2206 = vmatprep.subr.bf16.mxu1 %v2370_v51 }
  0x79   :  { %2180 = vmatpush3.bf16.msra.mxu0 %v2370_v51 }
  0x7a   :  { %2214 = vmatpush3.bf16.msra.mxu1 %v2370_v51  ;;  %2181 = vmatprep.subr.bf16.mxu0 %v2377_v53 }
  0x7b   :  { %1295 = vmatmul.mubr.bf16.gmra.mxu0 %v2354_v52  ;;  %2207 = vmatprep.subr.bf16.mxu1 %v2377_v53 }
  0x7c   :  { %1392 = vmatmul.mubr.bf16.gmra.mxu1 %v2355_v54  ;;  %1302 = vmatprep.mubr.bf16.mxu0 %v2357_v55 }
  0x7d   :  { %1399 = vmatprep.mubr.bf16.mxu1 %v2359_v56  ;;  %2182 = vmatpush3.bf16.msra.mxu0 %v2377_v53 }
  0x7e   :  { %2215 = vmatpush3.bf16.msra.mxu1 %v2377_v53  ;;  %2183 = vmatprep.subr.bf16.mxu0 %v2384_v57 }
  0x7f   :  { %2208 = vmatprep.subr.bf16.mxu1 %v2384_v57 }
  0x81   :  { %2184 = vmatpush3.bf16.msra.mxu0 %v2384_v57 }
  0x82   :  { %2216 = vmatpush3.bf16.msra.mxu1 %v2384_v57 }
  0x83   :  { %1303 = vmatmul.mubr.bf16.gmra.mxu0 %v2361_v58 }
  0x84   :  { %1400 = vmatmul.mubr.bf16.gmra.mxu1 %v2362_v59  ;;  %1310 = vmatprep.mubr.bf16.mxu0 %v2364_v60 }
  0x85   :  { %1407 = vmatprep.mubr.bf16.mxu1 %v2366_v61 }
  0x8b   :  { %1311 = vmatmul.mubr.bf16.gmra.mxu0 %v2368_v62 }
  0x8c   :  { %1408 = vmatmul.mubr.bf16.gmra.mxu1 %v2369_v63  ;;  %1318 = vmatprep.mubr.bf16.mxu0 %v2371_v0 }
  0x8d   :  { %1415 = vmatprep.mubr.bf16.mxu1 %v2373_v1 }
  0x93   :  { %1319 = vmatmul.mubr.bf16.gmra.mxu0 %v2375_v2 }
  0x94   :  { %1416 = vmatmul.mubr.bf16.gmra.mxu1 %v2376_v3  ;;  %1326 = vmatprep.mubr.bf16.mxu0 %v2378_v4 }
  0x95   :  { %1423 = vmatprep.mubr.bf16.mxu1 %v2380_v5 }
  0x9b   :  { %1327 = vmatmul.mubr.bf16.gmra.mxu0 %v2382_v6 }
  0x9c   :  { %1424 = vmatmul.mubr.bf16.gmra.mxu1 %v2383_v7  ;;  %2185 = vmatprep.mubr.bf16.mxu0 %v2385_v8 }
  0x9d   :  { %2193 = vmatprep.mubr.bf16.mxu1 %v2386_v9 }
  0xa3   :  { %2186 = vmatmul.mubr.bf16.vlgmr.msra.gmra.mxu0 %v2387_v10 }
  0xa4   :  { %2194 = vmatmul.mubr.bf16.vlgmr.msra.gmra.mxu1 %v2388_v11  ;;  %2189 = vmatprep.mubr.bf16.mxu0 %v2389_v12 }
  0xa5   :  { %2197 = vmatprep.mubr.bf16.mxu1 %v2390_v13 }
  0xab   :  { %2190 = vmatmul.mubr.bf16.gmra.mxu0 %v2391_v14 }
  0xac   :  { %2198 = vmatmul.mubr.bf16.gmra.mxu1 %v2392_v15 }
  0xe3   :  { %v1913_v16 = vpop.f32.mrf.mxu0 }
  0xe4   :  { %v1977_v17 = vpop.f32.mrf.mxu1 }
  0xe5   :  { %v1914_v19 = vpop.f32.mrf.mxu0 }
  0xe6   :  { %v1915_v20 = vadd.f32 %v1914_v19, %v1913_v16  ;;  %v1978_v21 = vpop.f32.mrf.mxu1 }
  0xe7   :  { %v1979_v22 = vadd.f32 %v1978_v21, %v1977_v17  ;;  %v1916_v23 = vpop.f32.mrf.mxu0 }
  0xe8   :  { %v1079_v24 = vadd.f32 %v1915_v20, %v2848_v18  ;;  %v1980_v25 = vpop.f32.mrf.mxu1 }
  0xe9   :  { %v1917_v26 = vpop.f32.mrf.mxu0 }
  0xea   :  { %v2851_v27 = vadd.f32 %v1979_v22, %v1079_v24  ;;  %v1918_v28 = vadd.f32 %v1917_v26, %v1916_v23  ;;  %v1981_v29 = vpop.f32.mrf.mxu1 }
  0xeb   :  { %v1982_v30 = vadd.f32 %v1981_v29, %v1980_v25  ;;  %v1919_v31 = vpop.f32.mrf.mxu0 }
  0xec   :  { %v1082_v32 = vadd.f32 %v1918_v28, %v2848_v18  ;;  %v1983_v33 = vpop.f32.mrf.mxu1 }
  0xed   :  { %v1920_v34 = vpop.f32.mrf.mxu0 }
  0xee   :  { %v2854_v35 = vadd.f32 %v1982_v30, %v1082_v32  ;;  %v1921_v36 = vadd.f32 %v1920_v34, %v1919_v31  ;;  %v1984_v37 = vpop.f32.mrf.mxu1 }
  0xef   :  { %v1985_v38 = vadd.f32 %v1984_v37, %v1983_v33  ;;  %v1922_v39 = vpop.f32.mrf.mxu0 }
  0xf0   :  { %v1087_v40 = vadd.f32 %v1921_v36, %v2848_v18  ;;  %v1986_v41 = vpop.f32.mrf.mxu1 }
  0xf1   :  { %v1923_v42 = vpop.f32.mrf.mxu0 }
  0xf2   :  { %v2857_v43 = vadd.f32 %v1985_v38, %v1087_v40  ;;  %v1924_v44 = vadd.f32 %v1923_v42, %v1922_v39  ;;  %v1987_v45 = vpop.f32.mrf.mxu1 }
  0xf3   :  { %v1988_v46 = vadd.f32 %v1987_v45, %v1986_v41  ;;  %v1925_v47 = vpop.f32.mrf.mxu0 }
  0xf4   :  { %v1090_v48 = vadd.f32 %v1924_v44, %v2848_v18  ;;  %v1989_v49 = vpop.f32.mrf.mxu1 }
  0xf5   :  { %v1926_v50 = vpop.f32.mrf.mxu0 }
  0xf6   :  { %v2860_v51 = vadd.f32 %v1988_v46, %v1090_v48  ;;  %v1927_v52 = vadd.f32 %v1926_v50, %v1925_v47  ;;  %v1990_v53 = vpop.f32.mrf.mxu1 }
  0xf7   :  { %v1991_v54 = vadd.f32 %v1990_v53, %v1989_v49  ;;  %v1928_v55 = vpop.f32.mrf.mxu0 }
  0xf8   :  { %v1095_v56 = vadd.f32 %v1927_v52, %v2848_v18  ;;  %v1992_v57 = vpop.f32.mrf.mxu1 }
  0xf9   :  { %v1929_v58 = vpop.f32.mrf.mxu0 }
  0xfa   :  { %v2863_v59 = vadd.f32 %v1991_v54, %v1095_v56  ;;  %v1930_v60 = vadd.f32 %v1929_v58, %v1928_v55  ;;  %v1993_v61 = vpop.f32.mrf.mxu1 }
  0xfb   :  { %v1994_v62 = vadd.f32 %v1993_v61, %v1992_v57  ;;  %v1931_v63 = vpop.f32.mrf.mxu0 }
  0xfc   :  { %v1098_v0 = vadd.f32 %v1930_v60, %v2848_v18  ;;  %v1995_v1 = vpop.f32.mrf.mxu1 }
  0xfd   :  { %v1932_v2 = vpop.f32.mrf.mxu0 }
  0xfe   :  { %v2866_v3 = vadd.f32 %v1994_v62, %v1098_v0  ;;  %v1933_v4 = vadd.f32 %v1932_v2, %v1931_v63  ;;  %v1996_v5 = vpop.f32.mrf.mxu1 }
  0xff   :  { %v1997_v6 = vadd.f32 %v1996_v5, %v1995_v1  ;;  %v1934_v7 = vpop.f32.mrf.mxu0 }
 0x100   :  { %v1103_v8 = vadd.f32 %v1933_v4, %v2848_v18  ;;  %v1998_v9 = vpop.f32.mrf.mxu1 }
 0x101   :  { %v1935_v10 = vpop.f32.mrf.mxu0 }
 0x102   :  { %v2869_v11 = vadd.f32 %v1997_v6, %v1103_v8  ;;  %v1936_v12 = vadd.f32 %v1935_v10, %v1934_v7  ;;  %v1999_v13 = vpop.f32.mrf.mxu1 }
 0x103   :  { %v2000_v14 = vadd.f32 %v1999_v13, %v1998_v9  ;;  %v1937_v15 = vpop.f32.mrf.mxu0 }
 0x104   :  { %v1106_v16 = vadd.f32 %v1936_v12, %v2848_v18  ;;  %v2001_v17 = vpop.f32.mrf.mxu1 }
 0x105   :  { %v1938_v19 = vpop.f32.mrf.mxu0 }
 0x106   :  { %v2872_v20 = vadd.f32 %v2000_v14, %v1106_v16  ;;  %v1939_v21 = vadd.f32 %v1938_v19, %v1937_v15  ;;  %v2002_v22 = vpop.f32.mrf.mxu1 }
 0x107   :  { %v2003_v23 = vadd.f32 %v2002_v22, %v2001_v17  ;;  %v1940_v24 = vpop.f32.mrf.mxu0 }
 0x108   :  { %3020 = vst [vmem:[#allocation2_spill] sm:$0xff] %v2872_v20  ;;  %v1111_v25 = vadd.f32 %v1939_v21, %v2848_v18  ;;  %v2004_v26 = vpop.f32.mrf.mxu1 }
 0x109   :  { %v1941_v28 = vpop.f32.mrf.mxu0 }
 0x10a   :  { %v2875_v29 = vadd.f32 %v2003_v23, %v1111_v25  ;;  %v1942_v30 = vadd.f32 %v1941_v28, %v1940_v24  ;;  %v2005_v31 = vpop.f32.mrf.mxu1 }
 0x10b   :  { %v2006_v32 = vadd.f32 %v2005_v31, %v2004_v26  ;;  %v1943_v33 = vpop.f32.mrf.mxu0 }
 0x10c   :  { %3021 = vst [vmem:[#allocation3_spill] sm:$0xff] %v2875_v29  ;;  %v1114_v34 = vadd.f32 %v1942_v30, %v2848_v18  ;;  %v2007_v36 = vpop.f32.mrf.mxu1 }
 0x10d   :  { %v1944_v37 = vpop.f32.mrf.mxu0 }
 0x10e   :  { %v2878_v38 = vadd.f32 %v2006_v32, %v1114_v34  ;;  %v1945_v39 = vadd.f32 %v1944_v37, %v1943_v33  ;;  %v2008_v40 = vpop.f32.mrf.mxu1 }
 0x10f   :  { %v2009_v41 = vadd.f32 %v2008_v40, %v2007_v36  ;;  %v1946_v42 = vpop.f32.mrf.mxu0 }
 0x110   :  { %3022 = vst [vmem:[#allocation4_spill] sm:$0xff] %v2878_v38  ;;  %v1119_v44 = vadd.f32 %v1945_v39, %v2848_v18  ;;  %v2010_v45 = vpop.f32.mrf.mxu1 }
 0x111   :  { %v1947_v46 = vpop.f32.mrf.mxu0 }
 0x112   :  { %v2881_v47 = vadd.f32 %v2009_v41, %v1119_v44  ;;  %v1948_v48 = vadd.f32 %v1947_v46, %v1946_v42  ;;  %v2011_v49 = vpop.f32.mrf.mxu1 }
 0x113   :  { %v2012_v50 = vadd.f32 %v2011_v49, %v2010_v45  ;;  %v1949_v52 = vpop.f32.mrf.mxu0 }
 0x114   :  { %v1122_v53 = vadd.f32 %v1948_v48, %v2848_v18  ;;  %v2013_v54 = vpop.f32.mrf.mxu1 }
 0x115   :  { %v1950_v55 = vpop.f32.mrf.mxu0 }
 0x116   :  { %v2884_v56 = vadd.f32 %v2012_v50, %v1122_v53  ;;  %v1951_v57 = vadd.f32 %v1950_v55, %v1949_v52  ;;  %v2014_v58 = vpop.f32.mrf.mxu1 }
 0x117   :  { %v2015_v60 = vadd.f32 %v2014_v58, %v2013_v54  ;;  %v1952_v61 = vpop.f32.mrf.mxu0 }
 0x118   :  { %3023 = vst [vmem:[#allocation5_spill] sm:$0xff] %v2884_v56  ;;  %v1127_v62 = vadd.f32 %v1951_v57, %v2848_v18  ;;  %v2016_v63 = vpop.f32.mrf.mxu1 }
 0x119   :  { %v1953_v0 = vpop.f32.mrf.mxu0 }
 0x11a   :  { %v2887_v1 = vadd.f32 %v2015_v60, %v1127_v62  ;;  %v1954_v2 = vadd.f32 %v1953_v0, %v1952_v61  ;;  %v2017_v4 = vpop.f32.mrf.mxu1 }
 0x11b   :  { %v2018_v5 = vadd.f32 %v2017_v4, %v2016_v63  ;;  %v1955_v6 = vpop.f32.mrf.mxu0 }
 0x11c   :  { %3024 = vst [vmem:[#allocation6_spill] sm:$0xff] %v2887_v1  ;;  %v1130_v7 = vadd.f32 %v1954_v2, %v2848_v18  ;;  %v2019_v8 = vpop.f32.mrf.mxu1 }
 0x11d   :  { %v1956_v9 = vpop.f32.mrf.mxu0 }
 0x11e   :  { %v2890_v10 = vadd.f32 %v2018_v5, %v1130_v7  ;;  %v1957_v12 = vadd.f32 %v1956_v9, %v1955_v6  ;;  %v2020_v13 = vpop.f32.mrf.mxu1 }
 0x11f   :  { %v2021_v14 = vadd.f32 %v2020_v13, %v2019_v8  ;;  %v1958_v15 = vpop.f32.mrf.mxu0 }
 0x120   :  { %3025 = vst [vmem:[#allocation7_spill] sm:$0xff] %v2890_v10  ;;  %v1135_v16 = vadd.f32 %v1957_v12, %v2848_v18  ;;  %v2022_v17 = vpop.f32.mrf.mxu1 }
 0x121   :  { %v1959_v19 = vpop.f32.mrf.mxu0 }
 0x122   :  { %v2893_v21 = vadd.f32 %v2021_v14, %v1135_v16  ;;  %v1960_v22 = vadd.f32 %v1959_v19, %v1958_v15  ;;  %v2023_v23 = vpop.f32.mrf.mxu1 }
 0x123   :  { %v2024_v24 = vadd.f32 %v2023_v23, %v2022_v17  ;;  %v2041_v25 = vpop.f32.mrf.mxu0 }
 0x124   :  { %3026 = vst [vmem:[#allocation8_spill] sm:$0xff] %v2893_v21  ;;  %v1138_v26 = vadd.f32 %v1960_v22, %v2848_v18  ;;  %v2105_v28 = vpop.f32.mrf.mxu1 }
 0x125   :  { %v2042_v30 = vpop.f32.mrf.mxu0 }
 0x126   :  { %v2896_v31 = vadd.f32 %v2024_v24, %v1138_v26  ;;  %v2043_v32 = vadd.f32 %v2042_v30, %v2041_v25  ;;  %v2106_v33 = vpop.f32.mrf.mxu1 }
 0x127   :  { %v2044_v34 = vpop.f32.mrf.mxu0  ;;  %v2107_v37 = vadd.f32 %v2106_v33, %v2105_v28 }
 0x128   :  { %3027 = vst [vmem:[#allocation9_spill] sm:$0xff] %v2896_v31  ;;  %v1273_v36 = vadd.f32 %v2043_v32, %v2851_v27  ;;  %v2108_v39 = vpop.f32.mrf.mxu1 }
 0x129   :  { %v2045_v40 = vpop.f32.mrf.mxu0 }
 0x12a   :  { %v2109_v41 = vpop.f32.mrf.mxu1  ;;  %v2899_v42 = vadd.f32 %v2107_v37, %v1273_v36  ;;  %v2046_v37 = vadd.f32 %v2045_v40, %v2044_v34 }
 0x12b   :  { %v2047_v44 = vpop.f32.mrf.mxu0 }
 0x12c   :  { %3028 = vst [vmem:[#allocation10_spill] sm:$0xff] %v2899_v42  ;;  %v2111_v45 = vpop.f32.mrf.mxu1 }
 0x12d   :  { %v2048_v46 = vpop.f32.mrf.mxu0 }
 0x12e   :  { %v2112_v48 = vpop.f32.mrf.mxu1  ;;  %v2049_v31 = vadd.f32 %v2048_v46, %v2047_v44 }
 0x12f   :  { %v2050_v18 = vpop.f32.mrf.mxu0  ;;  %v2113_v29 = vadd.f32 %v2112_v48, %v2111_v45 }
 0x130   :  { %v2114_v49 = vpop.f32.mrf.mxu1  ;;  %v1281_v38 = vadd.f32 %v2049_v31, %v2857_v43 }
 0x131   :  { %v2051_v50 = vpop.f32.mrf.mxu0 }
 0x132   :  { %v2115_v52 = vpop.f32.mrf.mxu1  ;;  %v2052_v42 = vadd.f32 %v2051_v50, %v2050_v18 }
 0x133   :  { %v2053_v53 = vpop.f32.mrf.mxu0 }
 0x134   :  { %v2117_v54 = vpop.f32.mrf.mxu1  ;;  %v1284_v20 = vadd.f32 %v2052_v42, %v2860_v51 }
 0x135   :  { %v2054_v55 = vpop.f32.mrf.mxu0 }
 0x136   :  { %v2118_v57 = vpop.f32.mrf.mxu1 }
 0x137   :  { %v2056_v58 = vpop.f32.mrf.mxu0 }
 0x138   :  { %v2120_v27 = vpop.f32.mrf.mxu1 }
 0x139   :  { %v2057_v60 = vpop.f32.mrf.mxu0 }
 0x13a   :  { %v2121_v61 = vpop.f32.mrf.mxu1  ;;  %v2058_v1 = vadd.f32 %v2057_v60, %v2056_v58  ;;  %v2119_v60 = vadd.f32 %v2118_v57, %v2117_v54  ;;  %v3036_v54 = vld [vmem:[#allocation3_spill] sm:$0xff] }
 0x13b   :  { %v2059_v62 = vpop.f32.mrf.mxu0  ;;  %v2122_v43 = vadd.f32 %v2121_v61, %v2120_v27  ;;  %v3037_v27 = vld [vmem:[#allocation4_spill] sm:$0xff] }
 0x13c   :  { %v2123_v63 = vpop.f32.mrf.mxu1  ;;  %v1292_v46 = vadd.f32 %v2058_v1, %v2866_v3  ;;  %v3035_v1 = vld [vmem:[#allocation2_spill] sm:$0xff] }
 0x13d   :  { %v2060_v0 = vpop.f32.mrf.mxu0 }
 0x13e   :  { %v2124_v2 = vpop.f32.mrf.mxu1 }
 0x13f   :  { %v2062_v4 = vpop.f32.mrf.mxu0  ;;  %v2125_v31 = vadd.f32 %v2124_v2, %v2123_v63  ;;  %v3038_v2 = vld [vmem:[#allocation5_spill] sm:$0xff] }
 0x140   :  { %v2901_v5 = vpop.f32.mrf.mxu1 }
 0x141   :  { %3029 = vst [vmem:[#allocation11_spill] sm:$0xff] %v2901_v5  ;;  %v2063_v6 = vpop.f32.mrf.mxu0  ;;  %v2110_v5 = vadd.f32 %v2109_v41, %v2108_v39 }
 0x142   :  { %v2903_v7 = vpop.f32.mrf.mxu1  ;;  %v2064_v50 = vadd.f32 %v2063_v6, %v2062_v4 }
 0x143   :  { %3030 = vst [vmem:[#allocation12_spill] sm:$0xff] %v2903_v7  ;;  %v2065_v8 = vpop.f32.mrf.mxu0  ;;  %v1276_v7 = vadd.f32 %v2046_v37, %v2854_v35 }
 0x144   :  { %v2905_v9 = vpop.f32.mrf.mxu1 }
 0x145   :  { %3031 = vst [vmem:[#allocation13_spill] sm:$0xff] %v2905_v9  ;;  %v2066_v12 = vpop.f32.mrf.mxu0  ;;  %v1373_v3 = vadd.f32 %v2110_v5, %v1276_v7 }
 0x146   :  { %v2907_v13 = vpop.f32.mrf.mxu1  ;;  %v2067_v58 = vadd.f32 %v2066_v12, %v2065_v8  ;;  %v3043_v12 = vld [vmem:[#allocation6_spill] sm:$0xff] }
 0x147   :  { %3032 = vst [vmem:[#allocation14_spill] sm:$0xff] %v2907_v13  ;;  %v2068_v14 = vpop.f32.mrf.mxu0  ;;  %v2061_v13 = vadd.f32 %v2060_v0, %v2059_v62 }
 0x148   :  { %v2909_v15 = vpop.f32.mrf.mxu1  ;;  %v1305_v57 = vadd.f32 %v2067_v58, %v3036_v54 }
 0x149   :  { %3033 = vst [vmem:[#allocation15_spill] sm:$0xff] %v2909_v15  ;;  %v2069_v16 = vpop.f32.mrf.mxu0  ;;  %v2055_v15 = vadd.f32 %v2054_v55, %v2053_v53  ;;  %v1297_v18 = vadd.f32 %v2061_v13, %v2869_v11  ;;  %v2116_v55 = vadd.f32 %v2115_v52, %v2114_v49  ;;  %v1300_v11 = vadd.f32 %v2064_v50, %v3035_v1 }
 0x14a   :  { %v2911_v17 = vpop.f32.mrf.mxu1  ;;  %v2070_v35 = vadd.f32 %v2069_v16, %v2068_v14  ;;  %v2927_v52 = vadd.f32 %v2122_v43, %v1292_v46 }
 0x14b   :  { %3034 = vst [vmem:[#allocation16_spill] sm:$0xff] %v2911_v17  ;;  %v2071_v19 = vpop.f32.mrf.mxu0  ;;  %v1289_v44 = vadd.f32 %v2055_v15, %v2863_v59  ;;  %v1378_v59 = vadd.f32 %v2113_v29, %v1281_v38  ;;  %v1381_v62 = vadd.f32 %v2116_v55, %v1284_v20  ;;  %v2923_v4 = vadd.f32 %v2125_v31, %v1297_v18  ;;  %v3039_v29 = vld [vmem:[#allocation11_spill] sm:$0xff]  ;;  %v3040_v20 = vld [vmem:[#allocation12_spill] sm:$0xff] }
 0x14c   :  { %v2135_v22 = vpop.f32.mrf.mxu1  ;;  %v1308_v61 = vadd.f32 %v2070_v35, %v3037_v27  ;;  %v2128_v38 = vadd.f32 %v3040_v20, %v3039_v29  ;;  %v3041_v5 = vld [vmem:[#allocation13_spill] sm:$0xff] }
 0x14d   :  { %v2072_v23 = vpop.f32.mrf.mxu0  ;;  %v2925_v49 = vadd.f32 %v2119_v60, %v1289_v44 }
 0x14e   :  { %v2136_v24 = vpop.f32.mrf.mxu1  ;;  %v2073_v34 = vadd.f32 %v2072_v23, %v2071_v19  ;;  %v3042_v7 = vld [vmem:[#allocation14_spill] sm:$0xff]  ;;  %v2939_v44 = vadd.f32 %v2128_v38, %v1300_v11 }
 0x14f   :  { %v2074_v25 = vpop.f32.mrf.mxu0  ;;  %v2137_v63 = vadd.f32 %v2136_v24, %v2135_v22  ;;  %v2131_v8 = vadd.f32 %v3042_v7, %v3041_v5 }
 0x150   :  { %v2138_v26 = vpop.f32.mrf.mxu1  ;;  %v1313_v42 = vadd.f32 %v2073_v34, %v2881_v47  ;;  %v3044_v16 = vld [vmem:[#allocation15_spill] sm:$0xff] }
 0x151   :  { %v2075_v28 = vpop.f32.mrf.mxu0  ;;  %v1402_v50 = vadd.f32 %v2131_v8, %v1305_v57 }
 0x152   :  { %v2139_v30 = vpop.f32.mrf.mxu1  ;;  %v2076_v39 = vadd.f32 %v2075_v28, %v2074_v25  ;;  %v3045_v19 = vld [vmem:[#allocation16_spill] sm:$0xff]  ;;  %v1410_v22 = vadd.f32 %v2137_v63, %v1313_v42  ;;  %v3049_v42 = vld [vmem:[#allocation7_spill] sm:$0xff] }
 0x153   :  { %v2077_v32 = vpop.f32.mrf.mxu0  ;;  %v2134_v23 = vadd.f32 %v3045_v19, %v3044_v16  ;;  %v2140_v25 = vadd.f32 %v2139_v30, %v2138_v26  ;;  %v2945_v26 = vld [vmem:[%s3018_s2 + $0x1] ss:$0 sm:$0xff] }
 0x154   :  { %v2141_v33 = vpop.f32.mrf.mxu1  ;;  %v1316_v47 = vadd.f32 %v2076_v39, %v3038_v2  ;;  %v3047_v30 = vld [vmem:[#allocation10_spill] sm:$0xff] }
 0x155   :  { %v2078_v36 = vpop.f32.mrf.mxu0  ;;  %v1405_v58 = vadd.f32 %v2134_v23, %v1308_v61 }
 0x156   :  { %v2142_v10 = vpop.f32.mrf.mxu1  ;;  %v2079_v45 = vadd.f32 %v2078_v36, %v2077_v32  ;;  %v1413_v55 = vadd.f32 %v2140_v25, %v1316_v47 }
 0x157   :  { %v2080_v21 = vpop.f32.mrf.mxu0  ;;  %v2143_v24 = vadd.f32 %v2142_v10, %v2141_v33 }
 0x158   :  { %v2913_v17 = vpop.f32.mrf.mxu1  ;;  %v1321_v13 = vadd.f32 %v2079_v45, %v3043_v12 }
 0x159   :  { %v2081_v9 = vpop.f32.mrf.mxu0 }
 0x15a   :  { %v2145_v56 = vpop.f32.mrf.mxu1  ;;  %v2082_v36 = vadd.f32 %v2081_v9, %v2080_v21  ;;  %v1418_v9 = vadd.f32 %v2143_v24, %v1321_v13 }
 0x15b   :  { %v2083_v40 = vpop.f32.mrf.mxu0  ;;  %v2146_v33 = vadd.f32 %v2145_v56, %v2913_v17  ;;  %v2955_v56 = vld [vmem:[%s3018_s2 + $0x2] ss:$0 sm:$0xff] }
 0x15c   :  { %v2147_v53 = vpop.f32.mrf.mxu1 }
 0x15d   :  { %v2084_v41 = vpop.f32.mrf.mxu0 }
 0x15e   :  { %v2148_v51 = vpop.f32.mrf.mxu1  ;;  %v2085_v14 = vadd.f32 %v2084_v41, %v2083_v40  ;;  %v3046_v40 = vld [vmem:[#allocation8_spill] sm:$0xff]  ;;  %v3048_v41 = vld [vmem:[#allocation9_spill] sm:$0xff] }
 0x15f   :  { %v2086_v48 = vpop.f32.mrf.mxu0 }
 0x160   :  { %v2150_v0 = vpop.f32.mrf.mxu1  ;;  %v1329_v35 = vadd.f32 %v2085_v14, %v3046_v40 }
 0x161   :  { %v2087_v6 = vpop.f32.mrf.mxu0 }
 0x162   :  { %v2151_v15 = vpop.f32.mrf.mxu1  ;;  %v2088_v28 = vadd.f32 %v2087_v6, %v2086_v48  ;;  %v1324_v48 = vadd.f32 %v2082_v36, %v3049_v42 }
 0x163   :  { %v2187_v32 = vpop.f32.mrf.mxu0  ;;  %v2152_v57 = vadd.f32 %v2151_v15, %v2150_v0 }
 0x164   :  { %v1475_v37 = vadd.f32 %v2187_v32, %v1378_v59  ;;  %v2195_v34 = vpop.f32.mrf.mxu1  ;;  %v1332_v60 = vadd.f32 %v2088_v28, %v3048_v41  ;;  %v2149_v59 = vadd.f32 %v2148_v51, %v2147_v53  ;;  %v1421_v41 = vadd.f32 %v2146_v33, %v1324_v48 }
 0x165   :  { %v1507_v46 = vadd.f32 %v2195_v34, %v1410_v22  ;;  %v1466_v18 = vpop.f32.mrf.mxu0 }
 0x166   :  { %v1531_v39 = vmax.f32 %v1475_v37, 0.0  ;;  %v1467_v10 = vadd.f32 %v1466_v18, %v3047_v30  ;;  %v1498_v21 = vpop.f32.mrf.mxu1  ;;  %v1426_v53 = vadd.f32 %v2149_v59, %v1329_v35  ;;  %v1429_v38 = vadd.f32 %v2152_v57, %v1332_v60 }
 0x167   :  { %v1539_v43 = vmax.f32 %v1507_v46, 0.0  ;;  %v1499_v31 = vadd.f32 %v1498_v21, %v1402_v50  ;;  %v2188_v45 = vpop.f32.mrf.mxu0 }
 0x168   :  { %v1529_v1 = vmax.f32 %v1467_v10, 0.0  ;;  %v1478_v11 = vadd.f32 %v2188_v45, %v1381_v62  ;;  %v2196_v54 = vpop.f32.mrf.mxu1  ;;  %v1552_v27 = vmul.f32 %v2945_v26, %v1531_v39 }
 0x169   :  { %v1537_v61 = vmax.f32 %v1499_v31, 0.0  ;;  %v1510_v63 = vadd.f32 %v2196_v54, %v1413_v55  ;;  %v1469_v2 = vpop.f32.mrf.mxu0  ;;  %v1560_v17 = vmul.f32 %v2945_v26, %v1539_v43 }
 0x16a   :  { %v1532_v47 = vmax.f32 %v1478_v11, 0.0  ;;  %v1470_v6 = vadd.f32 %v1469_v2, %v1373_v3  ;;  %v1501_v29 = vpop.f32.mrf.mxu1  ;;  %v1550_v51 = vmul.f32 %v2945_v26, %v1529_v1  ;;  %v1573_v14 = vadd.f32 %v2955_v56, %v1552_v27 }
 0x16b   :  { %v1540_v62 = vmax.f32 %v1510_v63, 0.0  ;;  %v1502_v0 = vadd.f32 %v1501_v29, %v1405_v58  ;;  %v2191_v20 = vpop.f32.mrf.mxu0  ;;  %v1558_v5 = vmul.f32 %v2945_v26, %v1537_v61  ;;  %v1581_v23 = vadd.f32 %v2955_v56, %v1560_v17 }
 0x16c   :  { %v1553_v7 = vmul.f32 %v2945_v26, %v1532_v47  ;;  %v1530_v8 = vmax.f32 %v1470_v6, 0.0  ;;  %v1491_v12 = vadd.f32 %v2191_v20, %v2923_v4  ;;  %v2199_v13 = vpop.f32.mrf.mxu1  ;;  %v1571_v24 = vadd.f32 %v2955_v56, %v1550_v51 }
 0x16d   :  { %v1561_v3 = vmul.f32 %v2945_v26, %v1540_v62  ;;  %v1538_v15 = vmax.f32 %v1502_v0, 0.0  ;;  %v1523_v16 = vadd.f32 %v2199_v13, %v1426_v53  ;;  %v1482_v19 = vpop.f32.mrf.mxu0  ;;  %v1579_v46 = vadd.f32 %v2955_v56, %v1558_v5 }
 0x16e   :  { %v1574_v25 = vadd.f32 %v2955_v56, %v1553_v7  ;;  %v1551_v28 = vmul.f32 %v2945_v26, %v1530_v8  ;;  %v1483_v32 = vadd.f32 %v1482_v19, %v2925_v49  ;;  %v1514_v22 = vpop.f32.mrf.mxu1  ;;  %v1535_v55 = vmax.f32 %v1491_v12, 0.0 }
 0x16f   :  { %v1582_v4 = vadd.f32 %v2955_v56, %v1561_v3  ;;  %v1559_v36 = vmul.f32 %v2945_v26, %v1538_v15  ;;  %v1515_v37 = vadd.f32 %v1514_v22, %v1418_v9  ;;  %v2192_v34 = vpop.f32.mrf.mxu0  ;;  %v1543_v49 = vmax.f32 %v1523_v16, 0.0 }
 0x170   :  { %v1858_v18 = vpack.c.bf16 %v1574_v25, %v1573_v14  ;;  %v1572_v50 = vadd.f32 %v2955_v56, %v1551_v28  ;;  %v2200_v58 = vpop.f32.mrf.mxu1  ;;  %v1533_v39 = vmax.f32 %v1483_v32, 0.0  ;;  %v1494_v9 = vadd.f32 %v2192_v34, %v2939_v44 }
 0x171   :  { %v1878_v40 = vpack.c.bf16 %v1582_v4, %v1581_v23  ;;  %v1580_v35 = vadd.f32 %v2955_v56, %v1559_v36  ;;  %v1485_v30 = vpop.f32.mrf.mxu0  ;;  %v1541_v21 = vmax.f32 %v1515_v37, 0.0  ;;  %v1526_v31 = vadd.f32 %v2200_v58, %v1429_v38 }
 0x172   :  { %1890 = vst [vmem:[%s3019_s3 + $0x8] sm:$0xff] %v1858_v18   ;;  %v1853_v10 = vpack.c.bf16 %v1572_v50, %v1571_v24  ;;  %v1517_v60 = vpop.f32.mrf.mxu1  ;;  %v1556_v45 = vmul.f32 %v2945_v26, %v1535_v55  ;;  %v1536_v42 = vmax.f32 %v1494_v9, 0.0  ;;  %v1486_v59 = vadd.f32 %v1485_v30, %v2927_v52 }
 0x173   :  { %1894 = vst [vmem:[%s3019_s3 + $0x28] sm:$0xff] %v1878_v40   ;;  %v1873_v43 = vpack.c.bf16 %v1580_v35, %v1579_v46  ;;  %v1518_v1 = vadd.f32 %v1517_v60, %v1421_v41  ;;  %v1564_v44 = vmul.f32 %v2945_v26, %v1543_v49  ;;  %v1554_v33 = vmul.f32 %v2945_v26, %v1533_v39 }
 0x174   :  { %1854 = vst [vmem:[%s3019_s3] sm:$0xff] %v1853_v10   ;;  %v1544_v48 = vmax.f32 %v1526_v31, 0.0  ;;  %v1562_v11 = vmul.f32 %v2945_v26, %v1541_v21  ;;  %v1557_v54 = vmul.f32 %v2945_v26, %v1536_v42  ;;  %v1534_v57 = vmax.f32 %v1486_v59, 0.0 }
 0x175   :  { %1893 = vst [vmem:[%s3019_s3 + $0x20] sm:$0xff] %v1873_v43   ;;  %v1542_v27 = vmax.f32 %v1518_v1, 0.0  ;;  %v1577_v52 = vadd.f32 %v2955_v56, %v1556_v45  ;;  %v1585_v47 = vadd.f32 %v2955_v56, %v1564_v44  ;;  %v1575_v6 = vadd.f32 %v2955_v56, %v1554_v33 }
 0x176   :  { %v1565_v61 = vmul.f32 %v2945_v26, %v1544_v48  ;;  %v1578_v63 = vadd.f32 %v2955_v56, %v1557_v54  ;;  %v1555_v2 = vmul.f32 %v2945_v26, %v1534_v57  ;;  %v1583_v53 = vadd.f32 %v2955_v56, %v1562_v11 }
 0x177   :  { %v1563_v17 = vmul.f32 %v2945_v26, %v1542_v27 }
 0x178   :  { %v1586_v29 = vadd.f32 %v2955_v56, %v1565_v61  ;;  %v1868_v51 = vpack.c.bf16 %v1578_v63, %v1577_v52  ;;  %v1576_v62 = vadd.f32 %v2955_v56, %v1555_v2 }
 0x179   :  { %v1584_v0 = vadd.f32 %v2955_v56, %v1563_v17 }
 0x17a   :  { %v1888_v20 = vpack.c.bf16 %v1586_v29, %v1585_v47  ;;  %1892 = vst [vmem:[%s3019_s3 + $0x18] sm:$0xff] %v1868_v51   ;;  %v1863_v38 = vpack.c.bf16 %v1576_v62, %v1575_v6 }
 0x17b   :  { %v1883_v26 = vpack.c.bf16 %v1584_v0, %v1583_v53 }
 0x17c   :  { %1896 = vst [vmem:[%s3019_s3 + $0x38] sm:$0xff] %v1888_v20   ;;  %1891 = vst [vmem:[%s3019_s3 + $0x10] sm:$0xff] %v1863_v38  }
 0x17d   :  { %1895 = vst [vmem:[%s3019_s3 + $0x30] sm:$0xff] %v1883_v26  }

// kernel: tile.108
= control target key start
LH: loop header
LB: loop body
LE: loop exit
PB: predicated region body
PF: predicated region fallthrough
CT: control target
= control target key end

     0   :  { %s22_s0 = inlined_call_operand.vmem [shape: f32[4], index: 0, kind: input, shape index: {}]   ;;  %s23_s1 = inlined_call_operand.vmem [shape: f32[4,4], index: 1, kind: output, shape index: {}]  }
   0x1   :  { %v4_v0 = vld [vmem:[%s22_s0] ss:$0 sm:$0xff] }
   0x2   :  { %5 = vst [vmem:[%s23_s1] sm:$0xf] %v4_v0 }

// kernel: film_forward.9
= control target key start
LH: loop header
LB: loop body
LE: loop exit
PB: predicated region body
PF: predicated region fallthrough
CT: control target
= control target key end

     0   :  { %s1656_s1 = inlined_call_operand.vmem [shape: bf16[1152,128], index: 1, kind: input, shape index: {}]   ;;  %s1657_s0 = inlined_call_operand.vmem [shape: bf16[32,1152], index: 0, kind: input, shape index: {}]   ;;  %s1658_s2 = inlined_call_operand.vmem [shape: f32[3,128], index: 2, kind: input, shape index: {}]   ;;  %s1659_s3 = inlined_call_operand.vmem [shape: bf16[32,128], index: 3, kind: output, shape index: {}]  }
   0x1   :  { %v1253_v0 = vld [vmem:[%s1656_s1 + $0x78] sm:$0xff]   ;;  %v1257_v4 = vld [vmem:[%s1656_s1 + $0x70] sm:$0xff]   ;;  %v1261_v8 = vld [vmem:[%s1656_s1 + $0x68] sm:$0xff]  }
   0x2   :  { %v1254_v1 = vld [vmem:[%s1656_s1 + $0x38] sm:$0xff]   ;;  %1111 = vmatprep.subr.bf16.mxu0 %v1253_v0  ;;  %v1258_v5 = vld [vmem:[%s1656_s1 + $0x30] sm:$0xff]   ;;  %v1262_v9 = vld [vmem:[%s1656_s1 + $0x28] sm:$0xff]  }
   0x3   :  { %v1255_v2 = vld [vmem:[%s1656_s1 + $0xf8] sm:$0xff]   ;;  %1112 = vmatpush3.bf16.msra.mxu0 %v1254_v1  ;;  %v1259_v6 = vld [vmem:[%s1656_s1 + $0xf0] sm:$0xff]   ;;  %v1263_v10 = vld [vmem:[%s1656_s1 + $0xe8] sm:$0xff]  }
   0x4   :  { %v1256_v3 = vld [vmem:[%s1656_s1 + $0xb8] sm:$0xff]   ;;  %1139 = vmatprep.subr.bf16.mxu1 %v1255_v2  ;;  %1113 = vmatprep.subr.bf16.mxu0 %v1257_v4  ;;  %v1260_v7 = vld [vmem:[%s1656_s1 + $0xb0] sm:$0xff]   ;;  %v1264_v11 = vld [vmem:[%s1656_s1 + $0xa8] sm:$0xff]  }
   0x5   :  { %1140 = vmatpush3.bf16.msra.mxu1 %v1256_v3  ;;  %v1265_v12 = vld [vmem:[%s1656_s1 + $0x60] sm:$0xff]   ;;  %v1269_v16 = vld [vmem:[%s1656_s1 + $0x58] sm:$0xff]   ;;  %v1273_v20 = vld [vmem:[%s1656_s1 + $0x50] sm:$0xff]  }
   0x6   :  { %1141 = vmatprep.subr.bf16.mxu1 %v1259_v6  ;;  %v1266_v13 = vld [vmem:[%s1656_s1 + $0x20] sm:$0xff]   ;;  %v1270_v17 = vld [vmem:[%s1656_s1 + $0x18] sm:$0xff]   ;;  %v1274_v21 = vld [vmem:[%s1656_s1 + $0x10] sm:$0xff]  }
   0x7   :  { %1114 = vmatpush3.bf16.msra.mxu0 %v1258_v5  ;;  %v1267_v14 = vld [vmem:[%s1656_s1 + $0xe0] sm:$0xff]   ;;  %v1271_v18 = vld [vmem:[%s1656_s1 + $0xd8] sm:$0xff]   ;;  %v1275_v22 = vld [vmem:[%s1656_s1 + $0xd0] sm:$0xff]  }
   0x8   :  { %1115 = vmatprep.subr.bf16.mxu0 %v1261_v8  ;;  %v1268_v15 = vld [vmem:[%s1656_s1 + $0xa0] sm:$0xff]   ;;  %v1272_v19 = vld [vmem:[%s1656_s1 + $0x98] sm:$0xff]   ;;  %v1276_v23 = vld [vmem:[%s1656_s1 + $0x90] sm:$0xff]  }
   0x9   :  { %1142 = vmatpush3.bf16.msra.mxu1 %v1260_v7  ;;  %v1277_v24 = vld [vmem:[%s1656_s1 + $0x48] sm:$0xff]   ;;  %v1281_v28 = vld [vmem:[%s1656_s1 + $0x40] sm:$0xff]   ;;  %v1288_v34 = vld [vmem:[%s1656_s1 + $0x178] sm:$0xff]  }
   0xa   :  { %1143 = vmatprep.subr.bf16.mxu1 %v1263_v10  ;;  %v1278_v25 = vld [vmem:[%s1656_s1 + $0x8] sm:$0xff]   ;;  %v1282_v29 = vld [vmem:[%s1656_s1] sm:$0xff]   ;;  %v1292_v37 = vld [vmem:[%s1656_s1 + $0x138] sm:$0xff]  }
   0xb   :  { %1116 = vmatpush3.bf16.msra.mxu0 %v1262_v9  ;;  %v1279_v26 = vld [vmem:[%s1656_s1 + $0xc8] sm:$0xff]   ;;  %v1283_v30 = vld [vmem:[%s1656_s1 + $0xc0] sm:$0xff]   ;;  %v1293_v38 = vld [vmem:[%s1656_s1 + $0x1f8] sm:$0xff]  }
   0xc   :  { %1117 = vmatprep.subr.bf16.mxu0 %v1265_v12  ;;  %v1280_v27 = vld [vmem:[%s1656_s1 + $0x88] sm:$0xff]   ;;  %v1284_v31 = vld [vmem:[%s1657_s0] ss:$36 sps:$4 sm:$0xff]   ;;  %v1294_v39 = vld [vmem:[%s1656_s1 + $0x1b8] sm:$0xff]  }
   0xd   :  { %1144 = vmatpush3.bf16.msra.mxu1 %v1264_v11  ;;  %v1286_v32 = vld [vmem:[%s1657_s0 + $0x4] ss:$36 sps:$4 sm:$0xff]   ;;  %v1291_v36 = vld [vmem:[%s1657_s0 + $0xc] ss:$36 sps:$4 sm:$0xff]   ;;  %v1307_v52 = vld [vmem:[%s1656_s1 + $0x158] sm:$0xff]  }
   0xe   :  { %1145 = vmatprep.subr.bf16.mxu1 %v1267_v14  ;;  %v1287_v33 = vld [vmem:[%s1656_s1 + $0x80] sm:$0xff]   ;;  %740 = vmatprep.mubr.bf16.mxu0 %v1286_v32  ;;  %v1289_v35 = vld [vmem:[%s1657_s0 + $0x8] ss:$36 sps:$4 sm:$0xff]   ;;  %v1295_v40 = vld [vmem:[%s1656_s1 + $0x170] sm:$0xff]  }
   0xf   :  { %1118 = vmatpush3.bf16.msra.mxu0 %v1266_v13  ;;  %789 = vmatprep.mubr.bf16.mxu1 %v1291_v36  ;;  %v1296_v41 = vld [vmem:[%s1656_s1 + $0x130] sm:$0xff]   ;;  %v1299_v44 = vld [vmem:[%s1656_s1 + $0x168] sm:$0xff]   ;;  %v1303_v48 = vld [vmem:[%s1656_s1 + $0x160] sm:$0xff]  }
  0x10   :  { %1119 = vmatprep.subr.bf16.mxu0 %v1269_v16  ;;  %v1297_v42 = vld [vmem:[%s1656_s1 + $0x1f0] sm:$0xff]   ;;  %v1300_v45 = vld [vmem:[%s1656_s1 + $0x128] sm:$0xff]   ;;  %v1304_v49 = vld [vmem:[%s1656_s1 + $0x120] sm:$0xff]  }
  0x11   :  { %1146 = vmatpush3.bf16.msra.mxu1 %v1268_v15  ;;  %v1298_v43 = vld [vmem:[%s1656_s1 + $0x1b0] sm:$0xff]   ;;  %v1301_v46 = vld [vmem:[%s1656_s1 + $0x1e8] sm:$0xff]   ;;  %v1305_v50 = vld [vmem:[%s1656_s1 + $0x1e0] sm:$0xff]  }
  0x12   :  { %1147 = vmatprep.subr.bf16.mxu1 %v1271_v18  ;;  %v1302_v47 = vld [vmem:[%s1656_s1 + $0x1a8] sm:$0xff]   ;;  %v1306_v51 = vld [vmem:[%s1656_s1 + $0x1a0] sm:$0xff]   ;;  %v1308_v53 = vld [vmem:[%s1656_s1 + $0x118] sm:$0xff]  }
  0x13   :  { %1120 = vmatpush3.bf16.msra.mxu0 %v1270_v17  ;;  %v1309_v54 = vld [vmem:[%s1657_s0 + $0x4c] ss:$36 sps:$4 sm:$0xff]   ;;  %v1311_v55 = vld [vmem:[%s1656_s1 + $0x1d8] sm:$0xff]   ;;  %v1325_v4 = vld [vmem:[%s1656_s1 + $0x140] sm:$0xff]  }
  0x14   :  { %1121 = vmatprep.subr.bf16.mxu0 %v1273_v20  ;;  %v1312_v56 = vld [vmem:[%s1657_s0 + $0x48] ss:$36 sps:$4 sm:$0xff]   ;;  %v1313_v57 = vld [vmem:[%s1656_s1 + $0x198] sm:$0xff]   ;;  %v1316_v59 = vld [vmem:[%s1656_s1 + $0x150] sm:$0xff]  }
  0x15   :  { %1148 = vmatpush3.bf16.msra.mxu1 %v1272_v19  ;;  %v1314_v58 = vld [vmem:[%s1657_s0 + $0x54] ss:$36 sps:$4 sm:$0xff]   ;;  %v1321_v0 = vld [vmem:[%s1656_s1 + $0x148] sm:$0xff]   ;;  %v1326_v5 = vld [vmem:[%s1656_s1 + $0x100] sm:$0xff]  }
  0x16   :  { %1149 = vmatprep.subr.bf16.mxu1 %v1275_v22  ;;  %v1317_v60 = vld [vmem:[%s1657_s0 + $0x50] ss:$36 sps:$4 sm:$0xff]   ;;  %v1322_v1 = vld [vmem:[%s1656_s1 + $0x108] sm:$0xff]   ;;  %v1327_v6 = vld [vmem:[%s1656_s1 + $0x1c0] sm:$0xff]  }
  0x17   :  { %1122 = vmatpush3.bf16.msra.mxu0 %v1274_v21  ;;  %v1318_v61 = vld [vmem:[%s1656_s1 + $0x110] sm:$0xff]   ;;  %v1323_v2 = vld [vmem:[%s1656_s1 + $0x1c8] sm:$0xff]   ;;  %v1331_v9 = vld [vmem:[%s1656_s1 + $0x180] sm:$0xff]  }
  0x18   :  { %1123 = vmatprep.subr.bf16.mxu0 %v1277_v24  ;;  %v1319_v62 = vld [vmem:[%s1656_s1 + $0x1d0] sm:$0xff]   ;;  %v1324_v3 = vld [vmem:[%s1656_s1 + $0x188] sm:$0xff]   ;;  %v1332_v10 = vld [vmem:[%s1656_s1 + $0x238] sm:$0xff]  }
  0x19   :  { %1150 = vmatpush3.bf16.msra.mxu1 %v1276_v23  ;;  %v1320_v63 = vld [vmem:[%s1656_s1 + $0x190] sm:$0xff]   ;;  %v1333_v11 = vld [vmem:[%s1657_s0 + $0x18] ss:$36 sps:$4 sm:$0xff]   ;;  %v1340_v16 = vld [vmem:[%s1656_s1 + $0x228] sm:$0xff]  }
  0x1a   :  { %1151 = vmatprep.subr.bf16.mxu1 %v1279_v26  ;;  %v1328_v7 = vld [vmem:[%s1657_s0 + $0x10] ss:$36 sps:$4 sm:$0xff]   ;;  %v1335_v12 = vld [vmem:[%s1657_s0 + $0x1c] ss:$36 sps:$4 sm:$0xff]   ;;  %v1341_v17 = vld [vmem:[%s1657_s0 + $0x64] ss:$36 sps:$4 sm:$0xff]  }
  0x1b   :  { %1124 = vmatpush3.bf16.msra.mxu0 %v1278_v25  ;;  %v1330_v8 = vld [vmem:[%s1657_s0 + $0x14] ss:$36 sps:$4 sm:$0xff]   ;;  %v1337_v14 = vld [vmem:[%s1657_s0 + $0x5c] ss:$36 sps:$4 sm:$0xff]   ;;  %v1347_v23 = vld [vmem:[%s1656_s1 + $0x208] sm:$0xff]  }
  0x1c   :  { %1125 = vmatprep.subr.bf16.mxu0 %v1281_v28  ;;  %v1336_v13 = vld [vmem:[%s1656_s1 + $0x230] sm:$0xff]   ;;  %v1339_v15 = vld [vmem:[%s1657_s0 + $0x58] ss:$36 sps:$4 sm:$0xff]   ;;  %v1343_v18 = vld [vmem:[%s1657_s0 + $0x60] ss:$36 sps:$4 sm:$0xff]  }
  0x1d   :  { %1152 = vmatpush3.bf16.msra.mxu1 %v1280_v27  ;;  %v1344_v19 = vld [vmem:[%s1656_s1 + $0x220] sm:$0xff]   ;;  %v1345_v20 = vld [vmem:[%s1656_s1 + $0x218] sm:$0xff]   ;;  %v1346_v22 = vld [vmem:[%s1656_s1 + $0x210] sm:$0xff]  }
  0x1e   :  { %1153 = vmatprep.subr.bf16.mxu1 %v1283_v30  ;;  %v1349_v21 = vld [vmem:[%s1657_s0 + $0x20] ss:$36 sps:$4 sm:$0xff]   ;;  %v1350_v25 = vld [vmem:[%s1657_s0 + $0x68] ss:$36 sps:$4 sm:$0xff]  }
  0x1f   :  { %1126 = vmatpush3.bf16.msra.mxu0 %v1282_v29  ;;  %v1348_v24 = vld [vmem:[%s1656_s1 + $0x200] sm:$0xff]  }
  0x20   :  { %1167 = vmatprep.subr.bf16.mxu0 %v1288_v34 }
  0x21   :  { %1154 = vmatpush3.bf16.msra.mxu1 %v1287_v33 }
  0x22   :  { %741 = vmatmul.mubr.bf16.vlgmr.msra.gmra.mxu0 %v1284_v31  ;;  %1195 = vmatprep.subr.bf16.mxu1 %v1293_v38 }
  0x23   :  { %1168 = vmatpush3.bf16.msra.mxu0 %v1292_v37  ;;  %748 = vmatprep.mubr.bf16.mxu0 %v1309_v54 }
  0x24   :  { %790 = vmatmul.mubr.bf16.vlgmr.msra.gmra.mxu1 %v1289_v35  ;;  %1169 = vmatprep.subr.bf16.mxu0 %v1295_v40 }
  0x25   :  { %1196 = vmatpush3.bf16.msra.mxu1 %v1294_v39  ;;  %797 = vmatprep.mubr.bf16.mxu1 %v1314_v58 }
  0x26   :  { %1197 = vmatprep.subr.bf16.mxu1 %v1297_v42 }
  0x27   :  { %1170 = vmatpush3.bf16.msra.mxu0 %v1296_v41 }
  0x28   :  { %1171 = vmatprep.subr.bf16.mxu0 %v1299_v44 }
  0x29   :  { %1198 = vmatpush3.bf16.msra.mxu1 %v1298_v43 }
  0x2a   :  { %1199 = vmatprep.subr.bf16.mxu1 %v1301_v46  ;;  %749 = vmatmul.mubr.bf16.gmra.mxu0 %v1312_v56 }
  0x2b   :  { %1172 = vmatpush3.bf16.msra.mxu0 %v1300_v45  ;;  %838 = vmatprep.mubr.bf16.mxu0 %v1330_v8 }
  0x2c   :  { %1173 = vmatprep.subr.bf16.mxu0 %v1303_v48  ;;  %798 = vmatmul.mubr.bf16.gmra.mxu1 %v1317_v60 }
  0x2d   :  { %1200 = vmatpush3.bf16.msra.mxu1 %v1302_v47  ;;  %887 = vmatprep.mubr.bf16.mxu1 %v1335_v12 }
  0x2e   :  { %1201 = vmatprep.subr.bf16.mxu1 %v1305_v50 }
  0x2f   :  { %1174 = vmatpush3.bf16.msra.mxu0 %v1304_v49 }
  0x30   :  { %1175 = vmatprep.subr.bf16.mxu0 %v1307_v52 }
  0x31   :  { %1202 = vmatpush3.bf16.msra.mxu1 %v1306_v51 }
  0x32   :  { %1203 = vmatprep.subr.bf16.mxu1 %v1311_v55  ;;  %v999_v55 = vld [vmem:[%s1658_s2] ss:$0 sm:$0xff] }
  0x33   :  { %1176 = vmatpush3.bf16.msra.mxu0 %v1308_v53 }
  0x34   :  { %1177 = vmatprep.subr.bf16.mxu0 %v1316_v59 }
  0x35   :  { %1204 = vmatpush3.bf16.msra.mxu1 %v1313_v57 }
  0x36   :  { %1205 = vmatprep.subr.bf16.mxu1 %v1319_v62 }
  0x37   :  { %1178 = vmatpush3.bf16.msra.mxu0 %v1318_v61 }
  0x38   :  { %1179 = vmatprep.subr.bf16.mxu0 %v1321_v0 }
  0x39   :  { %1206 = vmatpush3.bf16.msra.mxu1 %v1320_v63 }
  0x3a   :  { %1207 = vmatprep.subr.bf16.mxu1 %v1323_v2 }
  0x3b   :  { %1180 = vmatpush3.bf16.msra.mxu0 %v1322_v1 }
  0x3c   :  { %1181 = vmatprep.subr.bf16.mxu0 %v1325_v4 }
  0x3d   :  { %1208 = vmatpush3.bf16.msra.mxu1 %v1324_v3 }
  0x3e   :  { %1209 = vmatprep.subr.bf16.mxu1 %v1327_v6 }
  0x3f   :  { %1182 = vmatpush3.bf16.msra.mxu0 %v1326_v5 }
  0x40   :  { %1233 = vmatprep.subr.bf16.mxu0 %v1332_v10 }
  0x41   :  { %1210 = vmatpush3.bf16.msra.mxu1 %v1331_v9 }
  0x42   :  { %839 = vmatmul.mubr.bf16.vlgmr.msra.gmra.mxu0 %v1328_v7 }
  0x43   :  { %1234 = vmatpush3.bf16.msra.mxu0 %v1332_v10  ;;  %846 = vmatprep.mubr.bf16.mxu0 %v1337_v14 }
  0x44   :  { %888 = vmatmul.mubr.bf16.vlgmr.msra.gmra.mxu1 %v1333_v11  ;;  %1235 = vmatprep.subr.bf16.mxu0 %v1336_v13 }
  0x45   :  { %895 = vmatprep.mubr.bf16.mxu1 %v1341_v17 }
  0x47   :  { %1236 = vmatpush3.bf16.msra.mxu0 %v1336_v13 }
  0x48   :  { %1237 = vmatprep.subr.bf16.mxu0 %v1340_v16 }
  0x4a   :  { %847 = vmatmul.mubr.bf16.gmra.mxu0 %v1339_v15 }
  0x4b   :  { %1238 = vmatpush3.bf16.msra.mxu0 %v1340_v16  ;;  %1249 = vmatprep.mubr.bf16.mxu0 %v1349_v21 }
  0x4c   :  { %896 = vmatmul.mubr.bf16.gmra.mxu1 %v1343_v18  ;;  %1239 = vmatprep.subr.bf16.mxu0 %v1344_v19 }
  0x4f   :  { %1240 = vmatpush3.bf16.msra.mxu0 %v1344_v19 }
  0x50   :  { %1241 = vmatprep.subr.bf16.mxu0 %v1345_v20 }
  0x53   :  { %1242 = vmatpush3.bf16.msra.mxu0 %v1345_v20 }
  0x54   :  { %1243 = vmatprep.subr.bf16.mxu0 %v1346_v22 }
  0x57   :  { %1244 = vmatpush3.bf16.msra.mxu0 %v1346_v22 }
  0x58   :  { %1245 = vmatprep.subr.bf16.mxu0 %v1347_v23 }
  0x5b   :  { %1246 = vmatpush3.bf16.msra.mxu0 %v1347_v23 }
  0x5c   :  { %1247 = vmatprep.subr.bf16.mxu0 %v1348_v24 }
  0x5f   :  { %1248 = vmatpush3.bf16.msra.mxu0 %v1348_v24 }
  0x62   :  { %1250 = vmatmul.mubr.bf16.vlgmr.msra.gmra.mxu0 %v1350_v25 }
  0xe2   :  { %v1127_v26 = vpop.f32.mrf.mxu0 }
  0xe4   :  { %v1155_v27 = vpop.f32.mrf.mxu1  ;;  %v1128_v28 = vpop.f32.mrf.mxu0 }
  0xe5   :  { %v1129_v54 = vadd.f32 %v1128_v28, %v1127_v26 }
  0xe6   :  { %v1156_v29 = vpop.f32.mrf.mxu1  ;;  %v1130_v30 = vpop.f32.mrf.mxu0 }
  0xe7   :  { %v743_v61 = vadd.f32 %v1129_v54, %v999_v55  ;;  %v1157_v62 = vadd.f32 %v1156_v29, %v1155_v27 }
  0xe8   :  { %v1158_v31 = vpop.f32.mrf.mxu1  ;;  %v1131_v32 = vpop.f32.mrf.mxu0 }
  0xe9   :  { %v1132_v63 = vadd.f32 %v1131_v32, %v1130_v30  ;;  %v792_v7 = vadd.f32 %v1157_v62, %v743_v61 }
  0xea   :  { %v1133_v33 = vpop.f32.mrf.mxu0  ;;  %v1159_v34 = vpop.f32.mrf.mxu1 }
  0xeb   :  { %v746_v8 = vadd.f32 %v1132_v63, %v999_v55  ;;  %v1160_v9 = vadd.f32 %v1159_v34, %v1158_v31  ;;  %v1090_v31 = vld [vmem:[%s1658_s2 + $0x1] ss:$0 sm:$0xff] }
  0xec   :  { %v1161_v35 = vpop.f32.mrf.mxu1  ;;  %v1134_v36 = vpop.f32.mrf.mxu0 }
  0xed   :  { %v1135_v53 = vadd.f32 %v1134_v36, %v1133_v33  ;;  %v795_v18 = vadd.f32 %v1160_v9, %v746_v8 }
  0xee   :  { %v1162_v37 = vpop.f32.mrf.mxu1  ;;  %v1136_v38 = vpop.f32.mrf.mxu0 }
  0xef   :  { %v751_v58 = vadd.f32 %v1135_v53, %v999_v55  ;;  %v1163_v59 = vadd.f32 %v1162_v37, %v1161_v35 }
  0xf0   :  { %v1164_v39 = vpop.f32.mrf.mxu1  ;;  %v1137_v40 = vpop.f32.mrf.mxu0 }
  0xf1   :  { %v1138_v60 = vadd.f32 %v1137_v40, %v1136_v38  ;;  %v800_v3 = vadd.f32 %v1163_v59, %v751_v58  ;;  %v1091_v40 = vld [vmem:[%s1658_s2 + $0x2] ss:$0 sm:$0xff] }
  0xf2   :  { %v1165_v42 = vpop.f32.mrf.mxu1 }
  0xf3   :  { %v754_v4 = vadd.f32 %v1138_v60, %v999_v55  ;;  %v1166_v5 = vadd.f32 %v1165_v42, %v1164_v39 }
  0xf5   :  { %v803_v14 = vadd.f32 %v1166_v5, %v754_v4 }
 0x102   :  { %v1183_v41 = vpop.f32.mrf.mxu0 }
 0x104   :  { %v1184_v43 = vpop.f32.mrf.mxu0  ;;  %v1211_v44 = vpop.f32.mrf.mxu1 }
 0x105   :  { %v1185_v6 = vadd.f32 %v1184_v43, %v1183_v41 }
 0x106   :  { %v1186_v45 = vpop.f32.mrf.mxu0  ;;  %v1212_v46 = vpop.f32.mrf.mxu1 }
 0x107   :  { %v841_v15 = vadd.f32 %v1185_v6, %v792_v7  ;;  %v1213_v16 = vadd.f32 %v1212_v46, %v1211_v44 }
 0x108   :  { %v1187_v47 = vpop.f32.mrf.mxu0  ;;  %v1214_v48 = vpop.f32.mrf.mxu1 }
 0x109   :  { %v1188_v17 = vadd.f32 %v1187_v47, %v1186_v45  ;;  %v890_v26 = vadd.f32 %v1213_v16, %v841_v15 }
 0x10a   :  { %v1189_v49 = vpop.f32.mrf.mxu0  ;;  %v1215_v50 = vpop.f32.mrf.mxu1 }
 0x10b   :  { %v844_v23 = vadd.f32 %v1188_v17, %v795_v18  ;;  %v1216_v24 = vadd.f32 %v1215_v50, %v1214_v48 }
 0x10c   :  { %v1190_v51 = vpop.f32.mrf.mxu0  ;;  %v1217_v52 = vpop.f32.mrf.mxu1 }
 0x10d   :  { %v1191_v0 = vadd.f32 %v1190_v51, %v1189_v49  ;;  %v893_v35 = vadd.f32 %v1216_v24, %v844_v23 }
 0x10e   :  { %v1192_v56 = vpop.f32.mrf.mxu0  ;;  %v1218_v57 = vpop.f32.mrf.mxu1 }
 0x10f   :  { %v849_v10 = vadd.f32 %v1191_v0, %v800_v3  ;;  %v1219_v11 = vadd.f32 %v1218_v57, %v1217_v52 }
 0x110   :  { %v1193_v1 = vpop.f32.mrf.mxu0  ;;  %v1220_v2 = vpop.f32.mrf.mxu1 }
 0x111   :  { %v1194_v12 = vadd.f32 %v1193_v1, %v1192_v56  ;;  %v898_v21 = vadd.f32 %v1219_v11, %v849_v10 }
 0x112   :  { %v1221_v13 = vpop.f32.mrf.mxu1 }
 0x113   :  { %v852_v19 = vadd.f32 %v1194_v12, %v803_v14  ;;  %v1222_v20 = vadd.f32 %v1221_v13, %v1220_v2 }
 0x115   :  { %v901_v30 = vadd.f32 %v1222_v20, %v852_v19 }
 0x122   :  { %v1251_v22 = vpop.f32.mrf.mxu0 }
 0x123   :  { %v947_v25 = vadd.f32 %v1251_v22, %v898_v21 }
 0x124   :  { %v938_v27 = vpop.f32.mrf.mxu0 }
 0x125   :  { %v955_v28 = vmax.f32 %v947_v25, 0.0  ;;  %v939_v29 = vadd.f32 %v938_v27, %v890_v26 }
 0x126   :  { %v1252_v32 = vpop.f32.mrf.mxu0 }
 0x127   :  { %v953_v33 = vmax.f32 %v939_v29, 0.0  ;;  %v950_v34 = vadd.f32 %v1252_v32, %v901_v30  ;;  %v964_v37 = vmul.f32 %v1090_v31, %v955_v28 }
 0x128   :  { %v941_v36 = vpop.f32.mrf.mxu0 }
 0x129   :  { %v956_v38 = vmax.f32 %v950_v34, 0.0  ;;  %v942_v39 = vadd.f32 %v941_v36, %v893_v35  ;;  %v962_v41 = vmul.f32 %v1090_v31, %v953_v33  ;;  %v973_v44 = vadd.f32 %v1091_v40, %v964_v37 }
 0x12b   :  { %v965_v42 = vmul.f32 %v1090_v31, %v956_v38  ;;  %v954_v43 = vmax.f32 %v942_v39, 0.0  ;;  %v971_v47 = vadd.f32 %v1091_v40, %v962_v41 }
 0x12d   :  { %v974_v45 = vadd.f32 %v1091_v40, %v965_v42  ;;  %v963_v46 = vmul.f32 %v1090_v31, %v954_v43 }
 0x12f   :  { %v1108_v48 = vpack.c.bf16 %v974_v45, %v973_v44  ;;  %v972_v49 = vadd.f32 %v1091_v40, %v963_v46 }
 0x131   :  { %1110 = vst [vmem:[%s1659_s3 + $0x8] sm:$0xff] %v1108_v48   ;;  %v1103_v50 = vpack.c.bf16 %v972_v49, %v971_v47 }
 0x133   :  { %1104 = vst [vmem:[%s1659_s3] sm:$0xff] %v1103_v50  }

// kernel: film_forward.10
= control target key start
LH: loop header
LB: loop body
LE: loop exit
PB: predicated region body
PF: predicated region fallthrough
CT: control target
= control target key end

     0   :  { %v2809_v0 = vmov 0   ;;  %s3829_s4 = inlined_call_operand.vmem [shape: f32[9,32,1], index: 4, kind: input, shape index: {}]   ;;  %s3830_s1 = inlined_call_operand.vmem [shape: bf16[1152,128], index: 1, kind: input, shape index: {}]   ;;  %s3831_s0 = inlined_call_operand.vmem [shape: bf16[32,128], index: 0, kind: input, shape index: {}]   ;;  %s3832_s2 = inlined_call_operand.vmem [shape: bf16[1152,128], index: 2, kind: input, shape index: {}]   ;;  %s3833_s3 = inlined_call_operand.vmem [shape: f32[6,128], index: 3, kind: input, shape index: {}]   ;;  %s3834_s5 = inlined_call_operand.vmem [shape: bf16[32,128], index: 5, kind: output, shape index: {}]  }
   0x1   :  { %2664 = vset.pattern.permute.xlu1 %v2809_v0  ;;  %2663 = vset.pattern.permute.xlu0 %v2809_v0  ;;  %v2168_v1 = vld [vmem:[%s3829_s4 + $0x20] sm:$0xff]  ;;  %v2169_v3 = vld [vmem:[%s3829_s4 + $0x28] sm:$0xff]  ;;  %v2170_v9 = vld [vmem:[%s3829_s4 + $0x30] sm:$0xff] }
   0x2   :  { %v40_v2 = vld [vmem:[%s3829_s4] sm:$0xff]  ;;  %84 = vperm.xlu0 %2663, %v2168_v1   ;;  %v41_v4 = vld [vmem:[%s3829_s4 + $0x8] sm:$0xff]  ;;  %v2171_v10 = vld [vmem:[%s3829_s4 + $0x38] sm:$0xff] }
   0x3   :  { %46 = vperm.xlu1 %2664, %v40_v2   ;;  %v2176_v5 = vld [vmem:[%s3829_s4 + $0x60] sm:$0xff]  ;;  %v2177_v6 = vld [vmem:[%s3829_s4 + $0x68] sm:$0xff]  ;;  %v2665_v11 = vld [vmem:[%s3830_s1 + $0x78] sm:$0xff]  }
   0x4   :  { %v2172_v7 = vld [vmem:[%s3829_s4 + $0x40] sm:$0xff]  ;;  %v2173_v8 = vld [vmem:[%s3829_s4 + $0x48] sm:$0xff]  ;;  %v2666_v12 = vld [vmem:[%s3830_s1 + $0x38] sm:$0xff]   ;;  %2378 = vmatprep.subr.bf16.mxu0 %v2665_v11 }
   0x5   :  { %v2667_v13 = vld [vmem:[%s3830_s1 + $0x70] sm:$0xff]   ;;  %2379 = vmatpush3.bf16.msra.mxu0 %v2666_v12  ;;  %v43_v16 = vld [vmem:[%s3829_s4 + $0x18] sm:$0xff]  ;;  %v2669_v17 = vld [vmem:[%s3830_s1 + $0x68] sm:$0xff]  }
   0x6   :  { %89 = vperm.xlu0 %2663, %v2169_v3   ;;  %v2668_v14 = vld [vmem:[%s3830_s1 + $0x30] sm:$0xff]   ;;  %2380 = vmatprep.subr.bf16.mxu0 %v2667_v13  ;;  %v2670_v18 = vld [vmem:[%s3830_s1 + $0xf8] sm:$0xff]   ;;  %v2671_v19 = vld [vmem:[%s3830_s1 + $0x28] sm:$0xff]  }
   0x7   :  { %51 = vperm.xlu1 %2664, %v41_v4   ;;  %v42_v15 = vld [vmem:[%s3829_s4 + $0x10] sm:$0xff]  ;;  %2406 = vmatprep.subr.bf16.mxu1 %v2670_v18  ;;  %v2672_v20 = vld [vmem:[%s3830_s1 + $0xb8] sm:$0xff]   ;;  %v2184_v21 = vld [vmem:[%s3829_s4 + $0xa0] sm:$0xff] }
   0x8   :  { %v2185_v22 = vld [vmem:[%s3829_s4 + $0xa8] sm:$0xff]  ;;  %v2673_v23 = vld [vmem:[%s3830_s1 + $0x60] sm:$0xff]   ;;  %v2674_v24 = vld [vmem:[%s3830_s1 + $0xf0] sm:$0xff]   ;;  %2407 = vmatpush3.bf16.msra.mxu1 %v2672_v20 }
   0x9   :  { %2381 = vmatpush3.bf16.msra.mxu0 %v2668_v14  ;;  %v2675_v25 = vld [vmem:[%s3830_s1 + $0x20] sm:$0xff]   ;;  %2408 = vmatprep.subr.bf16.mxu1 %v2674_v24  ;;  %v2676_v26 = vld [vmem:[%s3830_s1 + $0xb0] sm:$0xff]   ;;  %v2181_v28 = vld [vmem:[%s3829_s4 + $0x88] sm:$0xff] }
   0xa   :  { %160 = vperm.xlu0 %2663, %v2176_v5   ;;  %2382 = vmatprep.subr.bf16.mxu0 %v2669_v17  ;;  %v2180_v27 = vld [vmem:[%s3829_s4 + $0x80] sm:$0xff]  ;;  %v2677_v29 = vld [vmem:[%s3830_s1 + $0x58] sm:$0xff]   ;;  %v2678_v30 = vld [vmem:[%s3830_s1 + $0xe8] sm:$0xff]  }
   0xb   :  { %165 = vperm.xlu1 %2664, %v2177_v6   ;;  %v2679_v31 = vld [vmem:[%s3830_s1 + $0x18] sm:$0xff]   ;;  %v2680_v32 = vld [vmem:[%s3830_s1 + $0xa8] sm:$0xff]   ;;  %v2178_v33 = vld [vmem:[%s3829_s4 + $0x70] sm:$0xff] }
   0xc   :  { %2409 = vmatpush3.bf16.msra.mxu1 %v2676_v26  ;;  %v2179_v34 = vld [vmem:[%s3829_s4 + $0x78] sm:$0xff]  ;;  %v2681_v35 = vld [vmem:[%s3830_s1 + $0x50] sm:$0xff]   ;;  %v2682_v36 = vld [vmem:[%s3830_s1 + $0xe0] sm:$0xff]  }
   0xd   :  { %2383 = vmatpush3.bf16.msra.mxu0 %v2671_v19  ;;  %2410 = vmatprep.subr.bf16.mxu1 %v2678_v30  ;;  %v2683_v37 = vld [vmem:[%s3830_s1 + $0x10] sm:$0xff]   ;;  %v2684_v38 = vld [vmem:[%s3830_s1 + $0xa0] sm:$0xff]   ;;  %v2175_v40 = vld [vmem:[%s3829_s4 + $0x58] sm:$0xff] }
   0xe   :  { %122 = vperm.xlu0 %2663, %v2172_v7   ;;  %2384 = vmatprep.subr.bf16.mxu0 %v2673_v23  ;;  %v2174_v39 = vld [vmem:[%s3829_s4 + $0x50] sm:$0xff]  ;;  %v2685_v41 = vld [vmem:[%s3830_s1 + $0x48] sm:$0xff]   ;;  %v2686_v42 = vld [vmem:[%s3830_s1 + $0xd8] sm:$0xff]   ;;  %v33_v7 = vlaneseq }
   0xf   :  { %127 = vperm.xlu1 %2664, %v2173_v8   ;;  %v2192_v43 = vld [vmem:[%s3829_s4 + $0xe0] sm:$0xff]  ;;  %v2193_v44 = vld [vmem:[%s3829_s4 + $0xe8] sm:$0xff]  ;;  %v2688_v46 = vld [vmem:[%s3830_s1 + $0x98] sm:$0xff]  }
  0x10   :  { %2411 = vmatpush3.bf16.msra.mxu1 %v2680_v32  ;;  %v2687_v45 = vld [vmem:[%s3830_s1 + $0x8] sm:$0xff]   ;;  %v2689_v47 = vld [vmem:[%s3830_s1 + $0x40] sm:$0xff]   ;;  %v2690_v48 = vld [vmem:[%s3830_s1 + $0xd0] sm:$0xff]  }
  0x11   :  { %2385 = vmatpush3.bf16.msra.mxu0 %v2675_v25  ;;  %2412 = vmatprep.subr.bf16.mxu1 %v2682_v36  ;;  %v2188_v49 = vld [vmem:[%s3829_s4 + $0xc0] sm:$0xff]  ;;  %v2189_v50 = vld [vmem:[%s3829_s4 + $0xc8] sm:$0xff]  ;;  %v2692_v52 = vld [vmem:[%s3830_s1 + $0x90] sm:$0xff]  }
  0x12   :  { %94 = vperm.xlu0 %2663, %v2170_v9   ;;  %2386 = vmatprep.subr.bf16.mxu0 %v2677_v29  ;;  %v2691_v51 = vld [vmem:[%s3830_s1] sm:$0xff]   ;;  %v2693_v53 = vld [vmem:[%s3830_s1 + $0xc8] sm:$0xff]   ;;  %v2694_v54 = vld [vmem:[%s3830_s1 + $0x178] sm:$0xff]  }
  0x13   :  { %99 = vperm.xlu1 %2664, %v2171_v10   ;;  %v2186_v55 = vld [vmem:[%s3829_s4 + $0xb0] sm:$0xff]  ;;  %v2695_v56 = vld [vmem:[%s3830_s1 + $0x88] sm:$0xff]   ;;  %v2187_v57 = vld [vmem:[%s3829_s4 + $0xb8] sm:$0xff]  ;;  %v3056_v10 = vshrl.u32 %v33_v7, 7 }
  0x14   :  { %2413 = vmatpush3.bf16.msra.mxu1 %v2684_v38  ;;  %v2697_v58 = vld [vmem:[%s3830_s1 + $0xc0] sm:$0xff]   ;;  %v2182_v60 = vld [vmem:[%s3829_s4 + $0x90] sm:$0xff]  ;;  %v2183_v61 = vld [vmem:[%s3829_s4 + $0x98] sm:$0xff] }
  0x15   :  { %2387 = vmatpush3.bf16.msra.mxu0 %v2679_v31  ;;  %2414 = vmatprep.subr.bf16.mxu1 %v2686_v42  ;;  %v2699_v59 = vld [vmem:[%s3830_s1 + $0x80] sm:$0xff]   ;;  %v2702_v62 = vld [vmem:[%s3830_s1 + $0x1f8] sm:$0xff]   ;;  %v2194_v63 = vld [vmem:[%s3829_s4 + $0xf0] sm:$0xff]  ;;  %vm72_vm0 = vcmp.lt.s32.totalorder %v3056_v10, 4  ;;  %vm35_vm1 = vcmp.lt.s32.totalorder %v3056_v10, 5  ;;  %vm148_vm2 = vcmp.lt.s32.totalorder %v3056_v10, 1 }
  0x16   :  { %56 = vperm.xlu0 %2663, %v42_v15   ;;  %2388 = vmatprep.subr.bf16.mxu0 %v2681_v35  ;;  %v2195_v0 = vld [vmem:[%s3829_s4 + $0xf8] sm:$0xff]  ;;  %v2190_v1 = vld [vmem:[%s3829_s4 + $0xd0] sm:$0xff]  ;;  %v2196_v3 = vld [vmem:[%s3829_s4 + $0x100] sm:$0xff]  ;;  %vm110_vm3 = vcmp.lt.s32.totalorder %v3056_v10, 3  ;;  %vm215_vm4 = vcmp.lt.s32.totalorder %v3056_v10, 7 }
  0x17   :  { %61 = vperm.xlu1 %2664, %v43_v16   ;;  %v2191_v2 = vld [vmem:[%s3829_s4 + $0xd8] sm:$0xff]  ;;  %v2197_v4 = vld [vmem:[%s3829_s4 + $0x108] sm:$0xff]  ;;  %v2198_v5 = vld [vmem:[%s3829_s4 + $0x110] sm:$0xff] }
  0x18   :  { %2415 = vmatpush3.bf16.msra.mxu1 %v2688_v46  ;;  %v2199_v6 = vld [vmem:[%s3829_s4 + $0x118] sm:$0xff]  ;;  %v2359_v8 = vld [vmem:[%s3831_s0] sm:$0xff]   ;;  %v2376_v9 = vld [vmem:[%s3831_s0 + $0x8] sm:$0xff]  }
  0x19   :  { %2389 = vmatpush3.bf16.msra.mxu0 %v2683_v37  ;;  %2416 = vmatprep.subr.bf16.mxu1 %v2690_v48  ;;  %v3058_v11 = vunpack.c.l.bf16 %v2359_v8  ;;  %v3060_v12 = vunpack.c.h.bf16 %v2376_v9  ;;  %v3062_v13 = vunpack.c.h.bf16 %v2359_v8  ;;  %v3108_v32 = vunpack.c.l.bf16 %v2376_v9  ;;  %v2698_v46 = vld [vmem:[%s3830_s1 + $0x170] sm:$0xff]  }
  0x1a   :  { %227 = vperm.xlu0 %2663, %v2184_v21   ;;  %2390 = vmatprep.subr.bf16.mxu0 %v2685_v41 }
  0x1b   :  { %232 = vperm.xlu1 %2664, %v2185_v22   ;;  %v68_v14 = vrot.slane %v3058_v11, 4  ;;  %v71_v15 = vrot.slane %v3060_v12, 4  ;;  %v29_v16 = vrot.slane %v3058_v11, 3  ;;  %v32_v17 = vrot.slane %v3060_v12, 3 }
  0x1c   :  { %2417 = vmatpush3.bf16.msra.mxu1 %v2692_v52  ;;  %v69_v18 = vrot.slane %v3062_v13, 4  ;;  %v30_v19 = vrot.slane %v3062_v13, 3  ;;  %v144_v22 = vrot.slane %v3058_v11, 7  ;;  %v147_v23 = vrot.slane %v3060_v12, 7 }
  0x1d   :  { %2391 = vmatpush3.bf16.msra.mxu0 %v2687_v45  ;;  %2418 = vmatprep.subr.bf16.mxu1 %v2693_v53  ;;  %v3080_v24 = vsel %vm72_vm0, %v71_v15, %v68_v14  ;;  %v3087_v25 = vsel %vm35_vm1, %v32_v17, %v29_v16  ;;  %v106_v38 = vrot.slane %v3058_v11, 5  ;;  %v2700_v53 = vld [vmem:[%s3830_s1 + $0x130] sm:$0xff]   ;;  %v211_v7 = vrot.slane %v3058_v11, 1 }
  0x1e   :  { %189 = vperm.xlu0 %2663, %v2180_v27   ;;  %2392 = vmatprep.subr.bf16.mxu0 %v2689_v47  ;;  %v3091_v26 = vsel %vm72_vm0, %v68_v14, %v69_v18  ;;  %v3097_v27 = vsel %vm35_vm1, %v29_v16, %v30_v19  ;;  %v152_v31 = vsel %vm148_vm2, %v147_v23, %v144_v22  ;;  %v2708_v14 = vld [vmem:[%s3830_s1 + $0x1b0] sm:$0xff]   ;;  %v213_v16 = vrot.slane %v3108_v32, 1 }
  0x1f   :  { %194 = vperm.xlu1 %2664, %v2181_v28   ;;  %v145_v28 = vrot.slane %v3062_v13, 7 }
  0x20   :  { %2419 = vmatpush3.bf16.msra.mxu1 %v2695_v56  ;;  %v2701_v56 = vld [vmem:[%s3830_s1 + $0x168] sm:$0xff]  }
  0x21   :  { %2393 = vmatpush3.bf16.msra.mxu0 %v2691_v51  ;;  %2420 = vmatprep.subr.bf16.mxu1 %v2697_v58  ;;  %v151_v37 = vsel %vm148_vm2, %v144_v22, %v145_v28  ;;  %v70_v51 = vrot.slane %v3108_v32, 4 }
  0x22   :  { %170 = vperm.xlu0 %2663, %v2178_v33   ;;  %2434 = vmatprep.subr.bf16.mxu0 %v2694_v54 }
  0x23   :  { %175 = vperm.xlu1 %2664, %v2179_v34  }
  0x24   :  { %2421 = vmatpush3.bf16.msra.mxu1 %v2699_v59  ;;  %v3167_v59 = vsel %vm72_vm0, %v69_v18, %v70_v51 }
  0x25   :  { %2462 = vmatprep.subr.bf16.mxu1 %v2702_v62  ;;  %v31_v62 = vrot.slane %v3108_v32, 3 }
  0x26   :  { %132 = vperm.xlu0 %2663, %v2174_v39   ;;  %v109_v39 = vrot.slane %v3060_v12, 5 }
  0x27   :  { %137 = vperm.xlu1 %2664, %v2175_v40   ;;  %v107_v40 = vrot.slane %v3062_v13, 5  ;;  %v3199_v8 = vsel %vm35_vm1, %v30_v19, %v31_v62  ;;  %v3205_v9 = vsel %vm35_vm1, %v31_v62, %v32_v17  ;;  %v2707_v19 = vld [vmem:[%s3830_s1 + $0x120] sm:$0xff]   ;;  %v2710_v17 = vld [vmem:[%s3830_s1 + $0x1e8] sm:$0xff]  }
  0x2a   :  { %285 = vperm.xlu0 %2663, %v2192_v43   ;;  %v2696_v43 = vld [vmem:[%s3830_s1 + $0x138] sm:$0xff]  }
  0x2b   :  { %290 = vperm.xlu1 %2664, %v2193_v44  }
  0x2e   :  { %256 = vperm.xlu0 %2663, %v2188_v49   ;;  %v3142_v49 = vsel %vm110_vm3, %v109_v39, %v106_v38 }
  0x2f   :  { %261 = vperm.xlu1 %2664, %v2189_v50   ;;  %v3148_v50 = vsel %vm110_vm3, %v106_v38, %v107_v40  ;;  %v2712_v38 = vld [vmem:[%s3830_s1 + $0x1a8] sm:$0xff]  }
  0x32   :  { %237 = vperm.xlu0 %2663, %v2186_v55  }
  0x33   :  { %242 = vperm.xlu1 %2664, %v2187_v57  }
  0x36   :  { %199 = vperm.xlu0 %2663, %v2182_v60   ;;  %v3171_v60 = vsel %vm72_vm0, %v70_v51, %v71_v15  ;;  %v212_v15 = vrot.slane %v3062_v13, 1 }
  0x37   :  { %204 = vperm.xlu1 %2664, %v2183_v61   ;;  %v2704_v61 = vld [vmem:[%s3830_s1 + $0x1b8] sm:$0xff]  }
  0x3a   :  { %295 = vperm.xlu0 %2663, %v2194_v63  }
  0x3b   :  { %300 = vperm.xlu1 %2664, %v2195_v0   ;;  %v2703_v0 = vld [vmem:[%s3830_s1 + $0x128] sm:$0xff]  }
  0x3e   :  { %266 = vperm.xlu0 %2663, %v2190_v1   ;;  %v2706_v1 = vld [vmem:[%s3830_s1 + $0x1f0] sm:$0xff]  }
  0x3f   :  { %271 = vperm.xlu1 %2664, %v2191_v2  }
  0x42   :  { %314 = vperm.xlu0 %2663, %v2196_v3  }
  0x43   :  { %319 = vperm.xlu1 %2664, %v2197_v4   ;;  %v2705_v4 = vld [vmem:[%s3830_s1 + $0x160] sm:$0xff]  }
  0x46   :  { %324 = vperm.xlu0 %2663, %v2198_v5  }
  0x47   :  { %329 = vperm.xlu1 %2664, %v2199_v6  }
  0x7d   :  { %v3072_v20 = vpop.permute.xlu0 %84 }
  0x7e   :  { %v3074_v21 = vpop.permute.xlu1 %46  ;;  %v102_v33 = vmul.f32 %v3072_v20, %v3080_v24 }
  0x7f   :  { %v64_v34 = vmul.f32 %v3074_v21, %v3087_v25 }
  0x81   :  { %v3100_v29 = vpop.permute.xlu0 %89 }
  0x82   :  { %v3102_v30 = vpop.permute.xlu1 %51  ;;  %v103_v35 = vmul.f32 %v3100_v29, %v3091_v26 }
  0x83   :  { %v65_v36 = vmul.f32 %v3102_v30, %v3097_v27 }
  0x84   :  { %v337_v42 = vpack.c.bf16 %v103_v35, %v102_v33  ;;  %v2709_v33 = vld [vmem:[%s3830_s1 + $0x158] sm:$0xff]  }
  0x85   :  { %v336_v41 = vpack.c.bf16 %v65_v36, %v64_v34  ;;  %v3129_v44 = vpop.permute.xlu0 %160  ;;  %v218_v36 = vsel %vm215_vm4, %v211_v7, %v212_v15 }
  0x86   :  { %v3131_v45 = vpop.permute.xlu1 %165  ;;  %v178_v47 = vmul.f32 %v3129_v44, %v152_v31  ;;  %967 = vmatprep.mubr.bf16.mxu0 %v337_v42  ;;  %v2711_v42 = vld [vmem:[%s3830_s1 + $0x118] sm:$0xff]  }
  0x87   :  { %v179_v48 = vmul.f32 %v3131_v45, %v151_v37  ;;  %968 = vmatmul.mubr.bf16.vlgmr.msra.gmra.mxu0 %v336_v41  ;;  %v217_v37 = vsel %vm215_vm4, %v212_v15, %v213_v16 }
  0x88   :  { %2435 = vmatpush3.bf16.msra.mxu0 %v2696_v43  ;;  %v2714_v43 = vld [vmem:[%s3830_s1 + $0x1e0] sm:$0xff]  }
  0x89   :  { %v339_v52 = vpack.c.bf16 %v179_v48, %v178_v47  ;;  %v3154_v54 = vpop.permute.xlu0 %122  ;;  %2436 = vmatprep.subr.bf16.mxu0 %v2698_v46  ;;  %v2713_v48 = vld [vmem:[%s3830_s1 + $0x150] sm:$0xff]  }
  0x8a   :  { %v3156_v55 = vpop.permute.xlu1 %127  ;;  %v140_v57 = vmul.f32 %v3154_v54, %v3142_v49 }
  0x8b   :  { %v141_v58 = vmul.f32 %v3156_v55, %v3148_v50  ;;  %1016 = vmatprep.mubr.bf16.mxu1 %v339_v52 }
  0x8c   :  { %2437 = vmatpush3.bf16.msra.mxu0 %v2700_v53  ;;  %v2716_v53 = vld [vmem:[%s3830_s1 + $0x1a0] sm:$0xff]  }
  0x8d   :  { %v338_v63 = vpack.c.bf16 %v141_v58, %v140_v57  ;;  %v3183_v2 = vpop.permute.xlu0 %94  ;;  %2438 = vmatprep.subr.bf16.mxu0 %v2701_v56  ;;  %v146_v56 = vrot.slane %v3108_v32, 7  ;;  %v2715_v58 = vld [vmem:[%s3830_s1 + $0x110] sm:$0xff]  }
  0x8e   :  { %v3185_v3 = vpop.permute.xlu1 %99  ;;  %v104_v5 = vmul.f32 %v3183_v2, %v3167_v59 }
  0x8f   :  { %v105_v6 = vmul.f32 %v3185_v3, %v3171_v60  ;;  %1017 = vmatmul.mubr.bf16.vlgmr.msra.gmra.mxu1 %v338_v63 }
  0x90   :  { %2463 = vmatpush3.bf16.msra.mxu1 %v2704_v61  ;;  %2439 = vmatpush3.bf16.msra.mxu0 %v2703_v0  ;;  %v2718_v61 = vld [vmem:[%s3830_s1 + $0x1d8] sm:$0xff]   ;;  %v2717_v0 = vld [vmem:[%s3830_s1 + $0x148] sm:$0xff]  }
  0x91   :  { %v346_v18 = vpack.c.bf16 %v105_v6, %v104_v5  ;;  %2464 = vmatprep.subr.bf16.mxu1 %v2706_v1  ;;  %v3219_v22 = vpop.permute.xlu0 %56  ;;  %2440 = vmatprep.subr.bf16.mxu0 %v2705_v4  ;;  %v150_v1 = vsel %vm148_vm2, %v145_v28, %v146_v56  ;;  %v149_v4 = vsel %vm148_vm2, %v146_v56, %v147_v23  ;;  %v2720_v5 = vld [vmem:[%s3830_s1 + $0x198] sm:$0xff]   ;;  %v108_v6 = vrot.slane %v3108_v32, 5  ;;  %v2722_v28 = vld [vmem:[%s3830_s1 + $0x1d0] sm:$0xff]   ;;  %v2721_v23 = vld [vmem:[%s3830_s1 + $0x140] sm:$0xff]  }
  0x92   :  { %v3221_v31 = vpop.permute.xlu1 %61  ;;  %v66_v34 = vmul.f32 %v3219_v22, %v3199_v8 }
  0x93   :  { %v67_v35 = vmul.f32 %v3221_v31, %v3205_v9  ;;  %975 = vmatprep.mubr.bf16.mxu0 %v346_v18 }
  0x94   :  { %2465 = vmatpush3.bf16.msra.mxu1 %v2708_v14  ;;  %2441 = vmatpush3.bf16.msra.mxu0 %v2707_v19  ;;  %v2719_v14 = vld [vmem:[%s3830_s1 + $0x108] sm:$0xff]  }
  0x95   :  { %v345_v41 = vpack.c.bf16 %v67_v35, %v66_v34  ;;  %2466 = vmatprep.subr.bf16.mxu1 %v2710_v17  ;;  %v3247_v46 = vpop.permute.xlu0 %227  ;;  %2442 = vmatprep.subr.bf16.mxu0 %v2709_v33  ;;  %v3304_v33 = vsel %vm110_vm3, %v107_v40, %v108_v6  ;;  %v3310_v34 = vsel %vm110_vm3, %v108_v6, %v109_v39  ;;  %v2724_v35 = vld [vmem:[%s3830_s1 + $0x190] sm:$0xff]   ;;  %v2725_v40 = vld [vmem:[%s3830_s1 + $0x1c8] sm:$0xff]  }
  0x96   :  { %3854 = vst [vmem:[#allocation2_spill] sm:$0xff] %v3247_v46  ;;  %v3249_v47 = vpop.permute.xlu1 %232  ;;  %v245_v51 = vmul.f32 %v3247_v46, %v218_v36 }
  0x97   :  { %3855 = vst [vmem:[#allocation3_spill] sm:$0xff] %v3249_v47  ;;  %v246_v52 = vmul.f32 %v3249_v47, %v217_v37  ;;  %976 = vmatmul.mubr.bf16.gmra.mxu0 %v345_v41  ;;  %v2723_v37 = vld [vmem:[%s3830_s1 + $0x100] sm:$0xff]  }
  0x98   :  { %2467 = vmatpush3.bf16.msra.mxu1 %v2712_v38  ;;  %2443 = vmatpush3.bf16.msra.mxu0 %v2711_v42 }
  0x99   :  { %v341_v57 = vpack.c.bf16 %v246_v52, %v245_v51  ;;  %2468 = vmatprep.subr.bf16.mxu1 %v2714_v43  ;;  %v3266_v62 = vpop.permute.xlu0 %189  ;;  %2444 = vmatprep.subr.bf16.mxu0 %v2713_v48  ;;  %v2726_v43 = vld [vmem:[%s3830_s1 + $0x238] sm:$0xff]  }
  0x9a   :  { %3856 = vst [vmem:[#allocation4_spill] sm:$0xff] %v3266_v62  ;;  %v3268_v63 = vpop.permute.xlu1 %194  ;;  %v207_v38 = vmul.f32 %v3058_v11, %v3266_v62 }
  0x9b   :  { %3857 = vst [vmem:[#allocation5_spill] sm:$0xff] %v3268_v63  ;;  %1065 = vmatprep.mubr.bf16.mxu0 %v341_v57  ;;  %v208_v39 = vmul.f32 %v3062_v13, %v3268_v63  ;;  %v2727_v13 = vld [vmem:[%s3830_s1 + $0x188] sm:$0xff]  }
  0x9c   :  { %2469 = vmatpush3.bf16.msra.mxu1 %v2716_v53  ;;  %2445 = vmatpush3.bf16.msra.mxu0 %v2715_v58  ;;  %v2728_v53 = vld [vmem:[%s3830_s1 + $0x1c0] sm:$0xff]  }
  0x9d   :  { %2470 = vmatprep.subr.bf16.mxu1 %v2718_v61  ;;  %v3291_v15 = vpop.permute.xlu0 %170  ;;  %2446 = vmatprep.subr.bf16.mxu0 %v2717_v0  ;;  %v340_v56 = vpack.c.bf16 %v208_v39, %v207_v38  ;;  %v2729_v61 = vld [vmem:[%s3830_s1 + $0x230] sm:$0xff]   ;;  %v2733_v38 = vld [vmem:[%s3830_s1 + $0x218] sm:$0xff]  }
  0x9e   :  { %v3293_v18 = vpop.permute.xlu1 %175  ;;  %v180_v19 = vmul.f32 %v3291_v15, %v150_v1 }
  0x9f   :  { %v181_v17 = vmul.f32 %v3293_v18, %v149_v4  ;;  %v2730_v4 = vld [vmem:[%s3830_s1 + $0x180] sm:$0xff]  }
  0xa0   :  { %2471 = vmatpush3.bf16.msra.mxu1 %v2720_v5  ;;  %2447 = vmatpush3.bf16.msra.mxu0 %v2719_v14  ;;  %v214_v5 = vrot.slane %v3060_v12, 1 }
  0xa1   :  { %v348_v36 = vpack.c.bf16 %v181_v17, %v180_v19  ;;  %2472 = vmatprep.subr.bf16.mxu1 %v2722_v28  ;;  %v3325_v41 = vpop.permute.xlu0 %132  ;;  %2448 = vmatprep.subr.bf16.mxu0 %v2721_v23 }
  0xa2   :  { %v3327_v42 = vpop.permute.xlu1 %137  ;;  %v142_v48 = vmul.f32 %v3325_v41, %v3304_v33  ;;  %v216_v19 = vsel %vm215_vm4, %v213_v16, %v214_v5  ;;  %v219_v17 = vsel %vm215_vm4, %v214_v5, %v211_v7 }
  0xa3   :  { %v143_v51 = vmul.f32 %v3327_v42, %v3310_v34  ;;  %1024 = vmatprep.mubr.bf16.mxu1 %v348_v36 }
  0xa4   :  { %2473 = vmatpush3.bf16.msra.mxu1 %v2724_v35  ;;  %2449 = vmatpush3.bf16.msra.mxu0 %v2723_v37 }
  0xa5   :  { %v347_v52 = vpack.c.bf16 %v143_v51, %v142_v48  ;;  %2474 = vmatprep.subr.bf16.mxu1 %v2725_v40  ;;  %v3342_v57 = vpop.permute.xlu0 %285  ;;  %2622 = vmatprep.subr.bf16.mxu0 %v2726_v43 }
  0xa6   :  { %v3344_v58 = vpop.permute.xlu1 %290  ;;  %v303_v0 = vmul.f32 %v3342_v57, %v3091_v26  ;;  %v2731_v26 = vld [vmem:[%s3830_s1 + $0x228] sm:$0xff]  }
  0xa7   :  { %3858 = vst [vmem:[#allocation6_spill] sm:$0xff] %v3344_v58  ;;  %v304_v1 = vmul.f32 %v3344_v58, %v3167_v59  ;;  %1025 = vmatmul.mubr.bf16.gmra.mxu1 %v347_v52  ;;  %1066 = vmatmul.mubr.bf16.vlgmr.msra.gmra.mxu0 %v340_v56  ;;  %v2734_v52 = vld [vmem:[%s3830_s1 + $0x210] sm:$0xff]  }
  0xa8   :  { %2475 = vmatpush3.bf16.msra.mxu1 %v2727_v13  ;;  %2623 = vmatpush3.bf16.msra.mxu0 %v2726_v43 }
  0xa9   :  { %v343_v6 = vpack.c.bf16 %v304_v1, %v303_v0  ;;  %2476 = vmatprep.subr.bf16.mxu1 %v2728_v53  ;;  %v3357_v14 = vpop.permute.xlu0 %256  ;;  %2624 = vmatprep.subr.bf16.mxu0 %v2729_v61  ;;  %v2735_v0 = vld [vmem:[%s3830_s1 + $0x208] sm:$0xff]  }
  0xaa   :  { %3859 = vst [vmem:[#allocation7_spill] sm:$0xff] %v3357_v14  ;;  %v3359_v28 = vpop.permute.xlu1 %261  ;;  %v274_v59 = vmul.f32 %v3357_v14, %v3097_v27 }
  0xab   :  { %3860 = vst [vmem:[#allocation8_spill] sm:$0xff] %v3359_v28  ;;  %v275_v23 = vmul.f32 %v3359_v28, %v3199_v8  ;;  %1114 = vmatprep.mubr.bf16.mxu1 %v343_v6  ;;  %v2732_v8 = vld [vmem:[%s3830_s1 + $0x220] sm:$0xff]  }
  0xac   :  { %2477 = vmatpush3.bf16.msra.mxu1 %v2730_v4  ;;  %2625 = vmatpush3.bf16.msra.mxu0 %v2729_v61  ;;  %v2736_v6 = vld [vmem:[%s3830_s1 + $0x200] sm:$0xff]  }
  0xad   :  { %v342_v35 = vpack.c.bf16 %v275_v23, %v274_v59  ;;  %v3376_v36 = vpop.permute.xlu0 %237  ;;  %2626 = vmatprep.subr.bf16.mxu0 %v2731_v26 }
  0xae   :  { %3861 = vst [vmem:[#allocation9_spill] sm:$0xff] %v3376_v36  ;;  %v3378_v27 = vpop.permute.xlu1 %242  ;;  %v247_v37 = vmul.f32 %v3376_v36, %v216_v19 }
  0xaf   :  { %3862 = vst [vmem:[#allocation10_spill] sm:$0xff] %v3378_v27  ;;  %v248_v16 = vmul.f32 %v3378_v27, %v219_v17  ;;  %1115 = vmatmul.mubr.bf16.vlgmr.msra.gmra.mxu1 %v342_v35 }
  0xb0   :  { %2627 = vmatpush3.bf16.msra.mxu0 %v2731_v26 }
  0xb1   :  { %v350_v11 = vpack.c.bf16 %v248_v16, %v247_v37  ;;  %v3385_v40 = vpop.permute.xlu0 %199  ;;  %2628 = vmatprep.subr.bf16.mxu0 %v2732_v8  ;;  %v2742_v37 = vld [vmem:[%s3832_s2 + $0xf0] sm:$0xff]   ;;  %v3877_v10 = vld [vmem:[#allocation7_spill] sm:$0xff] }
  0xb2   :  { %3863 = vst [vmem:[#allocation11_spill] sm:$0xff] %v3385_v40  ;;  %v3387_v7 = vpop.permute.xlu1 %204  ;;  %v209_v39 = vmul.f32 %v3108_v32, %v3385_v40  ;;  %v2743_v16 = vld [vmem:[%s3832_s2 + $0x30] sm:$0xff]   ;;  %v2200_v40 = vld [vmem:[%s3833_s3] ss:$0 sm:$0xff] }
  0xb3   :  { %3864 = vst [vmem:[#allocation12_spill] sm:$0xff] %v3387_v7  ;;  %v210_v43 = vmul.f32 %v3060_v12, %v3387_v7  ;;  %1073 = vmatprep.mubr.bf16.mxu0 %v350_v11  ;;  %v2744_v11 = vld [vmem:[%s3832_s2 + $0xb0] sm:$0xff]  }
  0xb4   :  { %2629 = vmatpush3.bf16.msra.mxu0 %v2732_v8  ;;  %v2741_v8 = vld [vmem:[%s3832_s2 + $0x70] sm:$0xff]  }
  0xb5   :  { %v349_v48 = vpack.c.bf16 %v210_v43, %v209_v39  ;;  %v3396_v51 = vpop.permute.xlu0 %295  ;;  %2630 = vmatprep.subr.bf16.mxu0 %v2733_v38  ;;  %v2746_v39 = vld [vmem:[%s3832_s2 + $0xe8] sm:$0xff]  }
  0xb6   :  { %3865 = vst [vmem:[#allocation13_spill] sm:$0xff] %v3396_v51  ;;  %v3398_v13 = vpop.permute.xlu1 %300  ;;  %v305_v53 = vmul.f32 %v3396_v51, %v3171_v60  ;;  %v2747_v43 = vld [vmem:[%s3832_s2 + $0x28] sm:$0xff]  }
  0xb7   :  { %3866 = vst [vmem:[#allocation14_spill] sm:$0xff] %v3398_v13  ;;  %v306_v32 = vmul.f32 %v3398_v13, %v3080_v24  ;;  %1074 = vmatmul.mubr.bf16.gmra.mxu0 %v349_v48  ;;  %v2748_v48 = vld [vmem:[%s3832_s2 + $0xa8] sm:$0xff]  }
  0xb8   :  { %2631 = vmatpush3.bf16.msra.mxu0 %v2733_v38  ;;  %v2745_v38 = vld [vmem:[%s3832_s2 + $0x68] sm:$0xff]  }
  0xb9   :  { %v352_v12 = vpack.c.bf16 %v306_v32, %v305_v53  ;;  %v3407_v56 = vpop.permute.xlu0 %266  ;;  %2632 = vmatprep.subr.bf16.mxu0 %v2734_v52  ;;  %v2750_v53 = vld [vmem:[%s3832_s2 + $0xe0] sm:$0xff]  }
  0xba   :  { %3867 = vst [vmem:[#allocation15_spill] sm:$0xff] %v3407_v56  ;;  %v3409_v61 = vpop.permute.xlu1 %271  ;;  %v276_v1 = vmul.f32 %v3407_v56, %v3205_v9  ;;  %v2751_v32 = vld [vmem:[%s3832_s2 + $0x20] sm:$0xff]  }
  0xbb   :  { %3868 = vst [vmem:[#allocation16_spill] sm:$0xff] %v3409_v61  ;;  %v277_v60 = vmul.f32 %v3409_v61, %v3087_v25  ;;  %1122 = vmatprep.mubr.bf16.mxu1 %v352_v12  ;;  %v2752_v12 = vld [vmem:[%s3832_s2 + $0xa0] sm:$0xff]  }
  0xbc   :  { %2633 = vmatpush3.bf16.msra.mxu0 %v2734_v52  ;;  %v2749_v52 = vld [vmem:[%s3832_s2 + $0x60] sm:$0xff]  }
  0xbd   :  { %v351_v24 = vpack.c.bf16 %v277_v60, %v276_v1  ;;  %v3418_v4 = vpop.permute.xlu0 %314  ;;  %2634 = vmatprep.subr.bf16.mxu0 %v2735_v0  ;;  %v2754_v1 = vld [vmem:[%s3832_s2 + $0xd8] sm:$0xff]  }
  0xbe   :  { %3869 = vst [vmem:[#allocation17_spill] sm:$0xff] %v3418_v4  ;;  %v3420_v5 = vpop.permute.xlu1 %319  ;;  %v332_v26 = vmul.f32 %v3418_v4, %v3148_v50  ;;  %v2737_v50 = vld [vmem:[%s3832_s2 + $0x78] sm:$0xff]  }
  0xbf   :  { %3870 = vst [vmem:[#allocation18_spill] sm:$0xff] %v3420_v5  ;;  %v333_v9 = vmul.f32 %v3420_v5, %v3304_v33  ;;  %1123 = vmatmul.mubr.bf16.gmra.mxu1 %v351_v24  ;;  %v2738_v33 = vld [vmem:[%s3832_s2 + $0xf8] sm:$0xff]   ;;  %2500 = vmatprep.subr.bf16.mxu1 %v2737_v50  ;;  %v2764_v50 = vld [vmem:[%s3832_s2 + $0x88] sm:$0xff]  }
  0xc0   :  { %2635 = vmatpush3.bf16.msra.mxu0 %v2735_v0  ;;  %v2753_v0 = vld [vmem:[%s3832_s2 + $0x58] sm:$0xff]  }
  0xc1   :  { %v344_v25 = vpack.c.bf16 %v333_v9, %v332_v26  ;;  %v3429_v59 = vpop.permute.xlu0 %324  ;;  %2636 = vmatprep.subr.bf16.mxu0 %v2736_v6  ;;  %v2755_v60 = vld [vmem:[%s3832_s2 + $0x18] sm:$0xff]   ;;  %v2758_v26 = vld [vmem:[%s3832_s2 + $0xd0] sm:$0xff]  }
  0xc2   :  { %3871 = vst [vmem:[#allocation19_spill] sm:$0xff] %v3429_v59  ;;  %v3431_v23 = vpop.permute.xlu1 %329  ;;  %v334_v19 = vmul.f32 %v3429_v59, %v3310_v34  ;;  %v2739_v34 = vld [vmem:[%s3832_s2 + $0x38] sm:$0xff]   ;;  %v2759_v9 = vld [vmem:[%s3832_s2 + $0x10] sm:$0xff]  }
  0xc3   :  { %3872 = vst [vmem:[#allocation20_spill] sm:$0xff] %v3431_v23  ;;  %v335_v17 = vmul.f32 %v3431_v23, %v3142_v49  ;;  %2638 = vmatprep.mubr.bf16.mxu0 %v344_v25  ;;  %v2740_v49 = vld [vmem:[%s3832_s2 + $0xb8] sm:$0xff]   ;;  %2501 = vmatpush3.bf16.msra.mxu1 %v2739_v34  ;;  %v2760_v25 = vld [vmem:[%s3832_s2 + $0x90] sm:$0xff]   ;;  %v2766_v34 = vld [vmem:[%s3832_s2 + $0xc0] sm:$0xff]  }
  0xc4   :  { %2637 = vmatpush3.bf16.msra.mxu0 %v2736_v6  ;;  %2502 = vmatprep.subr.bf16.mxu1 %v2741_v8  ;;  %v2756_v24 = vld [vmem:[%s3832_s2 + $0x98] sm:$0xff]   ;;  %v2757_v6 = vld [vmem:[%s3832_s2 + $0x50] sm:$0xff]   ;;  %v2768_v8 = vld [vmem:[%s3832_s2 + $0x80] sm:$0xff]  }
  0xc5   :  { %v353_v35 = vpack.c.bf16 %v335_v17, %v334_v19  ;;  %2528 = vmatprep.subr.bf16.mxu0 %v2738_v33  ;;  %v2761_v19 = vld [vmem:[%s3832_s2 + $0x48] sm:$0xff]   ;;  %v2765_v33 = vld [vmem:[%s3832_s2 + $0x40] sm:$0xff]  }
  0xc6   :  { %v2762_v17 = vld [vmem:[%s3832_s2 + $0xc8] sm:$0xff]  }
  0xc7   :  { %2639 = vmatmul.mubr.bf16.vlgmr.msra.gmra.mxu0 %v353_v35  ;;  %2503 = vmatpush3.bf16.msra.mxu1 %v2743_v16  ;;  %v2763_v35 = vld [vmem:[%s3832_s2 + $0x8] sm:$0xff]   ;;  %v2770_v16 = vld [vmem:[%s3832_s2 + $0x1f8] sm:$0xff]  }
  0xc8   :  { %2529 = vmatpush3.bf16.msra.mxu0 %v2740_v49  ;;  %2504 = vmatprep.subr.bf16.mxu1 %v2745_v38  ;;  %v2767_v49 = vld [vmem:[%s3832_s2] sm:$0xff]  }
  0xc9   :  { %2530 = vmatprep.subr.bf16.mxu0 %v2742_v37  ;;  %v2769_v37 = vld [vmem:[%s3832_s2 + $0x178] sm:$0xff]  }
  0xcb   :  { %2505 = vmatpush3.bf16.msra.mxu1 %v2747_v43 }
  0xcc   :  { %2531 = vmatpush3.bf16.msra.mxu0 %v2744_v11  ;;  %2506 = vmatprep.subr.bf16.mxu1 %v2749_v52 }
  0xcd   :  { %2532 = vmatprep.subr.bf16.mxu0 %v2746_v39 }
  0xcf   :  { %2507 = vmatpush3.bf16.msra.mxu1 %v2751_v32 }
  0xd0   :  { %2533 = vmatpush3.bf16.msra.mxu0 %v2748_v48  ;;  %2508 = vmatprep.subr.bf16.mxu1 %v2753_v0 }
  0xd1   :  { %2534 = vmatprep.subr.bf16.mxu0 %v2750_v53 }
  0xd3   :  { %2509 = vmatpush3.bf16.msra.mxu1 %v2755_v60 }
  0xd4   :  { %2535 = vmatpush3.bf16.msra.mxu0 %v2752_v12  ;;  %2510 = vmatprep.subr.bf16.mxu1 %v2757_v6 }
  0xd5   :  { %2536 = vmatprep.subr.bf16.mxu0 %v2754_v1 }
  0xd7   :  { %2511 = vmatpush3.bf16.msra.mxu1 %v2759_v9 }
  0xd8   :  { %2537 = vmatpush3.bf16.msra.mxu0 %v2756_v24  ;;  %2512 = vmatprep.subr.bf16.mxu1 %v2761_v19 }
  0xd9   :  { %2538 = vmatprep.subr.bf16.mxu0 %v2758_v26 }
  0xdb   :  { %2513 = vmatpush3.bf16.msra.mxu1 %v2763_v35 }
  0xdc   :  { %2539 = vmatpush3.bf16.msra.mxu0 %v2760_v25  ;;  %2514 = vmatprep.subr.bf16.mxu1 %v2765_v33 }
  0xdd   :  { %2540 = vmatprep.subr.bf16.mxu0 %v2762_v17 }
  0xdf   :  { %2515 = vmatpush3.bf16.msra.mxu1 %v2767_v49 }
  0xe0   :  { %2541 = vmatpush3.bf16.msra.mxu0 %v2764_v50  ;;  %2556 = vmatprep.subr.bf16.mxu1 %v2769_v37 }
  0xe1   :  { %2542 = vmatprep.subr.bf16.mxu0 %v2766_v34 }
  0xe4   :  { %2543 = vmatpush3.bf16.msra.mxu0 %v2768_v8 }
  0xe5   :  { %2584 = vmatprep.subr.bf16.mxu0 %v2770_v16 }
 0x147   :  { %v2394_v11 = vpop.f32.mrf.mxu0 }
 0x149   :  { %v2395_v38 = vpop.f32.mrf.mxu0 }
 0x14a   :  { %v2396_v59 = vadd.f32 %v2395_v38, %v2394_v11 }
 0x14b   :  { %v2397_v39 = vpop.f32.mrf.mxu0 }
 0x14c   :  { %v970_v62 = vadd.f32 %v2396_v59, %v2200_v40 }
 0x14d   :  { %v2398_v43 = vpop.f32.mrf.mxu0 }
 0x14e   :  { %v2399_v27 = vadd.f32 %v2398_v43, %v2397_v39 }
 0x14f   :  { %v2422_v48 = vpop.f32.mrf.mxu1 }
 0x151   :  { %v2423_v53 = vpop.f32.mrf.mxu1 }
 0x152   :  { %v2424_v61 = vadd.f32 %v2423_v53, %v2422_v48  ;;  %v973_v48 = vadd.f32 %v2399_v27, %v2200_v40 }
 0x153   :  { %v2425_v12 = vpop.f32.mrf.mxu1 }
 0x154   :  { %v1019_v38 = vadd.f32 %v2424_v61, %v970_v62  ;;  %v2273_v62 = vld [vmem:[%s3833_s3 + $0x1] ss:$0 sm:$0xff] }
 0x155   :  { %v2426_v1 = vpop.f32.mrf.mxu1 }
 0x156   :  { %v2427_v63 = vadd.f32 %v2426_v1, %v2425_v12 }
 0x157   :  { %v2400_v52 = vpop.f32.mrf.mxu0 }
 0x158   :  { %v1022_v39 = vadd.f32 %v2427_v63, %v973_v48  ;;  %v2274_v63 = vld [vmem:[%s3833_s3 + $0x2] ss:$0 sm:$0xff] }
 0x159   :  { %v2401_v32 = vpop.f32.mrf.mxu0 }
 0x15a   :  { %v2402_v37 = vadd.f32 %v2401_v32, %v2400_v52 }
 0x15b   :  { %v2403_v0 = vpop.f32.mrf.mxu0 }
 0x15c   :  { %v978_v56 = vadd.f32 %v2402_v37, %v2200_v40 }
 0x15d   :  { %v2404_v60 = vpop.f32.mrf.mxu0 }
 0x15e   :  { %v2405_v7 = vadd.f32 %v2404_v60, %v2403_v0 }
 0x160   :  { %v981_v47 = vadd.f32 %v2405_v7, %v2200_v40 }
 0x167   :  { %v2428_v24 = vpop.f32.mrf.mxu1  ;;  %v2450_v6 = vpop.f32.mrf.mxu0 }
 0x169   :  { %v2429_v26 = vpop.f32.mrf.mxu1  ;;  %v2451_v25 = vpop.f32.mrf.mxu0 }
 0x16a   :  { %v2430_v5 = vadd.f32 %v2429_v26, %v2428_v24  ;;  %v2452_v36 = vadd.f32 %v2451_v25, %v2450_v6 }
 0x16b   :  { %v2431_v9 = vpop.f32.mrf.mxu1  ;;  %v2453_v17 = vpop.f32.mrf.mxu0 }
 0x16c   :  { %v1027_v14 = vadd.f32 %v2430_v5, %v978_v56  ;;  %v1068_v53 = vadd.f32 %v2452_v36, %v1019_v38 }
 0x16d   :  { %v2432_v19 = vpop.f32.mrf.mxu1  ;;  %v2454_v50 = vpop.f32.mrf.mxu0 }
 0x16e   :  { %v2433_v52 = vadd.f32 %v2432_v19, %v2431_v9  ;;  %v2455_v60 = vadd.f32 %v2454_v50, %v2453_v17 }
 0x16f   :  { %v2478_v35 = vpop.f32.mrf.mxu1 }
 0x170   :  { %v1030_v0 = vadd.f32 %v2433_v52, %v981_v47 }
 0x171   :  { %v2479_v33 = vpop.f32.mrf.mxu1 }
 0x172   :  { %v2480_v46 = vadd.f32 %v2479_v33, %v2478_v35 }
 0x173   :  { %v2481_v49 = vpop.f32.mrf.mxu1 }
 0x175   :  { %v2482_v16 = vpop.f32.mrf.mxu1 }
 0x176   :  { %v2483_v6 = vadd.f32 %v2482_v16, %v2481_v49 }
 0x177   :  { %v2456_v34 = vpop.f32.mrf.mxu0 }
 0x179   :  { %v2457_v8 = vpop.f32.mrf.mxu0 }
 0x17a   :  { %v2458_v13 = vadd.f32 %v2457_v8, %v2456_v34 }
 0x17b   :  { %v2459_v23 = vpop.f32.mrf.mxu0 }
 0x17c   :  { %v1076_v58 = vadd.f32 %v2458_v13, %v1027_v14  ;;  %v1071_v14 = vadd.f32 %v2455_v60, %v1022_v39 }
 0x17d   :  { %v2460_v28 = vpop.f32.mrf.mxu0 }
 0x17e   :  { %v2461_v24 = vadd.f32 %v2460_v28, %v2459_v23  ;;  %v1120_v61 = vadd.f32 %v2483_v6, %v1071_v14 }
 0x17f   :  { %v2484_v4 = vpop.f32.mrf.mxu1 }
 0x180   :  { %v1079_v56 = vadd.f32 %v2461_v24, %v1030_v0 }
 0x181   :  { %v2485_v51 = vpop.f32.mrf.mxu1 }
 0x182   :  { %v2486_v32 = vadd.f32 %v2485_v51, %v2484_v4  ;;  %v1117_v51 = vadd.f32 %v2480_v46, %v1068_v53 }
 0x183   :  { %v2487_v11 = vpop.f32.mrf.mxu1 }
 0x184   :  { %v1125_v59 = vadd.f32 %v2486_v32, %v1076_v58 }
 0x185   :  { %v2488_v26 = vpop.f32.mrf.mxu1 }
 0x186   :  { %v2489_v34 = vadd.f32 %v2488_v26, %v2487_v11 }
 0x187   :  { %v2640_v43 = vpop.f32.mrf.mxu0 }
 0x188   :  { %v1174_v5 = vadd.f32 %v2640_v43, %v1125_v59  ;;  %v1128_v27 = vadd.f32 %v2489_v34, %v1079_v56 }
 0x189   :  { %v1165_v7 = vpop.f32.mrf.mxu0 }
 0x18a   :  { %v1182_v28 = vmax.f32 %v1174_v5, 0.0  ;;  %v1166_v13 = vadd.f32 %v1165_v7, %v1117_v51 }
 0x18b   :  { %v2641_v36 = vpop.f32.mrf.mxu0 }
 0x18c   :  { %v1191_v47 = vmul.f32 %v2273_v62, %v1182_v28  ;;  %v1180_v58 = vmax.f32 %v1166_v13, 0.0  ;;  %v1177_v40 = vadd.f32 %v2641_v36, %v1128_v27  ;;  %v2771_v36 = vld [vmem:[%s3832_s2 + $0x138] sm:$0xff]  }
 0x18d   :  { %v1168_v4 = vpop.f32.mrf.mxu0 }
 0x18e   :  { %v1189_v46 = vmul.f32 %v2273_v62, %v1180_v58  ;;  %v1183_v23 = vmax.f32 %v1177_v40, 0.0  ;;  %v1169_v12 = vadd.f32 %v1168_v4, %v1120_v61  ;;  %v3548_v1 = vadd.f32 %v2274_v63, %v1191_v47  ;;  %v2772_v47 = vld [vmem:[%s3832_s2 + $0x1b8] sm:$0xff]   ;;  %v2773_v58 = vld [vmem:[%s3832_s2 + $0x170] sm:$0xff]  }
 0x190   :  { %v3550_v9 = vadd.f32 %v2274_v63, %v1189_v46  ;;  %v1192_v25 = vmul.f32 %v2273_v62, %v1183_v23  ;;  %v1181_v19 = vmax.f32 %v1169_v12, 0.0  ;;  %v1216_v49 = vrot.slane %v3548_v1, 4  ;;  %v2774_v46 = vld [vmem:[%s3832_s2 + $0x1f0] sm:$0xff]  }
 0x191   :  { %v1240_v38 = vrot.slane %v3548_v1, 7  ;;  %v1204_v24 = vrot.slane %v3548_v1, 3 }
 0x192   :  { %v3552_v17 = vadd.f32 %v2274_v63, %v1192_v25  ;;  %v1190_v35 = vmul.f32 %v2273_v62, %v1181_v19  ;;  %v1214_v50 = vrot.slane %v3550_v9, 4  ;;  %v1238_v33 = vrot.slane %v3550_v9, 7 }
 0x193   :  { %v1202_v32 = vrot.slane %v3550_v9, 3  ;;  %v1226_v39 = vrot.slane %v3550_v9, 5 }
 0x194   :  { %v3557_v8 = vadd.f32 %v2274_v63, %v1190_v35  ;;  %v1217_v37 = vrot.slane %v3552_v17, 4  ;;  %v1241_v16 = vrot.slane %v3552_v17, 7  ;;  %v1205_v52 = vrot.slane %v3552_v17, 3 }
 0x195   :  { %v1229_v11 = vrot.slane %v3552_v17, 5  ;;  %v1228_v35 = vrot.slane %v3548_v1, 5 }
 0x196   :  { %v1215_v26 = vrot.slane %v3557_v8, 4  ;;  %v3569_v48 = vsel %vm72_vm0, %v1217_v37, %v1214_v50  ;;  %v1239_v53 = vrot.slane %v3557_v8, 7  ;;  %v1245_v0 = vsel %vm148_vm2, %v1241_v16, %v1238_v33 }
 0x197   :  { %v1222_v60 = vmul.f32 %v3569_v48, %v3072_v20  ;;  %v1203_v34 = vrot.slane %v3557_v8, 3  ;;  %v3579_v59 = vsel %vm35_vm1, %v1205_v52, %v1202_v32  ;;  %v1246_v56 = vmul.f32 %v1245_v0, %v3129_v44 }
 0x198   :  { %v1220_v43 = vsel %vm72_vm0, %v1214_v50, %v1215_v26  ;;  %v1244_v6 = vsel %vm148_vm2, %v1238_v33, %v1239_v53  ;;  %v1227_v5 = vrot.slane %v3557_v8, 5  ;;  %v3596_v7 = vsel %vm110_vm3, %v1229_v11, %v1226_v39  ;;  %v2776_v50 = vld [vmem:[%s3832_s2 + $0x1b0] sm:$0xff]   ;;  %v2777_v33 = vld [vmem:[%s3832_s2 + $0x168] sm:$0xff]  }
 0x199   :  { %v1223_v20 = vmul.f32 %v1220_v43, %v3100_v29  ;;  %v1247_v51 = vmul.f32 %v1244_v6, %v3131_v45  ;;  %v3592_v62 = vsel %vm35_vm1, %v1202_v32, %v1203_v34  ;;  %v1210_v14 = vmul.f32 %v3579_v59, %v3074_v21 }
 0x19a   :  { %v1211_v44 = vmul.f32 %v3592_v62, %v3102_v30  ;;  %v3604_v28 = vsel %vm110_vm3, %v1226_v39, %v1227_v5  ;;  %v1234_v29 = vmul.f32 %v3596_v7, %v3154_v54  ;;  %v3615_v21 = vsel %vm72_vm0, %v1216_v49, %v1217_v37  ;;  %v2778_v37 = vld [vmem:[%s3832_s2 + $0x1e8] sm:$0xff]   ;;  %v3874_v39 = vld [vmem:[#allocation2_spill] sm:$0xff] }
 0x19b   :  { %v1279_v45 = vpack.c.bf16 %v1223_v20, %v1222_v60  ;;  %v1281_v13 = vpack.c.bf16 %v1247_v51, %v1246_v56  ;;  %v1235_v27 = vmul.f32 %v3604_v28, %v3156_v55  ;;  %v1219_v54 = vsel %vm72_vm0, %v1215_v26, %v1216_v49  ;;  %v3873_v60 = vld [vmem:[#allocation6_spill] sm:$0xff] }
 0x19c   :  { %v1278_v30 = vpack.c.bf16 %v1211_v44, %v1210_v14  ;;  %v1225_v63 = vmul.f32 %v3615_v21, %v3185_v3  ;;  %v1242_v55 = vsel %vm148_vm2, %v1240_v38, %v1241_v16  ;;  %v1224_v61 = vmul.f32 %v1219_v54, %v3183_v2  ;;  %v2775_v2 = vld [vmem:[%s3832_s2 + $0x130] sm:$0xff]   ;;  %v2781_v51 = vld [vmem:[%s3832_s2 + $0x160] sm:$0xff]  }
 0x19d   :  { %1909 = vmatprep.mubr.bf16.mxu1 %v1279_v45  ;;  %1958 = vmatprep.mubr.bf16.mxu0 %v1281_v13  ;;  %v1280_v40 = vpack.c.bf16 %v1235_v27, %v1234_v29  ;;  %v1243_v4 = vsel %vm148_vm2, %v1239_v53, %v1240_v38  ;;  %v1249_v23 = vmul.f32 %v1242_v55, %v3293_v18  ;;  %v1254_v32 = vrot.slane %v3550_v9, 1  ;;  %v2783_v44 = vld [vmem:[%s3832_s2 + $0x120] sm:$0xff]   ;;  %v2785_v45 = vld [vmem:[%s3832_s2 + $0x158] sm:$0xff]   ;;  %v2793_v55 = vld [vmem:[%s3832_s2 + $0x148] sm:$0xff]  }
 0x19e   :  { %1910 = vmatmul.mubr.bf16.vlgmr.msra.gmra.mxu1 %v1278_v30  ;;  %v1248_v3 = vmul.f32 %v1243_v4, %v3291_v15  ;;  %v3639_v12 = vsel %vm35_vm1, %v1203_v34, %v1204_v24  ;;  %v1288_v25 = vpack.c.bf16 %v1225_v63, %v1224_v61  ;;  %v3646_v19 = vsel %vm35_vm1, %v1204_v24, %v1205_v52  ;;  %v2780_v34 = vld [vmem:[%s3832_s2 + $0x1a8] sm:$0xff]   ;;  %v2784_v29 = vld [vmem:[%s3832_s2 + $0x1a0] sm:$0xff]   ;;  %v2786_v13 = vld [vmem:[%s3832_s2 + $0x1d8] sm:$0xff]  }
 0x19f   :  { %1959 = vmatmul.mubr.bf16.vlgmr.msra.gmra.mxu0 %v1280_v40  ;;  %2557 = vmatpush3.bf16.msra.mxu1 %v2771_v36  ;;  %v1255_v15 = vrot.slane %v3557_v8, 1  ;;  %v1212_v49 = vmul.f32 %v3639_v12, %v3219_v22  ;;  %v3663_v16 = vsel %vm110_vm3, %v1228_v35, %v1229_v11  ;;  %v3667_v52 = vsel %vm110_vm3, %v1227_v5, %v1228_v35  ;;  %v2779_v11 = vld [vmem:[%s3832_s2 + $0x128] sm:$0xff]   ;;  %v2787_v27 = vld [vmem:[%s3832_s2 + $0x118] sm:$0xff]   ;;  %v2789_v30 = vld [vmem:[%s3832_s2 + $0x150] sm:$0xff]  }
 0x1a0   :  { %2585 = vmatpush3.bf16.msra.mxu0 %v2772_v47  ;;  %v1290_v18 = vpack.c.bf16 %v1249_v23, %v1248_v3  ;;  %2558 = vmatprep.subr.bf16.mxu1 %v2773_v58  ;;  %v1256_v38 = vrot.slane %v3548_v1, 1  ;;  %v1213_v22 = vmul.f32 %v3646_v19, %v3221_v31  ;;  %v1236_v24 = vmul.f32 %v3667_v52, %v3325_v41  ;;  %v3875_v5 = vld [vmem:[#allocation3_spill] sm:$0xff]  ;;  %v2788_v36 = vld [vmem:[%s3832_s2 + $0x198] sm:$0xff]   ;;  %v2790_v47 = vld [vmem:[%s3832_s2 + $0x1d0] sm:$0xff]  }
 0x1a1   :  { %1917 = vmatprep.mubr.bf16.mxu1 %v1288_v25  ;;  %2586 = vmatprep.subr.bf16.mxu0 %v2774_v46  ;;  %v1237_v26 = vmul.f32 %v3663_v16, %v3327_v42  ;;  %v1260_v0 = vsel %vm215_vm4, %v1254_v32, %v1255_v15  ;;  %v1270_v31 = vmul.f32 %v1220_v43, %v3342_v57  ;;  %v2782_v43 = vld [vmem:[%s3832_s2 + $0x1e0] sm:$0xff]   ;;  %v2792_v63 = vld [vmem:[%s3832_s2 + $0x190] sm:$0xff]   ;;  %v2794_v58 = vld [vmem:[%s3832_s2 + $0x1c8] sm:$0xff]   ;;  %v1257_v40 = vrot.slane %v3552_v17, 1 }
 0x1a2   :  { %1966 = vmatprep.mubr.bf16.mxu0 %v1290_v18  ;;  %v1259_v53 = vsel %vm215_vm4, %v1255_v15, %v1256_v38  ;;  %v1271_v41 = vmul.f32 %v1219_v54, %v3873_v60  ;;  %v1287_v42 = vpack.c.bf16 %v1213_v22, %v1212_v49  ;;  %v1262_v6 = vmul.f32 %v1260_v0, %v3874_v39  ;;  %v2791_v54 = vld [vmem:[%s3832_s2 + $0x110] sm:$0xff]   ;;  %v2795_v61 = vld [vmem:[%s3832_s2 + $0x108] sm:$0xff]   ;;  %v2797_v46 = vld [vmem:[%s3832_s2 + $0x140] sm:$0xff]  }
 0x1a3   :  { %2559 = vmatpush3.bf16.msra.mxu1 %v2775_v2  ;;  %v1289_v56 = vpack.c.bf16 %v1237_v26, %v1236_v24  ;;  %v1263_v20 = vmul.f32 %v1259_v53, %v3875_v5  ;;  %v2796_v4 = vld [vmem:[%s3832_s2 + $0x188] sm:$0xff]   ;;  %v2798_v3 = vld [vmem:[%s3832_s2 + $0x1c0] sm:$0xff]   ;;  %v1258_v23 = vsel %vm215_vm4, %v1256_v38, %v1257_v40  ;;  %v1261_v25 = vsel %vm215_vm4, %v1257_v40, %v1254_v32  ;;  %v3876_v15 = vld [vmem:[#allocation5_spill] sm:$0xff] }
 0x1a4   :  { %2587 = vmatpush3.bf16.msra.mxu0 %v2776_v50  ;;  %2560 = vmatprep.subr.bf16.mxu1 %v2777_v33  ;;  %v1285_v57 = vpack.c.bf16 %v1271_v41, %v1270_v31  ;;  %v2799_v2 = vld [vmem:[%s3832_s2 + $0x100] sm:$0xff]   ;;  %v1251_v18 = vmul.f32 %v3557_v8, %v3876_v15  ;;  %v2801_v50 = vld [vmem:[%s3832_s2 + $0x238] sm:$0xff]   ;;  %v1266_v33 = vmul.f32 %v3592_v62, %v3877_v10  ;;  %v3878_v49 = vld [vmem:[#allocation8_spill] sm:$0xff] }
 0x1a5   :  { %2588 = vmatprep.subr.bf16.mxu0 %v2778_v37  ;;  %v1283_v14 = vpack.c.bf16 %v1263_v20, %v1262_v6  ;;  %v2800_v35 = vld [vmem:[%s3832_s2 + $0x180] sm:$0xff]   ;;  %v1267_v37 = vmul.f32 %v3639_v12, %v3878_v49  ;;  %v3879_v32 = vld [vmem:[#allocation9_spill] sm:$0xff]  ;;  %v3881_v26 = vld [vmem:[#allocation4_spill] sm:$0xff] }
 0x1a6   :  { %1918 = vmatmul.mubr.bf16.gmra.mxu1 %v1287_v42  ;;  %v1264_v38 = vmul.f32 %v1258_v23, %v3879_v32  ;;  %v3880_v22 = vld [vmem:[#allocation10_spill] sm:$0xff]  ;;  %v3882_v53 = vld [vmem:[#allocation13_spill] sm:$0xff]  ;;  %v2802_v41 = vld [vmem:[%s3832_s2 + $0x230] sm:$0xff]  }
 0x1a7   :  { %1967 = vmatmul.mubr.bf16.gmra.mxu0 %v1289_v56  ;;  %2561 = vmatpush3.bf16.msra.mxu1 %v2779_v11  ;;  %v1265_v24 = vmul.f32 %v1261_v25, %v3880_v22  ;;  %v1250_v11 = vmul.f32 %v3550_v9, %v3881_v26  ;;  %v1272_v8 = vmul.f32 %v3615_v21, %v3882_v53  ;;  %v3883_v0 = vld [vmem:[#allocation14_spill] sm:$0xff]  ;;  %v3884_v9 = vld [vmem:[#allocation12_spill] sm:$0xff]  ;;  %v2803_v56 = vld [vmem:[%s3832_s2 + $0x228] sm:$0xff]  }
 0x1a8   :  { %2589 = vmatpush3.bf16.msra.mxu0 %v2780_v34  ;;  %2056 = vmatprep.mubr.bf16.mxu0 %v1285_v57  ;;  %v1273_v31 = vmul.f32 %v3569_v48, %v3883_v0  ;;  %v1284_v60 = vpack.c.bf16 %v1267_v37, %v1266_v33  ;;  %v1253_v21 = vmul.f32 %v3552_v17, %v3884_v9  ;;  %v3885_v48 = vld [vmem:[#allocation15_spill] sm:$0xff]  ;;  %v3886_v39 = vld [vmem:[#allocation16_spill] sm:$0xff]  ;;  %v3887_v5 = vld [vmem:[#allocation17_spill] sm:$0xff] }
 0x1a9   :  { %2007 = vmatprep.mubr.bf16.mxu1 %v1283_v14  ;;  %2562 = vmatprep.subr.bf16.mxu1 %v2781_v51  ;;  %v1282_v62 = vpack.c.bf16 %v1251_v18, %v1250_v11  ;;  %v1292_v12 = vpack.c.bf16 %v1265_v24, %v1264_v38  ;;  %v1268_v34 = vmul.f32 %v3646_v19, %v3885_v48  ;;  %v3888_v51 = vld [vmem:[#allocation18_spill] sm:$0xff] }
 0x1aa   :  { %2590 = vmatprep.subr.bf16.mxu0 %v2782_v43  ;;  %v1294_v42 = vpack.c.bf16 %v1273_v31, %v1272_v8  ;;  %v1269_v6 = vmul.f32 %v3579_v59, %v3886_v39  ;;  %v1274_v20 = vmul.f32 %v3604_v28, %v3887_v5  ;;  %v1275_v57 = vmul.f32 %v3667_v52, %v3888_v51  ;;  %v3889_v43 = vld [vmem:[#allocation11_spill] sm:$0xff]  ;;  %v2804_v59 = vld [vmem:[%s3832_s2 + $0x220] sm:$0xff]   ;;  %v2805_v28 = vld [vmem:[%s3832_s2 + $0x218] sm:$0xff]  }
 0x1ab   :  { %2563 = vmatpush3.bf16.msra.mxu1 %v2783_v44  ;;  %v1252_v17 = vmul.f32 %v3548_v1, %v3889_v43  ;;  %v2806_v1 = vld [vmem:[%s3832_s2 + $0x210] sm:$0xff]   ;;  %v2807_v52 = vld [vmem:[%s3832_s2 + $0x208] sm:$0xff]   ;;  %v2275_v53 = vld [vmem:[%s3833_s3 + $0x3] ss:$0 sm:$0xff] }
 0x1ac   :  { %2591 = vmatpush3.bf16.msra.mxu0 %v2784_v29  ;;  %2564 = vmatprep.subr.bf16.mxu1 %v2785_v45  ;;  %v1293_v44 = vpack.c.bf16 %v1269_v6, %v1268_v34  ;;  %v1286_v19 = vpack.c.bf16 %v1275_v57, %v1274_v20  ;;  %v2808_v29 = vld [vmem:[%s3832_s2 + $0x200] sm:$0xff]   ;;  %v3890_v45 = vld [vmem:[#allocation20_spill] sm:$0xff] }
 0x1ad   :  { %2592 = vmatprep.subr.bf16.mxu0 %v2786_v13  ;;  %v1291_v14 = vpack.c.bf16 %v1253_v21, %v1252_v17  ;;  %v1277_v13 = vmul.f32 %v3596_v7, %v3890_v45 }
 0x1af   :  { %2565 = vmatpush3.bf16.msra.mxu1 %v2787_v27  ;;  %v3891_v27 = vld [vmem:[#allocation19_spill] sm:$0xff] }
 0x1b0   :  { %2593 = vmatpush3.bf16.msra.mxu0 %v2788_v36  ;;  %2566 = vmatprep.subr.bf16.mxu1 %v2789_v30  ;;  %v1276_v36 = vmul.f32 %v3663_v16, %v3891_v27 }
 0x1b1   :  { %2594 = vmatprep.subr.bf16.mxu0 %v2790_v47 }
 0x1b2   :  { %v1295_v30 = vpack.c.bf16 %v1277_v13, %v1276_v36 }
 0x1b3   :  { %2567 = vmatpush3.bf16.msra.mxu1 %v2791_v54 }
 0x1b4   :  { %2595 = vmatpush3.bf16.msra.mxu0 %v2792_v63  ;;  %2568 = vmatprep.subr.bf16.mxu1 %v2793_v55 }
 0x1b5   :  { %2596 = vmatprep.subr.bf16.mxu0 %v2794_v58 }
 0x1b7   :  { %2569 = vmatpush3.bf16.msra.mxu1 %v2795_v61 }
 0x1b8   :  { %2597 = vmatpush3.bf16.msra.mxu0 %v2796_v4  ;;  %2570 = vmatprep.subr.bf16.mxu1 %v2797_v46 }
 0x1b9   :  { %2598 = vmatprep.subr.bf16.mxu0 %v2798_v3 }
 0x1bb   :  { %2571 = vmatpush3.bf16.msra.mxu1 %v2799_v2 }
 0x1bc   :  { %2599 = vmatpush3.bf16.msra.mxu0 %v2800_v35  ;;  %2642 = vmatprep.subr.bf16.mxu1 %v2801_v50 }
 0x1be   :  { %2008 = vmatmul.mubr.bf16.vlgmr.msra.gmra.mxu1 %v1282_v62 }
 0x1bf   :  { %2057 = vmatmul.mubr.bf16.vlgmr.msra.gmra.mxu0 %v1284_v60  ;;  %2015 = vmatprep.mubr.bf16.mxu1 %v1292_v12 }
 0x1c0   :  { %2064 = vmatprep.mubr.bf16.mxu0 %v1294_v42  ;;  %2643 = vmatpush3.bf16.msra.mxu1 %v2801_v50 }
 0x1c1   :  { %2644 = vmatprep.subr.bf16.mxu1 %v2802_v41 }
 0x1c4   :  { %2645 = vmatpush3.bf16.msra.mxu1 %v2802_v41 }
 0x1c5   :  { %2646 = vmatprep.subr.bf16.mxu1 %v2803_v56 }
 0x1c6   :  { %2016 = vmatmul.mubr.bf16.gmra.mxu1 %v1291_v14 }
 0x1c7   :  { %2065 = vmatmul.mubr.bf16.gmra.mxu0 %v1293_v44  ;;  %2658 = vmatprep.mubr.bf16.mxu1 %v1286_v19 }
 0x1c8   :  { %2647 = vmatpush3.bf16.msra.mxu1 %v2803_v56 }
 0x1c9   :  { %2648 = vmatprep.subr.bf16.mxu1 %v2804_v59 }
 0x1cc   :  { %2649 = vmatpush3.bf16.msra.mxu1 %v2804_v59 }
 0x1cd   :  { %2650 = vmatprep.subr.bf16.mxu1 %v2805_v28 }
 0x1d0   :  { %2651 = vmatpush3.bf16.msra.mxu1 %v2805_v28 }
 0x1d1   :  { %2652 = vmatprep.subr.bf16.mxu1 %v2806_v1 }
 0x1d4   :  { %2653 = vmatpush3.bf16.msra.mxu1 %v2806_v1 }
 0x1d5   :  { %2654 = vmatprep.subr.bf16.mxu1 %v2807_v52 }
 0x1d8   :  { %2655 = vmatpush3.bf16.msra.mxu1 %v2807_v52 }
 0x1d9   :  { %2656 = vmatprep.subr.bf16.mxu1 %v2808_v29 }
 0x1dc   :  { %2657 = vmatpush3.bf16.msra.mxu1 %v2808_v29 }
 0x1df   :  { %2659 = vmatmul.mubr.bf16.vlgmr.msra.gmra.mxu1 %v1295_v30 }
 0x25e   :  { %v2516_v47 = vpop.f32.mrf.mxu1 }
 0x25f   :  { %v2544_v54 = vpop.f32.mrf.mxu0 }
 0x260   :  { %v2517_v63 = vpop.f32.mrf.mxu1 }
 0x261   :  { %v2545_v55 = vpop.f32.mrf.mxu0  ;;  %v2518_v26 = vadd.f32 %v2517_v63, %v2516_v47 }
 0x262   :  { %v2519_v58 = vpop.f32.mrf.mxu1  ;;  %v2546_v9 = vadd.f32 %v2545_v55, %v2544_v54 }
 0x263   :  { %v2547_v40 = vpop.f32.mrf.mxu0  ;;  %v1912_v62 = vadd.f32 %v2518_v26, %v2275_v53 }
 0x264   :  { %v2520_v61 = vpop.f32.mrf.mxu1 }
 0x265   :  { %v2548_v4 = vpop.f32.mrf.mxu0  ;;  %v2521_v12 = vadd.f32 %v2520_v61, %v2519_v58  ;;  %v1961_v6 = vadd.f32 %v2546_v9, %v1912_v62 }
 0x266   :  { %v2522_v46 = vpop.f32.mrf.mxu1  ;;  %v2549_v43 = vadd.f32 %v2548_v4, %v2547_v40  ;;  %v2348_v40 = vld [vmem:[%s3833_s3 + $0x4] ss:$0 sm:$0xff] }
 0x267   :  { %v2550_v3 = vpop.f32.mrf.mxu0  ;;  %v1915_v5 = vadd.f32 %v2521_v12, %v2275_v53 }
 0x268   :  { %v2523_v23 = vpop.f32.mrf.mxu1 }
 0x269   :  { %v2551_v25 = vpop.f32.mrf.mxu0  ;;  %v2524_v24 = vadd.f32 %v2523_v23, %v2522_v46  ;;  %v1964_v28 = vadd.f32 %v2549_v43, %v1915_v5 }
 0x26a   :  { %v2525_v7 = vpop.f32.mrf.mxu1  ;;  %v2552_v41 = vadd.f32 %v2551_v25, %v2550_v3 }
 0x26b   :  { %v2553_v2 = vpop.f32.mrf.mxu0  ;;  %v1920_v0 = vadd.f32 %v2524_v24, %v2275_v53 }
 0x26c   :  { %v2526_v35 = vpop.f32.mrf.mxu1 }
 0x26d   :  { %v2554_v15 = vpop.f32.mrf.mxu0  ;;  %v2527_v31 = vadd.f32 %v2526_v35, %v2525_v7  ;;  %v1969_v48 = vadd.f32 %v2552_v41, %v1920_v0  ;;  %v2349_v35 = vld [vmem:[%s3833_s3 + $0x5] ss:$0 sm:$0xff] }
 0x26e   :  { %v2555_v20 = vadd.f32 %v2554_v15, %v2553_v2 }
 0x26f   :  { %v1923_v34 = vadd.f32 %v2527_v31, %v2275_v53 }
 0x271   :  { %v1972_v17 = vadd.f32 %v2555_v20, %v1923_v34 }
 0x27e   :  { %v2572_v16 = vpop.f32.mrf.mxu1 }
 0x27f   :  { %v2600_v50 = vpop.f32.mrf.mxu0 }
 0x280   :  { %v2573_v18 = vpop.f32.mrf.mxu1 }
 0x281   :  { %v2601_v33 = vpop.f32.mrf.mxu0  ;;  %v2574_v39 = vadd.f32 %v2573_v18, %v2572_v16 }
 0x282   :  { %v2575_v10 = vpop.f32.mrf.mxu1  ;;  %v2602_v1 = vadd.f32 %v2601_v33, %v2600_v50 }
 0x283   :  { %v2603_v37 = vpop.f32.mrf.mxu0  ;;  %v2010_v14 = vadd.f32 %v2574_v39, %v1961_v6 }
 0x284   :  { %v2576_v49 = vpop.f32.mrf.mxu1 }
 0x285   :  { %v2604_v38 = vpop.f32.mrf.mxu0  ;;  %v2577_v44 = vadd.f32 %v2576_v49, %v2575_v10  ;;  %v2059_v30 = vadd.f32 %v2602_v1, %v2010_v14 }
 0x286   :  { %v2578_v32 = vpop.f32.mrf.mxu1  ;;  %v2605_v54 = vadd.f32 %v2604_v38, %v2603_v37 }
 0x287   :  { %v2606_v11 = vpop.f32.mrf.mxu0  ;;  %v2013_v13 = vadd.f32 %v2577_v44, %v1964_v28 }
 0x288   :  { %v2579_v22 = vpop.f32.mrf.mxu1 }
 0x289   :  { %v2607_v60 = vpop.f32.mrf.mxu0  ;;  %v2580_v42 = vadd.f32 %v2579_v22, %v2578_v32  ;;  %v2062_v3 = vadd.f32 %v2605_v54, %v2013_v13 }
 0x28a   :  { %v2581_v8 = vpop.f32.mrf.mxu1  ;;  %v2608_v19 = vadd.f32 %v2607_v60, %v2606_v11 }
 0x28b   :  { %v2609_v56 = vpop.f32.mrf.mxu0  ;;  %v2018_v51 = vadd.f32 %v2580_v42, %v1969_v48 }
 0x28c   :  { %v2582_v21 = vpop.f32.mrf.mxu1 }
 0x28d   :  { %v2583_v57 = vadd.f32 %v2582_v21, %v2581_v8  ;;  %v2610_v59 = vpop.f32.mrf.mxu0  ;;  %v2067_v29 = vadd.f32 %v2608_v19, %v2018_v51 }
 0x28e   :  { %v2611_v27 = vadd.f32 %v2610_v59, %v2609_v56 }
 0x28f   :  { %v2021_v52 = vadd.f32 %v2583_v57, %v1972_v17 }
 0x291   :  { %v2070_v58 = vadd.f32 %v2611_v27, %v2021_v52 }
 0x29f   :  { %v2660_v45 = vpop.f32.mrf.mxu1 }
 0x2a0   :  { %v2116_v36 = vadd.f32 %v2660_v45, %v2067_v29 }
 0x2a1   :  { %v2107_v47 = vpop.f32.mrf.mxu1 }
 0x2a2   :  { %v2124_v63 = vmax.f32 %v2116_v36, 0.0  ;;  %v2108_v55 = vadd.f32 %v2107_v47, %v2059_v30 }
 0x2a3   :  { %v2661_v61 = vpop.f32.mrf.mxu1 }
 0x2a4   :  { %v2122_v4 = vmax.f32 %v2108_v55, 0.0  ;;  %v2119_v46 = vadd.f32 %v2661_v61, %v2070_v58  ;;  %v2133_v25 = vmul.f32 %v2348_v40, %v2124_v63 }
 0x2a5   :  { %v2110_v23 = vpop.f32.mrf.mxu1 }
 0x2a6   :  { %v2125_v7 = vmax.f32 %v2119_v46, 0.0  ;;  %v2111_v2 = vadd.f32 %v2110_v23, %v2062_v3  ;;  %v2131_v16 = vmul.f32 %v2348_v40, %v2122_v4  ;;  %v2142_v50 = vadd.f32 %v2349_v35, %v2133_v25 }
 0x2a8   :  { %v2134_v15 = vmul.f32 %v2348_v40, %v2125_v7  ;;  %v2123_v18 = vmax.f32 %v2111_v2, 0.0  ;;  %v2140_v49 = vadd.f32 %v2349_v35, %v2131_v16 }
 0x2aa   :  { %v2143_v10 = vadd.f32 %v2349_v35, %v2134_v15  ;;  %v2132_v33 = vmul.f32 %v2348_v40, %v2123_v18 }
 0x2ac   :  { %v2374_v37 = vpack.c.bf16 %v2143_v10, %v2142_v50  ;;  %v2141_v32 = vadd.f32 %v2349_v35, %v2132_v33 }
 0x2ae   :  { %2377 = vst [vmem:[%s3834_s5 + $0x8] sm:$0xff] %v2374_v37   ;;  %v2369_v38 = vpack.c.bf16 %v2141_v32, %v2140_v49 }
 0x2b0   :  { %2370 = vst [vmem:[%s3834_s5] sm:$0xff] %v2369_v38  }

// kernel: film_forward.11
= control target key start
LH: loop header
LB: loop body
LE: loop exit
PB: predicated region body
PF: predicated region fallthrough
CT: control target
= control target key end

     0   :  { %v1750_v1 = vmov 0   ;;  %s2347_s1 = inlined_call_operand.vmem [shape: bf16[128,128], index: 1, kind: input, shape index: {}]   ;;  %s2348_s0 = inlined_call_operand.vmem [shape: bf16[32,128], index: 0, kind: input, shape index: {}]   ;;  %s2349_s3 = inlined_call_operand.vmem [shape: f32[9,32,1], index: 3, kind: input, shape index: {}]   ;;  %s2350_s4 = inlined_call_operand.vmem [shape: bf16[1152,128], index: 4, kind: input, shape index: {}]   ;;  %s2351_s2 = inlined_call_operand.vmem [shape: f32[32,128], index: 2, kind: input, shape index: {}]   ;;  %s2352_s5 = inlined_call_operand.vmem [shape: f32[2,32,128], index: 5, kind: input, shape index: {}]   ;;  %s2353_s6 = inlined_call_operand.vmem [shape: bf16[32,128], index: 6, kind: output, shape index: {}]  }
   0x1   :  { %v1668_v0 = vld [vmem:[%s2347_s1 + $0x38] sm:$0xff]   ;;  %1667 = vset.pattern.permute.xlu1 %v1750_v1  ;;  %1666 = vset.pattern.permute.xlu0 %v1750_v1  ;;  %v1669_v2 = vld [vmem:[%s2347_s1 + $0x30] sm:$0xff]   ;;  %v1670_v3 = vld [vmem:[%s2347_s1 + $0x28] sm:$0xff]  }
   0x2   :  { %1625 = vmatprep.subr.bf16.mxu0 %v1668_v0  ;;  %v1671_v4 = vld [vmem:[%s2347_s1 + $0x20] sm:$0xff]   ;;  %v1672_v8 = vld [vmem:[%s2347_s1 + $0x18] sm:$0xff]   ;;  %v1367_v9 = vld [vmem:[%s2349_s3 + $0x28] sm:$0xff] }
   0x3   :  { %1626 = vmatpush3.bf16.msra.mxu0 %v1668_v0  ;;  %v1676_v5 = vld [vmem:[%s2348_s0] sm:$0xff]   ;;  %v173_v10 = vld [vmem:[%s2349_s3 + $0x8] sm:$0xff]  ;;  %v1673_v11 = vld [vmem:[%s2347_s1 + $0x10] sm:$0xff]  }
   0x4   :  { %1627 = vmatprep.subr.bf16.mxu0 %v1669_v2  ;;  %1641 = vmatprep.mubr.bf16.mxu0 %v1676_v5  ;;  %v1366_v6 = vld [vmem:[%s2349_s3 + $0x20] sm:$0xff]  ;;  %v1375_v13 = vld [vmem:[%s2349_s3 + $0x68] sm:$0xff]  ;;  %v1368_v18 = vld [vmem:[%s2349_s3 + $0x30] sm:$0xff] }
   0x5   :  { %v172_v7 = vld [vmem:[%s2349_s3] sm:$0xff]  ;;  %216 = vperm.xlu0 %1666, %v1366_v6   ;;  %v1674_v14 = vld [vmem:[%s2347_s1 + $0x8] sm:$0xff]   ;;  %v1369_v19 = vld [vmem:[%s2349_s3 + $0x38] sm:$0xff] }
   0x6   :  { %178 = vperm.xlu1 %1667, %v172_v7   ;;  %v1374_v12 = vld [vmem:[%s2349_s3 + $0x60] sm:$0xff]  ;;  %v1371_v16 = vld [vmem:[%s2349_s3 + $0x48] sm:$0xff]  ;;  %v174_v20 = vld [vmem:[%s2349_s3 + $0x10] sm:$0xff] }
   0x7   :  { %1628 = vmatpush3.bf16.msra.mxu0 %v1669_v2  ;;  %v1370_v15 = vld [vmem:[%s2349_s3 + $0x40] sm:$0xff]  ;;  %v175_v21 = vld [vmem:[%s2349_s3 + $0x18] sm:$0xff]  ;;  %v1677_v22 = vld [vmem:[%s2348_s0 + $0x8] sm:$0xff]  }
   0x8   :  { %1629 = vmatprep.subr.bf16.mxu0 %v1670_v3  ;;  %v1675_v17 = vld [vmem:[%s2347_s1] sm:$0xff]   ;;  %v1383_v24 = vld [vmem:[%s2349_s3 + $0xa8] sm:$0xff]  ;;  %v1376_v27 = vld [vmem:[%s2349_s3 + $0x70] sm:$0xff] }
   0x9   :  { %221 = vperm.xlu0 %1666, %v1367_v9   ;;  %v1382_v23 = vld [vmem:[%s2349_s3 + $0xa0] sm:$0xff]  ;;  %v1379_v26 = vld [vmem:[%s2349_s3 + $0x88] sm:$0xff]  ;;  %v1377_v28 = vld [vmem:[%s2349_s3 + $0x78] sm:$0xff] }
   0xa   :  { %183 = vperm.xlu1 %1667, %v173_v10   ;;  %v1378_v25 = vld [vmem:[%s2349_s3 + $0x80] sm:$0xff]  ;;  %v1372_v29 = vld [vmem:[%s2349_s3 + $0x50] sm:$0xff]  ;;  %v1373_v30 = vld [vmem:[%s2349_s3 + $0x58] sm:$0xff] }
   0xb   :  { %1630 = vmatpush3.bf16.msra.mxu0 %v1670_v3  ;;  %v1390_v31 = vld [vmem:[%s2349_s3 + $0xe0] sm:$0xff]  ;;  %v1391_v32 = vld [vmem:[%s2349_s3 + $0xe8] sm:$0xff]  ;;  %v1678_v35 = vld [vmem:[%s2350_s4 + $0x78] sm:$0xff]  }
   0xc   :  { %1631 = vmatprep.subr.bf16.mxu0 %v1671_v4  ;;  %v1386_v33 = vld [vmem:[%s2349_s3 + $0xc0] sm:$0xff]  ;;  %v1387_v34 = vld [vmem:[%s2349_s3 + $0xc8] sm:$0xff]  ;;  %v1679_v36 = vld [vmem:[%s2350_s4 + $0xf8] sm:$0xff]   ;;  %1503 = vmatprep.subr.bf16.mxu1 %v1678_v35 }
   0xd   :  { %292 = vperm.xlu0 %1666, %v1374_v12   ;;  %v1384_v37 = vld [vmem:[%s2349_s3 + $0xb0] sm:$0xff]  ;;  %v1680_v38 = vld [vmem:[%s2350_s4 + $0x38] sm:$0xff]   ;;  %v1686_v47 = vld [vmem:[%s2350_s4 + $0x68] sm:$0xff]  }
   0xe   :  { %297 = vperm.xlu1 %1667, %v1375_v13   ;;  %v1385_v39 = vld [vmem:[%s2349_s3 + $0xb8] sm:$0xff]  ;;  %1504 = vmatpush3.bf16.msra.mxu1 %v1680_v38  ;;  %v1682_v41 = vld [vmem:[%s2350_s4 + $0x70] sm:$0xff]   ;;  %v1687_v48 = vld [vmem:[%s2350_s4 + $0xe8] sm:$0xff]  }
   0xf   :  { %1632 = vmatpush3.bf16.msra.mxu0 %v1671_v4  ;;  %v1681_v40 = vld [vmem:[%s2350_s4 + $0xb8] sm:$0xff]   ;;  %v1683_v42 = vld [vmem:[%s2350_s4 + $0xf0] sm:$0xff]   ;;  %1505 = vmatprep.subr.bf16.mxu1 %v1682_v41  ;;  %v1688_v50 = vld [vmem:[%s2350_s4 + $0x28] sm:$0xff]  }
  0x10   :  { %1633 = vmatprep.subr.bf16.mxu0 %v1672_v8  ;;  %v1380_v43 = vld [vmem:[%s2349_s3 + $0x90] sm:$0xff]  ;;  %v1381_v45 = vld [vmem:[%s2349_s3 + $0x98] sm:$0xff]  ;;  %v1689_v52 = vld [vmem:[%s2350_s4 + $0xa8] sm:$0xff]  }
  0x11   :  { %254 = vperm.xlu0 %1666, %v1370_v15   ;;  %v1684_v44 = vld [vmem:[%s2350_s4 + $0x30] sm:$0xff]   ;;  %v1393_v51 = vld [vmem:[%s2349_s3 + $0xf8] sm:$0xff]  ;;  %v1690_v53 = vld [vmem:[%s2350_s4 + $0x60] sm:$0xff]  }
  0x12   :  { %259 = vperm.xlu1 %1667, %v1371_v16   ;;  %v1685_v46 = vld [vmem:[%s2350_s4 + $0xb0] sm:$0xff]   ;;  %1506 = vmatpush3.bf16.msra.mxu1 %v1684_v44  ;;  %v1691_v54 = vld [vmem:[%s2350_s4 + $0xe0] sm:$0xff]   ;;  %v1389_v58 = vld [vmem:[%s2349_s3 + $0xd8] sm:$0xff] }
  0x13   :  { %1634 = vmatpush3.bf16.msra.mxu0 %v1672_v8  ;;  %v1392_v49 = vld [vmem:[%s2349_s3 + $0xf0] sm:$0xff]  ;;  %1507 = vmatprep.subr.bf16.mxu1 %v1686_v47  ;;  %v1692_v56 = vld [vmem:[%s2350_s4 + $0x20] sm:$0xff]   ;;  %v1395_v60 = vld [vmem:[%s2349_s3 + $0x108] sm:$0xff] }
  0x14   :  { %1635 = vmatprep.subr.bf16.mxu0 %v1673_v11  ;;  %v1388_v55 = vld [vmem:[%s2349_s3 + $0xd0] sm:$0xff]  ;;  %v1693_v57 = vld [vmem:[%s2350_s4 + $0xa0] sm:$0xff]   ;;  %v1397_v62 = vld [vmem:[%s2349_s3 + $0x118] sm:$0xff] }
  0x15   :  { %226 = vperm.xlu0 %1666, %v1368_v18   ;;  %v1394_v59 = vld [vmem:[%s2349_s3 + $0x100] sm:$0xff]  ;;  %v1396_v61 = vld [vmem:[%s2349_s3 + $0x110] sm:$0xff]  ;;  %v1694_v63 = vld [vmem:[%s2350_s4 + $0x58] sm:$0xff]  }
  0x16   :  { %231 = vperm.xlu1 %1667, %v1369_v19   ;;  %1508 = vmatpush3.bf16.msra.mxu1 %v1688_v50  ;;  %v1695_v0 = vld [vmem:[%s2350_s4 + $0xd8] sm:$0xff]   ;;  %v1698_v3 = vld [vmem:[%s2350_s4 + $0x50] sm:$0xff]   ;;  %v1702_v7 = vld [vmem:[%s2350_s4 + $0x48] sm:$0xff]  }
  0x17   :  { %1636 = vmatpush3.bf16.msra.mxu0 %v1673_v11  ;;  %1509 = vmatprep.subr.bf16.mxu1 %v1690_v53  ;;  %v1696_v1 = vld [vmem:[%s2350_s4 + $0x18] sm:$0xff]   ;;  %v1699_v4 = vld [vmem:[%s2350_s4 + $0xd0] sm:$0xff]   ;;  %v1703_v8 = vld [vmem:[%s2350_s4 + $0xc8] sm:$0xff]  }
  0x18   :  { %1637 = vmatprep.subr.bf16.mxu0 %v1674_v14  ;;  %v1697_v2 = vld [vmem:[%s2350_s4 + $0x98] sm:$0xff]   ;;  %v1700_v5 = vld [vmem:[%s2350_s4 + $0x10] sm:$0xff]   ;;  %v1704_v9 = vld [vmem:[%s2350_s4 + $0x8] sm:$0xff]  }
  0x19   :  { %188 = vperm.xlu0 %1666, %v174_v20   ;;  %v1701_v6 = vld [vmem:[%s2350_s4 + $0x90] sm:$0xff]   ;;  %v1705_v10 = vld [vmem:[%s2350_s4 + $0x88] sm:$0xff]   ;;  %v1706_v11 = vld [vmem:[%s2350_s4 + $0x40] sm:$0xff]  }
  0x1a   :  { %193 = vperm.xlu1 %1667, %v175_v21   ;;  %1510 = vmatpush3.bf16.msra.mxu1 %v1692_v56  ;;  %v1707_v12 = vld [vmem:[%s2350_s4 + $0xc0] sm:$0xff]   ;;  %v1710_v15 = vld [vmem:[%s2350_s4 + $0x178] sm:$0xff]   ;;  %v45_v41 = vld [vmem:[%s2351_s2 + $0x8] sm:$0xff] }
  0x1b   :  { %1638 = vmatpush3.bf16.msra.mxu0 %v1674_v14  ;;  %1511 = vmatprep.subr.bf16.mxu1 %v1694_v63  ;;  %v1708_v13 = vld [vmem:[%s2350_s4] sm:$0xff]   ;;  %v1711_v16 = vld [vmem:[%s2350_s4 + $0x1f8] sm:$0xff]  }
  0x1c   :  { %1639 = vmatprep.subr.bf16.mxu0 %v1675_v17  ;;  %v1709_v14 = vld [vmem:[%s2350_s4 + $0x80] sm:$0xff]   ;;  %v47_v35 = vld [vmem:[%s2351_s2 + $0x18] sm:$0xff] }
  0x1d   :  { %359 = vperm.xlu0 %1666, %v1382_v23  }
  0x1e   :  { %364 = vperm.xlu1 %1667, %v1383_v24   ;;  %1512 = vmatpush3.bf16.msra.mxu1 %v1696_v1 }
  0x1f   :  { %1640 = vmatpush3.bf16.msra.mxu0 %v1675_v17  ;;  %1513 = vmatprep.subr.bf16.mxu1 %v1698_v3 }
  0x20   :  { %1531 = vmatprep.subr.bf16.mxu0 %v1679_v36 }
  0x21   :  { %321 = vperm.xlu0 %1666, %v1378_v25  }
  0x22   :  { %1642 = vmatmul.mubr.bf16.vlgmr.msra.gmra.mxu0 %v1677_v22  ;;  %326 = vperm.xlu1 %1667, %v1379_v26  }
  0x23   :  { %1532 = vmatpush3.bf16.msra.mxu0 %v1681_v40  ;;  %1514 = vmatpush3.bf16.msra.mxu1 %v1700_v5 }
  0x24   :  { %1533 = vmatprep.subr.bf16.mxu0 %v1683_v42  ;;  %1515 = vmatprep.subr.bf16.mxu1 %v1702_v7 }
  0x25   :  { %302 = vperm.xlu0 %1666, %v1376_v27  }
  0x26   :  { %307 = vperm.xlu1 %1667, %v1377_v28  }
  0x27   :  { %1534 = vmatpush3.bf16.msra.mxu0 %v1685_v46  ;;  %1516 = vmatpush3.bf16.msra.mxu1 %v1704_v9 }
  0x28   :  { %1535 = vmatprep.subr.bf16.mxu0 %v1687_v48  ;;  %1517 = vmatprep.subr.bf16.mxu1 %v1706_v11 }
  0x29   :  { %264 = vperm.xlu0 %1666, %v1372_v29  }
  0x2a   :  { %269 = vperm.xlu1 %1667, %v1373_v30  }
  0x2b   :  { %1536 = vmatpush3.bf16.msra.mxu0 %v1689_v52  ;;  %1518 = vmatpush3.bf16.msra.mxu1 %v1708_v13 }
  0x2c   :  { %1537 = vmatprep.subr.bf16.mxu0 %v1691_v54  ;;  %1559 = vmatprep.subr.bf16.mxu1 %v1710_v15 }
  0x2d   :  { %417 = vperm.xlu0 %1666, %v1390_v31  }
  0x2e   :  { %422 = vperm.xlu1 %1667, %v1391_v32   ;;  %v44_v32 = vld [vmem:[%s2351_s2] sm:$0xff] }
  0x2f   :  { %1538 = vmatpush3.bf16.msra.mxu0 %v1693_v57 }
  0x30   :  { %1539 = vmatprep.subr.bf16.mxu0 %v1695_v0 }
  0x31   :  { %388 = vperm.xlu0 %1666, %v1386_v33   ;;  %v165_v33 = vlaneseq }
  0x32   :  { %393 = vperm.xlu1 %1667, %v1387_v34  }
  0x33   :  { %1540 = vmatpush3.bf16.msra.mxu0 %v1697_v2 }
  0x34   :  { %1541 = vmatprep.subr.bf16.mxu0 %v1699_v4 }
  0x35   :  { %369 = vperm.xlu0 %1666, %v1384_v37   ;;  %v46_v37 = vld [vmem:[%s2351_s2 + $0x10] sm:$0xff] }
  0x36   :  { %374 = vperm.xlu1 %1667, %v1385_v39  }
  0x37   :  { %1542 = vmatpush3.bf16.msra.mxu0 %v1701_v6 }
  0x38   :  { %1543 = vmatprep.subr.bf16.mxu0 %v1703_v8 }
  0x39   :  { %331 = vperm.xlu0 %1666, %v1380_v43   ;;  %v2058_v43 = vshrl.u32 %v165_v33, 7 }
  0x3a   :  { %336 = vperm.xlu1 %1667, %v1381_v45  }
  0x3b   :  { %1544 = vmatpush3.bf16.msra.mxu0 %v1705_v10  ;;  %vm242_vm0 = vcmp.lt.s32.totalorder %v2058_v43, 3  ;;  %vm204_vm1 = vcmp.lt.s32.totalorder %v2058_v43, 4  ;;  %vm280_vm2 = vcmp.lt.s32.totalorder %v2058_v43, 1  ;;  %vm167_vm3 = vcmp.lt.s32.totalorder %v2058_v43, 5 }
  0x3c   :  { %1545 = vmatprep.subr.bf16.mxu0 %v1707_v12  ;;  %vm347_vm4 = vcmp.lt.s32.totalorder %v2058_v43, 7 }
  0x3d   :  { %427 = vperm.xlu0 %1666, %v1392_v49  }
  0x3e   :  { %432 = vperm.xlu1 %1667, %v1393_v51  }
  0x3f   :  { %1546 = vmatpush3.bf16.msra.mxu0 %v1709_v14 }
  0x40   :  { %1587 = vmatprep.subr.bf16.mxu0 %v1711_v16 }
  0x41   :  { %398 = vperm.xlu0 %1666, %v1388_v55  }
  0x42   :  { %403 = vperm.xlu1 %1667, %v1389_v58  }
  0x45   :  { %446 = vperm.xlu0 %1666, %v1394_v59  }
  0x46   :  { %451 = vperm.xlu1 %1667, %v1395_v60  }
  0x49   :  { %456 = vperm.xlu0 %1666, %v1396_v61  }
  0x4a   :  { %461 = vperm.xlu1 %1667, %v1397_v62  }
  0x80   :  { %v217_v17 = vpop.permute.xlu0 %216 }
  0x81   :  { %v2026_v18 = vpop.permute.xlu1 %178 }
  0x84   :  { %v222_v19 = vpop.permute.xlu0 %221 }
  0x85   :  { %v2028_v20 = vpop.permute.xlu1 %183 }
  0x88   :  { %v293_v21 = vpop.permute.xlu0 %292 }
  0x89   :  { %v298_v22 = vpop.permute.xlu1 %297 }
  0x8c   :  { %v255_v23 = vpop.permute.xlu0 %254 }
  0x8d   :  { %v260_v24 = vpop.permute.xlu1 %259 }
  0x90   :  { %v2030_v25 = vpop.permute.xlu0 %226 }
  0x91   :  { %v2032_v26 = vpop.permute.xlu1 %231 }
  0x94   :  { %v2034_v27 = vpop.permute.xlu0 %188 }
  0x95   :  { %v2036_v28 = vpop.permute.xlu1 %193 }
  0x98   :  { %v2038_v29 = vpop.permute.xlu0 %359 }
  0x99   :  { %v2040_v30 = vpop.permute.xlu1 %364 }
  0x9c   :  { %v2048_v36 = vpop.permute.xlu0 %321 }
  0x9d   :  { %v2053_v39 = vpop.permute.xlu1 %326 }
  0xa0   :  { %v303_v52 = vpop.permute.xlu0 %302 }
  0xa1   :  { %v308_v53 = vpop.permute.xlu1 %307 }
  0xa4   :  { %v265_v11 = vpop.permute.xlu0 %264 }
  0xa5   :  { %v270_v12 = vpop.permute.xlu1 %269 }
  0xe2   :  { %v1643_v31 = vpop.f32.mrf.mxu0 }
  0xe3   :  { %v151_v44 = vadd.f32 %v1643_v31, %v46_v37 }
  0xe4   :  { %v142_v34 = vpop.f32.mrf.mxu0 }
  0xe5   :  { %v143_v38 = vadd.f32 %v142_v34, %v44_v32  ;;  %v2069_v54 = vmax.f32 %v151_v44, 0.0  ;;  %v1712_v44 = vld [vmem:[%s2350_s4 + $0x138] sm:$0xff]  }
  0xe6   :  { %v1644_v40 = vpop.f32.mrf.mxu0 }
  0xe7   :  { %v154_v42 = vadd.f32 %v1644_v40, %v47_v35  ;;  %v2060_v45 = vmax.f32 %v143_v38, 0.0  ;;  %v202_v6 = vrot.slane %v2069_v54, 4  ;;  %v278_v16 = vrot.slane %v2069_v54, 7  ;;  %v1715_v38 = vld [vmem:[%s2350_s4 + $0x1f0] sm:$0xff]  }
  0xe8   :  { %v145_v46 = vpop.f32.mrf.mxu0  ;;  %v240_v31 = vrot.slane %v2069_v54, 5 }
  0xe9   :  { %v2062_v47 = vmax.f32 %v154_v42, 0.0  ;;  %v146_v48 = vadd.f32 %v145_v46, %v45_v41  ;;  %v238_v55 = vrot.slane %v2060_v45, 5  ;;  %v200_v57 = vrot.slane %v2060_v45, 4 }
  0xea   :  { %v276_v61 = vrot.slane %v2060_v45, 7  ;;  %v161_v10 = vrot.slane %v2060_v45, 3 }
  0xeb   :  { %v2064_v49 = vmax.f32 %v146_v48, 0.0  ;;  %v241_v50 = vrot.slane %v2062_v47, 5  ;;  %v203_v51 = vrot.slane %v2062_v47, 4  ;;  %v279_v59 = vrot.slane %v2062_v47, 7  ;;  %v418_v48 = vpop.permute.xlu0 %417 }
  0xec   :  { %v164_v62 = vrot.slane %v2062_v47, 3 }
  0xed   :  { %v239_v56 = vrot.slane %v2064_v49, 5  ;;  %v201_v58 = vrot.slane %v2064_v49, 4  ;;  %v2080_v60 = vsel %vm242_vm0, %v241_v50, %v238_v55  ;;  %v2093_v1 = vsel %vm204_vm1, %v203_v51, %v200_v57 }
  0xee   :  { %v277_v2 = vrot.slane %v2064_v49, 7  ;;  %v234_v4 = vmul.f32 %v217_v17, %v2093_v1  ;;  %v272_v7 = vmul.f32 %v255_v23, %v2080_v60  ;;  %v284_v9 = vsel %vm280_vm2, %v279_v59, %v276_v61 }
  0xef   :  { %v2087_v63 = vsel %vm242_vm0, %v238_v55, %v239_v56  ;;  %v207_v0 = vsel %vm204_vm1, %v200_v57, %v201_v58  ;;  %v310_v14 = vmul.f32 %v293_v21, %v284_v9  ;;  %v2111_v23 = vsel %vm167_vm3, %v164_v62, %v161_v10  ;;  %v1713_v21 = vld [vmem:[%s2350_s4 + $0x1b8] sm:$0xff]   ;;  %v1714_v55 = vld [vmem:[%s2350_s4 + $0x170] sm:$0xff]  }
  0xf0   :  { %v273_v3 = vmul.f32 %v260_v24, %v2087_v63  ;;  %v235_v5 = vmul.f32 %v222_v19, %v207_v0  ;;  %v283_v8 = vsel %vm280_vm2, %v276_v61, %v277_v2  ;;  %v162_v19 = vrot.slane %v2064_v49, 3 }
  0xf1   :  { %v311_v15 = vmul.f32 %v298_v22, %v283_v8  ;;  %v206_v24 = vsel %vm204_vm1, %v201_v58, %v202_v6  ;;  %v2121_v22 = vsel %vm204_vm1, %v202_v6, %v203_v51  ;;  %v281_v35 = vsel %vm280_vm2, %v278_v16, %v279_v59  ;;  %v423_v51 = vpop.permute.xlu1 %422 }
  0xf2   :  { %v469_v13 = vpack.c.bf16 %v235_v5, %v234_v4  ;;  %v470_v17 = vpack.c.bf16 %v273_v3, %v272_v7  ;;  %v2125_v33 = vsel %vm167_vm3, %v161_v10, %v162_v19  ;;  %v236_v34 = vmul.f32 %v2030_v25, %v206_v24  ;;  %v1719_v5 = vld [vmem:[%s2350_s4 + $0x1e8] sm:$0xff]   ;;  %v1716_v7 = vld [vmem:[%s2350_s4 + $0x130] sm:$0xff]  }
  0xf3   :  { %v471_v32 = vpack.c.bf16 %v311_v15, %v310_v14  ;;  %v282_v37 = vsel %vm280_vm2, %v277_v2, %v278_v16  ;;  %v196_v40 = vmul.f32 %v2026_v18, %v2111_v23  ;;  %v197_v41 = vmul.f32 %v2028_v20, %v2125_v33  ;;  %v1718_v10 = vld [vmem:[%s2350_s4 + $0x168] sm:$0xff]   ;;  %v389_v15 = vpop.permute.xlu0 %388 }
  0xf4   :  { %1094 = vmatprep.mubr.bf16.mxu1 %v469_v13  ;;  %v312_v42 = vmul.f32 %v303_v52, %v282_v37  ;;  %v2142_v25 = vsel %vm242_vm0, %v240_v31, %v241_v50  ;;  %v237_v46 = vmul.f32 %v2032_v26, %v2121_v22  ;;  %v163_v18 = vrot.slane %v2069_v54, 3  ;;  %v1726_v37 = vld [vmem:[%s2350_s4 + $0x158] sm:$0xff]  }
  0xf5   :  { %1143 = vmatprep.mubr.bf16.mxu0 %v471_v32  ;;  %v2152_v20 = vsel %vm242_vm0, %v239_v56, %v240_v31  ;;  %v468_v52 = vpack.c.bf16 %v197_v41, %v196_v40  ;;  %v313_v50 = vmul.f32 %v308_v53, %v281_v35  ;;  %v343_v57 = vrot.slane %v2060_v45, 1  ;;  %v1717_v56 = vld [vmem:[%s2350_s4 + $0x1b0] sm:$0xff]   ;;  %v394_v16 = vpop.permute.xlu1 %393  ;;  %v1725_v31 = vld [vmem:[%s2350_s4 + $0x1a0] sm:$0xff]   ;;  %v1727_v32 = vld [vmem:[%s2350_s4 + $0x1d8] sm:$0xff]  }
  0xf6   :  { %1144 = vmatmul.mubr.bf16.vlgmr.msra.gmra.mxu0 %v470_v17  ;;  %v345_v58 = vrot.slane %v2069_v54, 1  ;;  %v478_v26 = vpack.c.bf16 %v237_v46, %v236_v34  ;;  %v2164_v59 = vsel %vm167_vm3, %v162_v19, %v163_v18  ;;  %v274_v53 = vmul.f32 %v265_v11, %v2152_v20  ;;  %v1731_v40 = vld [vmem:[%s2350_s4 + $0x1d0] sm:$0xff]   ;;  %v1728_v41 = vld [vmem:[%s2350_s4 + $0x118] sm:$0xff]  }
  0xf7   :  { %1588 = vmatpush3.bf16.msra.mxu0 %v1713_v21  ;;  %v344_v61 = vrot.slane %v2064_v49, 1  ;;  %v275_v2 = vmul.f32 %v270_v12, %v2142_v25  ;;  %v435_v3 = vmul.f32 %v418_v48, %v207_v0  ;;  %1095 = vmatmul.mubr.bf16.vlgmr.msra.gmra.mxu1 %v468_v52  ;;  %v480_v4 = vpack.c.bf16 %v313_v50, %v312_v42  ;;  %v1721_v12 = vld [vmem:[%s2350_s4 + $0x1a8] sm:$0xff]   ;;  %v1724_v21 = vld [vmem:[%s2350_s4 + $0x120] sm:$0xff]   ;;  %v370_v34 = vpop.permute.xlu0 %369  ;;  %v1730_v42 = vld [vmem:[%s2350_s4 + $0x150] sm:$0xff]  }
  0xf8   :  { %1589 = vmatprep.subr.bf16.mxu0 %v1715_v38  ;;  %v436_v6 = vmul.f32 %v423_v51, %v206_v24  ;;  %1560 = vmatpush3.bf16.msra.mxu1 %v1712_v44  ;;  %v2179_v8 = vsel %vm167_vm3, %v163_v18, %v164_v62  ;;  %v198_v62 = vmul.f32 %v2034_v27, %v2164_v59  ;;  %v1723_v27 = vld [vmem:[%s2350_s4 + $0x1e0] sm:$0xff]   ;;  %v1720_v24 = vld [vmem:[%s2350_s4 + $0x128] sm:$0xff]   ;;  %v1729_v38 = vld [vmem:[%s2350_s4 + $0x198] sm:$0xff]  }
  0xf9   :  { %1102 = vmatprep.mubr.bf16.mxu1 %v478_v26  ;;  %v349_v0 = vsel %vm347_vm4, %v344_v61, %v345_v58  ;;  %v350_v9 = vsel %vm347_vm4, %v343_v57, %v344_v61  ;;  %1151 = vmatprep.mubr.bf16.mxu0 %v480_v4  ;;  %v479_v11 = vpack.c.bf16 %v275_v2, %v274_v53  ;;  %v375_v35 = vpop.permute.xlu1 %374  ;;  %v1733_v44 = vld [vmem:[%s2350_s4 + $0x190] sm:$0xff]   ;;  %v1735_v48 = vld [vmem:[%s2350_s4 + $0x1c8] sm:$0xff]   ;;  %v346_v26 = vrot.slane %v2062_v47, 1  ;;  %v1738_v2 = vld [vmem:[%s2350_s4 + $0x140] sm:$0xff]  }
  0xfa   :  { %1561 = vmatprep.subr.bf16.mxu1 %v1714_v55  ;;  %v377_v13 = vmul.f32 %v2038_v29, %v350_v9  ;;  %v378_v14 = vmul.f32 %v2040_v30, %v349_v0  ;;  %v199_v17 = vmul.f32 %v2036_v28, %v2179_v8  ;;  %v475_v19 = vpack.c.bf16 %v436_v6, %v435_v3  ;;  %v1722_v30 = vld [vmem:[%s2350_s4 + $0x160] sm:$0xff]   ;;  %v1732_v51 = vld [vmem:[%s2350_s4 + $0x110] sm:$0xff]   ;;  %v1734_v52 = vld [vmem:[%s2350_s4 + $0x148] sm:$0xff]  }
  0xfb   :  { %1590 = vmatpush3.bf16.msra.mxu0 %v1717_v56  ;;  %v332_v46 = vpop.permute.xlu0 %331  ;;  %v1737_v50 = vld [vmem:[%s2350_s4 + $0x188] sm:$0xff]   ;;  %v1739_v55 = vld [vmem:[%s2350_s4 + $0x1c0] sm:$0xff]   ;;  %v406_v4 = vmul.f32 %v389_v15, %v2125_v33  ;;  %v348_v6 = vsel %vm347_vm4, %v345_v58, %v346_v26  ;;  %v340_v9 = vmul.f32 %v2053_v39, %v2064_v49  ;;  %v1742_v58 = vld [vmem:[%s2350_s4 + $0x238] sm:$0xff]  }
  0xfc   :  { %1591 = vmatprep.subr.bf16.mxu0 %v1719_v5  ;;  %1562 = vmatpush3.bf16.msra.mxu1 %v1716_v7  ;;  %v477_v29 = vpack.c.bf16 %v199_v17, %v198_v62  ;;  %v473_v28 = vpack.c.bf16 %v378_v14, %v377_v13  ;;  %v1736_v56 = vld [vmem:[%s2350_s4 + $0x108] sm:$0xff]   ;;  %v1741_v3 = vld [vmem:[%s2350_s4 + $0x180] sm:$0xff]   ;;  %v407_v5 = vmul.f32 %v394_v16, %v2164_v59  ;;  %v1743_v39 = vld [vmem:[%s2350_s4 + $0x230] sm:$0xff]  }
  0xfd   :  { %1563 = vmatprep.subr.bf16.mxu1 %v1718_v10  ;;  %v337_v18 = vpop.permute.xlu1 %336  ;;  %v351_v7 = vsel %vm347_vm4, %v346_v26, %v343_v57  ;;  %v1740_v33 = vld [vmem:[%s2350_s4 + $0x100] sm:$0xff]   ;;  %v379_v43 = vmul.f32 %v370_v34, %v348_v6 }
  0xfe   :  { %1152 = vmatmul.mubr.bf16.gmra.mxu0 %v479_v11  ;;  %v380_v57 = vmul.f32 %v375_v35, %v351_v7  ;;  %v474_v62 = vpack.c.bf16 %v407_v5, %v406_v4  ;;  %v339_v11 = vmul.f32 %v2048_v36, %v2060_v45  ;;  %v342_v17 = vmul.f32 %v337_v18, %v2062_v47 }
  0xff   :  { %1241 = vmatprep.mubr.bf16.mxu0 %v475_v19  ;;  %1592 = vmatpush3.bf16.msra.mxu0 %v1721_v12  ;;  %v428_v53 = vpop.permute.xlu0 %427  ;;  %v1744_v19 = vld [vmem:[%s2350_s4 + $0x228] sm:$0xff]  }
 0x100   :  { %1103 = vmatmul.mubr.bf16.gmra.mxu1 %v477_v29  ;;  %1593 = vmatprep.subr.bf16.mxu0 %v1723_v27  ;;  %v437_v59 = vmul.f32 %v428_v53, %v2121_v22  ;;  %v472_v22 = vpack.c.bf16 %v340_v9, %v339_v11  ;;  %v482_v13 = vpack.c.bf16 %v380_v57, %v379_v43 }
 0x101   :  { %1564 = vmatpush3.bf16.msra.mxu1 %v1720_v24  ;;  %1192 = vmatprep.mubr.bf16.mxu1 %v473_v28  ;;  %v433_v61 = vpop.permute.xlu1 %432  ;;  %v341_v29 = vmul.f32 %v332_v46, %v2069_v54 }
 0x102   :  { %1565 = vmatprep.subr.bf16.mxu1 %v1722_v30  ;;  %v438_v0 = vmul.f32 %v433_v61, %v2093_v1  ;;  %v1745_v30 = vld [vmem:[%s2350_s4 + $0x220] sm:$0xff]  }
 0x103   :  { %1594 = vmatpush3.bf16.msra.mxu0 %v1725_v31  ;;  %v399_v10 = vpop.permute.xlu0 %398  ;;  %v1748_v31 = vld [vmem:[%s2350_s4 + $0x208] sm:$0xff]  }
 0x104   :  { %1595 = vmatprep.subr.bf16.mxu0 %v1727_v32  ;;  %v484_v12 = vpack.c.bf16 %v438_v0, %v437_v59  ;;  %v408_v14 = vmul.f32 %v399_v10, %v2179_v8  ;;  %v1749_v32 = vld [vmem:[%s2350_s4 + $0x200] sm:$0xff]  }
 0x105   :  { %1566 = vmatpush3.bf16.msra.mxu1 %v1724_v21  ;;  %v404_v1 = vpop.permute.xlu1 %403 }
 0x106   :  { %1567 = vmatprep.subr.bf16.mxu1 %v1726_v37  ;;  %v409_v15 = vmul.f32 %v404_v1, %v2111_v23  ;;  %v481_v23 = vpack.c.bf16 %v342_v17, %v341_v29 }
 0x107   :  { %1596 = vmatpush3.bf16.msra.mxu0 %v1729_v38  ;;  %v447_v16 = vpop.permute.xlu0 %446 }
 0x108   :  { %1597 = vmatprep.subr.bf16.mxu0 %v1731_v40  ;;  %v464_v27 = vmul.f32 %v447_v16, %v2087_v63  ;;  %v483_v8 = vpack.c.bf16 %v409_v15, %v408_v14  ;;  %v1746_v63 = vld [vmem:[%s2350_s4 + $0x218] sm:$0xff]  }
 0x109   :  { %1568 = vmatpush3.bf16.msra.mxu1 %v1728_v41  ;;  %v452_v36 = vpop.permute.xlu1 %451 }
 0x10a   :  { %1569 = vmatprep.subr.bf16.mxu1 %v1730_v42  ;;  %v465_v24 = vmul.f32 %v452_v36, %v2152_v20  ;;  %v1747_v20 = vld [vmem:[%s2350_s4 + $0x210] sm:$0xff]  }
 0x10b   :  { %1598 = vmatpush3.bf16.msra.mxu0 %v1733_v44  ;;  %v457_v21 = vpop.permute.xlu0 %456 }
 0x10c   :  { %1599 = vmatprep.subr.bf16.mxu0 %v1735_v48  ;;  %v476_v28 = vpack.c.bf16 %v465_v24, %v464_v27  ;;  %v466_v35 = vmul.f32 %v457_v21, %v2142_v25  ;;  %v1309_v21 = vld [vmem:[%s2352_s5 + $0x10] sm:$0xff] }
 0x10d   :  { %1570 = vmatpush3.bf16.msra.mxu1 %v1732_v51  ;;  %v462_v34 = vpop.permute.xlu1 %461 }
 0x10e   :  { %1571 = vmatprep.subr.bf16.mxu1 %v1734_v52  ;;  %v467_v37 = vmul.f32 %v462_v34, %v2080_v60 }
 0x10f   :  { %1600 = vmatpush3.bf16.msra.mxu0 %v1737_v50 }
 0x110   :  { %1601 = vmatprep.subr.bf16.mxu0 %v1739_v55  ;;  %v485_v38 = vpack.c.bf16 %v467_v37, %v466_v35 }
 0x111   :  { %1572 = vmatpush3.bf16.msra.mxu1 %v1736_v56 }
 0x112   :  { %1573 = vmatprep.subr.bf16.mxu1 %v1738_v2 }
 0x113   :  { %1602 = vmatpush3.bf16.msra.mxu0 %v1741_v3 }
 0x115   :  { %1574 = vmatpush3.bf16.msra.mxu1 %v1740_v33 }
 0x116   :  { %1242 = vmatmul.mubr.bf16.vlgmr.msra.gmra.mxu0 %v474_v62  ;;  %1645 = vmatprep.subr.bf16.mxu1 %v1742_v58 }
 0x117   :  { %1249 = vmatprep.mubr.bf16.mxu0 %v484_v12 }
 0x118   :  { %1193 = vmatmul.mubr.bf16.vlgmr.msra.gmra.mxu1 %v472_v22 }
 0x119   :  { %1200 = vmatprep.mubr.bf16.mxu1 %v482_v13  ;;  %1646 = vmatpush3.bf16.msra.mxu1 %v1742_v58 }
 0x11a   :  { %1647 = vmatprep.subr.bf16.mxu1 %v1743_v39 }
 0x11d   :  { %1648 = vmatpush3.bf16.msra.mxu1 %v1743_v39 }
 0x11e   :  { %1250 = vmatmul.mubr.bf16.gmra.mxu0 %v483_v8  ;;  %1649 = vmatprep.subr.bf16.mxu1 %v1744_v19 }
 0x120   :  { %1201 = vmatmul.mubr.bf16.gmra.mxu1 %v481_v23 }
 0x121   :  { %1650 = vmatpush3.bf16.msra.mxu1 %v1744_v19  ;;  %1661 = vmatprep.mubr.bf16.mxu1 %v476_v28 }
 0x122   :  { %1651 = vmatprep.subr.bf16.mxu1 %v1745_v30 }
 0x125   :  { %1652 = vmatpush3.bf16.msra.mxu1 %v1745_v30 }
 0x126   :  { %1653 = vmatprep.subr.bf16.mxu1 %v1746_v63 }
 0x129   :  { %1654 = vmatpush3.bf16.msra.mxu1 %v1746_v63 }
 0x12a   :  { %1655 = vmatprep.subr.bf16.mxu1 %v1747_v20 }
 0x12d   :  { %1656 = vmatpush3.bf16.msra.mxu1 %v1747_v20 }
 0x12e   :  { %1657 = vmatprep.subr.bf16.mxu1 %v1748_v31 }
 0x131   :  { %1658 = vmatpush3.bf16.msra.mxu1 %v1748_v31 }
 0x132   :  { %1659 = vmatprep.subr.bf16.mxu1 %v1749_v32 }
 0x135   :  { %1660 = vmatpush3.bf16.msra.mxu1 %v1749_v32 }
 0x138   :  { %1662 = vmatmul.mubr.bf16.vlgmr.msra.gmra.mxu1 %v485_v38 }
 0x1b6   :  { %v1547_v41 = vpop.f32.mrf.mxu0 }
 0x1b7   :  { %v1519_v40 = vpop.f32.mrf.mxu1 }
 0x1b8   :  { %v1548_v44 = vpop.f32.mrf.mxu0 }
 0x1b9   :  { %v1520_v42 = vpop.f32.mrf.mxu1  ;;  %v1549_v62 = vadd.f32 %v1548_v44, %v1547_v41 }
 0x1ba   :  { %v1550_v18 = vpop.f32.mrf.mxu0  ;;  %v1521_v1 = vadd.f32 %v1520_v42, %v1519_v40  ;;  %v1472_v40 = vld [vmem:[%s2352_s5 + $0x30] sm:$0xff]  ;;  %v1307_v42 = vld [vmem:[%s2352_s5] sm:$0xff] }
 0x1bb   :  { %v1522_v46 = vpop.f32.mrf.mxu1 }
 0x1bc   :  { %v1551_v51 = vpop.f32.mrf.mxu0  ;;  %v1146_v36 = vadd.f32 %v1549_v62, %v1521_v1 }
 0x1bd   :  { %v1523_v48 = vpop.f32.mrf.mxu1  ;;  %v1552_v15 = vadd.f32 %v1551_v51, %v1550_v18  ;;  %v1470_v51 = vld [vmem:[%s2352_s5 + $0x20] sm:$0xff] }
 0x1be   :  { %v1553_v50 = vpop.f32.mrf.mxu0  ;;  %v1524_v17 = vadd.f32 %v1523_v48, %v1522_v46 }
 0x1c0   :  { %v1525_v52 = vpop.f32.mrf.mxu1  ;;  %v1554_v26 = vpop.f32.mrf.mxu0  ;;  %v1149_v28 = vadd.f32 %v1552_v15, %v1524_v17 }
 0x1c1   :  { %v1555_v57 = vadd.f32 %v1554_v26, %v1553_v50  ;;  %v1310_v50 = vld [vmem:[%s2352_s5 + $0x18] sm:$0xff] }
 0x1c2   :  { %v1526_v55 = vpop.f32.mrf.mxu1  ;;  %v1556_v25 = vpop.f32.mrf.mxu0 }
 0x1c3   :  { %v1527_v43 = vadd.f32 %v1526_v55, %v1525_v52 }
 0x1c4   :  { %v1528_v56 = vpop.f32.mrf.mxu1  ;;  %v1557_v60 = vpop.f32.mrf.mxu0 }
 0x1c5   :  { %v1154_v22 = vadd.f32 %v1555_v57, %v1527_v43  ;;  %v1558_v13 = vadd.f32 %v1557_v60, %v1556_v25 }
 0x1c6   :  { %v1529_v53 = vpop.f32.mrf.mxu1 }
 0x1c7   :  { %v1530_v39 = vadd.f32 %v1529_v53, %v1528_v56  ;;  %v1473_v53 = vld [vmem:[%s2352_s5 + $0x38] sm:$0xff] }
 0x1c9   :  { %v1157_v24 = vadd.f32 %v1558_v13, %v1530_v39 }
 0x1d6   :  { %v1603_v2 = vpop.f32.mrf.mxu0 }
 0x1d8   :  { %v1575_v61 = vpop.f32.mrf.mxu1  ;;  %v1604_v5 = vpop.f32.mrf.mxu0 }
 0x1d9   :  { %v1605_v63 = vadd.f32 %v1604_v5, %v1603_v2  ;;  %v1471_v5 = vld [vmem:[%s2352_s5 + $0x28] sm:$0xff] }
 0x1da   :  { %v1576_v3 = vpop.f32.mrf.mxu1  ;;  %v1606_v7 = vpop.f32.mrf.mxu0 }
 0x1db   :  { %v1577_v14 = vadd.f32 %v1576_v3, %v1575_v61  ;;  %v1308_v61 = vld [vmem:[%s2352_s5 + $0x8] sm:$0xff] }
 0x1dc   :  { %v1578_v4 = vpop.f32.mrf.mxu1  ;;  %v1607_v33 = vpop.f32.mrf.mxu0 }
 0x1dd   :  { %v1195_v29 = vadd.f32 %v1577_v14, %v1146_v36  ;;  %v1608_v44 = vadd.f32 %v1607_v33, %v1606_v7 }
 0x1de   :  { %v1579_v6 = vpop.f32.mrf.mxu1  ;;  %v1609_v9 = vpop.f32.mrf.mxu0 }
 0x1df   :  { %v1580_v8 = vadd.f32 %v1579_v6, %v1578_v4  ;;  %v1244_v38 = vadd.f32 %v1605_v63, %v1195_v29 }
 0x1e0   :  { %v1581_v0 = vpop.f32.mrf.mxu1  ;;  %v1610_v10 = vpop.f32.mrf.mxu0 }
 0x1e1   :  { %v1611_v23 = vadd.f32 %v1610_v10, %v1609_v9  ;;  %v1198_v34 = vadd.f32 %v1580_v8, %v1149_v28 }
 0x1e2   :  { %v1582_v59 = vpop.f32.mrf.mxu1  ;;  %v1612_v16 = vpop.f32.mrf.mxu0 }
 0x1e3   :  { %v1583_v11 = vadd.f32 %v1582_v59, %v1581_v0  ;;  %v1247_v25 = vadd.f32 %v1608_v44, %v1198_v34 }
 0x1e4   :  { %v1584_v58 = vpop.f32.mrf.mxu1  ;;  %v1613_v30 = vpop.f32.mrf.mxu0 }
 0x1e5   :  { %v1203_v19 = vadd.f32 %v1583_v11, %v1154_v22  ;;  %v1614_v35 = vadd.f32 %v1613_v30, %v1612_v16 }
 0x1e6   :  { %v1585_v12 = vpop.f32.mrf.mxu1 }
 0x1e7   :  { %v1586_v27 = vadd.f32 %v1585_v12, %v1584_v58  ;;  %v1252_v31 = vadd.f32 %v1611_v23, %v1203_v19 }
 0x1e9   :  { %v1206_v20 = vadd.f32 %v1586_v27, %v1157_v24 }
 0x1eb   :  { %v1255_v48 = vadd.f32 %v1614_v35, %v1206_v20 }
 0x1f8   :  { %v1663_v32 = vpop.f32.mrf.mxu1 }
 0x1f9   :  { %v1301_v37 = vadd.f32 %v1663_v32, %v1252_v31 }
 0x1fa   :  { %v1292_v41 = vpop.f32.mrf.mxu1 }
 0x1fb   :  { %v1313_v46 = vmul.f32 %v1309_v21, %v1301_v37  ;;  %v1293_v18 = vadd.f32 %v1292_v41, %v1244_v38 }
 0x1fc   :  { %v1664_v52 = vpop.f32.mrf.mxu1 }
 0x1fd   :  { %v1322_v55 = vadd.f32 %v1472_v40, %v1313_v46  ;;  %v1311_v26 = vmul.f32 %v1307_v42, %v1293_v18  ;;  %v1304_v56 = vadd.f32 %v1664_v52, %v1255_v48 }
 0x1fe   :  { %v1295_v60 = vpop.f32.mrf.mxu1 }
 0x1ff   :  { %v1320_v2 = vadd.f32 %v1470_v51, %v1311_v26  ;;  %v1314_v3 = vmul.f32 %v1310_v50, %v1304_v56  ;;  %v1296_v4 = vadd.f32 %v1295_v60, %v1247_v25  ;;  %v1326_v6 = vmax.f32 %v1322_v55, 0.0 }
 0x201   :  { %v1323_v7 = vadd.f32 %v1473_v53, %v1314_v3  ;;  %v1312_v0 = vmul.f32 %v1308_v61, %v1296_v4  ;;  %v1324_v33 = vmax.f32 %v1320_v2, 0.0  ;;  %v1330_v58 = vadd.f32 %v1326_v6, %v2069_v54 }
 0x203   :  { %v1327_v59 = vmax.f32 %v1323_v7, 0.0  ;;  %v1321_v9 = vadd.f32 %v1471_v5, %v1312_v0  ;;  %v1328_v10 = vadd.f32 %v1324_v33, %v2060_v45 }
 0x205   :  { %v1331_v43 = vadd.f32 %v1327_v59, %v2062_v47  ;;  %v1325_v57 = vmax.f32 %v1321_v9, 0.0 }
 0x207   :  { %v1490_v1 = vpack.c.bf16 %v1331_v43, %v1330_v58  ;;  %v1329_v62 = vadd.f32 %v1325_v57, %v2064_v49 }
 0x209   :  { %1492 = vst [vmem:[%s2353_s6 + $0x8] sm:$0xff] %v1490_v1   ;;  %v1485_v11 = vpack.c.bf16 %v1329_v62, %v1328_v10 }
 0x20b   :  { %1486 = vst [vmem:[%s2353_s6] sm:$0xff] %v1485_v11  }

// kernel: film_forward.13
= control target key start
LH: loop header
LB: loop body
LE: loop exit
PB: predicated region body
PF: predicated region fallthrough
CT: control target
= control target key end

     0   :  { %v7955_v2 = vmov 0   ;;  %s10906_s0 = inlined_call_operand.vmem [shape: bf16[32,128], index: 0, kind: input, shape index: {}]   ;;  %s10907_s1 = inlined_call_operand.vmem [shape: bf16[128,512], index: 1, kind: input, shape index: {}]   ;;  %s10908_s2 = inlined_call_operand.vmem [shape: f32[1,512], index: 2, kind: input, shape index: {}]   ;;  %s10909_s3 = inlined_call_operand.vmem [shape: bf16[512,1024], index: 3, kind: input, shape index: {}]   ;;  %s10910_s4 = inlined_call_operand.vmem [shape: f32[1,1024], index: 4, kind: input, shape index: {}]   ;;  %s10911_s5 = inlined_call_operand.vmem [shape: bf16[1024,1024], index: 5, kind: input, shape index: {}]   ;;  %s10912_s6 = inlined_call_operand.vmem [shape: f32[1,1024], index: 6, kind: input, shape index: {}]   ;;  %s10913_s7 = inlined_call_operand.vmem [shape: bf16[1024,10], index: 7, kind: input, shape index: {}]   ;;  %s10914_s8 = inlined_call_operand.vmem [shape: f32[1,10], index: 8, kind: input, shape index: {}]   ;;  %s10915_s9 = inlined_call_operand.vmem [shape: f32[32,512], index: 9, kind: output, shape index: {0}]   ;;  %s10916_s10 = inlined_call_operand.hbm [shape: f32[2,10], index: 10, kind: output, shape index: {1}]  }
   0x1   :  { %v7817_v0 = vld [vmem:[%s10907_s1 + $0xe4] ss:$16 sps:$4 sm:$0xff]   ;;  %v7819_v1 = vld [vmem:[%s10907_s1 + $0xec] ss:$16 sps:$4 sm:$0xff]   ;;  %298 = vmatprep.mubr.bf16.mxu0 %v7955_v2  ;;  %351 = vmatprep.mubr.bf16.mxu1 %v7955_v2  ;;  %v7821_v3 = vld [vmem:[%s10907_s1 + $0xe0] ss:$16 sps:$4 sm:$0xff]  }
   0x2   :  { %266 = vmatprep.subr.bf16.mxu0 %v7817_v0  ;;  %v7822_v4 = vld [vmem:[%s10907_s1 + $0xe8] ss:$16 sps:$4 sm:$0xff]   ;;  %319 = vmatprep.subr.bf16.mxu1 %v7819_v1  ;;  %v7823_v5 = vld [vmem:[%s10907_s1 + $0xc4] ss:$16 sps:$4 sm:$0xff]   ;;  %v7825_v6 = vld [vmem:[%s10907_s1 + $0xcc] ss:$16 sps:$4 sm:$0xff]  }
   0x3   :  { %267 = vmatpush1.bf16.msra.mxu0 %v7821_v3  ;;  %320 = vmatpush1.bf16.msra.mxu1 %v7822_v4  ;;  %v7827_v7 = vld [vmem:[%s10907_s1 + $0xc0] ss:$16 sps:$4 sm:$0xff]   ;;  %v7828_v8 = vld [vmem:[%s10907_s1 + $0xc8] ss:$16 sps:$4 sm:$0xff]   ;;  %v7829_v9 = vld [vmem:[%s10907_s1 + $0xa4] ss:$16 sps:$4 sm:$0xff]  }
   0x4   :  { %268 = vmatprep.subr.bf16.mxu0 %v7823_v5  ;;  %321 = vmatprep.subr.bf16.mxu1 %v7825_v6  ;;  %v7831_v10 = vld [vmem:[%s10907_s1 + $0xac] ss:$16 sps:$4 sm:$0xff]   ;;  %v7833_v11 = vld [vmem:[%s10907_s1 + $0xa0] ss:$16 sps:$4 sm:$0xff]   ;;  %v7834_v12 = vld [vmem:[%s10907_s1 + $0xa8] ss:$16 sps:$4 sm:$0xff]  }
   0x5   :  { %v7835_v13 = vld [vmem:[%s10907_s1 + $0x84] ss:$16 sps:$4 sm:$0xff]   ;;  %v7837_v14 = vld [vmem:[%s10907_s1 + $0x8c] ss:$16 sps:$4 sm:$0xff]   ;;  %v7839_v15 = vld [vmem:[%s10907_s1 + $0x80] ss:$16 sps:$4 sm:$0xff]  }
   0x6   :  { %v7840_v16 = vld [vmem:[%s10907_s1 + $0x88] ss:$16 sps:$4 sm:$0xff]   ;;  %v7841_v17 = vld [vmem:[%s10907_s1 + $0x64] ss:$16 sps:$4 sm:$0xff]   ;;  %v7843_v18 = vld [vmem:[%s10907_s1 + $0x6c] ss:$16 sps:$4 sm:$0xff]  }
   0x7   :  { %269 = vmatpush1.bf16.msra.mxu0 %v7827_v7  ;;  %322 = vmatpush1.bf16.msra.mxu1 %v7828_v8  ;;  %v7845_v19 = vld [vmem:[%s10907_s1 + $0x60] ss:$16 sps:$4 sm:$0xff]   ;;  %v7846_v20 = vld [vmem:[%s10907_s1 + $0x68] ss:$16 sps:$4 sm:$0xff]   ;;  %v7847_v21 = vld [vmem:[%s10907_s1 + $0x44] ss:$16 sps:$4 sm:$0xff]  }
   0x8   :  { %270 = vmatprep.subr.bf16.mxu0 %v7829_v9  ;;  %323 = vmatprep.subr.bf16.mxu1 %v7831_v10  ;;  %v7849_v22 = vld [vmem:[%s10907_s1 + $0x4c] ss:$16 sps:$4 sm:$0xff]   ;;  %v7851_v23 = vld [vmem:[%s10907_s1 + $0x40] ss:$16 sps:$4 sm:$0xff]   ;;  %v7852_v24 = vld [vmem:[%s10907_s1 + $0x48] ss:$16 sps:$4 sm:$0xff]  }
   0x9   :  { %v7853_v25 = vld [vmem:[%s10907_s1 + $0x24] ss:$16 sps:$4 sm:$0xff]   ;;  %v7855_v26 = vld [vmem:[%s10907_s1 + $0x2c] ss:$16 sps:$4 sm:$0xff]   ;;  %v7857_v27 = vld [vmem:[%s10907_s1 + $0x20] ss:$16 sps:$4 sm:$0xff]  }
   0xa   :  { %v7858_v28 = vld [vmem:[%s10907_s1 + $0x28] ss:$16 sps:$4 sm:$0xff]   ;;  %v7859_v29 = vld [vmem:[%s10907_s1 + $0x4] ss:$16 sps:$4 sm:$0xff]   ;;  %v7861_v30 = vld [vmem:[%s10907_s1 + $0xc] ss:$16 sps:$4 sm:$0xff]  }
   0xb   :  { %271 = vmatpush1.bf16.msra.mxu0 %v7833_v11  ;;  %324 = vmatpush1.bf16.msra.mxu1 %v7834_v12  ;;  %v509_v31 = vld [vmem:[%s10909_s3 + $0x1c0] sm:$0xff]  ;;  %v7864_v36 = vld [vmem:[%s10907_s1 + $0x8] ss:$16 sps:$4 sm:$0xff]  }
   0xc   :  { %272 = vmatprep.subr.bf16.mxu0 %v7835_v13  ;;  %325 = vmatprep.subr.bf16.mxu1 %v7837_v14  ;;  %v513_v32 = vld [vmem:[%s10909_s3 + $0x1e0] sm:$0xff]  ;;  %v7866_v52 = vld [vmem:[%s10906_s0 + $0x8] sm:$0xff]  }
   0xd   :  { %v637_v33 = vld [vmem:[%s10909_s3 + $0x5c0] sm:$0xff]  ;;  %v6951_v37 = vcombine.high %v509_v31, %v513_v32  ;;  %v6950_v44 = vcombine.low %v509_v31, %v513_v32 }
   0xe   :  { %v641_v34 = vld [vmem:[%s10909_s3 + $0x5e0] sm:$0xff] }
   0xf   :  { %273 = vmatpush1.bf16.msra.mxu0 %v7839_v15  ;;  %326 = vmatpush1.bf16.msra.mxu1 %v7840_v16  ;;  %v7863_v35 = vld [vmem:[%s10907_s1] ss:$16 sps:$4 sm:$0xff]   ;;  %v7079_v38 = vcombine.high %v637_v33, %v641_v34  ;;  %v7078_v45 = vcombine.low %v637_v33, %v641_v34 }
  0x10   :  { %274 = vmatprep.subr.bf16.mxu0 %v7841_v17  ;;  %327 = vmatprep.subr.bf16.mxu1 %v7843_v18  ;;  %v7865_v39 = vld [vmem:[%s10906_s0] sm:$0xff]  }
  0x11   :  { %v501_v40 = vld [vmem:[%s10909_s3 + $0x180] sm:$0xff] }
  0x12   :  { %v505_v41 = vld [vmem:[%s10909_s3 + $0x1a0] sm:$0xff] }
  0x13   :  { %275 = vmatpush1.bf16.msra.mxu0 %v7845_v19  ;;  %328 = vmatpush1.bf16.msra.mxu1 %v7846_v20  ;;  %v629_v42 = vld [vmem:[%s10909_s3 + $0x580] sm:$0xff]  ;;  %v6943_v49 = vcombine.high %v501_v40, %v505_v41  ;;  %v6942_v53 = vcombine.low %v501_v40, %v505_v41 }
  0x14   :  { %276 = vmatprep.subr.bf16.mxu0 %v7847_v21  ;;  %329 = vmatprep.subr.bf16.mxu1 %v7849_v22  ;;  %v633_v43 = vld [vmem:[%s10909_s3 + $0x5a0] sm:$0xff] }
  0x15   :  { %v493_v46 = vld [vmem:[%s10909_s3 + $0x140] sm:$0xff]  ;;  %v7071_v50 = vcombine.high %v629_v42, %v633_v43  ;;  %v7070_v54 = vcombine.low %v629_v42, %v633_v43 }
  0x16   :  { %v497_v47 = vld [vmem:[%s10909_s3 + $0x160] sm:$0xff] }
  0x17   :  { %277 = vmatpush1.bf16.msra.mxu0 %v7851_v23  ;;  %330 = vmatpush1.bf16.msra.mxu1 %v7852_v24  ;;  %v621_v48 = vld [vmem:[%s10909_s3 + $0x540] sm:$0xff]  ;;  %v6935_v59 = vcombine.high %v493_v46, %v497_v47  ;;  %v6934_v61 = vcombine.low %v493_v46, %v497_v47 }
  0x18   :  { %278 = vmatprep.subr.bf16.mxu0 %v7853_v25  ;;  %331 = vmatprep.subr.bf16.mxu1 %v7855_v26  ;;  %v625_v51 = vld [vmem:[%s10909_s3 + $0x560] sm:$0xff] }
  0x19   :  { %v485_v55 = vld [vmem:[%s10909_s3 + $0x100] sm:$0xff]  ;;  %v7063_v60 = vcombine.high %v621_v48, %v625_v51  ;;  %v7062_v62 = vcombine.low %v621_v48, %v625_v51 }
  0x1a   :  { %v489_v56 = vld [vmem:[%s10909_s3 + $0x120] sm:$0xff] }
  0x1b   :  { %279 = vmatpush1.bf16.msra.mxu0 %v7857_v27  ;;  %332 = vmatpush1.bf16.msra.mxu1 %v7858_v28  ;;  %v613_v57 = vld [vmem:[%s10909_s3 + $0x500] sm:$0xff]  ;;  %v6927_v3 = vcombine.high %v485_v55, %v489_v56  ;;  %v6926_v5 = vcombine.low %v485_v55, %v489_v56 }
  0x1c   :  { %280 = vmatprep.subr.bf16.mxu0 %v7859_v29  ;;  %333 = vmatprep.subr.bf16.mxu1 %v7861_v30  ;;  %v617_v58 = vld [vmem:[%s10909_s3 + $0x520] sm:$0xff] }
  0x1d   :  { %v477_v63 = vld [vmem:[%s10909_s3 + $0xc0] sm:$0xff]  ;;  %v7055_v4 = vcombine.high %v613_v57, %v617_v58  ;;  %v7054_v6 = vcombine.low %v613_v57, %v617_v58 }
  0x1e   :  { %v481_v0 = vld [vmem:[%s10909_s3 + $0xe0] sm:$0xff] }
  0x1f   :  { %281 = vmatpush1.bf16.msra.mxu0 %v7863_v35  ;;  %334 = vmatpush1.bf16.msra.mxu1 %v7864_v36  ;;  %v605_v1 = vld [vmem:[%s10909_s3 + $0x4c0] sm:$0xff]  ;;  %v6919_v11 = vcombine.high %v477_v63, %v481_v0  ;;  %v6918_v13 = vcombine.low %v477_v63, %v481_v0 }
  0x20   :  { %2031 = vmatprep.subr.bf16.mxu0 %v6951_v37  ;;  %2072 = vmatprep.subr.bf16.mxu1 %v7079_v38  ;;  %v469_v7 = vld [vmem:[%s10909_s3 + $0x80] sm:$0xff] }
  0x21   :  { %v473_v8 = vld [vmem:[%s10909_s3 + $0xa0] sm:$0xff] }
  0x22   :  { %299 = vmatmul.mubr.bf16.vlgmr.msra.gmra.mxu0 %v7865_v39  ;;  %352 = vmatmul.mubr.bf16.vlgmr.msra.gmra.mxu1 %v7865_v39  ;;  %v597_v9 = vld [vmem:[%s10909_s3 + $0x480] sm:$0xff]  ;;  %v6911_v19 = vcombine.high %v469_v7, %v473_v8  ;;  %v6910_v21 = vcombine.low %v469_v7, %v473_v8 }
  0x23   :  { %308 = vmatprep.mubr.bf16.mxu0 %v7955_v2  ;;  %361 = vmatprep.mubr.bf16.mxu1 %v7955_v2  ;;  %v609_v2 = vld [vmem:[%s10909_s3 + $0x4e0] sm:$0xff] }
  0x24   :  { %2032 = vmatpush1.bf16.msra.mxu0 %v6950_v44  ;;  %2073 = vmatpush1.bf16.msra.mxu1 %v7078_v45  ;;  %v601_v10 = vld [vmem:[%s10909_s3 + $0x4a0] sm:$0xff]  ;;  %v7047_v12 = vcombine.high %v605_v1, %v609_v2  ;;  %v7046_v14 = vcombine.low %v605_v1, %v609_v2 }
  0x25   :  { %2033 = vmatprep.subr.bf16.mxu0 %v6943_v49  ;;  %2074 = vmatprep.subr.bf16.mxu1 %v7071_v50  ;;  %v461_v15 = vld [vmem:[%s10909_s3 + $0x40] sm:$0xff]  ;;  %v7039_v20 = vcombine.high %v597_v9, %v601_v10  ;;  %v7038_v22 = vcombine.low %v597_v9, %v601_v10 }
  0x26   :  { %v465_v16 = vld [vmem:[%s10909_s3 + $0x60] sm:$0xff] }
  0x27   :  { %v589_v17 = vld [vmem:[%s10909_s3 + $0x440] sm:$0xff]  ;;  %v6903_v27 = vcombine.high %v461_v15, %v465_v16  ;;  %v6902_v29 = vcombine.low %v461_v15, %v465_v16 }
  0x28   :  { %2034 = vmatpush1.bf16.msra.mxu0 %v6942_v53  ;;  %2075 = vmatpush1.bf16.msra.mxu1 %v7070_v54  ;;  %v593_v18 = vld [vmem:[%s10909_s3 + $0x460] sm:$0xff] }
  0x29   :  { %2035 = vmatprep.subr.bf16.mxu0 %v6935_v59  ;;  %2076 = vmatprep.subr.bf16.mxu1 %v7063_v60  ;;  %v453_v23 = vld [vmem:[%s10909_s3] sm:$0xff]  ;;  %v7031_v28 = vcombine.high %v589_v17, %v593_v18  ;;  %v7030_v30 = vcombine.low %v589_v17, %v593_v18 }
  0x2a   :  { %309 = vmatmul.mubr.bf16.gmra.mxu0 %v7866_v52  ;;  %362 = vmatmul.mubr.bf16.gmra.mxu1 %v7866_v52  ;;  %v457_v24 = vld [vmem:[%s10909_s3 + $0x20] sm:$0xff] }
  0x2b   :  { %v581_v25 = vld [vmem:[%s10909_s3 + $0x400] sm:$0xff]  ;;  %v6895_v31 = vcombine.high %v453_v23, %v457_v24  ;;  %v6894_v33 = vcombine.low %v453_v23, %v457_v24 }
  0x2c   :  { %2036 = vmatpush1.bf16.msra.mxu0 %v6934_v61  ;;  %2077 = vmatpush1.bf16.msra.mxu1 %v7062_v62  ;;  %v585_v26 = vld [vmem:[%s10909_s3 + $0x420] sm:$0xff] }
  0x2d   :  { %2037 = vmatprep.subr.bf16.mxu0 %v6927_v3  ;;  %2078 = vmatprep.subr.bf16.mxu1 %v7055_v4  ;;  %v7023_v32 = vcombine.high %v581_v25, %v585_v26  ;;  %v7022_v34 = vcombine.low %v581_v25, %v585_v26 }
  0x30   :  { %2038 = vmatpush1.bf16.msra.mxu0 %v6926_v5  ;;  %2079 = vmatpush1.bf16.msra.mxu1 %v7054_v6 }
  0x31   :  { %2039 = vmatprep.subr.bf16.mxu0 %v6919_v11  ;;  %2080 = vmatprep.subr.bf16.mxu1 %v7047_v12 }
  0x34   :  { %2040 = vmatpush1.bf16.msra.mxu0 %v6918_v13  ;;  %2081 = vmatpush1.bf16.msra.mxu1 %v7046_v14 }
  0x35   :  { %2041 = vmatprep.subr.bf16.mxu0 %v6911_v19  ;;  %2082 = vmatprep.subr.bf16.mxu1 %v7039_v20 }
  0x38   :  { %2042 = vmatpush1.bf16.msra.mxu0 %v6910_v21  ;;  %2083 = vmatpush1.bf16.msra.mxu1 %v7038_v22 }
  0x39   :  { %2043 = vmatprep.subr.bf16.mxu0 %v6903_v27  ;;  %2084 = vmatprep.subr.bf16.mxu1 %v7031_v28 }
  0x3c   :  { %2044 = vmatpush1.bf16.msra.mxu0 %v6902_v29  ;;  %2085 = vmatpush1.bf16.msra.mxu1 %v7030_v30 }
  0x3d   :  { %2045 = vmatprep.subr.bf16.mxu0 %v6895_v31  ;;  %2086 = vmatprep.subr.bf16.mxu1 %v7023_v32 }
  0x40   :  { %2046 = vmatpush1.bf16.msra.mxu0 %v6894_v33  ;;  %2087 = vmatpush1.bf16.msra.mxu1 %v7022_v34 }
  0x41   :  { %16 = vsyncpa [#allocation3], 0  ;;  %v573_v35 = vld [vmem:[%s10909_s3 + $0x3c0] sm:$0xff]  ;;  %vm444_vm0 = vcmask 1040384   ;;  %s7956_s18 = smov [#allocation2]   ;;  %vm6840_vm1 = vcmask 74752  }
  0x42   :  { %v577_v36 = vld [vmem:[%s10909_s3 + $0x3e0] sm:$0xff]  ;;  %s6850_s19 = sshll.u32 %s7956_s18, 4  ;;  %s6851_s19 = int_to_ptr.vmem [resolvable:$true] %s6850_s19 }
  0x43   :  { %v701_v37 = vld [vmem:[%s10909_s3 + $0x7c0] sm:$0xff]  ;;  %v7015_v38 = vcombine.high %v573_v35, %v577_v36  ;;  %v7014_v40 = vcombine.low %v573_v35, %v577_v36  ;;  %v8313_v35 = vld [vmem:[%s10909_s3 + $0x1c8] sm:$0xff]  ;;  %p7938_p1 = scmp.lt.s32.totalorder %s6851_s19, %s6851_s19 }
  0x44   :  { %v705_v39 = vld [vmem:[%s10909_s3 + $0x7e0] sm:$0xff]  ;;  %v8318_v36 = vld [vmem:[%s10909_s3 + $0x1e8] sm:$0xff] }
  0x45   :  { %2047 = vmatprep.subr.bf16.mxu0 %v7015_v38  ;;  %v7142_v41 = vcombine.low %v701_v37, %v705_v39  ;;  %v7143_v42 = vcombine.high %v701_v37, %v705_v39  ;;  %v565_v43 = vld [vmem:[%s10909_s3 + $0x380] sm:$0xff]  ;;  %v8323_v37 = vld [vmem:[%s10909_s3 + $0x5c8] sm:$0xff]  ;;  %v6953_v38 = vcombine.high %v8313_v35, %v8318_v36 }
  0x46   :  { %2048 = vmatpush2.bf16.msra.mxu0 %v7014_v40  ;;  %v569_v44 = vld [vmem:[%s10909_s3 + $0x3a0] sm:$0xff]  ;;  %v8330_v39 = vld [vmem:[%s10909_s3 + $0x5e8] sm:$0xff]  ;;  %v6952_v40 = vcombine.low %v8313_v35, %v8318_v36 }
  0x47   :  { %v693_v45 = vld [vmem:[%s10909_s3 + $0x780] sm:$0xff]  ;;  %2088 = vmatprep.subr.bf16.mxu1 %v7143_v42  ;;  %v7007_v46 = vcombine.high %v565_v43, %v569_v44  ;;  %v7006_v48 = vcombine.low %v565_v43, %v569_v44  ;;  %v7081_v42 = vcombine.high %v8323_v37, %v8330_v39  ;;  %v74_v43 = vlaneseq  ;;  %v490_v35 = vld [vmem:[%s10909_s3 + $0x128] sm:$0xff] }
  0x48   :  { %v697_v47 = vld [vmem:[%s10909_s3 + $0x7a0] sm:$0xff]  ;;  %2089 = vmatpush2.bf16.msra.mxu1 %v7142_v41  ;;  %v7080_v41 = vcombine.low %v8323_v37, %v8330_v39  ;;  %v614_v36 = vld [vmem:[%s10909_s3 + $0x508] sm:$0xff] }
  0x49   :  { %v7134_v49 = vcombine.low %v693_v45, %v697_v47  ;;  %v7135_v50 = vcombine.high %v693_v45, %v697_v47  ;;  %2049 = vmatprep.subr.bf16.mxu0 %v7007_v46  ;;  %v557_v51 = vld [vmem:[%s10909_s3 + $0x340] sm:$0xff]  ;;  %v8338_v44 = vshrl.u32 %v74_v43, 7  ;;  %v618_v37 = vld [vmem:[%s10909_s3 + $0x528] sm:$0xff] }
  0x4a   :  { %2050 = vmatpush2.bf16.msra.mxu0 %v7006_v48  ;;  %v561_v52 = vld [vmem:[%s10909_s3 + $0x360] sm:$0xff] }
  0x4b   :  { %2090 = vmatprep.subr.bf16.mxu1 %v7135_v50  ;;  %v685_v53 = vld [vmem:[%s10909_s3 + $0x740] sm:$0xff]  ;;  %v6999_v54 = vcombine.high %v557_v51, %v561_v52  ;;  %v6998_v56 = vcombine.low %v557_v51, %v561_v52  ;;  %v8341_v45 = vsub.s32 0, %v8338_v44  ;;  %v8344_v46 = vsub.s32 2, %v8338_v44 }
  0x4c   :  { %2091 = vmatpush2.bf16.msra.mxu1 %v7134_v49  ;;  %v689_v55 = vld [vmem:[%s10909_s3 + $0x760] sm:$0xff]  ;;  %v8350_v48 = vsub.s32 1, %v8338_v44  ;;  %v8353_v49 = vsub.s32 3, %v8338_v44 }
  0x4d   :  { %v7126_v57 = vcombine.low %v685_v53, %v689_v55  ;;  %v7127_v58 = vcombine.high %v685_v53, %v689_v55  ;;  %2051 = vmatprep.subr.bf16.mxu0 %v6999_v54  ;;  %v549_v59 = vld [vmem:[%s10909_s3 + $0x300] sm:$0xff] }
  0x4e   :  { %2052 = vmatpush2.bf16.msra.mxu0 %v6998_v56  ;;  %v553_v60 = vld [vmem:[%s10909_s3 + $0x320] sm:$0xff] }
  0x4f   :  { %2092 = vmatprep.subr.bf16.mxu1 %v7127_v58  ;;  %v677_v61 = vld [vmem:[%s10909_s3 + $0x700] sm:$0xff]  ;;  %v6991_v62 = vcombine.high %v549_v59, %v553_v60  ;;  %v6990_v0 = vcombine.low %v549_v59, %v553_v60 }
  0x50   :  { %2093 = vmatpush2.bf16.msra.mxu1 %v7126_v57  ;;  %v681_v63 = vld [vmem:[%s10909_s3 + $0x720] sm:$0xff] }
  0x51   :  { %v7118_v1 = vcombine.low %v677_v61, %v681_v63  ;;  %v7119_v2 = vcombine.high %v677_v61, %v681_v63  ;;  %2053 = vmatprep.subr.bf16.mxu0 %v6991_v62  ;;  %v541_v3 = vld [vmem:[%s10909_s3 + $0x2c0] sm:$0xff] }
  0x52   :  { %2054 = vmatpush2.bf16.msra.mxu0 %v6990_v0  ;;  %v545_v4 = vld [vmem:[%s10909_s3 + $0x2e0] sm:$0xff] }
  0x53   :  { %2094 = vmatprep.subr.bf16.mxu1 %v7119_v2  ;;  %v669_v5 = vld [vmem:[%s10909_s3 + $0x6c0] sm:$0xff]  ;;  %v6983_v6 = vcombine.high %v541_v3, %v545_v4  ;;  %v6982_v8 = vcombine.low %v541_v3, %v545_v4 }
  0x54   :  { %2095 = vmatpush2.bf16.msra.mxu1 %v7118_v1  ;;  %v673_v7 = vld [vmem:[%s10909_s3 + $0x6e0] sm:$0xff] }
  0x55   :  { %v7110_v9 = vcombine.low %v669_v5, %v673_v7  ;;  %v7111_v10 = vcombine.high %v669_v5, %v673_v7  ;;  %2055 = vmatprep.subr.bf16.mxu0 %v6983_v6  ;;  %v533_v11 = vld [vmem:[%s10909_s3 + $0x280] sm:$0xff] }
  0x56   :  { %2056 = vmatpush2.bf16.msra.mxu0 %v6982_v8  ;;  %v537_v12 = vld [vmem:[%s10909_s3 + $0x2a0] sm:$0xff] }
  0x57   :  { %2096 = vmatprep.subr.bf16.mxu1 %v7111_v10  ;;  %v661_v13 = vld [vmem:[%s10909_s3 + $0x680] sm:$0xff]  ;;  %v6975_v14 = vcombine.high %v533_v11, %v537_v12  ;;  %v6974_v16 = vcombine.low %v533_v11, %v537_v12 }
  0x58   :  { %2097 = vmatpush2.bf16.msra.mxu1 %v7110_v9  ;;  %v665_v15 = vld [vmem:[%s10909_s3 + $0x6a0] sm:$0xff] }
  0x59   :  { %v7102_v17 = vcombine.low %v661_v13, %v665_v15  ;;  %v7103_v18 = vcombine.high %v661_v13, %v665_v15  ;;  %2057 = vmatprep.subr.bf16.mxu0 %v6975_v14  ;;  %v525_v19 = vld [vmem:[%s10909_s3 + $0x240] sm:$0xff] }
  0x5a   :  { %2058 = vmatpush2.bf16.msra.mxu0 %v6974_v16  ;;  %v529_v20 = vld [vmem:[%s10909_s3 + $0x260] sm:$0xff] }
  0x5b   :  { %2098 = vmatprep.subr.bf16.mxu1 %v7103_v18  ;;  %v653_v21 = vld [vmem:[%s10909_s3 + $0x640] sm:$0xff]  ;;  %v6967_v22 = vcombine.high %v525_v19, %v529_v20  ;;  %v6966_v24 = vcombine.low %v525_v19, %v529_v20 }
  0x5c   :  { %2099 = vmatpush2.bf16.msra.mxu1 %v7102_v17  ;;  %v657_v23 = vld [vmem:[%s10909_s3 + $0x660] sm:$0xff] }
  0x5d   :  { %v7094_v25 = vcombine.low %v653_v21, %v657_v23  ;;  %v7095_v26 = vcombine.high %v653_v21, %v657_v23  ;;  %2059 = vmatprep.subr.bf16.mxu0 %v6967_v22  ;;  %v517_v27 = vld [vmem:[%s10909_s3 + $0x200] sm:$0xff] }
  0x5e   :  { %2060 = vmatpush2.bf16.msra.mxu0 %v6966_v24  ;;  %v521_v28 = vld [vmem:[%s10909_s3 + $0x220] sm:$0xff] }
  0x5f   :  { %2100 = vmatprep.subr.bf16.mxu1 %v7095_v26  ;;  %v645_v29 = vld [vmem:[%s10909_s3 + $0x600] sm:$0xff]  ;;  %v6959_v30 = vcombine.high %v517_v27, %v521_v28  ;;  %v6958_v32 = vcombine.low %v517_v27, %v521_v28 }
  0x60   :  { %2101 = vmatpush2.bf16.msra.mxu1 %v7094_v25  ;;  %v649_v31 = vld [vmem:[%s10909_s3 + $0x620] sm:$0xff] }
  0x61   :  { %v7086_v33 = vcombine.low %v645_v29, %v649_v31  ;;  %v7087_v34 = vcombine.high %v645_v29, %v649_v31  ;;  %2061 = vmatprep.subr.bf16.mxu0 %v6959_v30  ;;  %v72_v47 = vld [vmem:[%s10908_s2] sm:$0xf] }
  0x62   :  { %2062 = vmatpush2.bf16.msra.mxu0 %v6958_v32  ;;  %v77_v50 = vrot.slane %v72_v47, %v8341_v45  ;;  %v85_v51 = vrot.slane %v72_v47, %v8344_v46  ;;  %v81_v52 = vrot.slane %v72_v47, %v8350_v48  ;;  %v89_v53 = vrot.slane %v72_v47, %v8353_v49 }
  0x63   :  { %2102 = vmatprep.subr.bf16.mxu1 %v7087_v34  ;;  %2113 = vmatprep.subr.bf16.mxu0 %v6953_v38 }
  0x64   :  { %2103 = vmatpush2.bf16.msra.mxu1 %v7086_v33 }
  0x65   :  { %2154 = vmatprep.subr.bf16.mxu1 %v7081_v42 }
  0xe2   :  { %v300_v54 = vpop.f32.mrf.mxu0  ;;  %v353_v55 = vpop.f32.mrf.mxu1 }
  0xe3   :  { %v301_v56 = vadd.f32 %v300_v54, %v77_v50  ;;  %v354_v57 = vadd.f32 %v353_v55, %v85_v51 }
  0xe4   :  { %v302_v58 = vpop.f32.mrf.mxu0  ;;  %v355_v59 = vpop.f32.mrf.mxu1 }
  0xe5   :  { %372 = vst [vmem:[%s10915_s9] sm:$0xff] %v301_v56  ;;  %374 = vst [vmem:[%s10915_s9 + $0x10] sm:$0xff] %v354_v57  ;;  %v303_v60 = vadd.f32 %v302_v58, %v81_v52  ;;  %v356_v61 = vadd.f32 %v355_v59, %v89_v53 }
  0xe6   :  { %v304_v62 = vpop.f32.mrf.mxu0  ;;  %v357_v63 = vpop.f32.mrf.mxu1 }
  0xe7   :  { %373 = vst [vmem:[%s10915_s9 + $0x8] sm:$0xff] %v303_v60  ;;  %375 = vst [vmem:[%s10915_s9 + $0x18] sm:$0xff] %v356_v61  ;;  %v305_v0 = vadd.f32 %v304_v62, %v77_v50  ;;  %v358_v1 = vadd.f32 %v357_v63, %v85_v51 }
  0xe8   :  { %v306_v2 = vpop.f32.mrf.mxu0  ;;  %v359_v3 = vpop.f32.mrf.mxu1 }
  0xe9   :  { %376 = vst [vmem:[%s10915_s9 + $0x20] sm:$0xff] %v305_v0  ;;  %v388_v4 = vmax.f32 %v301_v56, %v305_v0  ;;  %378 = vst [vmem:[%s10915_s9 + $0x30] sm:$0xff] %v358_v1  ;;  %v402_v5 = vmax.f32 %v354_v57, %v358_v1  ;;  %v307_v6 = vadd.f32 %v306_v2, %v81_v52 }
  0xea   :  { %v360_v7 = vadd.f32 %v359_v3, %v89_v53  ;;  %v310_v8 = vpop.f32.mrf.mxu0  ;;  %v363_v9 = vpop.f32.mrf.mxu1 }
  0xeb   :  { %v389_v10 = vrot.slane %v388_v4, 4  ;;  %v403_v11 = vrot.slane %v402_v5, 4  ;;  %377 = vst [vmem:[%s10915_s9 + $0x28] sm:$0xff] %v307_v6  ;;  %v395_v12 = vmax.f32 %v303_v60, %v307_v6  ;;  %v311_v14 = vadd.f32 %v310_v8, %v77_v50 }
  0xec   :  { %379 = vst [vmem:[%s10915_s9 + $0x38] sm:$0xff] %v360_v7  ;;  %v409_v13 = vmax.f32 %v356_v61, %v360_v7  ;;  %v364_v15 = vadd.f32 %v363_v9, %v85_v51  ;;  %v312_v16 = vpop.f32.mrf.mxu0  ;;  %v365_v17 = vpop.f32.mrf.mxu1 }
  0xed   :  { %v396_v18 = vrot.slane %v395_v12, 4  ;;  %380 = vst [vmem:[%s10915_s9 + $0x40] sm:$0xff] %v311_v14  ;;  %v313_v20 = vadd.f32 %v312_v16, %v81_v52  ;;  %v366_v21 = vadd.f32 %v365_v17, %v89_v53  ;;  %v390_v24 = vmax.f32 %v388_v4, %v389_v10 }
  0xee   :  { %v410_v19 = vrot.slane %v409_v13, 4  ;;  %382 = vst [vmem:[%s10915_s9 + $0x50] sm:$0xff] %v364_v15  ;;  %v314_v22 = vpop.f32.mrf.mxu0  ;;  %v367_v23 = vpop.f32.mrf.mxu1  ;;  %v404_v25 = vmax.f32 %v402_v5, %v403_v11 }
  0xef   :  { %v397_v26 = vmax.f32 %v395_v12, %v396_v18  ;;  %381 = vst [vmem:[%s10915_s9 + $0x48] sm:$0xff] %v313_v20  ;;  %383 = vst [vmem:[%s10915_s9 + $0x58] sm:$0xff] %v366_v21  ;;  %v315_v28 = vadd.f32 %v314_v22, %v77_v50  ;;  %v368_v29 = vadd.f32 %v367_v23, %v85_v51  ;;  %v391_v42 = vrot.slane %v390_v24, 2 }
  0xf0   :  { %v411_v27 = vmax.f32 %v409_v13, %v410_v19  ;;  %v316_v30 = vpop.f32.mrf.mxu0  ;;  %v369_v31 = vpop.f32.mrf.mxu1  ;;  %v405_v43 = vrot.slane %v404_v25, 2 }
  0xf1   :  { %384 = vst [vmem:[%s10915_s9 + $0x60] sm:$0xff] %v315_v28  ;;  %v416_v32 = vmax.f32 %v311_v14, %v315_v28  ;;  %386 = vst [vmem:[%s10915_s9 + $0x70] sm:$0xff] %v368_v29  ;;  %v430_v33 = vmax.f32 %v364_v15, %v368_v29  ;;  %v317_v34 = vadd.f32 %v316_v30, %v81_v52  ;;  %v398_v47 = vrot.slane %v397_v26, 2  ;;  %v506_v30 = vld [vmem:[%s10909_s3 + $0x1a8] sm:$0xff] }
  0xf2   :  { %v370_v38 = vadd.f32 %v369_v31, %v89_v53  ;;  %v412_v54 = vrot.slane %v411_v27, 2  ;;  %v392_v59 = vmax.f32 %v390_v24, %v391_v42  ;;  %v406_v60 = vmax.f32 %v404_v25, %v405_v43  ;;  %v630_v31 = vld [vmem:[%s10909_s3 + $0x588] sm:$0xff] }
  0xf3   :  { %v417_v50 = vrot.slane %v416_v32, 4  ;;  %v431_v51 = vrot.slane %v430_v33, 4  ;;  %385 = vst [vmem:[%s10915_s9 + $0x68] sm:$0xff] %v317_v34  ;;  %v423_v55 = vmax.f32 %v313_v20, %v317_v34  ;;  %v399_v61 = vmax.f32 %v397_v26, %v398_v47  ;;  %v494_v43 = vld [vmem:[%s10909_s3 + $0x148] sm:$0xff] }
  0xf4   :  { %387 = vst [vmem:[%s10915_s9 + $0x78] sm:$0xff] %v370_v38  ;;  %v437_v56 = vmax.f32 %v366_v21, %v370_v38  ;;  %v413_v62 = vmax.f32 %v411_v27, %v412_v54  ;;  %v393_v7 = vrot.slane %v392_v59, 1  ;;  %v407_v8 = vrot.slane %v406_v60, 1  ;;  %v502_v27 = vld [vmem:[%s10909_s3 + $0x188] sm:$0xff] }
  0xf5   :  { %v418_v57 = vmax.f32 %v416_v32, %v417_v50  ;;  %v432_v58 = vmax.f32 %v430_v33, %v431_v51  ;;  %v424_v52 = vrot.slane %v423_v55, 4  ;;  %v400_v9 = vrot.slane %v399_v61, 1  ;;  %v634_v32 = vld [vmem:[%s10909_s3 + $0x5a8] sm:$0xff] }
  0xf6   :  { %v438_v53 = vrot.slane %v437_v56, 4  ;;  %v414_v10 = vrot.slane %v413_v62, 1  ;;  %v394_v19 = vmax.f32 %v392_v59, %v393_v7  ;;  %v408_v20 = vmax.f32 %v406_v60, %v407_v8  ;;  %v498_v50 = vld [vmem:[%s10909_s3 + $0x168] sm:$0xff] }
  0xf7   :  { %v419_v63 = vrot.slane %v418_v57, 2  ;;  %v433_v0 = vrot.slane %v432_v58, 2  ;;  %v425_v1 = vmax.f32 %v423_v55, %v424_v52  ;;  %v401_v21 = vmax.f32 %v399_v61, %v400_v9  ;;  %v622_v51 = vld [vmem:[%s10909_s3 + $0x548] sm:$0xff] }
  0xf8   :  { %v439_v2 = vmax.f32 %v437_v56, %v438_v53  ;;  %v415_v22 = vmax.f32 %v413_v62, %v414_v10  ;;  %v6945_v47 = vcombine.high %v502_v27, %v506_v30  ;;  %v7073_v54 = vcombine.high %v630_v31, %v634_v32  ;;  %v626_v55 = vld [vmem:[%s10909_s3 + $0x568] sm:$0xff] }
  0xf9   :  { %v420_v3 = vmax.f32 %v418_v57, %v419_v63  ;;  %v434_v4 = vmax.f32 %v432_v58, %v433_v0  ;;  %v426_v5 = vrot.slane %v425_v1, 2  ;;  %v6944_v56 = vcombine.low %v502_v27, %v506_v30  ;;  %v486_v53 = vld [vmem:[%s10909_s3 + $0x108] sm:$0xff] }
  0xfa   :  { %v440_v6 = vrot.slane %v439_v2, 2  ;;  %v7072_v57 = vcombine.low %v630_v31, %v634_v32  ;;  %v6937_v58 = vcombine.high %v494_v43, %v498_v50  ;;  %v7065_v52 = vcombine.high %v622_v51, %v626_v55  ;;  %v478_v60 = vld [vmem:[%s10909_s3 + $0xc8] sm:$0xff] }
  0xfb   :  { %v421_v11 = vrot.slane %v420_v3, 1  ;;  %v435_v12 = vrot.slane %v434_v4, 1  ;;  %v427_v13 = vmax.f32 %v425_v1, %v426_v5  ;;  %v6936_v39 = vcombine.low %v494_v43, %v498_v50  ;;  %v482_v61 = vld [vmem:[%s10909_s3 + $0xe8] sm:$0xff] }
  0xfc   :  { %v441_v14 = vmax.f32 %v439_v2, %v440_v6  ;;  %v7057_v59 = vcombine.high %v614_v36, %v618_v37  ;;  %v606_v62 = vld [vmem:[%s10909_s3 + $0x4c8] sm:$0xff]  ;;  %v6928_v0 = vcombine.low %v486_v53, %v490_v35  ;;  %v7056_v1 = vcombine.low %v614_v36, %v618_v37 }
  0xfd   :  { %v422_v15 = vmax.f32 %v420_v3, %v421_v11  ;;  %v436_v16 = vmax.f32 %v434_v4, %v435_v12  ;;  %v428_v17 = vrot.slane %v427_v13, 1  ;;  %v610_v63 = vld [vmem:[%s10909_s3 + $0x4e8] sm:$0xff]  ;;  %v6921_v2 = vcombine.high %v478_v60, %v482_v61 }
  0xfe   :  { %v442_v18 = vrot.slane %v441_v14, 1  ;;  %v7049_v3 = vcombine.high %v606_v62, %v610_v63  ;;  %v470_v4 = vld [vmem:[%s10909_s3 + $0x88] sm:$0xff]  ;;  %v6920_v8 = vcombine.low %v478_v60, %v482_v61  ;;  %v7048_v9 = vcombine.low %v606_v62, %v610_v63 }
  0xff   :  { %v429_v23 = vmax.f32 %v427_v13, %v428_v17  ;;  %v445_v25 = vsel %vm444_vm0, %v394_v19, %v422_v15  ;;  %v447_v26 = vsel %vm444_vm0, %v408_v20, %v436_v16  ;;  %v474_v5 = vld [vmem:[%s10909_s3 + $0xa8] sm:$0xff] }
 0x100   :  { %v443_v24 = vmax.f32 %v441_v14, %v442_v18  ;;  %v8423_v38 = vpack.c.bf16 %v445_v25, %v445_v25  ;;  %v8425_v42 = vpack.c.bf16 %v447_v26, %v447_v26  ;;  %v598_v6 = vld [vmem:[%s10909_s3 + $0x488] sm:$0xff]  ;;  %v6913_v10 = vcombine.high %v470_v4, %v474_v5 }
 0x101   :  { %v446_v28 = vsel %vm444_vm0, %v401_v21, %v429_v23  ;;  %v602_v7 = vld [vmem:[%s10909_s3 + $0x4a8] sm:$0xff]  ;;  %v6912_v16 = vcombine.low %v470_v4, %v474_v5 }
 0x102   :  { %v448_v29 = vsel %vm444_vm0, %v415_v22, %v443_v24  ;;  %v8419_v33 = vpack.c.bf16 %v446_v28, %v446_v28  ;;  %v7041_v11 = vcombine.high %v598_v6, %v602_v7  ;;  %v462_v12 = vld [vmem:[%s10909_s3 + $0x48] sm:$0xff]  ;;  %v7040_v17 = vcombine.low %v598_v6, %v602_v7 }
 0x103   :  { %v8421_v34 = vpack.c.bf16 %v448_v29, %v448_v29  ;;  %v466_v13 = vld [vmem:[%s10909_s3 + $0x68] sm:$0xff] }
 0x104   :  { %2063 = vmatprep.mubr.bf16.mxu0 %v8419_v33  ;;  %v590_v14 = vld [vmem:[%s10909_s3 + $0x448] sm:$0xff]  ;;  %v6905_v18 = vcombine.high %v462_v12, %v466_v13  ;;  %v6904_v24 = vcombine.low %v462_v12, %v466_v13 }
 0x105   :  { %2104 = vmatprep.mubr.bf16.mxu1 %v8421_v34  ;;  %2064 = vmatmul.mubr.bf16.vlgmr.msra.gmra.mxu0 %v8423_v38  ;;  %v594_v15 = vld [vmem:[%s10909_s3 + $0x468] sm:$0xff] }
 0x106   :  { %2105 = vmatmul.mubr.bf16.vlgmr.msra.gmra.mxu1 %v8425_v42  ;;  %2114 = vmatpush1.bf16.msra.mxu0 %v6952_v40  ;;  %v7064_v40 = vcombine.low %v622_v51, %v626_v55  ;;  %v7033_v19 = vcombine.high %v590_v14, %v594_v15  ;;  %v454_v20 = vld [vmem:[%s10909_s3 + $0x8] sm:$0xff]  ;;  %v7032_v25 = vcombine.low %v590_v14, %v594_v15 }
 0x107   :  { %2155 = vmatpush1.bf16.msra.mxu1 %v7080_v41  ;;  %2145 = vmatprep.mubr.bf16.mxu0 %v8419_v33  ;;  %v6929_v41 = vcombine.high %v486_v53, %v490_v35  ;;  %v458_v21 = vld [vmem:[%s10909_s3 + $0x28] sm:$0xff] }
 0x108   :  { %2186 = vmatprep.mubr.bf16.mxu1 %v8421_v34  ;;  %2115 = vmatprep.subr.bf16.mxu0 %v6945_v47  ;;  %v582_v22 = vld [vmem:[%s10909_s3 + $0x408] sm:$0xff]  ;;  %v6897_v26 = vcombine.high %v454_v20, %v458_v21  ;;  %v6896_v32 = vcombine.low %v454_v20, %v458_v21 }
 0x109   :  { %2156 = vmatprep.subr.bf16.mxu1 %v7073_v54  ;;  %v586_v23 = vld [vmem:[%s10909_s3 + $0x428] sm:$0xff] }
 0x10a   :  { %2116 = vmatpush1.bf16.msra.mxu0 %v6944_v56  ;;  %v7025_v27 = vcombine.high %v582_v22, %v586_v23  ;;  %v574_v28 = vld [vmem:[%s10909_s3 + $0x3c8] sm:$0xff]  ;;  %v7024_v43 = vcombine.low %v582_v22, %v586_v23 }
 0x10b   :  { %2157 = vmatpush1.bf16.msra.mxu1 %v7072_v57  ;;  %2117 = vmatprep.subr.bf16.mxu0 %v6937_v58  ;;  %v578_v29 = vld [vmem:[%s10909_s3 + $0x3e8] sm:$0xff] }
 0x10c   :  { %2158 = vmatprep.subr.bf16.mxu1 %v7065_v52  ;;  %v702_v30 = vld [vmem:[%s10909_s3 + $0x7c8] sm:$0xff]  ;;  %v7017_v47 = vcombine.high %v574_v28, %v578_v29  ;;  %v7016_v57 = vcombine.low %v574_v28, %v578_v29 }
 0x10d   :  { %v706_v31 = vld [vmem:[%s10909_s3 + $0x7e8] sm:$0xff] }
 0x10e   :  { %2118 = vmatpush1.bf16.msra.mxu0 %v6936_v39  ;;  %v7145_v54 = vcombine.high %v702_v30, %v706_v31  ;;  %v566_v50 = vld [vmem:[%s10909_s3 + $0x388] sm:$0xff]  ;;  %v7144_v58 = vcombine.low %v702_v30, %v706_v31 }
 0x10f   :  { %2159 = vmatpush1.bf16.msra.mxu1 %v7064_v40  ;;  %2119 = vmatprep.subr.bf16.mxu0 %v6929_v41  ;;  %v570_v51 = vld [vmem:[%s10909_s3 + $0x3a8] sm:$0xff] }
 0x110   :  { %2160 = vmatprep.subr.bf16.mxu1 %v7057_v59  ;;  %v694_v55 = vld [vmem:[%s10909_s3 + $0x788] sm:$0xff]  ;;  %v7009_v52 = vcombine.high %v566_v50, %v570_v51  ;;  %v7008_v40 = vcombine.low %v566_v50, %v570_v51  ;;  %v511_v51 = vld [vmem:[%s10909_s3 + $0x1d0] sm:$0xff] }
 0x111   :  { %v698_v56 = vld [vmem:[%s10909_s3 + $0x7a8] sm:$0xff] }
 0x112   :  { %2120 = vmatpush1.bf16.msra.mxu0 %v6928_v0  ;;  %v7137_v53 = vcombine.high %v694_v55, %v698_v56  ;;  %v558_v35 = vld [vmem:[%s10909_s3 + $0x348] sm:$0xff]  ;;  %v7136_v41 = vcombine.low %v694_v55, %v698_v56  ;;  %v515_v55 = vld [vmem:[%s10909_s3 + $0x1f0] sm:$0xff] }
 0x113   :  { %2161 = vmatpush1.bf16.msra.mxu1 %v7056_v1  ;;  %2121 = vmatprep.subr.bf16.mxu0 %v6921_v2  ;;  %v562_v36 = vld [vmem:[%s10909_s3 + $0x368] sm:$0xff]  ;;  %v639_v56 = vld [vmem:[%s10909_s3 + $0x5d0] sm:$0xff] }
 0x114   :  { %2162 = vmatprep.subr.bf16.mxu1 %v7049_v3  ;;  %v686_v37 = vld [vmem:[%s10909_s3 + $0x748] sm:$0xff]  ;;  %v7001_v59 = vcombine.high %v558_v35, %v562_v36  ;;  %v7000_v1 = vcombine.low %v558_v35, %v562_v36  ;;  %v503_v36 = vld [vmem:[%s10909_s3 + $0x190] sm:$0xff] }
 0x115   :  { %v690_v39 = vld [vmem:[%s10909_s3 + $0x768] sm:$0xff] }
 0x116   :  { %2122 = vmatpush1.bf16.msra.mxu0 %v6920_v8  ;;  %v7129_v60 = vcombine.high %v686_v37, %v690_v39  ;;  %v550_v61 = vld [vmem:[%s10909_s3 + $0x308] sm:$0xff]  ;;  %v7128_v2 = vcombine.low %v686_v37, %v690_v39  ;;  %v507_v37 = vld [vmem:[%s10909_s3 + $0x1b0] sm:$0xff] }
 0x117   :  { %2163 = vmatpush1.bf16.msra.mxu1 %v7048_v9  ;;  %2123 = vmatprep.subr.bf16.mxu0 %v6913_v10  ;;  %v554_v62 = vld [vmem:[%s10909_s3 + $0x328] sm:$0xff]  ;;  %v631_v39 = vld [vmem:[%s10909_s3 + $0x590] sm:$0xff] }
 0x118   :  { %2164 = vmatprep.subr.bf16.mxu1 %v7041_v11  ;;  %v678_v63 = vld [vmem:[%s10909_s3 + $0x708] sm:$0xff]  ;;  %v6993_v3 = vcombine.high %v550_v61, %v554_v62  ;;  %v6992_v9 = vcombine.low %v550_v61, %v554_v62  ;;  %v495_v62 = vld [vmem:[%s10909_s3 + $0x150] sm:$0xff] }
 0x119   :  { %v682_v0 = vld [vmem:[%s10909_s3 + $0x728] sm:$0xff] }
 0x11a   :  { %2124 = vmatpush1.bf16.msra.mxu0 %v6912_v16  ;;  %v7121_v4 = vcombine.high %v678_v63, %v682_v0  ;;  %v542_v5 = vld [vmem:[%s10909_s3 + $0x2c8] sm:$0xff]  ;;  %v7120_v10 = vcombine.low %v678_v63, %v682_v0  ;;  %v499_v63 = vld [vmem:[%s10909_s3 + $0x170] sm:$0xff] }
 0x11b   :  { %2165 = vmatpush1.bf16.msra.mxu1 %v7040_v17  ;;  %2125 = vmatprep.subr.bf16.mxu0 %v6905_v18  ;;  %v546_v6 = vld [vmem:[%s10909_s3 + $0x2e8] sm:$0xff]  ;;  %v623_v0 = vld [vmem:[%s10909_s3 + $0x550] sm:$0xff] }
 0x11c   :  { %2166 = vmatprep.subr.bf16.mxu1 %v7033_v19  ;;  %v670_v7 = vld [vmem:[%s10909_s3 + $0x6c8] sm:$0xff]  ;;  %v6985_v11 = vcombine.high %v542_v5, %v546_v6  ;;  %v6984_v17 = vcombine.low %v542_v5, %v546_v6  ;;  %v487_v6 = vld [vmem:[%s10909_s3 + $0x110] sm:$0xff] }
 0x11d   :  { %v674_v8 = vld [vmem:[%s10909_s3 + $0x6e8] sm:$0xff] }
 0x11e   :  { %2126 = vmatpush1.bf16.msra.mxu0 %v6904_v24  ;;  %v7113_v12 = vcombine.high %v670_v7, %v674_v8  ;;  %v534_v13 = vld [vmem:[%s10909_s3 + $0x288] sm:$0xff]  ;;  %v7112_v18 = vcombine.low %v670_v7, %v674_v8  ;;  %v491_v7 = vld [vmem:[%s10909_s3 + $0x130] sm:$0xff] }
 0x11f   :  { %2167 = vmatpush1.bf16.msra.mxu1 %v7032_v25  ;;  %2127 = vmatprep.subr.bf16.mxu0 %v6897_v26  ;;  %v538_v14 = vld [vmem:[%s10909_s3 + $0x2a8] sm:$0xff]  ;;  %v615_v8 = vld [vmem:[%s10909_s3 + $0x510] sm:$0xff] }
 0x120   :  { %2168 = vmatprep.subr.bf16.mxu1 %v7025_v27  ;;  %v662_v15 = vld [vmem:[%s10909_s3 + $0x688] sm:$0xff]  ;;  %v6977_v19 = vcombine.high %v534_v13, %v538_v14  ;;  %v6976_v25 = vcombine.low %v534_v13, %v538_v14  ;;  %v479_v14 = vld [vmem:[%s10909_s3 + $0xd0] sm:$0xff] }
 0x121   :  { %v666_v16 = vld [vmem:[%s10909_s3 + $0x6a8] sm:$0xff] }
 0x122   :  { %2128 = vmatpush1.bf16.msra.mxu0 %v6896_v32  ;;  %v7105_v20 = vcombine.high %v662_v15, %v666_v16  ;;  %v526_v21 = vld [vmem:[%s10909_s3 + $0x248] sm:$0xff]  ;;  %v7104_v26 = vcombine.low %v662_v15, %v666_v16  ;;  %v483_v15 = vld [vmem:[%s10909_s3 + $0xf0] sm:$0xff] }
 0x123   :  { %2169 = vmatpush1.bf16.msra.mxu1 %v7024_v43  ;;  %2129 = vmatprep.subr.bf16.mxu0 %v7017_v47  ;;  %v530_v22 = vld [vmem:[%s10909_s3 + $0x268] sm:$0xff]  ;;  %v607_v16 = vld [vmem:[%s10909_s3 + $0x4d0] sm:$0xff] }
 0x124   :  { %2170 = vmatprep.subr.bf16.mxu1 %v7145_v54  ;;  %v654_v23 = vld [vmem:[%s10909_s3 + $0x648] sm:$0xff]  ;;  %v6969_v27 = vcombine.high %v526_v21, %v530_v22  ;;  %v6968_v43 = vcombine.low %v526_v21, %v530_v22  ;;  %v471_v22 = vld [vmem:[%s10909_s3 + $0x90] sm:$0xff] }
 0x125   :  { %v658_v24 = vld [vmem:[%s10909_s3 + $0x668] sm:$0xff] }
 0x126   :  { %2130 = vmatpush2.bf16.msra.mxu0 %v7016_v57  ;;  %v7097_v28 = vcombine.high %v654_v23, %v658_v24  ;;  %v518_v29 = vld [vmem:[%s10909_s3 + $0x208] sm:$0xff]  ;;  %v7096_v47 = vcombine.low %v654_v23, %v658_v24  ;;  %v643_v57 = vld [vmem:[%s10909_s3 + $0x5f0] sm:$0xff] }
 0x127   :  { %2171 = vmatpush2.bf16.msra.mxu1 %v7144_v58  ;;  %2131 = vmatprep.subr.bf16.mxu0 %v7009_v52  ;;  %v522_v30 = vld [vmem:[%s10909_s3 + $0x228] sm:$0xff]  ;;  %v7083_v35 = vcombine.high %v639_v56, %v643_v57  ;;  %v475_v23 = vld [vmem:[%s10909_s3 + $0xb0] sm:$0xff] }
 0x128   :  { %2172 = vmatprep.subr.bf16.mxu1 %v7137_v53  ;;  %v646_v31 = vld [vmem:[%s10909_s3 + $0x608] sm:$0xff]  ;;  %v6961_v54 = vcombine.high %v518_v29, %v522_v30  ;;  %v6960_v58 = vcombine.low %v518_v29, %v522_v30  ;;  %v6955_v53 = vcombine.high %v511_v51, %v515_v55  ;;  %v599_v24 = vld [vmem:[%s10909_s3 + $0x490] sm:$0xff] }
 0x129   :  { %v650_v32 = vld [vmem:[%s10909_s3 + $0x628] sm:$0xff]  ;;  %v463_v30 = vld [vmem:[%s10909_s3 + $0x50] sm:$0xff] }
 0x12a   :  { %2132 = vmatpush2.bf16.msra.mxu0 %v7008_v40  ;;  %v7089_v50 = vcombine.high %v646_v31, %v650_v32  ;;  %v7088_v52 = vcombine.low %v646_v31, %v650_v32  ;;  %v635_v40 = vld [vmem:[%s10909_s3 + $0x5b0] sm:$0xff] }
 0x12b   :  { %2173 = vmatpush2.bf16.msra.mxu1 %v7136_v41  ;;  %2133 = vmatprep.subr.bf16.mxu0 %v7001_v59  ;;  %v6954_v41 = vcombine.low %v511_v51, %v515_v55  ;;  %v7082_v59 = vcombine.low %v639_v56, %v643_v57  ;;  %v7075_v61 = vcombine.high %v631_v39, %v635_v40  ;;  %v467_v31 = vld [vmem:[%s10909_s3 + $0x70] sm:$0xff] }
 0x12c   :  { %2174 = vmatprep.subr.bf16.mxu1 %v7129_v60  ;;  %v6947_v60 = vcombine.high %v503_v36, %v507_v37  ;;  %v591_v32 = vld [vmem:[%s10909_s3 + $0x450] sm:$0xff] }
 0x12d   :  { %v455_v55 = vld [vmem:[%s10909_s3 + $0x10] sm:$0xff] }
 0x12e   :  { %2134 = vmatpush2.bf16.msra.mxu0 %v7000_v1  ;;  %v627_v1 = vld [vmem:[%s10909_s3 + $0x570] sm:$0xff] }
 0x12f   :  { %2175 = vmatpush2.bf16.msra.mxu1 %v7128_v2  ;;  %2135 = vmatprep.subr.bf16.mxu0 %v6993_v3  ;;  %v6946_v2 = vcombine.low %v503_v36, %v507_v37  ;;  %v7074_v3 = vcombine.low %v631_v39, %v635_v40  ;;  %v7067_v5 = vcombine.high %v623_v0, %v627_v1  ;;  %v459_v56 = vld [vmem:[%s10909_s3 + $0x30] sm:$0xff] }
 0x130   :  { %2176 = vmatprep.subr.bf16.mxu1 %v7121_v4  ;;  %v6939_v4 = vcombine.high %v495_v62, %v499_v63  ;;  %v583_v57 = vld [vmem:[%s10909_s3 + $0x410] sm:$0xff] }
 0x131   :  { %v575_v37 = vld [vmem:[%s10909_s3 + $0x3d0] sm:$0xff] }
 0x132   :  { %2136 = vmatpush2.bf16.msra.mxu0 %v6992_v9  ;;  %v619_v9 = vld [vmem:[%s10909_s3 + $0x530] sm:$0xff] }
 0x133   :  { %2177 = vmatpush2.bf16.msra.mxu1 %v7120_v10  ;;  %2137 = vmatprep.subr.bf16.mxu0 %v6985_v11  ;;  %v6938_v10 = vcombine.low %v495_v62, %v499_v63  ;;  %v7066_v11 = vcombine.low %v623_v0, %v627_v1  ;;  %v7059_v13 = vcombine.high %v615_v8, %v619_v9  ;;  %v579_v39 = vld [vmem:[%s10909_s3 + $0x3f0] sm:$0xff] }
 0x134   :  { %2178 = vmatprep.subr.bf16.mxu1 %v7113_v12  ;;  %v6931_v12 = vcombine.high %v487_v6, %v491_v7  ;;  %v703_v40 = vld [vmem:[%s10909_s3 + $0x7d0] sm:$0xff] }
 0x135   :  { %v567_v63 = vld [vmem:[%s10909_s3 + $0x390] sm:$0xff] }
 0x136   :  { %2138 = vmatpush2.bf16.msra.mxu0 %v6984_v17  ;;  %v611_v17 = vld [vmem:[%s10909_s3 + $0x4f0] sm:$0xff] }
 0x137   :  { %2179 = vmatpush2.bf16.msra.mxu1 %v7112_v18  ;;  %2139 = vmatprep.subr.bf16.mxu0 %v6977_v19  ;;  %v6930_v18 = vcombine.low %v487_v6, %v491_v7  ;;  %v7058_v19 = vcombine.low %v615_v8, %v619_v9  ;;  %v7051_v21 = vcombine.high %v607_v16, %v611_v17  ;;  %v571_v0 = vld [vmem:[%s10909_s3 + $0x3b0] sm:$0xff] }
 0x138   :  { %2180 = vmatprep.subr.bf16.mxu1 %v7105_v20  ;;  %v6923_v20 = vcombine.high %v479_v14, %v483_v15  ;;  %v695_v1 = vld [vmem:[%s10909_s3 + $0x790] sm:$0xff] }
 0x139   :  { %v559_v7 = vld [vmem:[%s10909_s3 + $0x350] sm:$0xff] }
 0x13a   :  { %2140 = vmatpush2.bf16.msra.mxu0 %v6976_v25  ;;  %v603_v25 = vld [vmem:[%s10909_s3 + $0x4b0] sm:$0xff] }
 0x13b   :  { %2181 = vmatpush2.bf16.msra.mxu1 %v7104_v26  ;;  %2141 = vmatprep.subr.bf16.mxu0 %v6969_v27  ;;  %v6922_v26 = vcombine.low %v479_v14, %v483_v15  ;;  %v7050_v27 = vcombine.low %v607_v16, %v611_v17  ;;  %v7043_v29 = vcombine.high %v599_v24, %v603_v25  ;;  %v563_v8 = vld [vmem:[%s10909_s3 + $0x370] sm:$0xff] }
 0x13c   :  { %2182 = vmatprep.subr.bf16.mxu1 %v7097_v28  ;;  %v6915_v28 = vcombine.high %v471_v22, %v475_v23  ;;  %v687_v9 = vld [vmem:[%s10909_s3 + $0x750] sm:$0xff] }
 0x13d   :  { %v551_v15 = vld [vmem:[%s10909_s3 + $0x310] sm:$0xff] }
 0x13e   :  { %2142 = vmatpush2.bf16.msra.mxu0 %v6968_v43  ;;  %v595_v43 = vld [vmem:[%s10909_s3 + $0x470] sm:$0xff] }
 0x13f   :  { %2183 = vmatpush2.bf16.msra.mxu1 %v7096_v47  ;;  %2143 = vmatprep.subr.bf16.mxu0 %v6961_v54  ;;  %v6914_v47 = vcombine.low %v471_v22, %v475_v23  ;;  %v7042_v54 = vcombine.low %v599_v24, %v603_v25  ;;  %v7035_v51 = vcombine.high %v591_v32, %v595_v43  ;;  %v555_v16 = vld [vmem:[%s10909_s3 + $0x330] sm:$0xff] }
 0x140   :  { %2184 = vmatprep.subr.bf16.mxu1 %v7089_v50  ;;  %v6907_v50 = vcombine.high %v463_v30, %v467_v31  ;;  %v679_v17 = vld [vmem:[%s10909_s3 + $0x710] sm:$0xff] }
 0x141   :  { %v543_v23 = vld [vmem:[%s10909_s3 + $0x2d0] sm:$0xff] }
 0x142   :  { %2144 = vmatpush2.bf16.msra.mxu0 %v6960_v58  ;;  %v587_v58 = vld [vmem:[%s10909_s3 + $0x430] sm:$0xff] }
 0x143   :  { %2185 = vmatpush2.bf16.msra.mxu1 %v7088_v52  ;;  %2195 = vmatprep.subr.bf16.mxu0 %v6955_v53  ;;  %v6906_v52 = vcombine.low %v463_v30, %v467_v31  ;;  %v7034_v53 = vcombine.low %v591_v32, %v595_v43  ;;  %v7027_v36 = vcombine.high %v583_v57, %v587_v58  ;;  %v547_v24 = vld [vmem:[%s10909_s3 + $0x2f0] sm:$0xff] }
 0x144   :  { %2236 = vmatprep.subr.bf16.mxu1 %v7083_v35  ;;  %v6899_v35 = vcombine.high %v455_v55, %v459_v56  ;;  %v671_v25 = vld [vmem:[%s10909_s3 + $0x6d0] sm:$0xff] }
 0x145   :  { %2146 = vmatmul.mubr.bf16.vlgmr.msra.gmra.mxu0 %v8423_v38  ;;  %v535_v31 = vld [vmem:[%s10909_s3 + $0x290] sm:$0xff] }
 0x146   :  { %2187 = vmatmul.mubr.bf16.vlgmr.msra.gmra.mxu1 %v8425_v42  ;;  %2196 = vmatpush1.bf16.msra.mxu0 %v6954_v41  ;;  %v707_v41 = vld [vmem:[%s10909_s3 + $0x7f0] sm:$0xff] }
 0x147   :  { %2227 = vmatprep.mubr.bf16.mxu0 %v8419_v33  ;;  %2237 = vmatpush1.bf16.msra.mxu1 %v7082_v59  ;;  %v6898_v59 = vcombine.low %v455_v55, %v459_v56  ;;  %v7147_v62 = vcombine.high %v703_v40, %v707_v41  ;;  %v539_v32 = vld [vmem:[%s10909_s3 + $0x2b0] sm:$0xff] }
 0x148   :  { %2268 = vmatprep.mubr.bf16.mxu1 %v8421_v34  ;;  %2197 = vmatprep.subr.bf16.mxu0 %v6947_v60  ;;  %v7026_v60 = vcombine.low %v583_v57, %v587_v58  ;;  %v663_v43 = vld [vmem:[%s10909_s3 + $0x690] sm:$0xff] }
 0x149   :  { %2238 = vmatprep.subr.bf16.mxu1 %v7075_v61  ;;  %v7019_v61 = vcombine.high %v575_v37, %v579_v39  ;;  %v527_v56 = vld [vmem:[%s10909_s3 + $0x250] sm:$0xff] }
 0x14a   :  { %2198 = vmatpush1.bf16.msra.mxu0 %v6946_v2  ;;  %v699_v2 = vld [vmem:[%s10909_s3 + $0x7b0] sm:$0xff] }
 0x14b   :  { %2239 = vmatpush1.bf16.msra.mxu1 %v7074_v3  ;;  %2199 = vmatprep.subr.bf16.mxu0 %v6939_v4  ;;  %v7018_v3 = vcombine.low %v575_v37, %v579_v39  ;;  %v7146_v4 = vcombine.low %v703_v40, %v707_v41  ;;  %v7139_v6 = vcombine.high %v695_v1, %v699_v2  ;;  %v531_v57 = vld [vmem:[%s10909_s3 + $0x270] sm:$0xff] }
 0x14c   :  { %2240 = vmatprep.subr.bf16.mxu1 %v7067_v5  ;;  %v7011_v5 = vcombine.high %v567_v63, %v571_v0  ;;  %v655_v58 = vld [vmem:[%s10909_s3 + $0x650] sm:$0xff] }
 0x14d   :  { %v519_v39 = vld [vmem:[%s10909_s3 + $0x210] sm:$0xff] }
 0x14e   :  { %2200 = vmatpush1.bf16.msra.mxu0 %v6938_v10  ;;  %v691_v10 = vld [vmem:[%s10909_s3 + $0x770] sm:$0xff] }
 0x14f   :  { %2241 = vmatpush1.bf16.msra.mxu1 %v7066_v11  ;;  %2201 = vmatprep.subr.bf16.mxu0 %v6931_v12  ;;  %v7010_v11 = vcombine.low %v567_v63, %v571_v0  ;;  %v7138_v12 = vcombine.low %v695_v1, %v699_v2  ;;  %v7131_v14 = vcombine.high %v687_v9, %v691_v10  ;;  %v523_v40 = vld [vmem:[%s10909_s3 + $0x230] sm:$0xff]  ;;  %v512_v0 = vld [vmem:[%s10909_s3 + $0x1d8] sm:$0xff] }
 0x150   :  { %2242 = vmatprep.subr.bf16.mxu1 %v7059_v13  ;;  %v7003_v13 = vcombine.high %v559_v7, %v563_v8  ;;  %v647_v41 = vld [vmem:[%s10909_s3 + $0x610] sm:$0xff]  ;;  %v516_v1 = vld [vmem:[%s10909_s3 + $0x1f8] sm:$0xff] }
 0x151   :  { %v640_v2 = vld [vmem:[%s10909_s3 + $0x5d8] sm:$0xff] }
 0x152   :  { %2202 = vmatpush1.bf16.msra.mxu0 %v6930_v18  ;;  %v683_v18 = vld [vmem:[%s10909_s3 + $0x730] sm:$0xff] }
 0x153   :  { %2243 = vmatpush1.bf16.msra.mxu1 %v7058_v19  ;;  %2203 = vmatprep.subr.bf16.mxu0 %v6923_v20  ;;  %v7002_v19 = vcombine.low %v559_v7, %v563_v8  ;;  %v7130_v20 = vcombine.low %v687_v9, %v691_v10  ;;  %v7123_v22 = vcombine.high %v679_v17, %v683_v18  ;;  %v504_v8 = vld [vmem:[%s10909_s3 + $0x198] sm:$0xff] }
 0x154   :  { %2244 = vmatprep.subr.bf16.mxu1 %v7051_v21  ;;  %v6995_v21 = vcombine.high %v551_v15, %v555_v16  ;;  %v508_v9 = vld [vmem:[%s10909_s3 + $0x1b8] sm:$0xff]  ;;  %v6956_v10 = vcombine.low %v512_v0, %v516_v1 }
 0x156   :  { %2204 = vmatpush1.bf16.msra.mxu0 %v6922_v26  ;;  %v675_v26 = vld [vmem:[%s10909_s3 + $0x6f0] sm:$0xff] }
 0x157   :  { %2245 = vmatpush1.bf16.msra.mxu1 %v7050_v27  ;;  %2205 = vmatprep.subr.bf16.mxu0 %v6915_v28  ;;  %v6994_v27 = vcombine.low %v551_v15, %v555_v16  ;;  %v7122_v28 = vcombine.low %v679_v17, %v683_v18  ;;  %v7115_v30 = vcombine.high %v671_v25, %v675_v26  ;;  %v496_v15 = vld [vmem:[%s10909_s3 + $0x158] sm:$0xff] }
 0x158   :  { %2246 = vmatprep.subr.bf16.mxu1 %v7043_v29  ;;  %v6987_v29 = vcombine.high %v543_v23, %v547_v24  ;;  %v500_v16 = vld [vmem:[%s10909_s3 + $0x178] sm:$0xff] }
 0x159   :  { %v624_v18 = vld [vmem:[%s10909_s3 + $0x558] sm:$0xff] }
 0x15a   :  { %2206 = vmatpush1.bf16.msra.mxu0 %v6914_v47  ;;  %v667_v47 = vld [vmem:[%s10909_s3 + $0x6b0] sm:$0xff] }
 0x15b   :  { %2247 = vmatpush1.bf16.msra.mxu1 %v7042_v54  ;;  %2207 = vmatprep.subr.bf16.mxu0 %v6907_v50  ;;  %v6986_v54 = vcombine.low %v543_v23, %v547_v24  ;;  %v7114_v50 = vcombine.low %v671_v25, %v675_v26  ;;  %v7107_v55 = vcombine.high %v663_v43, %v667_v47  ;;  %v488_v24 = vld [vmem:[%s10909_s3 + $0x118] sm:$0xff] }
 0x15c   :  { %2248 = vmatprep.subr.bf16.mxu1 %v7035_v51  ;;  %v6979_v51 = vcombine.high %v535_v31, %v539_v32  ;;  %v492_v25 = vld [vmem:[%s10909_s3 + $0x138] sm:$0xff] }
 0x15d   :  { %v620_v26 = vld [vmem:[%s10909_s3 + $0x538] sm:$0xff] }
 0x15e   :  { %2208 = vmatpush1.bf16.msra.mxu0 %v6906_v52  ;;  %v659_v52 = vld [vmem:[%s10909_s3 + $0x670] sm:$0xff] }
 0x15f   :  { %2249 = vmatpush1.bf16.msra.mxu1 %v7034_v53  ;;  %2209 = vmatprep.subr.bf16.mxu0 %v6899_v35  ;;  %v6978_v53 = vcombine.low %v535_v31, %v539_v32  ;;  %v7106_v35 = vcombine.low %v663_v43, %v667_v47  ;;  %v7099_v37 = vcombine.high %v655_v58, %v659_v52  ;;  %v484_v31 = vld [vmem:[%s10909_s3 + $0xf8] sm:$0xff] }
 0x160   :  { %2250 = vmatprep.subr.bf16.mxu1 %v7027_v36  ;;  %v6971_v36 = vcombine.high %v527_v56, %v531_v57  ;;  %v608_v32 = vld [vmem:[%s10909_s3 + $0x4d8] sm:$0xff]  ;;  %v6932_v47 = vcombine.low %v488_v24, %v492_v25 }
 0x161   :  { %v612_v43 = vld [vmem:[%s10909_s3 + $0x4f8] sm:$0xff] }
 0x162   :  { %2210 = vmatpush1.bf16.msra.mxu0 %v6898_v59  ;;  %v651_v59 = vld [vmem:[%s10909_s3 + $0x630] sm:$0xff] }
 0x163   :  { %2251 = vmatpush1.bf16.msra.mxu1 %v7026_v60  ;;  %2211 = vmatprep.subr.bf16.mxu0 %v7019_v61  ;;  %v6970_v60 = vcombine.low %v527_v56, %v531_v57  ;;  %v7098_v61 = vcombine.low %v655_v58, %v659_v52  ;;  %v7091_v63 = vcombine.high %v647_v41, %v651_v59  ;;  %v476_v56 = vld [vmem:[%s10909_s3 + $0xb8] sm:$0xff] }
 0x164   :  { %2252 = vmatprep.subr.bf16.mxu1 %v7147_v62  ;;  %v6963_v62 = vcombine.high %v519_v39, %v523_v40  ;;  %v600_v57 = vld [vmem:[%s10909_s3 + $0x498] sm:$0xff] }
 0x165   :  { %v604_v58 = vld [vmem:[%s10909_s3 + $0x4b8] sm:$0xff] }
 0x166   :  { %2212 = vmatpush2.bf16.msra.mxu0 %v7018_v3  ;;  %v644_v3 = vld [vmem:[%s10909_s3 + $0x5f8] sm:$0xff] }
 0x167   :  { %2253 = vmatpush2.bf16.msra.mxu1 %v7146_v4  ;;  %2213 = vmatprep.subr.bf16.mxu0 %v7011_v5  ;;  %v6962_v4 = vcombine.low %v519_v39, %v523_v40  ;;  %v7090_v5 = vcombine.low %v647_v41, %v651_v59  ;;  %v7085_v7 = vcombine.high %v640_v2, %v644_v3  ;;  %v468_v39 = vld [vmem:[%s10909_s3 + $0x78] sm:$0xff] }
 0x168   :  { %2254 = vmatprep.subr.bf16.mxu1 %v7139_v6  ;;  %v6957_v6 = vcombine.high %v512_v0, %v516_v1  ;;  %v592_v40 = vld [vmem:[%s10909_s3 + $0x458] sm:$0xff] }
 0x169   :  { %v596_v41 = vld [vmem:[%s10909_s3 + $0x478] sm:$0xff] }
 0x16a   :  { %2214 = vmatpush2.bf16.msra.mxu0 %v7010_v11  ;;  %v632_v11 = vld [vmem:[%s10909_s3 + $0x598] sm:$0xff] }
 0x16b   :  { %2255 = vmatpush2.bf16.msra.mxu1 %v7138_v12  ;;  %2215 = vmatprep.subr.bf16.mxu0 %v7003_v13  ;;  %v636_v12 = vld [vmem:[%s10909_s3 + $0x5b8] sm:$0xff]  ;;  %v7084_v13 = vcombine.low %v640_v2, %v644_v3 }
 0x16c   :  { %2256 = vmatprep.subr.bf16.mxu1 %v7131_v14  ;;  %v6949_v14 = vcombine.high %v504_v8, %v508_v9  ;;  %v7077_v17 = vcombine.high %v632_v11, %v636_v12  ;;  %v460_v0 = vld [vmem:[%s10909_s3 + $0x38] sm:$0xff] }
 0x16d   :  { %v584_v1 = vld [vmem:[%s10909_s3 + $0x418] sm:$0xff] }
 0x16e   :  { %2216 = vmatpush2.bf16.msra.mxu0 %v7002_v19  ;;  %v628_v19 = vld [vmem:[%s10909_s3 + $0x578] sm:$0xff] }
 0x16f   :  { %2257 = vmatpush2.bf16.msra.mxu1 %v7130_v20  ;;  %2217 = vmatprep.subr.bf16.mxu0 %v6995_v21  ;;  %v6948_v20 = vcombine.low %v504_v8, %v508_v9  ;;  %v7076_v21 = vcombine.low %v632_v11, %v636_v12  ;;  %v7069_v23 = vcombine.high %v624_v18, %v628_v19  ;;  %v588_v2 = vld [vmem:[%s10909_s3 + $0x438] sm:$0xff] }
 0x170   :  { %2258 = vmatprep.subr.bf16.mxu1 %v7123_v22  ;;  %v6941_v22 = vcombine.high %v496_v15, %v500_v16  ;;  %v580_v8 = vld [vmem:[%s10909_s3 + $0x3f8] sm:$0xff]  ;;  %v7028_v12 = vcombine.low %v584_v1, %v588_v2 }
 0x171   :  { %v704_v9 = vld [vmem:[%s10909_s3 + $0x7d8] sm:$0xff] }
 0x172   :  { %2218 = vmatpush2.bf16.msra.mxu0 %v6994_v27  ;;  %v7068_v27 = vcombine.low %v624_v18, %v628_v19  ;;  %v700_v18 = vld [vmem:[%s10909_s3 + $0x7b8] sm:$0xff] }
 0x173   :  { %2259 = vmatpush2.bf16.msra.mxu1 %v7122_v28  ;;  %2219 = vmatprep.subr.bf16.mxu0 %v6987_v29  ;;  %v6933_v28 = vcombine.high %v488_v24, %v492_v25  ;;  %v564_v24 = vld [vmem:[%s10909_s3 + $0x378] sm:$0xff] }
 0x174   :  { %2260 = vmatprep.subr.bf16.mxu1 %v7115_v30  ;;  %v480_v30 = vld [vmem:[%s10909_s3 + $0xd8] sm:$0xff] }
 0x175   :  { %v6924_v52 = vcombine.low %v480_v30, %v484_v31  ;;  %v688_v25 = vld [vmem:[%s10909_s3 + $0x758] sm:$0xff] }
 0x176   :  { %2220 = vmatpush2.bf16.msra.mxu0 %v6986_v54 }
 0x177   :  { %2261 = vmatpush2.bf16.msra.mxu1 %v7114_v50  ;;  %2221 = vmatprep.subr.bf16.mxu0 %v6979_v51  ;;  %v6925_v50 = vcombine.high %v480_v30, %v484_v31  ;;  %v7053_v51 = vcombine.high %v608_v32, %v612_v43  ;;  %v556_v30 = vld [vmem:[%s10909_s3 + $0x338] sm:$0xff] }
 0x178   :  { %2262 = vmatprep.subr.bf16.mxu1 %v7107_v55  ;;  %v472_v55 = vld [vmem:[%s10909_s3 + $0x98] sm:$0xff] }
 0x179   :  { %v6916_v59 = vcombine.low %v472_v55, %v476_v56  ;;  %v680_v31 = vld [vmem:[%s10909_s3 + $0x718] sm:$0xff] }
 0x17a   :  { %2222 = vmatpush2.bf16.msra.mxu0 %v6978_v53  ;;  %v7052_v53 = vcombine.low %v608_v32, %v612_v43  ;;  %v684_v32 = vld [vmem:[%s10909_s3 + $0x738] sm:$0xff] }
 0x17b   :  { %2263 = vmatpush2.bf16.msra.mxu1 %v7106_v35  ;;  %2223 = vmatprep.subr.bf16.mxu0 %v6971_v36  ;;  %v6917_v35 = vcombine.high %v472_v55, %v476_v56  ;;  %v7045_v36 = vcombine.high %v600_v57, %v604_v58  ;;  %v548_v55 = vld [vmem:[%s10909_s3 + $0x2f8] sm:$0xff] }
 0x17c   :  { %2264 = vmatprep.subr.bf16.mxu1 %v7099_v37  ;;  %v464_v37 = vld [vmem:[%s10909_s3 + $0x58] sm:$0xff] }
 0x17d   :  { %v6908_v3 = vcombine.low %v464_v37, %v468_v39  ;;  %v672_v56 = vld [vmem:[%s10909_s3 + $0x6d8] sm:$0xff] }
 0x17e   :  { %2224 = vmatpush2.bf16.msra.mxu0 %v6970_v60  ;;  %v7044_v60 = vcombine.low %v600_v57, %v604_v58  ;;  %v676_v57 = vld [vmem:[%s10909_s3 + $0x6f8] sm:$0xff] }
 0x17f   :  { %2265 = vmatpush2.bf16.msra.mxu1 %v7098_v61  ;;  %2225 = vmatprep.subr.bf16.mxu0 %v6963_v62  ;;  %v6909_v61 = vcombine.high %v464_v37, %v468_v39  ;;  %v7037_v62 = vcombine.high %v592_v40, %v596_v41  ;;  %v540_v37 = vld [vmem:[%s10909_s3 + $0x2b8] sm:$0xff] }
 0x180   :  { %2266 = vmatprep.subr.bf16.mxu1 %v7091_v63  ;;  %v456_v63 = vld [vmem:[%s10909_s3 + $0x18] sm:$0xff] }
 0x181   :  { %v6900_v11 = vcombine.low %v456_v63, %v460_v0  ;;  %v664_v39 = vld [vmem:[%s10909_s3 + $0x698] sm:$0xff] }
 0x182   :  { %2226 = vmatpush2.bf16.msra.mxu0 %v6962_v4  ;;  %v7036_v4 = vcombine.low %v592_v40, %v596_v41  ;;  %v668_v40 = vld [vmem:[%s10909_s3 + $0x6b8] sm:$0xff] }
 0x183   :  { %2267 = vmatpush2.bf16.msra.mxu1 %v7090_v5  ;;  %2277 = vmatprep.subr.bf16.mxu0 %v6957_v6  ;;  %v6901_v5 = vcombine.high %v456_v63, %v460_v0  ;;  %v7029_v6 = vcombine.high %v584_v1, %v588_v2  ;;  %v532_v63 = vld [vmem:[%s10909_s3 + $0x278] sm:$0xff] }
 0x184   :  { %2318 = vmatprep.subr.bf16.mxu1 %v7085_v7  ;;  %v576_v7 = vld [vmem:[%s10909_s3 + $0x3d8] sm:$0xff] }
 0x185   :  { %2228 = vmatmul.mubr.bf16.vlgmr.msra.gmra.mxu0 %v8423_v38  ;;  %v7020_v19 = vcombine.low %v576_v7, %v580_v8  ;;  %v656_v0 = vld [vmem:[%s10909_s3 + $0x658] sm:$0xff] }
 0x186   :  { %2269 = vmatmul.mubr.bf16.vlgmr.msra.gmra.mxu1 %v8425_v42  ;;  %2278 = vmatpush1.bf16.msra.mxu0 %v6956_v10  ;;  %v708_v10 = vld [vmem:[%s10909_s3 + $0x7f8] sm:$0xff] }
 0x187   :  { %2309 = vmatprep.mubr.bf16.mxu0 %v8419_v33  ;;  %2319 = vmatpush1.bf16.msra.mxu1 %v7084_v13  ;;  %v616_v33 = vld [vmem:[%s10909_s3 + $0x518] sm:$0xff]  ;;  %v7021_v13 = vcombine.high %v576_v7, %v580_v8 }
 0x188   :  { %2350 = vmatprep.mubr.bf16.mxu1 %v8421_v34  ;;  %2279 = vmatprep.subr.bf16.mxu0 %v6949_v14  ;;  %v6940_v34 = vcombine.low %v496_v15, %v500_v16  ;;  %v7061_v29 = vcombine.high %v616_v33, %v620_v26  ;;  %v7060_v54 = vcombine.low %v616_v33, %v620_v26  ;;  %v568_v15 = vld [vmem:[%s10909_s3 + $0x398] sm:$0xff] }
 0x189   :  { %2320 = vmatprep.subr.bf16.mxu1 %v7077_v17  ;;  %v7149_v14 = vcombine.high %v704_v9, %v708_v10  ;;  %v572_v16 = vld [vmem:[%s10909_s3 + $0x3b8] sm:$0xff] }
 0x18a   :  { %2280 = vmatpush1.bf16.msra.mxu0 %v6948_v20  ;;  %v696_v17 = vld [vmem:[%s10909_s3 + $0x798] sm:$0xff]  ;;  %v7148_v20 = vcombine.low %v704_v9, %v708_v10  ;;  %v7012_v26 = vcombine.low %v568_v15, %v572_v16 }
 0x18b   :  { %2321 = vmatpush1.bf16.msra.mxu1 %v7076_v21  ;;  %2281 = vmatprep.subr.bf16.mxu0 %v6941_v22  ;;  %v7013_v21 = vcombine.high %v568_v15, %v572_v16  ;;  %v7141_v22 = vcombine.high %v696_v17, %v700_v18  ;;  %v692_v33 = vld [vmem:[%s10909_s3 + $0x778] sm:$0xff]  ;;  %v2435_v15 = vld [vmem:[%s10911_s5 + $0x1e0] sm:$0xff] }
 0x18c   :  { %2322 = vmatprep.subr.bf16.mxu1 %v7069_v23  ;;  %v560_v23 = vld [vmem:[%s10909_s3 + $0x358] sm:$0xff]  ;;  %v2559_v16 = vld [vmem:[%s10911_s5 + $0x5c0] sm:$0xff] }
 0x18d   :  { %v7004_v43 = vcombine.low %v560_v23, %v564_v24  ;;  %v660_v1 = vld [vmem:[%s10909_s3 + $0x678] sm:$0xff] }
 0x18e   :  { %2282 = vmatpush1.bf16.msra.mxu0 %v6940_v34  ;;  %v7140_v34 = vcombine.low %v696_v17, %v700_v18  ;;  %v524_v7 = vld [vmem:[%s10909_s3 + $0x238] sm:$0xff]  ;;  %v2563_v17 = vld [vmem:[%s10911_s5 + $0x5e0] sm:$0xff] }
 0x18f   :  { %2323 = vmatpush1.bf16.msra.mxu1 %v7068_v27  ;;  %2283 = vmatprep.subr.bf16.mxu0 %v6933_v28  ;;  %v7005_v27 = vcombine.high %v560_v23, %v564_v24  ;;  %v7133_v28 = vcombine.high %v688_v25, %v692_v33  ;;  %v648_v8 = vld [vmem:[%s10909_s3 + $0x618] sm:$0xff]  ;;  %v7335_v23 = vcombine.high %v2559_v16, %v2563_v17  ;;  %v2551_v24 = vld [vmem:[%s10911_s5 + $0x580] sm:$0xff] }
 0x190   :  { %2324 = vmatprep.subr.bf16.mxu1 %v7061_v29  ;;  %v552_v29 = vld [vmem:[%s10909_s3 + $0x318] sm:$0xff] }
 0x191   :  { %v6996_v58 = vcombine.low %v552_v29, %v556_v30  ;;  %v652_v9 = vld [vmem:[%s10909_s3 + $0x638] sm:$0xff] }
 0x192   :  { %2284 = vmatpush1.bf16.msra.mxu0 %v6932_v47  ;;  %v7132_v47 = vcombine.low %v688_v25, %v692_v33  ;;  %v2555_v25 = vld [vmem:[%s10911_s5 + $0x5a0] sm:$0xff] }
 0x193   :  { %2325 = vmatpush1.bf16.msra.mxu1 %v7060_v54  ;;  %2285 = vmatprep.subr.bf16.mxu0 %v6925_v50  ;;  %v6997_v54 = vcombine.high %v552_v29, %v556_v30  ;;  %v7125_v50 = vcombine.high %v680_v31, %v684_v32  ;;  %v2415_v29 = vld [vmem:[%s10911_s5 + $0x140] sm:$0xff] }
 0x194   :  { %2326 = vmatprep.subr.bf16.mxu1 %v7053_v51  ;;  %v544_v51 = vld [vmem:[%s10909_s3 + $0x2d8] sm:$0xff]  ;;  %v2419_v30 = vld [vmem:[%s10911_s5 + $0x160] sm:$0xff] }
 0x195   :  { %v6988_v41 = vcombine.low %v544_v51, %v548_v55 }
 0x196   :  { %2286 = vmatpush1.bf16.msra.mxu0 %v6924_v52  ;;  %v7124_v52 = vcombine.low %v680_v31, %v684_v32  ;;  %v7327_v31 = vcombine.high %v2551_v24, %v2555_v25 }
 0x197   :  { %2327 = vmatpush1.bf16.msra.mxu1 %v7052_v53  ;;  %2287 = vmatprep.subr.bf16.mxu0 %v6917_v35  ;;  %v6989_v53 = vcombine.high %v544_v51, %v548_v55  ;;  %v7117_v35 = vcombine.high %v672_v56, %v676_v57 }
 0x198   :  { %2328 = vmatprep.subr.bf16.mxu1 %v7045_v36  ;;  %v536_v36 = vld [vmem:[%s10909_s3 + $0x298] sm:$0xff] }
 0x199   :  { %v6980_v2 = vcombine.low %v536_v36, %v540_v37 }
 0x19a   :  { %2288 = vmatpush1.bf16.msra.mxu0 %v6916_v59  ;;  %v7116_v59 = vcombine.low %v672_v56, %v676_v57  ;;  %v7326_v56 = vcombine.low %v2551_v24, %v2555_v25  ;;  %v2375_v24 = vld [vmem:[%s10911_s5] sm:$0xff] }
 0x19b   :  { %2329 = vmatpush1.bf16.msra.mxu1 %v7044_v60  ;;  %2289 = vmatprep.subr.bf16.mxu0 %v6909_v61  ;;  %v6981_v60 = vcombine.high %v536_v36, %v540_v37  ;;  %v7109_v61 = vcombine.high %v664_v39, %v668_v40  ;;  %v2535_v36 = vld [vmem:[%s10911_s5 + $0x500] sm:$0xff] }
 0x19c   :  { %2330 = vmatprep.subr.bf16.mxu1 %v7037_v62  ;;  %v528_v62 = vld [vmem:[%s10909_s3 + $0x258] sm:$0xff]  ;;  %v2539_v37 = vld [vmem:[%s10911_s5 + $0x520] sm:$0xff] }
 0x19d   :  { %v6972_v10 = vcombine.low %v528_v62, %v532_v63  ;;  %v2379_v25 = vld [vmem:[%s10911_s5 + $0x20] sm:$0xff] }
 0x19e   :  { %2290 = vmatpush1.bf16.msra.mxu0 %v6908_v3  ;;  %v7108_v3 = vcombine.low %v664_v39, %v668_v40  ;;  %v7190_v40 = vcombine.low %v2415_v29, %v2419_v30 }
 0x19f   :  { %2331 = vmatpush1.bf16.msra.mxu1 %v7036_v4  ;;  %2291 = vmatprep.subr.bf16.mxu0 %v6901_v5  ;;  %v6973_v4 = vcombine.high %v528_v62, %v532_v63  ;;  %v7101_v5 = vcombine.high %v656_v0, %v660_v1  ;;  %v2399_v63 = vld [vmem:[%s10911_s5 + $0xc0] sm:$0xff] }
 0x1a0   :  { %2332 = vmatprep.subr.bf16.mxu1 %v7029_v6  ;;  %v520_v6 = vld [vmem:[%s10909_s3 + $0x218] sm:$0xff] }
 0x1a1   :  { %v6964_v18 = vcombine.low %v520_v6, %v524_v7 }
 0x1a2   :  { %2292 = vmatpush1.bf16.msra.mxu0 %v6900_v11  ;;  %v7100_v11 = vcombine.low %v656_v0, %v660_v1  ;;  %v2403_v0 = vld [vmem:[%s10911_s5 + $0xe0] sm:$0xff]  ;;  %v7311_v1 = vcombine.high %v2535_v36, %v2539_v37 }
 0x1a3   :  { %2333 = vmatpush1.bf16.msra.mxu1 %v7028_v12  ;;  %2293 = vmatprep.subr.bf16.mxu0 %v7021_v13  ;;  %v6965_v12 = vcombine.high %v520_v6, %v524_v7  ;;  %v7093_v13 = vcombine.high %v648_v8, %v652_v9  ;;  %v7175_v6 = vcombine.high %v2399_v63, %v2403_v0 }
 0x1a4   :  { %2334 = vmatprep.subr.bf16.mxu1 %v7149_v14  ;;  %v2431_v14 = vld [vmem:[%s10911_s5 + $0x1c0] sm:$0xff]  ;;  %v7310_v7 = vcombine.low %v2535_v36, %v2539_v37 }
 0x1a5   :  { %v7206_v33 = vcombine.low %v2431_v14, %v2435_v15 }
 0x1a6   :  { %2294 = vmatpush2.bf16.msra.mxu0 %v7020_v19  ;;  %v7092_v19 = vcombine.low %v648_v8, %v652_v9  ;;  %v2391_v8 = vld [vmem:[%s10911_s5 + $0x80] sm:$0xff] }
 0x1a7   :  { %2335 = vmatpush2.bf16.msra.mxu1 %v7148_v20  ;;  %2295 = vmatprep.subr.bf16.mxu0 %v7013_v21  ;;  %v7207_v20 = vcombine.high %v2431_v14, %v2435_v15  ;;  %v2423_v21 = vld [vmem:[%s10911_s5 + $0x180] sm:$0xff] }
 0x1a8   :  { %2336 = vmatprep.subr.bf16.mxu1 %v7141_v22  ;;  %v2427_v22 = vld [vmem:[%s10911_s5 + $0x1a0] sm:$0xff] }
 0x1a9   :  { %v2395_v9 = vld [vmem:[%s10911_s5 + $0xa0] sm:$0xff] }
 0x1aa   :  { %2296 = vmatpush2.bf16.msra.mxu0 %v7012_v26  ;;  %v9026_v26 = vld [vmem:[%s10910_s4] sm:$0xff]  ;;  %v7167_v14 = vcombine.high %v2391_v8, %v2395_v9 }
 0x1ab   :  { %2337 = vmatpush2.bf16.msra.mxu1 %v7140_v34  ;;  %2297 = vmatprep.subr.bf16.mxu0 %v7005_v27  ;;  %v7199_v34 = vcombine.high %v2423_v21, %v2427_v22  ;;  %v7334_v27 = vcombine.low %v2559_v16, %v2563_v17  ;;  %v2383_v16 = vld [vmem:[%s10911_s5 + $0x40] sm:$0xff] }
 0x1ac   :  { %2338 = vmatprep.subr.bf16.mxu1 %v7133_v28  ;;  %v718_v28 = vrot.slane %v9026_v26, %v8350_v48  ;;  %v2387_v17 = vld [vmem:[%s10911_s5 + $0x60] sm:$0xff] }
 0x1ae   :  { %2298 = vmatpush2.bf16.msra.mxu0 %v7004_v43 }
 0x1af   :  { %2339 = vmatpush2.bf16.msra.mxu1 %v7132_v47  ;;  %2299 = vmatprep.subr.bf16.mxu0 %v6997_v54  ;;  %v2543_v47 = vld [vmem:[%s10911_s5 + $0x540] sm:$0xff] }
 0x1b0   :  { %2340 = vmatprep.subr.bf16.mxu1 %v7125_v50  ;;  %v2547_v54 = vld [vmem:[%s10911_s5 + $0x560] sm:$0xff]  ;;  %v7198_v50 = vcombine.low %v2423_v21, %v2427_v22  ;;  %v7166_v21 = vcombine.low %v2391_v8, %v2395_v9  ;;  %v7159_v22 = vcombine.high %v2383_v16, %v2387_v17 }
 0x1b1   :  { %v2463_v9 = vld [vmem:[%s10911_s5 + $0x2c0] sm:$0xff] }
 0x1b2   :  { %2300 = vmatpush2.bf16.msra.mxu0 %v6996_v58  ;;  %v2407_v58 = vld [vmem:[%s10911_s5 + $0x100] sm:$0xff] }
 0x1b3   :  { %2341 = vmatpush2.bf16.msra.mxu1 %v7124_v52  ;;  %2301 = vmatprep.subr.bf16.mxu0 %v6989_v53  ;;  %v2411_v52 = vld [vmem:[%s10911_s5 + $0x120] sm:$0xff]  ;;  %v7319_v53 = vcombine.high %v2543_v47, %v2547_v54 }
 0x1b4   :  { %2342 = vmatprep.subr.bf16.mxu1 %v7117_v35 }
 0x1b6   :  { %2302 = vmatpush2.bf16.msra.mxu0 %v6988_v41 }
 0x1b7   :  { %2343 = vmatpush2.bf16.msra.mxu1 %v7116_v59  ;;  %2303 = vmatprep.subr.bf16.mxu0 %v6981_v60  ;;  %v7183_v60 = vcombine.high %v2407_v58, %v2411_v52 }
 0x1b8   :  { %2344 = vmatprep.subr.bf16.mxu1 %v7109_v61  ;;  %v7318_v61 = vcombine.low %v2543_v47, %v2547_v54  ;;  %v2499_v47 = vld [vmem:[%s10911_s5 + $0x3e0] sm:$0xff] }
 0x1ba   :  { %2304 = vmatpush2.bf16.msra.mxu0 %v6980_v2  ;;  %v2527_v2 = vld [vmem:[%s10911_s5 + $0x4c0] sm:$0xff] }
 0x1bb   :  { %2345 = vmatpush2.bf16.msra.mxu1 %v7108_v3  ;;  %2305 = vmatprep.subr.bf16.mxu0 %v6973_v4  ;;  %v2531_v3 = vld [vmem:[%s10911_s5 + $0x4e0] sm:$0xff] }
 0x1bc   :  { %2346 = vmatprep.subr.bf16.mxu1 %v7101_v5  ;;  %v7182_v5 = vcombine.low %v2407_v58, %v2411_v52  ;;  %v7302_v15 = vcombine.low %v2527_v2, %v2531_v3  ;;  %v2491_v58 = vld [vmem:[%s10911_s5 + $0x3a0] sm:$0xff] }
 0x1be   :  { %2306 = vmatpush2.bf16.msra.mxu0 %v6972_v10  ;;  %v7303_v10 = vcombine.high %v2527_v2, %v2531_v3  ;;  %v2599_v3 = vld [vmem:[%s10911_s5 + $0x700] sm:$0xff] }
 0x1bf   :  { %2347 = vmatpush2.bf16.msra.mxu1 %v7100_v11  ;;  %2307 = vmatprep.subr.bf16.mxu0 %v6965_v12  ;;  %v2519_v11 = vld [vmem:[%s10911_s5 + $0x480] sm:$0xff] }
 0x1c0   :  { %2348 = vmatprep.subr.bf16.mxu1 %v7093_v13  ;;  %v2523_v12 = vld [vmem:[%s10911_s5 + $0x4a0] sm:$0xff]  ;;  %v7174_v13 = vcombine.low %v2399_v63, %v2403_v0 }
 0x1c1   :  { %v2471_v0 = vld [vmem:[%s10911_s5 + $0x300] sm:$0xff] }
 0x1c2   :  { %2308 = vmatpush2.bf16.msra.mxu0 %v6964_v18  ;;  %v7295_v18 = vcombine.high %v2519_v11, %v2523_v12 }
 0x1c3   :  { %2349 = vmatpush2.bf16.msra.mxu1 %v7092_v19  ;;  %5489 = vmatprep.subr.bf16.mxu0 %v7207_v20  ;;  %v2511_v19 = vld [vmem:[%s10911_s5 + $0x440] sm:$0xff] }
 0x1c4   :  { %5530 = vmatprep.subr.bf16.mxu1 %v7335_v23  ;;  %v2515_v20 = vld [vmem:[%s10911_s5 + $0x460] sm:$0xff]  ;;  %v7294_v23 = vcombine.low %v2519_v11, %v2523_v12 }
 0x1c5   :  { %2310 = vmatmul.mubr.bf16.vlgmr.msra.gmra.mxu0 %v8423_v38  ;;  %v9037_v32 = vpop.f32.mrf.mxu0  ;;  %v7191_v38 = vcombine.high %v2415_v29, %v2419_v30  ;;  %v7151_v29 = vcombine.high %v2375_v24, %v2379_v25  ;;  %v7286_v30 = vcombine.low %v2511_v19, %v2515_v20  ;;  %v2591_v12 = vld [vmem:[%s10911_s5 + $0x6c0] sm:$0xff] }
 0x1c6   :  { %v9039_v43 = vpop.f32.mrf.mxu1  ;;  %2351 = vmatmul.mubr.bf16.vlgmr.msra.gmra.mxu1 %v8425_v42  ;;  %5490 = vmatpush1.bf16.msra.mxu0 %v7206_v33  ;;  %v7287_v33 = vcombine.high %v2511_v19, %v2515_v20  ;;  %v2583_v20 = vld [vmem:[%s10911_s5 + $0x680] sm:$0xff] }
 0x1c7   :  { %v2067_v51 = vpop.f32.mrf.mxu0  ;;  %5491 = vmatprep.subr.bf16.mxu0 %v7199_v34  ;;  %5531 = vmatpush1.bf16.msra.mxu1 %v7334_v27  ;;  %v2503_v34 = vld [vmem:[%s10911_s5 + $0x400] sm:$0xff] }
 0x1c8   :  { %v2108_v55 = vpop.f32.mrf.mxu1  ;;  %v2068_v57 = vadd.f32 %v2067_v51, %v718_v28  ;;  %5532 = vmatprep.subr.bf16.mxu1 %v7327_v31  ;;  %v2507_v27 = vld [vmem:[%s10911_s5 + $0x420] sm:$0xff]  ;;  %v7158_v28 = vcombine.low %v2383_v16, %v2387_v17 }
 0x1c9   :  { %v2069_v42 = vpop.f32.mrf.mxu0  ;;  %v2495_v31 = vld [vmem:[%s10911_s5 + $0x3c0] sm:$0xff]  ;;  %v7279_v54 = vcombine.high %v2503_v34, %v2507_v27 }
 0x1ca   :  { %v2110_v35 = vpop.f32.mrf.mxu1  ;;  %v2109_v39 = vadd.f32 %v2108_v55, %v2068_v57  ;;  %5492 = vmatpush1.bf16.msra.mxu0 %v7198_v50  ;;  %v2623_v50 = vld [vmem:[%s10911_s5 + $0x7c0] sm:$0xff]  ;;  %v7150_v55 = vcombine.low %v2375_v24, %v2379_v25 }
 0x1cb   :  { %v2070_v41 = vpop.f32.mrf.mxu0  ;;  %5493 = vmatprep.subr.bf16.mxu0 %v7191_v38  ;;  %5533 = vmatpush1.bf16.msra.mxu1 %v7326_v56  ;;  %v2627_v51 = vld [vmem:[%s10911_s5 + $0x7e0] sm:$0xff]  ;;  %v7271_v38 = vcombine.high %v2495_v31, %v2499_v47  ;;  %v7278_v56 = vcombine.low %v2503_v34, %v2507_v27  ;;  %v7270_v35 = vcombine.low %v2495_v31, %v2499_v47 }
 0x1cc   :  { %v2111_v59 = vpop.f32.mrf.mxu1  ;;  %v2360_v62 = vmax.f32 %v2109_v39, 0.0  ;;  %5534 = vmatprep.subr.bf16.mxu1 %v7319_v53  ;;  %v2487_v57 = vld [vmem:[%s10911_s5 + $0x380] sm:$0xff]  ;;  %v7399_v52 = vcombine.high %v2623_v50, %v2627_v51  ;;  %v7398_v37 = vcombine.low %v2623_v50, %v2627_v51 }
 0x1cd   :  { %v2615_v53 = vld [vmem:[%s10911_s5 + $0x780] sm:$0xff]  ;;  %v7263_v36 = vcombine.high %v2487_v57, %v2491_v58 }
 0x1ce   :  { %v9072_v4 = vpack.c.bf16 %v2360_v62, %v2360_v62  ;;  %5494 = vmatpush1.bf16.msra.mxu0 %v7190_v40  ;;  %v2619_v42 = vld [vmem:[%s10911_s5 + $0x7a0] sm:$0xff] }
 0x1cf   :  { %5495 = vmatprep.subr.bf16.mxu0 %v7183_v60  ;;  %5535 = vmatpush1.bf16.msra.mxu1 %v7318_v61  ;;  %v2479_v39 = vld [vmem:[%s10911_s5 + $0x340] sm:$0xff]  ;;  %v7391_v41 = vcombine.high %v2615_v53, %v2619_v42  ;;  %v7262_v61 = vcombine.low %v2487_v57, %v2491_v58  ;;  %v7390_v63 = vcombine.low %v2615_v53, %v2619_v42 }
 0x1d0   :  { %5521 = vmatprep.mubr.bf16.mxu0 %v9072_v4  ;;  %5536 = vmatprep.subr.bf16.mxu1 %v7311_v1  ;;  %v2483_v40 = vld [vmem:[%s10911_s5 + $0x360] sm:$0xff] }
 0x1d1   :  { %v2607_v59 = vld [vmem:[%s10911_s5 + $0x740] sm:$0xff]  ;;  %v7255_v62 = vcombine.high %v2479_v39, %v2483_v40 }
 0x1d2   :  { %5496 = vmatpush1.bf16.msra.mxu0 %v7182_v5  ;;  %v2611_v60 = vld [vmem:[%s10911_s5 + $0x760] sm:$0xff] }
 0x1d3   :  { %5497 = vmatprep.subr.bf16.mxu0 %v7175_v6  ;;  %5537 = vmatpush1.bf16.msra.mxu1 %v7310_v7  ;;  %v2475_v1 = vld [vmem:[%s10911_s5 + $0x320] sm:$0xff]  ;;  %v7383_v2 = vcombine.high %v2607_v59, %v2611_v60  ;;  %v7254_v6 = vcombine.low %v2479_v39, %v2483_v40  ;;  %v7382_v8 = vcombine.low %v2607_v59, %v2611_v60 }
 0x1d4   :  { %5538 = vmatprep.subr.bf16.mxu1 %v7303_v10  ;;  %v2603_v5 = vld [vmem:[%s10911_s5 + $0x720] sm:$0xff]  ;;  %v7247_v7 = vcombine.high %v2471_v0, %v2475_v1 }
 0x1d5   :  { %v2467_v10 = vld [vmem:[%s10911_s5 + $0x2e0] sm:$0xff]  ;;  %v7375_v11 = vcombine.high %v2599_v3, %v2603_v5  ;;  %v7374_v16 = vcombine.low %v2599_v3, %v2603_v5 }
 0x1d6   :  { %5498 = vmatpush1.bf16.msra.mxu0 %v7174_v13  ;;  %v2595_v13 = vld [vmem:[%s10911_s5 + $0x6e0] sm:$0xff] }
 0x1d7   :  { %5499 = vmatprep.subr.bf16.mxu0 %v7167_v14  ;;  %5539 = vmatpush1.bf16.msra.mxu1 %v7302_v15  ;;  %v7246_v14 = vcombine.low %v2471_v0, %v2475_v1  ;;  %v7239_v15 = vcombine.high %v2463_v9, %v2467_v10  ;;  %v2455_v17 = vld [vmem:[%s10911_s5 + $0x280] sm:$0xff]  ;;  %v7367_v19 = vcombine.high %v2591_v12, %v2595_v13 }
 0x1d8   :  { %5540 = vmatprep.subr.bf16.mxu1 %v7295_v18  ;;  %v2459_v18 = vld [vmem:[%s10911_s5 + $0x2a0] sm:$0xff]  ;;  %v7366_v25 = vcombine.low %v2591_v12, %v2595_v13 }
 0x1d9   :  { %v7231_v24 = vcombine.high %v2455_v17, %v2459_v18  ;;  %v2451_v34 = vld [vmem:[%s10911_s5 + $0x260] sm:$0xff] }
 0x1da   :  { %5500 = vmatpush1.bf16.msra.mxu0 %v7166_v21  ;;  %v2587_v21 = vld [vmem:[%s10911_s5 + $0x6a0] sm:$0xff] }
 0x1db   :  { %5501 = vmatprep.subr.bf16.mxu0 %v7159_v22  ;;  %5541 = vmatpush1.bf16.msra.mxu1 %v7294_v23  ;;  %v7238_v22 = vcombine.low %v2463_v9, %v2467_v10  ;;  %v714_v23 = vrot.slane %v9026_v26, %v8341_v45  ;;  %v7359_v27 = vcombine.high %v2583_v20, %v2587_v21  ;;  %v2439_v50 = vld [vmem:[%s10911_s5 + $0x200] sm:$0xff] }
 0x1dc   :  { %5542 = vmatprep.subr.bf16.mxu1 %v7287_v33  ;;  %v2447_v33 = vld [vmem:[%s10911_s5 + $0x240] sm:$0xff] }
 0x1dd   :  { %v2066_v31 = vadd.f32 %v9037_v32, %v714_v23  ;;  %v7223_v47 = vcombine.high %v2447_v33, %v2451_v34  ;;  %v2443_v51 = vld [vmem:[%s10911_s5 + $0x220] sm:$0xff] }
 0x1de   :  { %5502 = vmatpush1.bf16.msra.mxu0 %v7158_v28  ;;  %v2575_v28 = vld [vmem:[%s10911_s5 + $0x640] sm:$0xff]  ;;  %v7215_v58 = vcombine.high %v2439_v50, %v2443_v51 }
 0x1df   :  { %5503 = vmatprep.subr.bf16.mxu0 %v7151_v29  ;;  %5543 = vmatpush1.bf16.msra.mxu1 %v7286_v30  ;;  %v2579_v29 = vld [vmem:[%s10911_s5 + $0x660] sm:$0xff]  ;;  %v7230_v30 = vcombine.low %v2455_v17, %v2459_v18  ;;  %v2107_v57 = vadd.f32 %v9039_v43, %v2066_v31 }
 0x1e0   :  { %5544 = vmatprep.subr.bf16.mxu1 %v7279_v54  ;;  %v7358_v54 = vcombine.low %v2583_v20, %v2587_v21  ;;  %v2571_v32 = vld [vmem:[%s10911_s5 + $0x620] sm:$0xff] }
 0x1e1   :  { %v2687_v42 = vld [vmem:[%s10911_s5 + $0x9c0] sm:$0xff]  ;;  %v2359_v39 = vmax.f32 %v2107_v57, 0.0 }
 0x1e2   :  { %5504 = vmatpush1.bf16.msra.mxu0 %v7150_v55  ;;  %v7351_v55 = vcombine.high %v2575_v28, %v2579_v29  ;;  %v9225_v43 = vld [vmem:[%s10911_s5 + $0xde0] sm:$0xff] }
 0x1e3   :  { %5505 = vmatprep.subr.bf16.mxu0 %v7271_v38  ;;  %5545 = vmatpush1.bf16.msra.mxu1 %v7278_v56  ;;  %v2567_v38 = vld [vmem:[%s10911_s5 + $0x600] sm:$0xff]  ;;  %v7222_v56 = vcombine.low %v2447_v33, %v2451_v34  ;;  %v9237_v0 = vpack.c.bf16 %v2359_v39, %v2359_v39 }
 0x1e4   :  { %5546 = vmatprep.subr.bf16.mxu1 %v7399_v52  ;;  %v7350_v52 = vcombine.low %v2575_v28, %v2579_v29  ;;  %v7343_v53 = vcombine.high %v2567_v38, %v2571_v32  ;;  %v7342_v40 = vcombine.low %v2567_v38, %v2571_v32  ;;  %v2679_v59 = vld [vmem:[%s10911_s5 + $0x980] sm:$0xff]  ;;  %v9283_v38 = vld [vmem:[%s10911_s5 + $0x5e8] sm:$0xff] }
 0x1e5   :  { %v2683_v60 = vld [vmem:[%s10911_s5 + $0x9a0] sm:$0xff] }
 0x1e6   :  { %5506 = vmatpush2.bf16.msra.mxu0 %v7270_v35  ;;  %v2691_v35 = vld [vmem:[%s10911_s5 + $0x9e0] sm:$0xff]  ;;  %v7455_v1 = vcombine.high %v2679_v59, %v2683_v60  ;;  %v7454_v9 = vcombine.low %v2679_v59, %v2683_v60 }
 0x1e7   :  { %5507 = vmatprep.subr.bf16.mxu0 %v7263_v36  ;;  %5547 = vmatpush2.bf16.msra.mxu1 %v7398_v37  ;;  %v9220_v36 = vld [vmem:[%s10911_s5 + $0xdc0] sm:$0xff]  ;;  %v7214_v37 = vcombine.low %v2439_v50, %v2443_v51 }
 0x1e8   :  { %5548 = vmatprep.subr.bf16.mxu1 %v7391_v41  ;;  %v7463_v41 = vcombine.high %v2687_v42, %v2691_v35  ;;  %v2671_v3 = vld [vmem:[%s10911_s5 + $0x940] sm:$0xff]  ;;  %v7590_v31 = vcombine.low %v9220_v36, %v9225_v43 }
 0x1e9   :  { %v2675_v5 = vld [vmem:[%s10911_s5 + $0x960] sm:$0xff] }
 0x1ea   :  { %5508 = vmatpush2.bf16.msra.mxu0 %v7262_v61  ;;  %v7591_v61 = vcombine.high %v9220_v36, %v9225_v43  ;;  %v7447_v12 = vcombine.high %v2671_v3, %v2675_v5  ;;  %v7446_v20 = vcombine.low %v2671_v3, %v2675_v5  ;;  %v2659_v34 = vld [vmem:[%s10911_s5 + $0x8e0] sm:$0xff] }
 0x1eb   :  { %5509 = vmatprep.subr.bf16.mxu0 %v7255_v62  ;;  %5549 = vmatpush2.bf16.msra.mxu1 %v7390_v63  ;;  %v722_v62 = vrot.slane %v9026_v26, %v8344_v46  ;;  %v7462_v63 = vcombine.low %v2687_v42, %v2691_v35  ;;  %v2811_v28 = vld [vmem:[%s10911_s5 + $0xda0] sm:$0xff] }
 0x1ec   :  { %5550 = vmatprep.subr.bf16.mxu1 %v7383_v2  ;;  %v726_v2 = vrot.slane %v9026_v26, %v8353_v49  ;;  %v2647_v50 = vld [vmem:[%s10911_s5 + $0x880] sm:$0xff] }
 0x1ed   :  { %v2651_v32 = vld [vmem:[%s10911_s5 + $0x8a0] sm:$0xff] }
 0x1ee   :  { %5510 = vmatpush2.bf16.msra.mxu0 %v7254_v6  ;;  %v2803_v57 = vld [vmem:[%s10911_s5 + $0xd60] sm:$0xff]  ;;  %v7423_v42 = vcombine.high %v2647_v50, %v2651_v32 }
 0x1ef   :  { %5511 = vmatprep.subr.bf16.mxu0 %v7247_v7  ;;  %5551 = vmatpush2.bf16.msra.mxu1 %v7382_v8  ;;  %v2639_v35 = vld [vmem:[%s10911_s5 + $0x840] sm:$0xff] }
 0x1f0   :  { %5552 = vmatprep.subr.bf16.mxu1 %v7375_v11  ;;  %v2643_v43 = vld [vmem:[%s10911_s5 + $0x860] sm:$0xff] }
 0x1f1   :  { %v2795_v39 = vld [vmem:[%s10911_s5 + $0xd20] sm:$0xff]  ;;  %v7415_v59 = vcombine.high %v2639_v35, %v2643_v43 }
 0x1f2   :  { %5512 = vmatpush2.bf16.msra.mxu0 %v7246_v14  ;;  %v2631_v60 = vld [vmem:[%s10911_s5 + $0x800] sm:$0xff] }
 0x1f3   :  { %5513 = vmatprep.subr.bf16.mxu0 %v7239_v15  ;;  %5553 = vmatpush2.bf16.msra.mxu1 %v7374_v16  ;;  %v2663_v15 = vld [vmem:[%s10911_s5 + $0x900] sm:$0xff] }
 0x1f4   :  { %5554 = vmatprep.subr.bf16.mxu1 %v7367_v19  ;;  %v2667_v16 = vld [vmem:[%s10911_s5 + $0x920] sm:$0xff] }
 0x1f6   :  { %5514 = vmatpush2.bf16.msra.mxu0 %v7238_v22 }
 0x1f7   :  { %5515 = vmatprep.subr.bf16.mxu0 %v7231_v24  ;;  %5555 = vmatpush2.bf16.msra.mxu1 %v7366_v25  ;;  %v7439_v24 = vcombine.high %v2663_v15, %v2667_v16  ;;  %v2655_v25 = vld [vmem:[%s10911_s5 + $0x8c0] sm:$0xff] }
 0x1f8   :  { %5556 = vmatprep.subr.bf16.mxu1 %v7359_v27  ;;  %v2807_v27 = vld [vmem:[%s10911_s5 + $0xd80] sm:$0xff] }
 0x1f9   :  { %v7583_v51 = vcombine.high %v2807_v27, %v2811_v28 }
 0x1fa   :  { %5516 = vmatpush2.bf16.msra.mxu0 %v7230_v30  ;;  %v7438_v30 = vcombine.low %v2663_v15, %v2667_v16  ;;  %v2747_v16 = vld [vmem:[%s10911_s5 + $0xba0] sm:$0xff] }
 0x1fb   :  { %5517 = vmatprep.subr.bf16.mxu0 %v7223_v47  ;;  %5557 = vmatpush2.bf16.msra.mxu1 %v7358_v54  ;;  %v7431_v54 = vcombine.high %v2655_v25, %v2659_v34 }
 0x1fc   :  { %5558 = vmatprep.subr.bf16.mxu1 %v7351_v55  ;;  %v9278_v55 = vld [vmem:[%s10911_s5 + $0x5c8] sm:$0xff] }
 0x1fe   :  { %5518 = vmatpush2.bf16.msra.mxu0 %v7222_v56  ;;  %v2799_v56 = vld [vmem:[%s10911_s5 + $0xd40] sm:$0xff] }
 0x1ff   :  { %5519 = vmatprep.subr.bf16.mxu0 %v7215_v58  ;;  %5559 = vmatpush2.bf16.msra.mxu1 %v7350_v52  ;;  %v7336_v58 = vcombine.low %v9278_v55, %v9283_v38  ;;  %v7430_v52 = vcombine.low %v2655_v25, %v2659_v34  ;;  %v7575_v36 = vcombine.high %v2799_v56, %v2803_v57  ;;  %v2759_v25 = vld [vmem:[%s10911_s5 + $0xc00] sm:$0xff] }
 0x200   :  { %5560 = vmatprep.subr.bf16.mxu1 %v7343_v53  ;;  %v7582_v53 = vcombine.low %v2807_v27, %v2811_v28 }
 0x202   :  { %5520 = vmatpush2.bf16.msra.mxu0 %v7214_v37  ;;  %v2791_v37 = vld [vmem:[%s10911_s5 + $0xd00] sm:$0xff] }
 0x203   :  { %5561 = vmatpush2.bf16.msra.mxu1 %v7342_v40  ;;  %5571 = vmatprep.subr.bf16.mxu0 %v7463_v41  ;;  %v7422_v40 = vcombine.low %v2647_v50, %v2651_v32  ;;  %v7574_v41 = vcombine.low %v2799_v56, %v2803_v57  ;;  %v7566_v3 = vcombine.low %v2791_v37, %v2795_v39  ;;  %v2879_v50 = vld [vmem:[%s10911_s5 + $0xfc0] sm:$0xff] }
 0x204   :  { %5612 = vmatprep.subr.bf16.mxu1 %v7591_v61  ;;  %v7567_v61 = vcombine.high %v2791_v37, %v2795_v39 }
 0x205   :  { %v2147_v6 = vpop.f32.mrf.mxu0  ;;  %5522 = vmatmul.mubr.bf16.vlgmr.msra.gmra.mxu0 %v9237_v0 }
 0x206   :  { %v2188_v7 = vpop.f32.mrf.mxu1  ;;  %v2148_v8 = vadd.f32 %v2147_v6, %v722_v62  ;;  %5572 = vmatpush1.bf16.msra.mxu0 %v7462_v63  ;;  %v2635_v62 = vld [vmem:[%s10911_s5 + $0x820] sm:$0xff] }
 0x207   :  { %v2149_v10 = vpop.f32.mrf.mxu0  ;;  %5573 = vmatprep.subr.bf16.mxu0 %v7455_v1  ;;  %v2783_v63 = vld [vmem:[%s10911_s5 + $0xcc0] sm:$0xff]  ;;  %v7407_v5 = vcombine.high %v2631_v60, %v2635_v62 }
 0x208   :  { %v2190_v11 = vpop.f32.mrf.mxu1  ;;  %v2189_v13 = vadd.f32 %v2188_v7, %v2148_v8  ;;  %v2150_v14 = vadd.f32 %v2149_v10, %v726_v2  ;;  %v2787_v1 = vld [vmem:[%s10911_s5 + $0xce0] sm:$0xff]  ;;  %v7414_v2 = vcombine.low %v2639_v35, %v2643_v43 }
 0x209   :  { %v2151_v17 = vpop.f32.mrf.mxu0  ;;  %v2751_v6 = vld [vmem:[%s10911_s5 + $0xbc0] sm:$0xff]  ;;  %v7559_v7 = vcombine.high %v2783_v63, %v2787_v1 }
 0x20a   :  { %v2192_v18 = vpop.f32.mrf.mxu1  ;;  %v2191_v19 = vadd.f32 %v2190_v11, %v2150_v14  ;;  %5574 = vmatpush1.bf16.msra.mxu0 %v7454_v9  ;;  %v2361_v21 = vmax.f32 %v2189_v13, 0.0  ;;  %v2755_v8 = vld [vmem:[%s10911_s5 + $0xbe0] sm:$0xff]  ;;  %v7406_v11 = vcombine.low %v2631_v60, %v2635_v62 }
 0x20b   :  { %v2152_v22 = vpop.f32.mrf.mxu0  ;;  %5575 = vmatprep.subr.bf16.mxu0 %v7447_v12  ;;  %v2775_v9 = vld [vmem:[%s10911_s5 + $0xc80] sm:$0xff]  ;;  %v7558_v12 = vcombine.low %v2783_v63, %v2787_v1  ;;  %v7527_v13 = vcombine.high %v2751_v6, %v2755_v8 }
 0x20c   :  { %v2193_v23 = vpop.f32.mrf.mxu1  ;;  %v2362_v33 = vmax.f32 %v2191_v19, 0.0  ;;  %v9270_v47 = vpack.c.bf16 %v2361_v21, %v2361_v21  ;;  %v2779_v10 = vld [vmem:[%s10911_s5 + $0xca0] sm:$0xff]  ;;  %v7526_v19 = vcombine.low %v2751_v6, %v2755_v8 }
 0x20d   :  { %v2743_v14 = vld [vmem:[%s10911_s5 + $0xb80] sm:$0xff]  ;;  %v7551_v15 = vcombine.high %v2775_v9, %v2779_v10 }
 0x20e   :  { %v9266_v29 = vpack.c.bf16 %v2362_v33, %v2362_v33  ;;  %5576 = vmatpush1.bf16.msra.mxu0 %v7446_v20  ;;  %v2767_v17 = vld [vmem:[%s10911_s5 + $0xc40] sm:$0xff]  ;;  %v7550_v20 = vcombine.low %v2775_v9, %v2779_v10  ;;  %v7519_v21 = vcombine.high %v2743_v14, %v2747_v16  ;;  %v7518_v34 = vcombine.low %v2743_v14, %v2747_v16 }
 0x20f   :  { %5577 = vmatprep.subr.bf16.mxu0 %v7439_v24  ;;  %v2771_v18 = vld [vmem:[%s10911_s5 + $0xc60] sm:$0xff] }
 0x210   :  { %5562 = vmatprep.mubr.bf16.mxu1 %v9266_v29  ;;  %v2735_v22 = vld [vmem:[%s10911_s5 + $0xb40] sm:$0xff]  ;;  %v7543_v23 = vcombine.high %v2767_v17, %v2771_v18  ;;  %v7542_v27 = vcombine.low %v2767_v17, %v2771_v18 }
 0x211   :  { %5563 = vmatmul.mubr.bf16.vlgmr.msra.gmra.mxu1 %v9270_v47  ;;  %v2739_v24 = vld [vmem:[%s10911_s5 + $0xb60] sm:$0xff] }
 0x212   :  { %5578 = vmatpush1.bf16.msra.mxu0 %v7438_v30  ;;  %5613 = vmatpush1.bf16.msra.mxu1 %v7590_v31  ;;  %v2763_v33 = vld [vmem:[%s10911_s5 + $0xc20] sm:$0xff]  ;;  %v7511_v28 = vcombine.high %v2735_v22, %v2739_v24  ;;  %v7510_v32 = vcombine.low %v2735_v22, %v2739_v24  ;;  %v729_v24 = vsub.s32 4, %v8338_v44 }
 0x213   :  { %5579 = vmatprep.subr.bf16.mxu0 %v7431_v54  ;;  %5614 = vmatprep.subr.bf16.mxu1 %v7583_v51  ;;  %v2727_v30 = vld [vmem:[%s10911_s5 + $0xb00] sm:$0xff]  ;;  %v7535_v31 = vcombine.high %v2759_v25, %v2763_v33  ;;  %v7534_v56 = vcombine.low %v2759_v25, %v2763_v33 }
 0x214   :  { %v2731_v54 = vld [vmem:[%s10911_s5 + $0xb20] sm:$0xff] }
 0x215   :  { %v2883_v51 = vld [vmem:[%s10911_s5 + $0xfe0] sm:$0xff]  ;;  %v7503_v57 = vcombine.high %v2727_v30, %v2731_v54  ;;  %v7502_v43 = vcombine.low %v2727_v30, %v2731_v54  ;;  %v730_v54 = vrot.slane %v9026_v26, %v729_v24 }
 0x216   :  { %5580 = vmatpush1.bf16.msra.mxu0 %v7430_v52  ;;  %5615 = vmatpush1.bf16.msra.mxu1 %v7582_v53  ;;  %v2719_v52 = vld [vmem:[%s10911_s5 + $0xac0] sm:$0xff]  ;;  %v7655_v53 = vcombine.high %v2879_v50, %v2883_v51  ;;  %v7654_v37 = vcombine.low %v2879_v50, %v2883_v51 }
 0x217   :  { %5581 = vmatprep.subr.bf16.mxu0 %v7423_v42  ;;  %5616 = vmatprep.subr.bf16.mxu1 %v7575_v36  ;;  %v2723_v42 = vld [vmem:[%s10911_s5 + $0xae0] sm:$0xff] }
 0x218   :  { %v2871_v35 = vld [vmem:[%s10911_s5 + $0xf80] sm:$0xff]  ;;  %v7495_v39 = vcombine.high %v2719_v52, %v2723_v42  ;;  %v7494_v62 = vcombine.low %v2719_v52, %v2723_v42 }
 0x219   :  { %v2875_v36 = vld [vmem:[%s10911_s5 + $0xfa0] sm:$0xff] }
 0x21a   :  { %5582 = vmatpush1.bf16.msra.mxu0 %v7422_v40  ;;  %5617 = vmatpush1.bf16.msra.mxu1 %v7574_v41  ;;  %v2711_v40 = vld [vmem:[%s10911_s5 + $0xa80] sm:$0xff]  ;;  %v7647_v41 = vcombine.high %v2871_v35, %v2875_v36  ;;  %v7646_v63 = vcombine.low %v2871_v35, %v2875_v36 }
 0x21b   :  { %5583 = vmatprep.subr.bf16.mxu0 %v7415_v59  ;;  %5618 = vmatprep.subr.bf16.mxu1 %v7567_v61  ;;  %v2715_v59 = vld [vmem:[%s10911_s5 + $0xaa0] sm:$0xff] }
 0x21c   :  { %v2863_v60 = vld [vmem:[%s10911_s5 + $0xf40] sm:$0xff]  ;;  %v7487_v1 = vcombine.high %v2711_v40, %v2715_v59  ;;  %v7486_v8 = vcombine.low %v2711_v40, %v2715_v59 }
 0x21d   :  { %v2867_v61 = vld [vmem:[%s10911_s5 + $0xf60] sm:$0xff] }
 0x21e   :  { %5584 = vmatpush1.bf16.msra.mxu0 %v7414_v2  ;;  %5619 = vmatpush1.bf16.msra.mxu1 %v7566_v3  ;;  %v2703_v2 = vld [vmem:[%s10911_s5 + $0xa40] sm:$0xff]  ;;  %v7639_v3 = vcombine.high %v2863_v60, %v2867_v61  ;;  %v7638_v9 = vcombine.low %v2863_v60, %v2867_v61 }
 0x21f   :  { %5585 = vmatprep.subr.bf16.mxu0 %v7407_v5  ;;  %5620 = vmatprep.subr.bf16.mxu1 %v7559_v7  ;;  %v2707_v5 = vld [vmem:[%s10911_s5 + $0xa60] sm:$0xff] }
 0x220   :  { %v2855_v6 = vld [vmem:[%s10911_s5 + $0xf00] sm:$0xff]  ;;  %v7479_v10 = vcombine.high %v2703_v2, %v2707_v5  ;;  %v7478_v16 = vcombine.low %v2703_v2, %v2707_v5  ;;  %v2428_v5 = vld [vmem:[%s10911_s5 + $0x1a8] sm:$0xff] }
 0x221   :  { %v2859_v7 = vld [vmem:[%s10911_s5 + $0xf20] sm:$0xff] }
 0x222   :  { %5586 = vmatpush1.bf16.msra.mxu0 %v7406_v11  ;;  %5621 = vmatpush1.bf16.msra.mxu1 %v7558_v12  ;;  %v2695_v11 = vld [vmem:[%s10911_s5 + $0xa00] sm:$0xff]  ;;  %v7631_v12 = vcombine.high %v2855_v6, %v2859_v7  ;;  %v7630_v17 = vcombine.low %v2855_v6, %v2859_v7 }
 0x223   :  { %5587 = vmatprep.subr.bf16.mxu0 %v7527_v13  ;;  %5622 = vmatprep.subr.bf16.mxu1 %v7551_v15  ;;  %v2699_v13 = vld [vmem:[%s10911_s5 + $0xa20] sm:$0xff] }
 0x224   :  { %v2847_v14 = vld [vmem:[%s10911_s5 + $0xec0] sm:$0xff]  ;;  %v7471_v18 = vcombine.high %v2695_v11, %v2699_v13  ;;  %v7470_v25 = vcombine.low %v2695_v11, %v2699_v13  ;;  %v2420_v11 = vld [vmem:[%s10911_s5 + $0x168] sm:$0xff] }
 0x225   :  { %v2851_v15 = vld [vmem:[%s10911_s5 + $0xee0] sm:$0xff] }
 0x226   :  { %5588 = vmatpush2.bf16.msra.mxu0 %v7526_v19  ;;  %5623 = vmatpush1.bf16.msra.mxu1 %v7550_v20  ;;  %v2432_v19 = vld [vmem:[%s10911_s5 + $0x1c8] sm:$0xff]  ;;  %v7623_v20 = vcombine.high %v2847_v14, %v2851_v15  ;;  %v2839_v22 = vld [vmem:[%s10911_s5 + $0xe80] sm:$0xff]  ;;  %v7622_v33 = vcombine.low %v2847_v14, %v2851_v15 }
 0x227   :  { %5589 = vmatprep.subr.bf16.mxu0 %v7519_v21  ;;  %5624 = vmatprep.subr.bf16.mxu1 %v7543_v23  ;;  %v2436_v21 = vld [vmem:[%s10911_s5 + $0x1e8] sm:$0xff]  ;;  %v2843_v23 = vld [vmem:[%s10911_s5 + $0xea0] sm:$0xff] }
 0x228   :  { %v2831_v30 = vld [vmem:[%s10911_s5 + $0xe40] sm:$0xff]  ;;  %v7614_v50 = vcombine.low %v2839_v22, %v2843_v23  ;;  %v7208_v7 = vcombine.low %v2432_v19, %v2436_v21  ;;  %v2408_v14 = vld [vmem:[%s10911_s5 + $0x108] sm:$0xff] }
 0x229   :  { %v2412_v15 = vld [vmem:[%s10911_s5 + $0x128] sm:$0xff] }
 0x22a   :  { %5590 = vmatpush2.bf16.msra.mxu0 %v7518_v34  ;;  %5625 = vmatpush1.bf16.msra.mxu1 %v7542_v27  ;;  %v7209_v34 = vcombine.high %v2432_v19, %v2436_v21  ;;  %v7615_v27 = vcombine.high %v2839_v22, %v2843_v23  ;;  %v2404_v19 = vld [vmem:[%s10911_s5 + $0xe8] sm:$0xff] }
 0x22b   :  { %5591 = vmatprep.subr.bf16.mxu0 %v7511_v28  ;;  %5626 = vmatprep.subr.bf16.mxu1 %v7535_v31  ;;  %v733_v28 = vsub.s32 5, %v8338_v44  ;;  %v2835_v31 = vld [vmem:[%s10911_s5 + $0xe60] sm:$0xff]  ;;  %v2392_v22 = vld [vmem:[%s10911_s5 + $0x88] sm:$0xff] }
 0x22c   :  { %v7607_v51 = vcombine.high %v2831_v30, %v2835_v31  ;;  %v7606_v35 = vcombine.low %v2831_v30, %v2835_v31  ;;  %v2396_v23 = vld [vmem:[%s10911_s5 + $0xa8] sm:$0xff] }
 0x22d   :  { %v7168_v30 = vcombine.low %v2392_v22, %v2396_v23 }
 0x22e   :  { %5592 = vmatpush2.bf16.msra.mxu0 %v7510_v32  ;;  %5627 = vmatpush1.bf16.msra.mxu1 %v7534_v56  ;;  %v734_v32 = vrot.slane %v9026_v26, %v733_v28  ;;  %v2823_v56 = vld [vmem:[%s10911_s5 + $0xe00] sm:$0xff] }
 0x22f   :  { %5593 = vmatprep.subr.bf16.mxu0 %v7503_v57  ;;  %5628 = vmatprep.subr.bf16.mxu1 %v7655_v53  ;;  %v2827_v57 = vld [vmem:[%s10911_s5 + $0xe20] sm:$0xff] }
 0x230   :  { %v7598_v60 = vcombine.low %v2823_v56, %v2827_v57 }
 0x232   :  { %5594 = vmatpush2.bf16.msra.mxu0 %v7502_v43  ;;  %5629 = vmatpush2.bf16.msra.mxu1 %v7654_v37  ;;  %v7599_v43 = vcombine.high %v2823_v56, %v2827_v57  ;;  %v2496_v56 = vld [vmem:[%s10911_s5 + $0x3c8] sm:$0xff] }
 0x233   :  { %5595 = vmatprep.subr.bf16.mxu0 %v7495_v39  ;;  %5630 = vmatprep.subr.bf16.mxu1 %v7647_v41  ;;  %v2500_v57 = vld [vmem:[%s10911_s5 + $0x3e8] sm:$0xff] }
 0x236   :  { %5596 = vmatpush2.bf16.msra.mxu0 %v7494_v62  ;;  %5631 = vmatpush2.bf16.msra.mxu1 %v7646_v63  ;;  %v7337_v63 = vcombine.high %v9278_v55, %v9283_v38  ;;  %v2540_v55 = vld [vmem:[%s10911_s5 + $0x528] sm:$0xff] }
 0x237   :  { %5597 = vmatprep.subr.bf16.mxu0 %v7487_v1  ;;  %5632 = vmatprep.subr.bf16.mxu1 %v7639_v3  ;;  %v2424_v3 = vld [vmem:[%s10911_s5 + $0x188] sm:$0xff] }
 0x238   :  { %v2664_v38 = vld [vmem:[%s10911_s5 + $0x908] sm:$0xff] }
 0x23a   :  { %5598 = vmatpush2.bf16.msra.mxu0 %v7486_v8  ;;  %5633 = vmatpush2.bf16.msra.mxu1 %v7638_v9  ;;  %v7201_v9 = vcombine.high %v2424_v3, %v2428_v5 }
 0x23b   :  { %5599 = vmatprep.subr.bf16.mxu0 %v7479_v10  ;;  %5634 = vmatprep.subr.bf16.mxu1 %v7631_v12  ;;  %v2416_v10 = vld [vmem:[%s10911_s5 + $0x148] sm:$0xff]  ;;  %v7200_v12 = vcombine.low %v2424_v3, %v2428_v5 }
 0x23c   :  { %v7193_v13 = vcombine.high %v2416_v10, %v2420_v11  ;;  %v2456_v3 = vld [vmem:[%s10911_s5 + $0x288] sm:$0xff] }
 0x23d   :  { %v2460_v5 = vld [vmem:[%s10911_s5 + $0x2a8] sm:$0xff] }
 0x23e   :  { %5600 = vmatpush2.bf16.msra.mxu0 %v7478_v16  ;;  %5635 = vmatpush2.bf16.msra.mxu1 %v7630_v17  ;;  %v7192_v16 = vcombine.low %v2416_v10, %v2420_v11  ;;  %v7185_v17 = vcombine.high %v2408_v14, %v2412_v15  ;;  %v7233_v10 = vcombine.high %v2456_v3, %v2460_v5  ;;  %v741_v11 = vsub.s32 7, %v8338_v44 }
 0x23f   :  { %5601 = vmatprep.subr.bf16.mxu0 %v7471_v18  ;;  %5636 = vmatprep.subr.bf16.mxu1 %v7623_v20  ;;  %v2400_v18 = vld [vmem:[%s10911_s5 + $0xc8] sm:$0xff]  ;;  %v7184_v20 = vcombine.low %v2408_v14, %v2412_v15  ;;  %v7232_v14 = vcombine.low %v2456_v3, %v2460_v5  ;;  %v7931_v15 = vld [vmem:[%s10910_s4] sm:$0xff] }
 0x240   :  { %v7177_v21 = vcombine.high %v2400_v18, %v2404_v19 }
 0x242   :  { %5602 = vmatpush2.bf16.msra.mxu0 %v7470_v25  ;;  %5637 = vmatpush2.bf16.msra.mxu1 %v7622_v33  ;;  %v7176_v25 = vcombine.low %v2400_v18, %v2404_v19  ;;  %v7169_v33 = vcombine.high %v2392_v22, %v2396_v23  ;;  %v742_v18 = vrot.slane %v7931_v15, %v741_v11  ;;  %v2440_v19 = vld [vmem:[%s10911_s5 + $0x208] sm:$0xff] }
 0x243   :  { %5653 = vmatprep.subr.bf16.mxu0 %v7209_v34  ;;  %5638 = vmatprep.subr.bf16.mxu1 %v7615_v27  ;;  %v2384_v34 = vld [vmem:[%s10911_s5 + $0x48] sm:$0xff] }
 0x244   :  { %v2388_v27 = vld [vmem:[%s10911_s5 + $0x68] sm:$0xff] }
 0x245   :  { %v2229_v52 = vpop.f32.mrf.mxu0  ;;  %v7161_v31 = vcombine.high %v2384_v34, %v2388_v27 }
 0x246   :  { %v2230_v53 = vadd.f32 %v2229_v52, %v730_v54  ;;  %v2270_v42 = vpop.f32.mrf.mxu1  ;;  %5639 = vmatpush2.bf16.msra.mxu1 %v7614_v50  ;;  %v2376_v54 = vld [vmem:[%s10911_s5 + $0x8] sm:$0xff] }
 0x247   :  { %v2231_v36 = vpop.f32.mrf.mxu0  ;;  %5640 = vmatprep.subr.bf16.mxu1 %v7607_v51  ;;  %v2380_v50 = vld [vmem:[%s10911_s5 + $0x28] sm:$0xff]  ;;  %v7160_v51 = vcombine.low %v2384_v34, %v2388_v27 }
 0x248   :  { %v2271_v37 = vadd.f32 %v2270_v42, %v2230_v53  ;;  %v2232_v39 = vadd.f32 %v2231_v36, %v734_v32  ;;  %v2272_v40 = vpop.f32.mrf.mxu1  ;;  %v7153_v32 = vcombine.high %v2376_v54, %v2380_v50  ;;  %v7152_v52 = vcombine.low %v2376_v54, %v2380_v50  ;;  %v2488_v42 = vld [vmem:[%s10911_s5 + $0x388] sm:$0xff] }
 0x249   :  { %v2233_v26 = vpop.f32.mrf.mxu0  ;;  %v7273_v53 = vcombine.high %v2496_v56, %v2500_v57  ;;  %v7272_v36 = vcombine.low %v2496_v56, %v2500_v57  ;;  %v2688_v54 = vld [vmem:[%s10911_s5 + $0x9c8] sm:$0xff] }
 0x24a   :  { %v2273_v41 = vadd.f32 %v2272_v40, %v2232_v39  ;;  %v2274_v59 = vpop.f32.mrf.mxu1  ;;  %5641 = vmatpush2.bf16.msra.mxu1 %v7606_v35  ;;  %v2363_v61 = vmax.f32 %v2271_v37, 0.0  ;;  %v2492_v35 = vld [vmem:[%s10911_s5 + $0x3a8] sm:$0xff] }
 0x24b   :  { %v2234_v62 = vpop.f32.mrf.mxu0  ;;  %5642 = vmatprep.subr.bf16.mxu1 %v7599_v43  ;;  %v7265_v43 = vcombine.high %v2488_v42, %v2492_v35  ;;  %v2480_v37 = vld [vmem:[%s10911_s5 + $0x348] sm:$0xff]  ;;  %v7264_v40 = vcombine.low %v2488_v42, %v2492_v35 }
 0x24c   :  { %v2364_v1 = vmax.f32 %v2273_v41, 0.0  ;;  %v2275_v2 = vpop.f32.mrf.mxu1  ;;  %v9460_v8 = vpack.c.bf16 %v2363_v61, %v2363_v61  ;;  %v2484_v39 = vld [vmem:[%s10911_s5 + $0x368] sm:$0xff] }
 0x24d   :  { %v7257_v26 = vcombine.high %v2480_v37, %v2484_v39  ;;  %v2472_v41 = vld [vmem:[%s10911_s5 + $0x308] sm:$0xff] }
 0x24e   :  { %v9458_v6 = vpack.c.bf16 %v2364_v1, %v2364_v1  ;;  %5643 = vmatpush2.bf16.msra.mxu1 %v7598_v60  ;;  %v2476_v59 = vld [vmem:[%s10911_s5 + $0x328] sm:$0xff]  ;;  %v7256_v60 = vcombine.low %v2480_v37, %v2484_v39 }
 0x24f   :  { %5694 = vmatprep.subr.bf16.mxu1 %v7337_v63  ;;  %v7249_v61 = vcombine.high %v2472_v41, %v2476_v59  ;;  %v2464_v62 = vld [vmem:[%s10911_s5 + $0x2c8] sm:$0xff]  ;;  %v7248_v1 = vcombine.low %v2472_v41, %v2476_v59 }
 0x250   :  { %5603 = vmatprep.mubr.bf16.mxu0 %v9458_v6  ;;  %v2468_v63 = vld [vmem:[%s10911_s5 + $0x2e8] sm:$0xff] }
 0x251   :  { %5604 = vmatmul.mubr.bf16.vlgmr.msra.gmra.mxu0 %v9460_v8  ;;  %v7241_v2 = vcombine.high %v2464_v62, %v2468_v63  ;;  %v2692_v50 = vld [vmem:[%s10911_s5 + $0x9e8] sm:$0xff] }
 0x252   :  { %5654 = vmatpush1.bf16.msra.mxu0 %v7208_v7  ;;  %5685 = vmatprep.mubr.bf16.mxu0 %v9072_v4  ;;  %v7240_v7 = vcombine.low %v2464_v62, %v2468_v63  ;;  %v7465_v42 = vcombine.high %v2688_v54, %v2692_v50  ;;  %v2556_v37 = vld [vmem:[%s10911_s5 + $0x5a8] sm:$0xff]  ;;  %v7464_v41 = vcombine.low %v2688_v54, %v2692_v50 }
 0x253   :  { %5655 = vmatprep.subr.bf16.mxu0 %v7201_v9  ;;  %v737_v9 = vsub.s32 6, %v8338_v44  ;;  %v2680_v39 = vld [vmem:[%s10911_s5 + $0x988] sm:$0xff]  ;;  %v7662_v44 = vld [vmem:[%s10914_s8] ss:$0 sm:$0xff]  ;;  %s7933_s8 = scalar_lea.vmem %s6851_s19, 32 }
 0x254   :  { %v2548_v63 = vld [vmem:[%s10911_s5 + $0x568] sm:$0xff]  ;;  %p7934_p0 = scmp.ne.s32.totalorder %s6851_s19, %s7933_s8  ;;  %p7939_p2 = scmp.lt.s32.totalorder %s7933_s8, %s7933_s8 }
 0x256   :  { %5656 = vmatpush1.bf16.msra.mxu0 %v7200_v12  ;;  %v2448_v12 = vld [vmem:[%s10911_s5 + $0x248] sm:$0xff]  ;;  %p7940_p3 = por %p7939_p2, %p7938_p1 }
 0x257   :  { %5657 = vmatprep.subr.bf16.mxu0 %v7193_v13  ;;  %v2452_v13 = vld [vmem:[%s10911_s5 + $0x268] sm:$0xff] }
 0x258   :  { %p7941_p4 = pnand %p7940_p3, %p7934_p0 }
 0x25a   :  { %5658 = vmatpush1.bf16.msra.mxu0 %v7192_v16  ;;  %v738_v16 = vrot.slane %v7931_v15, %v737_v9 }
 0x25b   :  { %5659 = vmatprep.subr.bf16.mxu0 %v7185_v17  ;;  %v7225_v17 = vcombine.high %v2448_v12, %v2452_v13 }
 0x25e   :  { %5660 = vmatpush1.bf16.msra.mxu0 %v7184_v20  ;;  %v2444_v20 = vld [vmem:[%s10911_s5 + $0x228] sm:$0xff] }
 0x25f   :  { %5661 = vmatprep.subr.bf16.mxu0 %v7177_v21  ;;  %v7217_v34 = vcombine.high %v2440_v19, %v2444_v20  ;;  %v7216_v57 = vcombine.low %v2440_v19, %v2444_v20  ;;  %v2656_v19 = vld [vmem:[%s10911_s5 + $0x8c8] sm:$0xff] }
 0x260   :  { %v2660_v20 = vld [vmem:[%s10911_s5 + $0x8e8] sm:$0xff] }
 0x261   :  { %v7432_v54 = vcombine.low %v2656_v19, %v2660_v20 }
 0x262   :  { %5662 = vmatpush1.bf16.msra.mxu0 %v7176_v25  ;;  %v7224_v25 = vcombine.low %v2448_v12, %v2452_v13  ;;  %v2536_v12 = vld [vmem:[%s10911_s5 + $0x508] sm:$0xff] }
 0x263   :  { %5663 = vmatprep.subr.bf16.mxu0 %v7169_v33  ;;  %v7313_v15 = vcombine.high %v2536_v12, %v2540_v55 }
 0x266   :  { %5664 = vmatpush1.bf16.msra.mxu0 %v7168_v30 }
 0x267   :  { %5665 = vmatprep.subr.bf16.mxu0 %v7161_v31 }
 0x26a   :  { %5666 = vmatpush1.bf16.msra.mxu0 %v7160_v51 }
 0x26b   :  { %5667 = vmatprep.subr.bf16.mxu0 %v7153_v32 }
 0x26e   :  { %5668 = vmatpush1.bf16.msra.mxu0 %v7152_v52 }
 0x26f   :  { %5669 = vmatprep.subr.bf16.mxu0 %v7273_v53 }
 0x272   :  { %5670 = vmatpush2.bf16.msra.mxu0 %v7272_v36 }
 0x273   :  { %5671 = vmatprep.subr.bf16.mxu0 %v7265_v43  ;;  %v2552_v43 = vld [vmem:[%s10911_s5 + $0x588] sm:$0xff] }
 0x274   :  { %v7328_v3 = vcombine.low %v2552_v43, %v2556_v37 }
 0x276   :  { %5672 = vmatpush2.bf16.msra.mxu0 %v7264_v40  ;;  %v2684_v40 = vld [vmem:[%s10911_s5 + $0x9a8] sm:$0xff] }
 0x277   :  { %5673 = vmatprep.subr.bf16.mxu0 %v7257_v26  ;;  %v7457_v62 = vcombine.high %v2680_v39, %v2684_v40  ;;  %v7456_v5 = vcombine.low %v2680_v39, %v2684_v40  ;;  %v2632_v39 = vld [vmem:[%s10911_s5 + $0x808] sm:$0xff] }
 0x278   :  { %v2636_v40 = vld [vmem:[%s10911_s5 + $0x828] sm:$0xff] }
 0x27a   :  { %5674 = vmatpush2.bf16.msra.mxu0 %v7256_v60  ;;  %v2544_v60 = vld [vmem:[%s10911_s5 + $0x548] sm:$0xff] }
 0x27b   :  { %5675 = vmatprep.subr.bf16.mxu0 %v7249_v61  ;;  %v7329_v61 = vcombine.high %v2552_v43, %v2556_v37  ;;  %v7320_v13 = vcombine.low %v2544_v60, %v2548_v63  ;;  %v2504_v43 = vld [vmem:[%s10911_s5 + $0x408] sm:$0xff] }
 0x27c   :  { %v2508_v37 = vld [vmem:[%s10911_s5 + $0x428] sm:$0xff] }
 0x27e   :  { %5676 = vmatpush2.bf16.msra.mxu0 %v7248_v1  ;;  %v2672_v1 = vld [vmem:[%s10911_s5 + $0x948] sm:$0xff] }
 0x27f   :  { %5677 = vmatprep.subr.bf16.mxu0 %v7241_v2  ;;  %v2676_v2 = vld [vmem:[%s10911_s5 + $0x968] sm:$0xff] }
 0x282   :  { %5678 = vmatpush2.bf16.msra.mxu0 %v7240_v7  ;;  %v7321_v7 = vcombine.high %v2544_v60, %v2548_v63  ;;  %v2624_v63 = vld [vmem:[%s10911_s5 + $0x7c8] sm:$0xff] }
 0x283   :  { %5679 = vmatprep.subr.bf16.mxu0 %v7233_v10  ;;  %v7449_v10 = vcombine.high %v2672_v1, %v2676_v2 }
 0x285   :  { %v2311_v21 = vpop.f32.mrf.mxu0 }
 0x286   :  { %v2312_v22 = vadd.f32 %v2311_v21, %v738_v16  ;;  %v2352_v23 = vpop.f32.mrf.mxu1  ;;  %5680 = vmatpush2.bf16.msra.mxu0 %v7232_v14  ;;  %v7448_v14 = vcombine.low %v2672_v1, %v2676_v2  ;;  %v7312_v21 = vcombine.low %v2536_v12, %v2540_v55  ;;  %v2628_v1 = vld [vmem:[%s10911_s5 + $0x7e8] sm:$0xff] }
 0x287   :  { %v2313_v33 = vpop.f32.mrf.mxu0  ;;  %5681 = vmatprep.subr.bf16.mxu0 %v7225_v17  ;;  %v2528_v17 = vld [vmem:[%s10911_s5 + $0x4c8] sm:$0xff] }
 0x288   :  { %v2353_v27 = vadd.f32 %v2352_v23, %v2312_v22  ;;  %v2314_v30 = vadd.f32 %v2313_v33, %v742_v18  ;;  %v2354_v31 = vpop.f32.mrf.mxu1  ;;  %v2532_v18 = vld [vmem:[%s10911_s5 + $0x4e8] sm:$0xff] }
 0x289   :  { %v2315_v51 = vpop.f32.mrf.mxu0  ;;  %v7305_v23 = vcombine.high %v2528_v17, %v2532_v18  ;;  %v2520_v33 = vld [vmem:[%s10911_s5 + $0x488] sm:$0xff] }
 0x28a   :  { %v2355_v32 = vadd.f32 %v2354_v31, %v2314_v30  ;;  %v2356_v56 = vpop.f32.mrf.mxu1  ;;  %5682 = vmatpush2.bf16.msra.mxu0 %v7224_v25  ;;  %v2365_v52 = vmax.f32 %v2353_v27, 0.0  ;;  %v7433_v25 = vcombine.high %v2656_v19, %v2660_v20  ;;  %v2648_v27 = vld [vmem:[%s10911_s5 + $0x888] sm:$0xff]  ;;  %v7304_v31 = vcombine.low %v2528_v17, %v2532_v18 }
 0x28b   :  { %v2316_v53 = vpop.f32.mrf.mxu0  ;;  %5683 = vmatprep.subr.bf16.mxu0 %v7217_v34  ;;  %v2524_v34 = vld [vmem:[%s10911_s5 + $0x4a8] sm:$0xff] }
 0x28c   :  { %v2366_v35 = vmax.f32 %v2355_v32, 0.0  ;;  %v2357_v36 = vpop.f32.mrf.mxu1  ;;  %v9578_v59 = vpack.c.bf16 %v2365_v52, %v2365_v52  ;;  %v2652_v30 = vld [vmem:[%s10911_s5 + $0x8a8] sm:$0xff]  ;;  %v7297_v50 = vcombine.high %v2520_v33, %v2524_v34  ;;  %v7296_v53 = vcombine.low %v2520_v33, %v2524_v34 }
 0x28d   :  { %v7425_v51 = vcombine.high %v2648_v27, %v2652_v30  ;;  %v2512_v32 = vld [vmem:[%s10911_s5 + $0x448] sm:$0xff] }
 0x28e   :  { %v9576_v26 = vpack.c.bf16 %v2366_v35, %v2366_v35  ;;  %5684 = vmatpush2.bf16.msra.mxu0 %v7216_v57  ;;  %v2516_v56 = vld [vmem:[%s10911_s5 + $0x468] sm:$0xff] }
 0x28f   :  { %5735 = vmatprep.subr.bf16.mxu0 %v7465_v42  ;;  %v2640_v57 = vld [vmem:[%s10911_s5 + $0x848] sm:$0xff]  ;;  %v7424_v42 = vcombine.low %v2648_v27, %v2652_v30  ;;  %v7289_v35 = vcombine.high %v2512_v32, %v2516_v56 }
 0x290   :  { %5644 = vmatprep.mubr.bf16.mxu1 %v9576_v26  ;;  %v2644_v52 = vld [vmem:[%s10911_s5 + $0x868] sm:$0xff] }
 0x291   :  { %5686 = vmatmul.mubr.bf16.vlgmr.msra.gmra.mxu0 %v9237_v0  ;;  %5645 = vmatmul.mubr.bf16.vlgmr.msra.gmra.mxu1 %v9578_v59  ;;  %v7417_v36 = vcombine.high %v2640_v57, %v2644_v52  ;;  %v7416_v60 = vcombine.low %v2640_v57, %v2644_v52  ;;  %v2752_v2 = vld [vmem:[%s10911_s5 + $0xbc8] sm:$0xff] }
 0x292   :  { %5695 = vmatpush1.bf16.msra.mxu1 %v7336_v58  ;;  %5736 = vmatpush1.bf16.msra.mxu0 %v7464_v41  ;;  %v2668_v58 = vld [vmem:[%s10911_s5 + $0x928] sm:$0xff]  ;;  %v7288_v41 = vcombine.low %v2512_v32, %v2516_v56 }
 0x293   :  { %5767 = vmatprep.mubr.bf16.mxu0 %v9458_v6  ;;  %5726 = vmatprep.mubr.bf16.mxu1 %v9266_v29  ;;  %v7441_v16 = vcombine.high %v2664_v38, %v2668_v58  ;;  %v7440_v22 = vcombine.low %v2664_v38, %v2668_v58  ;;  %v2616_v55 = vld [vmem:[%s10911_s5 + $0x788] sm:$0xff] }
 0x294   :  { %5696 = vmatprep.subr.bf16.mxu1 %v7329_v61  ;;  %5737 = vmatprep.subr.bf16.mxu0 %v7457_v62  ;;  %v7281_v61 = vcombine.high %v2504_v43, %v2508_v37  ;;  %v7409_v62 = vcombine.high %v2632_v39, %v2636_v40  ;;  %v2620_v38 = vld [vmem:[%s10911_s5 + $0x7a8] sm:$0xff] }
 0x295   :  { %v2744_v58 = vld [vmem:[%s10911_s5 + $0xb88] sm:$0xff] }
 0x296   :  { %5697 = vmatpush1.bf16.msra.mxu1 %v7328_v3  ;;  %5738 = vmatpush1.bf16.msra.mxu0 %v7456_v5  ;;  %v2756_v3 = vld [vmem:[%s10911_s5 + $0xbe8] sm:$0xff]  ;;  %v7280_v5 = vcombine.low %v2504_v43, %v2508_v37 }
 0x297   :  { %5698 = vmatprep.subr.bf16.mxu1 %v7321_v7  ;;  %5739 = vmatprep.subr.bf16.mxu0 %v7449_v10  ;;  %v7408_v7 = vcombine.low %v2632_v39, %v2636_v40  ;;  %v7401_v10 = vcombine.high %v2624_v63, %v2628_v1  ;;  %v7529_v12 = vcombine.high %v2752_v2, %v2756_v3  ;;  %v2608_v18 = vld [vmem:[%s10911_s5 + $0x748] sm:$0xff] }
 0x298   :  { %v2612_v19 = vld [vmem:[%s10911_s5 + $0x768] sm:$0xff] }
 0x299   :  { %v2736_v20 = vld [vmem:[%s10911_s5 + $0xb48] sm:$0xff] }
 0x29a   :  { %5699 = vmatpush1.bf16.msra.mxu1 %v7320_v13  ;;  %5740 = vmatpush1.bf16.msra.mxu0 %v7448_v14  ;;  %v2748_v13 = vld [vmem:[%s10911_s5 + $0xba8] sm:$0xff]  ;;  %v7400_v14 = vcombine.low %v2624_v63, %v2628_v1 }
 0x29b   :  { %5700 = vmatprep.subr.bf16.mxu1 %v7313_v15  ;;  %5741 = vmatprep.subr.bf16.mxu0 %v7441_v16  ;;  %v7528_v15 = vcombine.low %v2752_v2, %v2756_v3  ;;  %v7393_v16 = vcombine.high %v2616_v55, %v2620_v38  ;;  %v7521_v17 = vcombine.high %v2744_v58, %v2748_v13  ;;  %v2600_v34 = vld [vmem:[%s10911_s5 + $0x708] sm:$0xff] }
 0x29c   :  { %v2604_v27 = vld [vmem:[%s10911_s5 + $0x728] sm:$0xff] }
 0x29d   :  { %v2728_v30 = vld [vmem:[%s10911_s5 + $0xb08] sm:$0xff] }
 0x29e   :  { %5701 = vmatpush1.bf16.msra.mxu1 %v7312_v21  ;;  %5742 = vmatpush1.bf16.msra.mxu0 %v7440_v22  ;;  %v2740_v21 = vld [vmem:[%s10911_s5 + $0xb68] sm:$0xff]  ;;  %v7392_v22 = vcombine.low %v2616_v55, %v2620_v38 }
 0x29f   :  { %5702 = vmatprep.subr.bf16.mxu1 %v7305_v23  ;;  %5743 = vmatprep.subr.bf16.mxu0 %v7433_v25  ;;  %v7520_v23 = vcombine.low %v2744_v58, %v2748_v13  ;;  %v7385_v25 = vcombine.high %v2608_v18, %v2612_v19  ;;  %v7513_v33 = vcombine.high %v2736_v20, %v2740_v21  ;;  %v2592_v56 = vld [vmem:[%s10911_s5 + $0x6c8] sm:$0xff] }
 0x2a0   :  { %v2596_v57 = vld [vmem:[%s10911_s5 + $0x6e8] sm:$0xff] }
 0x2a1   :  { %v2720_v52 = vld [vmem:[%s10911_s5 + $0xac8] sm:$0xff] }
 0x2a2   :  { %5703 = vmatpush1.bf16.msra.mxu1 %v7304_v31  ;;  %5744 = vmatpush1.bf16.msra.mxu0 %v7432_v54  ;;  %v2732_v31 = vld [vmem:[%s10911_s5 + $0xb28] sm:$0xff]  ;;  %v7384_v54 = vcombine.low %v2608_v18, %v2612_v19 }
 0x2a3   :  { %5704 = vmatprep.subr.bf16.mxu1 %v7297_v50  ;;  %5745 = vmatprep.subr.bf16.mxu0 %v7425_v51  ;;  %v7512_v50 = vcombine.low %v2736_v20, %v2740_v21  ;;  %v7377_v51 = vcombine.high %v2600_v34, %v2604_v27  ;;  %v7505_v32 = vcombine.high %v2728_v30, %v2732_v31  ;;  %v2584_v37 = vld [vmem:[%s10911_s5 + $0x688] sm:$0xff] }
 0x2a4   :  { %v2588_v39 = vld [vmem:[%s10911_s5 + $0x6a8] sm:$0xff] }
 0x2a5   :  { %v2712_v40 = vld [vmem:[%s10911_s5 + $0xa88] sm:$0xff] }
 0x2a6   :  { %5705 = vmatpush1.bf16.msra.mxu1 %v7296_v53  ;;  %5746 = vmatpush1.bf16.msra.mxu0 %v7424_v42  ;;  %v2724_v53 = vld [vmem:[%s10911_s5 + $0xae8] sm:$0xff]  ;;  %v7376_v42 = vcombine.low %v2600_v34, %v2604_v27 }
 0x2a7   :  { %5706 = vmatprep.subr.bf16.mxu1 %v7289_v35  ;;  %5747 = vmatprep.subr.bf16.mxu0 %v7417_v36  ;;  %v7504_v35 = vcombine.low %v2728_v30, %v2732_v31  ;;  %v7369_v36 = vcombine.high %v2592_v56, %v2596_v57  ;;  %v7497_v43 = vcombine.high %v2720_v52, %v2724_v53  ;;  %v2576_v1 = vld [vmem:[%s10911_s5 + $0x648] sm:$0xff] }
 0x2a8   :  { %v2580_v2 = vld [vmem:[%s10911_s5 + $0x668] sm:$0xff] }
 0x2a9   :  { %v2704_v3 = vld [vmem:[%s10911_s5 + $0xa48] sm:$0xff] }
 0x2aa   :  { %5707 = vmatpush1.bf16.msra.mxu1 %v7288_v41  ;;  %5748 = vmatpush1.bf16.msra.mxu0 %v7416_v60  ;;  %v2716_v41 = vld [vmem:[%s10911_s5 + $0xaa8] sm:$0xff]  ;;  %v7368_v60 = vcombine.low %v2592_v56, %v2596_v57  ;;  %v2425_v57 = vld [vmem:[%s10911_s5 + $0x190] sm:$0xff] }
 0x2ab   :  { %5708 = vmatprep.subr.bf16.mxu1 %v7281_v61  ;;  %5749 = vmatprep.subr.bf16.mxu0 %v7409_v62  ;;  %v7496_v61 = vcombine.low %v2720_v52, %v2724_v53  ;;  %v7361_v62 = vcombine.high %v2584_v37, %v2588_v39  ;;  %v7489_v63 = vcombine.high %v2712_v40, %v2716_v41  ;;  %v2568_v38 = vld [vmem:[%s10911_s5 + $0x608] sm:$0xff]  ;;  %v2429_v52 = vld [vmem:[%s10911_s5 + $0x1b0] sm:$0xff] }
 0x2ac   :  { %v2572_v58 = vld [vmem:[%s10911_s5 + $0x628] sm:$0xff] }
 0x2ad   :  { %v2696_v13 = vld [vmem:[%s10911_s5 + $0xa08] sm:$0xff]  ;;  %v7345_v19 = vcombine.high %v2568_v38, %v2572_v58  ;;  %v7344_v27 = vcombine.low %v2568_v38, %v2572_v58  ;;  %v2413_v38 = vld [vmem:[%s10911_s5 + $0x130] sm:$0xff] }
 0x2ae   :  { %5709 = vmatpush1.bf16.msra.mxu1 %v7280_v5  ;;  %5750 = vmatpush1.bf16.msra.mxu0 %v7408_v7  ;;  %v2708_v5 = vld [vmem:[%s10911_s5 + $0xa68] sm:$0xff]  ;;  %v7360_v7 = vcombine.low %v2584_v37, %v2588_v39 }
 0x2af   :  { %5710 = vmatprep.subr.bf16.mxu1 %v7401_v10  ;;  %5751 = vmatprep.subr.bf16.mxu0 %v7529_v12  ;;  %v7488_v10 = vcombine.low %v2712_v40, %v2716_v41  ;;  %v7353_v12 = vcombine.high %v2576_v1, %v2580_v2  ;;  %v7481_v55 = vcombine.high %v2704_v3, %v2708_v5  ;;  %v2816_v21 = vld [vmem:[%s10911_s5 + $0xdc8] sm:$0xff]  ;;  %v2417_v40 = vld [vmem:[%s10911_s5 + $0x150] sm:$0xff] }
 0x2b0   :  { %v2812_v56 = vld [vmem:[%s10911_s5 + $0xda8] sm:$0xff]  ;;  %v2421_v41 = vld [vmem:[%s10911_s5 + $0x170] sm:$0xff] }
 0x2b1   :  { %v2800_v37 = vld [vmem:[%s10911_s5 + $0xd48] sm:$0xff] }
 0x2b2   :  { %5711 = vmatpush2.bf16.msra.mxu1 %v7400_v14  ;;  %5752 = vmatpush2.bf16.msra.mxu0 %v7528_v15  ;;  %v2700_v14 = vld [vmem:[%s10911_s5 + $0xa28] sm:$0xff] }
 0x2b3   :  { %5712 = vmatprep.subr.bf16.mxu1 %v7393_v16  ;;  %5753 = vmatprep.subr.bf16.mxu0 %v7521_v17  ;;  %v7352_v16 = vcombine.low %v2576_v1, %v2580_v2  ;;  %v7480_v17 = vcombine.low %v2704_v3, %v2708_v5  ;;  %v7473_v20 = vcombine.high %v2696_v13, %v2700_v14  ;;  %v2804_v39 = vld [vmem:[%s10911_s5 + $0xd68] sm:$0xff] }
 0x2b4   :  { %v7472_v30 = vcombine.low %v2696_v13, %v2700_v14  ;;  %v7202_v1 = vcombine.low %v2425_v57, %v2429_v52  ;;  %v7577_v2 = vcombine.high %v2800_v37, %v2804_v39  ;;  %v7195_v5 = vcombine.high %v2417_v40, %v2421_v41 }
 0x2b5   :  { %v7576_v58 = vcombine.low %v2800_v37, %v2804_v39  ;;  %v7194_v14 = vcombine.low %v2417_v40, %v2421_v41  ;;  %v2377_v37 = vld [vmem:[%s10911_s5 + $0x10] sm:$0xff] }
 0x2b6   :  { %5713 = vmatpush2.bf16.msra.mxu1 %v7392_v22  ;;  %5754 = vmatpush2.bf16.msra.mxu0 %v7520_v23  ;;  %v2820_v22 = vld [vmem:[%s10911_s5 + $0xde8] sm:$0xff]  ;;  %v2433_v23 = vld [vmem:[%s10911_s5 + $0x1d0] sm:$0xff] }
 0x2b7   :  { %5714 = vmatprep.subr.bf16.mxu1 %v7385_v25  ;;  %5755 = vmatprep.subr.bf16.mxu0 %v7513_v33  ;;  %v2437_v25 = vld [vmem:[%s10911_s5 + $0x1f0] sm:$0xff]  ;;  %v2887_v33 = vld [vmem:[%s10912_s6] sm:$0xff] }
 0x2b8   :  { %v2896_v53 = vrot.slane %v2887_v33, %v8350_v48  ;;  %v2381_v39 = vld [vmem:[%s10911_s5 + $0x30] sm:$0xff] }
 0x2ba   :  { %5715 = vmatpush2.bf16.msra.mxu1 %v7384_v54  ;;  %5756 = vmatpush2.bf16.msra.mxu0 %v7512_v50  ;;  %v7593_v54 = vcombine.high %v2816_v21, %v2820_v22  ;;  %v7211_v50 = vcombine.high %v2433_v23, %v2437_v25 }
 0x2bb   :  { %5716 = vmatprep.subr.bf16.mxu1 %v7377_v51  ;;  %5757 = vmatprep.subr.bf16.mxu0 %v7505_v32  ;;  %v2892_v51 = vrot.slane %v2887_v33, %v8341_v45  ;;  %v2808_v32 = vld [vmem:[%s10911_s5 + $0xd88] sm:$0xff]  ;;  %v7592_v45 = vcombine.low %v2816_v21, %v2820_v22 }
 0x2bc   :  { %v2776_v33 = vld [vmem:[%s10911_s5 + $0xc88] sm:$0xff] }
 0x2be   :  { %5717 = vmatpush2.bf16.msra.mxu1 %v7376_v42  ;;  %5758 = vmatpush2.bf16.msra.mxu0 %v7504_v35  ;;  %v7210_v42 = vcombine.low %v2433_v23, %v2437_v25 }
 0x2bf   :  { %5718 = vmatprep.subr.bf16.mxu1 %v7369_v36  ;;  %5759 = vmatprep.subr.bf16.mxu0 %v7497_v43  ;;  %v7585_v36 = vcombine.high %v2808_v32, %v2812_v56  ;;  %v7203_v43 = vcombine.high %v2425_v57, %v2429_v52  ;;  %v2385_v57 = vld [vmem:[%s10911_s5 + $0x50] sm:$0xff] }
 0x2c0   :  { %v2389_v52 = vld [vmem:[%s10911_s5 + $0x70] sm:$0xff] }
 0x2c1   :  { %v7162_v40 = vcombine.low %v2385_v57, %v2389_v52 }
 0x2c2   :  { %5719 = vmatpush2.bf16.msra.mxu1 %v7368_v60  ;;  %5760 = vmatpush2.bf16.msra.mxu0 %v7496_v61 }
 0x2c3   :  { %5720 = vmatprep.subr.bf16.mxu1 %v7361_v62  ;;  %5761 = vmatprep.subr.bf16.mxu0 %v7489_v63  ;;  %v7584_v62 = vcombine.low %v2808_v32, %v2812_v56  ;;  %v2768_v32 = vld [vmem:[%s10911_s5 + $0xc48] sm:$0xff] }
 0x2c4   :  { %v2772_v56 = vld [vmem:[%s10911_s5 + $0xc68] sm:$0xff] }
 0x2c5   :  { %v5523_v15 = vpop.f32.mrf.mxu0 }
 0x2c6   :  { %5721 = vmatpush2.bf16.msra.mxu1 %v7360_v7  ;;  %5762 = vmatpush2.bf16.msra.mxu0 %v7488_v10  ;;  %v5524_v35 = vadd.f32 %v5523_v15, %v2892_v51  ;;  %v2792_v7 = vld [vmem:[%s10911_s5 + $0xd08] sm:$0xff] }
 0x2c7   :  { %v5525_v18 = vpop.f32.mrf.mxu0  ;;  %5722 = vmatprep.subr.bf16.mxu1 %v7353_v12  ;;  %5763 = vmatprep.subr.bf16.mxu0 %v7481_v55  ;;  %v2796_v10 = vld [vmem:[%s10911_s5 + $0xd28] sm:$0xff]  ;;  %v2409_v55 = vld [vmem:[%s10911_s5 + $0x110] sm:$0xff] }
 0x2c8   :  { %v5526_v60 = vadd.f32 %v5525_v18, %v2896_v53  ;;  %v7569_v15 = vcombine.high %v2792_v7, %v2796_v10  ;;  %v2788_v18 = vld [vmem:[%s10911_s5 + $0xce8] sm:$0xff]  ;;  %v7568_v21 = vcombine.low %v2792_v7, %v2796_v10  ;;  %v7186_v22 = vcombine.low %v2409_v55, %v2413_v38 }
 0x2c9   :  { %v5527_v34 = vpop.f32.mrf.mxu0  ;;  %v7154_v7 = vcombine.low %v2377_v37, %v2381_v39 }
 0x2ca   :  { %5723 = vmatpush2.bf16.msra.mxu1 %v7352_v16  ;;  %5764 = vmatpush2.bf16.msra.mxu0 %v7480_v17  ;;  %v7187_v16 = vcombine.high %v2409_v55, %v2413_v38  ;;  %v2784_v17 = vld [vmem:[%s10911_s5 + $0xcc8] sm:$0xff] }
 0x2cb   :  { %v5528_v31 = vpop.f32.mrf.mxu0  ;;  %5724 = vmatprep.subr.bf16.mxu1 %v7345_v19  ;;  %5765 = vmatprep.subr.bf16.mxu0 %v7473_v20  ;;  %v2401_v19 = vld [vmem:[%s10911_s5 + $0xd0] sm:$0xff]  ;;  %v7561_v23 = vcombine.high %v2784_v17, %v2788_v18  ;;  %v2780_v34 = vld [vmem:[%s10911_s5 + $0xca8] sm:$0xff] }
 0x2cc   :  { %v2405_v20 = vld [vmem:[%s10911_s5 + $0xf0] sm:$0xff]  ;;  %v7560_v31 = vcombine.low %v2784_v17, %v2788_v18  ;;  %v7552_v53 = vcombine.low %v2776_v33, %v2780_v34  ;;  %v2872_v55 = vld [vmem:[%s10911_s5 + $0xf88] sm:$0xff] }
 0x2cd   :  { %v7179_v25 = vcombine.high %v2401_v19, %v2405_v20  ;;  %v2876_v38 = vld [vmem:[%s10911_s5 + $0xfa8] sm:$0xff] }
 0x2ce   :  { %5725 = vmatpush2.bf16.msra.mxu1 %v7344_v27  ;;  %5766 = vmatpush2.bf16.msra.mxu0 %v7472_v30  ;;  %v2393_v27 = vld [vmem:[%s10911_s5 + $0x90] sm:$0xff]  ;;  %v2864_v18 = vld [vmem:[%s10911_s5 + $0xf48] sm:$0xff] }
 0x2cf   :  { %5776 = vmatprep.subr.bf16.mxu1 %v7593_v54  ;;  %5817 = vmatprep.subr.bf16.mxu0 %v7211_v50  ;;  %v2397_v30 = vld [vmem:[%s10911_s5 + $0xb0] sm:$0xff]  ;;  %v7178_v54 = vcombine.low %v2401_v19, %v2405_v20  ;;  %v7553_v50 = vcombine.high %v2776_v33, %v2780_v34  ;;  %v2868_v19 = vld [vmem:[%s10911_s5 + $0xf68] sm:$0xff] }
 0x2d0   :  { %v7171_v51 = vcombine.high %v2393_v27, %v2397_v30  ;;  %v2481_v20 = vld [vmem:[%s10911_s5 + $0x350] sm:$0xff]  ;;  %v2856_v34 = vld [vmem:[%s10911_s5 + $0xf08] sm:$0xff] }
 0x2d1   :  { %5727 = vmatmul.mubr.bf16.vlgmr.msra.gmra.mxu1 %v9270_v47  ;;  %5768 = vmatmul.mubr.bf16.vlgmr.msra.gmra.mxu0 %v9460_v8  ;;  %v5564_v48 = vpop.f32.mrf.mxu1 }
 0x2d2   :  { %v9799_v61 = vadd.f32 %v5564_v48, %v5524_v35  ;;  %5777 = vmatpush1.bf16.msra.mxu1 %v7592_v45  ;;  %5808 = vmatprep.mubr.bf16.mxu1 %v9576_v26  ;;  %v7170_v45 = vcombine.low %v2393_v27, %v2397_v30  ;;  %v7163_v35 = vcombine.high %v2385_v57, %v2389_v52  ;;  %v2860_v27 = vld [vmem:[%s10911_s5 + $0xf28] sm:$0xff]  ;;  %v2473_v30 = vld [vmem:[%s10911_s5 + $0x310] sm:$0xff] }
 0x2d3   :  { %5818 = vmatpush1.bf16.msra.mxu0 %v7210_v42  ;;  %5849 = vmatprep.mubr.bf16.mxu0 %v9072_v4  ;;  %v5566_v63 = vpop.f32.mrf.mxu1  ;;  %v7545_v42 = vcombine.high %v2768_v32, %v2772_v56  ;;  %v7544_v48 = vcombine.low %v2768_v32, %v2772_v56  ;;  %v2848_v56 = vld [vmem:[%s10911_s5 + $0xec8] sm:$0xff]  ;;  %v2465_v52 = vld [vmem:[%s10911_s5 + $0x2d0] sm:$0xff] }
 0x2d4   :  { %v9803_v3 = vadd.f32 %v5566_v63, %v5526_v60  ;;  %5778 = vmatprep.subr.bf16.mxu1 %v7585_v36  ;;  %5819 = vmatprep.subr.bf16.mxu0 %v7203_v43  ;;  %v2760_v36 = vld [vmem:[%s10911_s5 + $0xc08] sm:$0xff]  ;;  %v7155_v60 = vcombine.high %v2377_v37, %v2381_v39  ;;  %v2457_v39 = vld [vmem:[%s10911_s5 + $0x290] sm:$0xff] }
 0x2d5   :  { %v5568_v12 = vpop.f32.mrf.mxu1  ;;  %v2764_v43 = vld [vmem:[%s10911_s5 + $0xc28] sm:$0xff] }
 0x2d6   :  { %5779 = vmatpush1.bf16.msra.mxu1 %v7584_v62  ;;  %v7537_v41 = vcombine.high %v2760_v36, %v2764_v43  ;;  %v2880_v62 = vld [vmem:[%s10911_s5 + $0xfc8] sm:$0xff] }
 0x2d7   :  { %5820 = vmatpush1.bf16.msra.mxu0 %v7202_v1  ;;  %v5569_v13 = vpop.f32.mrf.mxu1  ;;  %5780 = vmatprep.subr.bf16.mxu1 %v7577_v2  ;;  %v2884_v63 = vld [vmem:[%s10911_s5 + $0xfe8] sm:$0xff]  ;;  %v2497_v1 = vld [vmem:[%s10911_s5 + $0x3d0] sm:$0xff] }
 0x2d8   :  { %5821 = vmatprep.subr.bf16.mxu0 %v7195_v5  ;;  %v2501_v2 = vld [vmem:[%s10911_s5 + $0x3f0] sm:$0xff]  ;;  %v7536_v5 = vcombine.low %v2760_v36, %v2764_v43  ;;  %v7657_v10 = vcombine.high %v2880_v62, %v2884_v63  ;;  %v2852_v57 = vld [vmem:[%s10911_s5 + $0xee8] sm:$0xff] }
 0x2d9   :  { %v7275_v12 = vcombine.high %v2497_v1, %v2501_v2  ;;  %v2493_v13 = vld [vmem:[%s10911_s5 + $0x3b0] sm:$0xff]  ;;  %v2840_v43 = vld [vmem:[%s10911_s5 + $0xe88] sm:$0xff] }
 0x2da   :  { %5781 = vmatpush1.bf16.msra.mxu1 %v7576_v58  ;;  %v2489_v58 = vld [vmem:[%s10911_s5 + $0x390] sm:$0xff]  ;;  %v2844_v37 = vld [vmem:[%s10911_s5 + $0xea8] sm:$0xff] }
 0x2db   :  { %5822 = vmatpush1.bf16.msra.mxu0 %v7194_v14  ;;  %5782 = vmatprep.subr.bf16.mxu1 %v7569_v15  ;;  %v7656_v14 = vcombine.low %v2880_v62, %v2884_v63  ;;  %v7274_v15 = vcombine.low %v2497_v1, %v2501_v2  ;;  %v7267_v17 = vcombine.high %v2489_v58, %v2493_v13  ;;  %v2832_v63 = vld [vmem:[%s10911_s5 + $0xe48] sm:$0xff]  ;;  %v2449_v2 = vld [vmem:[%s10911_s5 + $0x250] sm:$0xff] }
 0x2dc   :  { %5823 = vmatprep.subr.bf16.mxu0 %v7187_v16  ;;  %v7649_v16 = vcombine.high %v2872_v55, %v2876_v38  ;;  %v2836_v1 = vld [vmem:[%s10911_s5 + $0xe68] sm:$0xff] }
 0x2de   :  { %5783 = vmatpush1.bf16.msra.mxu1 %v7568_v21  ;;  %v2485_v21 = vld [vmem:[%s10911_s5 + $0x370] sm:$0xff] }
 0x2df   :  { %5824 = vmatpush1.bf16.msra.mxu0 %v7186_v22  ;;  %5784 = vmatprep.subr.bf16.mxu1 %v7561_v23  ;;  %v7648_v22 = vcombine.low %v2872_v55, %v2876_v38  ;;  %v7266_v23 = vcombine.low %v2489_v58, %v2493_v13  ;;  %v7259_v33 = vcombine.high %v2481_v20, %v2485_v21  ;;  %v2824_v38 = vld [vmem:[%s10911_s5 + $0xe08] sm:$0xff]  ;;  %v2441_v13 = vld [vmem:[%s10911_s5 + $0x210] sm:$0xff] }
 0x2e0   :  { %5825 = vmatprep.subr.bf16.mxu0 %v7179_v25  ;;  %v7641_v25 = vcombine.high %v2864_v18, %v2868_v19  ;;  %v2828_v58 = vld [vmem:[%s10911_s5 + $0xe28] sm:$0xff] }
 0x2e2   :  { %5785 = vmatpush1.bf16.msra.mxu1 %v7560_v31  ;;  %v2477_v31 = vld [vmem:[%s10911_s5 + $0x330] sm:$0xff] }
 0x2e3   :  { %5826 = vmatpush1.bf16.msra.mxu0 %v7178_v54  ;;  %5786 = vmatprep.subr.bf16.mxu1 %v7553_v50  ;;  %v7640_v54 = vcombine.low %v2864_v18, %v2868_v19  ;;  %v7258_v50 = vcombine.low %v2481_v20, %v2485_v21  ;;  %v7251_v32 = vcombine.high %v2473_v30, %v2477_v31  ;;  %v2561_v19 = vld [vmem:[%s10911_s5 + $0x5d0] sm:$0xff] }
 0x2e4   :  { %5827 = vmatprep.subr.bf16.mxu0 %v7171_v51  ;;  %v7633_v51 = vcombine.high %v2856_v34, %v2860_v27  ;;  %v2565_v20 = vld [vmem:[%s10911_s5 + $0x5f0] sm:$0xff] }
 0x2e5   :  { %v2689_v21 = vld [vmem:[%s10911_s5 + $0x9d0] sm:$0xff] }
 0x2e6   :  { %5787 = vmatpush1.bf16.msra.mxu1 %v7552_v53  ;;  %v2469_v53 = vld [vmem:[%s10911_s5 + $0x2f0] sm:$0xff] }
 0x2e7   :  { %5828 = vmatpush1.bf16.msra.mxu0 %v7170_v45  ;;  %5788 = vmatprep.subr.bf16.mxu1 %v7545_v42  ;;  %v7632_v45 = vcombine.low %v2856_v34, %v2860_v27  ;;  %v7250_v42 = vcombine.low %v2473_v30, %v2477_v31  ;;  %v7243_v36 = vcombine.high %v2465_v52, %v2469_v53  ;;  %v2553_v27 = vld [vmem:[%s10911_s5 + $0x590] sm:$0xff] }
 0x2e8   :  { %5829 = vmatprep.subr.bf16.mxu0 %v7163_v35  ;;  %v7625_v35 = vcombine.high %v2848_v56, %v2852_v57  ;;  %v2557_v30 = vld [vmem:[%s10911_s5 + $0x5b0] sm:$0xff]  ;;  %v7338_v31 = vcombine.low %v2561_v19, %v2565_v20 }
 0x2ea   :  { %5789 = vmatpush1.bf16.msra.mxu1 %v7544_v48  ;;  %v2461_v48 = vld [vmem:[%s10911_s5 + $0x2b0] sm:$0xff] }
 0x2eb   :  { %5830 = vmatpush1.bf16.msra.mxu0 %v7162_v40  ;;  %5790 = vmatprep.subr.bf16.mxu1 %v7537_v41  ;;  %v7624_v40 = vcombine.low %v2848_v56, %v2852_v57  ;;  %v7242_v41 = vcombine.low %v2465_v52, %v2469_v53  ;;  %v7235_v62 = vcombine.high %v2457_v39, %v2461_v48  ;;  %v2545_v56 = vld [vmem:[%s10911_s5 + $0x550] sm:$0xff] }
 0x2ec   :  { %5831 = vmatprep.subr.bf16.mxu0 %v7155_v60  ;;  %v7617_v60 = vcombine.high %v2840_v43, %v2844_v37  ;;  %v2549_v57 = vld [vmem:[%s10911_s5 + $0x570] sm:$0xff] }
 0x2ee   :  { %5791 = vmatpush1.bf16.msra.mxu1 %v7536_v5  ;;  %v2453_v5 = vld [vmem:[%s10911_s5 + $0x270] sm:$0xff] }
 0x2ef   :  { %5832 = vmatpush1.bf16.msra.mxu0 %v7154_v7  ;;  %5792 = vmatprep.subr.bf16.mxu1 %v7657_v10  ;;  %v7616_v7 = vcombine.low %v2840_v43, %v2844_v37  ;;  %v7234_v10 = vcombine.low %v2457_v39, %v2461_v48  ;;  %v7227_v55 = vcombine.high %v2449_v2, %v2453_v5 }
 0x2f0   :  { %5833 = vmatprep.subr.bf16.mxu0 %v7275_v12  ;;  %v7609_v12 = vcombine.high %v2832_v63, %v2836_v1  ;;  %v7323_v39 = vcombine.high %v2545_v56, %v2549_v57 }
 0x2f2   :  { %5793 = vmatpush2.bf16.msra.mxu1 %v7656_v14  ;;  %v2445_v14 = vld [vmem:[%s10911_s5 + $0x230] sm:$0xff] }
 0x2f3   :  { %5834 = vmatpush2.bf16.msra.mxu0 %v7274_v15  ;;  %5794 = vmatprep.subr.bf16.mxu1 %v7649_v16  ;;  %v7608_v15 = vcombine.low %v2832_v63, %v2836_v1  ;;  %v7226_v16 = vcombine.low %v2449_v2, %v2453_v5  ;;  %v7219_v18 = vcombine.high %v2441_v13, %v2445_v14 }
 0x2f4   :  { %5835 = vmatprep.subr.bf16.mxu0 %v7267_v17  ;;  %v7601_v17 = vcombine.high %v2824_v38, %v2828_v58  ;;  %v7322_v63 = vcombine.low %v2545_v56, %v2549_v57  ;;  %v2633_v56 = vld [vmem:[%s10911_s5 + $0x810] sm:$0xff] }
 0x2f5   :  { %v2637_v57 = vld [vmem:[%s10911_s5 + $0x830] sm:$0xff] }
 0x2f6   :  { %5795 = vmatpush2.bf16.msra.mxu1 %v7648_v22  ;;  %v2693_v22 = vld [vmem:[%s10911_s5 + $0x9f0] sm:$0xff] }
 0x2f7   :  { %5836 = vmatpush2.bf16.msra.mxu0 %v7266_v23  ;;  %5796 = vmatprep.subr.bf16.mxu1 %v7641_v25  ;;  %v7600_v23 = vcombine.low %v2824_v38, %v2828_v58  ;;  %v7218_v25 = vcombine.low %v2441_v13, %v2445_v14  ;;  %v7467_v34 = vcombine.high %v2689_v21, %v2693_v22  ;;  %v2661_v38 = vld [vmem:[%s10911_s5 + $0x8f0] sm:$0xff] }
 0x2f8   :  { %5837 = vmatprep.subr.bf16.mxu0 %v7259_v33  ;;  %v7339_v33 = vcombine.high %v2561_v19, %v2565_v20  ;;  %v2653_v19 = vld [vmem:[%s10911_s5 + $0x8b0] sm:$0xff] }
 0x2fa   :  { %5797 = vmatpush2.bf16.msra.mxu1 %v7640_v54  ;;  %v2681_v54 = vld [vmem:[%s10911_s5 + $0x990] sm:$0xff] }
 0x2fb   :  { %5838 = vmatpush2.bf16.msra.mxu0 %v7258_v50  ;;  %5798 = vmatprep.subr.bf16.mxu1 %v7633_v51  ;;  %v2685_v50 = vld [vmem:[%s10911_s5 + $0x9b0] sm:$0xff]  ;;  %v7466_v51 = vcombine.low %v2689_v21, %v2693_v22 }
 0x2fc   :  { %5839 = vmatprep.subr.bf16.mxu0 %v7251_v32  ;;  %v7331_v32 = vcombine.high %v2553_v27, %v2557_v30  ;;  %v7459_v53 = vcombine.high %v2681_v54, %v2685_v50  ;;  %v7458_v37 = vcombine.low %v2681_v54, %v2685_v50 }
 0x2fe   :  { %5799 = vmatpush2.bf16.msra.mxu1 %v7632_v45  ;;  %v2673_v45 = vld [vmem:[%s10911_s5 + $0x950] sm:$0xff] }
 0x2ff   :  { %5840 = vmatpush2.bf16.msra.mxu0 %v7250_v42  ;;  %5800 = vmatprep.subr.bf16.mxu1 %v7625_v35  ;;  %v2677_v42 = vld [vmem:[%s10911_s5 + $0x970] sm:$0xff] }
 0x300   :  { %5841 = vmatprep.subr.bf16.mxu0 %v7243_v36  ;;  %v7330_v36 = vcombine.low %v2553_v27, %v2557_v30  ;;  %v7450_v2 = vcombine.low %v2673_v45, %v2677_v42  ;;  %v2645_v27 = vld [vmem:[%s10911_s5 + $0x870] sm:$0xff] }
 0x302   :  { %5801 = vmatpush2.bf16.msra.mxu1 %v7624_v40  ;;  %v7451_v40 = vcombine.high %v2673_v45, %v2677_v42  ;;  %v7411_v42 = vcombine.high %v2633_v56, %v2637_v57 }
 0x303   :  { %5842 = vmatpush2.bf16.msra.mxu0 %v7242_v41  ;;  %5802 = vmatprep.subr.bf16.mxu1 %v7617_v60  ;;  %v2541_v41 = vld [vmem:[%s10911_s5 + $0x530] sm:$0xff] }
 0x304   :  { %5843 = vmatprep.subr.bf16.mxu0 %v7235_v62  ;;  %v2665_v62 = vld [vmem:[%s10911_s5 + $0x910] sm:$0xff] }
 0x306   :  { %5803 = vmatpush2.bf16.msra.mxu1 %v7616_v7 }
 0x307   :  { %5844 = vmatpush2.bf16.msra.mxu0 %v7234_v10  ;;  %5804 = vmatprep.subr.bf16.mxu1 %v7609_v12  ;;  %v2529_v10 = vld [vmem:[%s10911_s5 + $0x4d0] sm:$0xff] }
 0x308   :  { %5845 = vmatprep.subr.bf16.mxu0 %v7227_v55  ;;  %v2533_v12 = vld [vmem:[%s10911_s5 + $0x4f0] sm:$0xff] }
 0x309   :  { %v2657_v55 = vld [vmem:[%s10911_s5 + $0x8d0] sm:$0xff]  ;;  %v7307_v14 = vcombine.high %v2529_v10, %v2533_v12  ;;  %v7306_v20 = vcombine.low %v2529_v10, %v2533_v12 }
 0x30a   :  { %5805 = vmatpush2.bf16.msra.mxu1 %v7608_v15  ;;  %v7435_v15 = vcombine.high %v2657_v55, %v2661_v38  ;;  %v7434_v21 = vcombine.low %v2657_v55, %v2661_v38  ;;  %v2609_v12 = vld [vmem:[%s10911_s5 + $0x750] sm:$0xff] }
 0x30b   :  { %5846 = vmatpush2.bf16.msra.mxu0 %v7226_v16  ;;  %5806 = vmatprep.subr.bf16.mxu1 %v7601_v17  ;;  %v2521_v16 = vld [vmem:[%s10911_s5 + $0x490] sm:$0xff] }
 0x30c   :  { %5847 = vmatprep.subr.bf16.mxu0 %v7219_v18  ;;  %v2525_v17 = vld [vmem:[%s10911_s5 + $0x4b0] sm:$0xff] }
 0x30d   :  { %v2649_v18 = vld [vmem:[%s10911_s5 + $0x890] sm:$0xff]  ;;  %v7299_v22 = vcombine.high %v2521_v16, %v2525_v17  ;;  %v7298_v30 = vcombine.low %v2521_v16, %v2525_v17 }
 0x30e   :  { %5807 = vmatpush2.bf16.msra.mxu1 %v7600_v23  ;;  %v7427_v23 = vcombine.high %v2649_v18, %v2653_v19  ;;  %v2613_v55 = vld [vmem:[%s10911_s5 + $0x770] sm:$0xff] }
 0x30f   :  { %5848 = vmatpush2.bf16.msra.mxu0 %v7218_v25  ;;  %5858 = vmatprep.subr.bf16.mxu1 %v7339_v33  ;;  %v2513_v25 = vld [vmem:[%s10911_s5 + $0x450] sm:$0xff] }
 0x310   :  { %5899 = vmatprep.subr.bf16.mxu0 %v7467_v34  ;;  %v2517_v33 = vld [vmem:[%s10911_s5 + $0x470] sm:$0xff] }
 0x311   :  { %5809 = vmatmul.mubr.bf16.vlgmr.msra.gmra.mxu1 %v9578_v59  ;;  %v5605_v52 = vpop.f32.mrf.mxu0  ;;  %v2641_v34 = vld [vmem:[%s10911_s5 + $0x850] sm:$0xff]  ;;  %v7291_v54 = vcombine.high %v2513_v25, %v2517_v33 }
 0x312   :  { %5850 = vmatmul.mubr.bf16.vlgmr.msra.gmra.mxu0 %v9237_v0  ;;  %v10000_v35 = vadd.f32 %v5605_v52, %v9799_v61  ;;  %5859 = vmatpush1.bf16.msra.mxu1 %v7338_v31  ;;  %v2537_v61 = vld [vmem:[%s10911_s5 + $0x510] sm:$0xff]  ;;  %v7426_v31 = vcombine.low %v2649_v18, %v2653_v19  ;;  %v7419_v50 = vcombine.high %v2641_v34, %v2645_v27 }
 0x313   :  { %5890 = vmatprep.mubr.bf16.mxu1 %v9266_v29  ;;  %5900 = vmatpush1.bf16.msra.mxu0 %v7466_v51  ;;  %v5607_v43 = vpop.f32.mrf.mxu0  ;;  %v7315_v5 = vcombine.high %v2537_v61, %v2541_v41  ;;  %v7314_v58 = vcombine.low %v2537_v61, %v2541_v41  ;;  %v2505_v51 = vld [vmem:[%s10911_s5 + $0x410] sm:$0xff]  ;;  %v7290_v52 = vcombine.low %v2513_v25, %v2517_v33 }
 0x314   :  { %5931 = vmatprep.mubr.bf16.mxu0 %v9458_v6  ;;  %v10005_v48 = vadd.f32 %v5607_v43, %v9803_v3  ;;  %5860 = vmatprep.subr.bf16.mxu1 %v7331_v32  ;;  %v2669_v3 = vld [vmem:[%s10911_s5 + $0x930] sm:$0xff]  ;;  %v7410_v61 = vcombine.low %v2633_v56, %v2637_v57 }
 0x315   :  { %5901 = vmatprep.subr.bf16.mxu0 %v7459_v53  ;;  %v5609_v60 = vpop.f32.mrf.mxu0  ;;  %v7443_v7 = vcombine.high %v2665_v62, %v2669_v3  ;;  %v7442_v13 = vcombine.low %v2665_v62, %v2669_v3  ;;  %v2509_v32 = vld [vmem:[%s10911_s5 + $0x430] sm:$0xff]  ;;  %v7418_v53 = vcombine.low %v2641_v34, %v2645_v27 }
 0x316   :  { %5861 = vmatpush1.bf16.msra.mxu1 %v7330_v36  ;;  %v7283_v45 = vcombine.high %v2505_v51, %v2509_v32  ;;  %v2625_v36 = vld [vmem:[%s10911_s5 + $0x7d0] sm:$0xff] }
 0x317   :  { %5902 = vmatpush1.bf16.msra.mxu0 %v7458_v37  ;;  %v5610_v1 = vpop.f32.mrf.mxu0  ;;  %5862 = vmatprep.subr.bf16.mxu1 %v7323_v39  ;;  %v2629_v43 = vld [vmem:[%s10911_s5 + $0x7f0] sm:$0xff] }
 0x318   :  { %5903 = vmatprep.subr.bf16.mxu0 %v7451_v40  ;;  %v2753_v37 = vld [vmem:[%s10911_s5 + $0xbd0] sm:$0xff]  ;;  %v7282_v40 = vcombine.low %v2505_v51, %v2509_v32  ;;  %v7403_v41 = vcombine.high %v2625_v36, %v2629_v43 }
 0x319   :  { %v2757_v39 = vld [vmem:[%s10911_s5 + $0xbf0] sm:$0xff] }
 0x31a   :  { %5863 = vmatpush1.bf16.msra.mxu1 %v7322_v63  ;;  %v7531_v60 = vcombine.high %v2753_v37, %v2757_v39  ;;  %v2617_v62 = vld [vmem:[%s10911_s5 + $0x790] sm:$0xff] }
 0x31b   :  { %5904 = vmatpush1.bf16.msra.mxu0 %v7450_v2  ;;  %5864 = vmatprep.subr.bf16.mxu1 %v7315_v5  ;;  %v2621_v3 = vld [vmem:[%s10911_s5 + $0x7b0] sm:$0xff]  ;;  %v7402_v2 = vcombine.low %v2625_v36, %v2629_v43  ;;  %v7530_v5 = vcombine.low %v2753_v37, %v2757_v39 }
 0x31c   :  { %5905 = vmatprep.subr.bf16.mxu0 %v7443_v7  ;;  %v2745_v63 = vld [vmem:[%s10911_s5 + $0xb90] sm:$0xff]  ;;  %v7395_v7 = vcombine.high %v2617_v62, %v2621_v3 }
 0x31d   :  { %v2749_v1 = vld [vmem:[%s10911_s5 + $0xbb0] sm:$0xff] }
 0x31e   :  { %5865 = vmatpush1.bf16.msra.mxu1 %v7314_v58  ;;  %v7523_v10 = vcombine.high %v2745_v63, %v2749_v1  ;;  %v2737_v38 = vld [vmem:[%s10911_s5 + $0xb50] sm:$0xff] }
 0x31f   :  { %5906 = vmatpush1.bf16.msra.mxu0 %v7442_v13  ;;  %5866 = vmatprep.subr.bf16.mxu1 %v7307_v14  ;;  %v2741_v58 = vld [vmem:[%s10911_s5 + $0xb70] sm:$0xff]  ;;  %v7394_v13 = vcombine.low %v2617_v62, %v2621_v3  ;;  %v7522_v14 = vcombine.low %v2745_v63, %v2749_v1 }
 0x320   :  { %5907 = vmatprep.subr.bf16.mxu0 %v7435_v15  ;;  %v7387_v15 = vcombine.high %v2609_v12, %v2613_v55  ;;  %v7515_v16 = vcombine.high %v2737_v38, %v2741_v58  ;;  %v2601_v17 = vld [vmem:[%s10911_s5 + $0x710] sm:$0xff] }
 0x321   :  { %v2605_v18 = vld [vmem:[%s10911_s5 + $0x730] sm:$0xff] }
 0x322   :  { %5867 = vmatpush1.bf16.msra.mxu1 %v7306_v20  ;;  %v2729_v19 = vld [vmem:[%s10911_s5 + $0xb10] sm:$0xff] }
 0x323   :  { %5908 = vmatpush1.bf16.msra.mxu0 %v7434_v21  ;;  %5868 = vmatprep.subr.bf16.mxu1 %v7299_v22  ;;  %v2733_v20 = vld [vmem:[%s10911_s5 + $0xb30] sm:$0xff]  ;;  %v7386_v21 = vcombine.low %v2609_v12, %v2613_v55  ;;  %v7514_v22 = vcombine.low %v2737_v38, %v2741_v58  ;;  %v2434_v58 = vld [vmem:[%s10911_s5 + $0x1d8] sm:$0xff] }
 0x324   :  { %5909 = vmatprep.subr.bf16.mxu0 %v7427_v23  ;;  %v7379_v23 = vcombine.high %v2601_v17, %v2605_v18  ;;  %v7507_v25 = vcombine.high %v2729_v19, %v2733_v20  ;;  %v2593_v33 = vld [vmem:[%s10911_s5 + $0x6d0] sm:$0xff] }
 0x325   :  { %v2597_v34 = vld [vmem:[%s10911_s5 + $0x6f0] sm:$0xff] }
 0x326   :  { %5869 = vmatpush1.bf16.msra.mxu1 %v7298_v30  ;;  %v2721_v27 = vld [vmem:[%s10911_s5 + $0xad0] sm:$0xff] }
 0x327   :  { %5910 = vmatpush1.bf16.msra.mxu0 %v7426_v31  ;;  %5870 = vmatprep.subr.bf16.mxu1 %v7291_v54  ;;  %v2725_v30 = vld [vmem:[%s10911_s5 + $0xaf0] sm:$0xff]  ;;  %v7378_v31 = vcombine.low %v2601_v17, %v2605_v18  ;;  %v7506_v54 = vcombine.low %v2729_v19, %v2733_v20 }
 0x328   :  { %5911 = vmatprep.subr.bf16.mxu0 %v7419_v50  ;;  %v7371_v50 = vcombine.high %v2593_v33, %v2597_v34  ;;  %v7499_v51 = vcombine.high %v2721_v27, %v2725_v30  ;;  %v2585_v32 = vld [vmem:[%s10911_s5 + $0x690] sm:$0xff] }
 0x329   :  { %v2589_v56 = vld [vmem:[%s10911_s5 + $0x6b0] sm:$0xff] }
 0x32a   :  { %5871 = vmatpush1.bf16.msra.mxu1 %v7290_v52  ;;  %v2713_v57 = vld [vmem:[%s10911_s5 + $0xa90] sm:$0xff] }
 0x32b   :  { %5912 = vmatpush1.bf16.msra.mxu0 %v7418_v53  ;;  %5872 = vmatprep.subr.bf16.mxu1 %v7283_v45  ;;  %v2717_v52 = vld [vmem:[%s10911_s5 + $0xab0] sm:$0xff]  ;;  %v7370_v53 = vcombine.low %v2593_v33, %v2597_v34  ;;  %v7498_v45 = vcombine.low %v2721_v27, %v2725_v30 }
 0x32c   :  { %5913 = vmatprep.subr.bf16.mxu0 %v7411_v42  ;;  %v7363_v42 = vcombine.high %v2585_v32, %v2589_v56  ;;  %v7491_v36 = vcombine.high %v2713_v57, %v2717_v52  ;;  %v2577_v43 = vld [vmem:[%s10911_s5 + $0x650] sm:$0xff] }
 0x32d   :  { %v2581_v37 = vld [vmem:[%s10911_s5 + $0x670] sm:$0xff] }
 0x32e   :  { %5873 = vmatpush1.bf16.msra.mxu1 %v7282_v40  ;;  %v2705_v39 = vld [vmem:[%s10911_s5 + $0xa50] sm:$0xff] }
 0x32f   :  { %5914 = vmatpush1.bf16.msra.mxu0 %v7410_v61  ;;  %5874 = vmatprep.subr.bf16.mxu1 %v7403_v41  ;;  %v2709_v40 = vld [vmem:[%s10911_s5 + $0xa70] sm:$0xff]  ;;  %v7362_v61 = vcombine.low %v2585_v32, %v2589_v56  ;;  %v7490_v41 = vcombine.low %v2713_v57, %v2717_v52 }
 0x330   :  { %5915 = vmatprep.subr.bf16.mxu0 %v7531_v60  ;;  %v7355_v60 = vcombine.high %v2577_v43, %v2581_v37  ;;  %v7483_v62 = vcombine.high %v2705_v39, %v2709_v40  ;;  %v2569_v3 = vld [vmem:[%s10911_s5 + $0x610] sm:$0xff] }
 0x331   :  { %v2573_v63 = vld [vmem:[%s10911_s5 + $0x630] sm:$0xff] }
 0x332   :  { %5875 = vmatpush2.bf16.msra.mxu1 %v7402_v2  ;;  %v2697_v1 = vld [vmem:[%s10911_s5 + $0xa10] sm:$0xff] }
 0x333   :  { %5916 = vmatpush2.bf16.msra.mxu0 %v7530_v5  ;;  %5876 = vmatprep.subr.bf16.mxu1 %v7395_v7  ;;  %v2701_v2 = vld [vmem:[%s10911_s5 + $0xa30] sm:$0xff]  ;;  %v7354_v5 = vcombine.low %v2577_v43, %v2581_v37  ;;  %v7482_v7 = vcombine.low %v2705_v39, %v2709_v40 }
 0x334   :  { %5917 = vmatprep.subr.bf16.mxu0 %v7523_v10  ;;  %v7347_v10 = vcombine.high %v2569_v3, %v2573_v63  ;;  %v7475_v12 = vcombine.high %v2697_v1, %v2701_v2  ;;  %v2817_v55 = vld [vmem:[%s10911_s5 + $0xdd0] sm:$0xff] }
 0x335   :  { %v2821_v38 = vld [vmem:[%s10911_s5 + $0xdf0] sm:$0xff] }
 0x336   :  { %5877 = vmatpush2.bf16.msra.mxu1 %v7394_v13  ;;  %v2438_v13 = vld [vmem:[%s10911_s5 + $0x1f8] sm:$0xff]  ;;  %v2809_v18 = vld [vmem:[%s10911_s5 + $0xd90] sm:$0xff]  ;;  %v7594_v20 = vcombine.low %v2817_v55, %v2821_v38 }
 0x337   :  { %5918 = vmatpush2.bf16.msra.mxu0 %v7522_v14  ;;  %5878 = vmatprep.subr.bf16.mxu1 %v7387_v15  ;;  %v7346_v14 = vcombine.low %v2569_v3, %v2573_v63  ;;  %v7474_v15 = vcombine.low %v2697_v1, %v2701_v2  ;;  %v7213_v17 = vcombine.high %v2434_v58, %v2438_v13  ;;  %v2813_v19 = vld [vmem:[%s10911_s5 + $0xdb0] sm:$0xff]  ;;  %v2402_v1 = vld [vmem:[%s10911_s5 + $0xd8] sm:$0xff] }
 0x338   :  { %5919 = vmatprep.subr.bf16.mxu0 %v7515_v16  ;;  %v7595_v16 = vcombine.high %v2817_v55, %v2821_v38  ;;  %v2801_v33 = vld [vmem:[%s10911_s5 + $0xd50] sm:$0xff]  ;;  %v7586_v32 = vcombine.low %v2809_v18, %v2813_v19  ;;  %v2406_v2 = vld [vmem:[%s10911_s5 + $0xf8] sm:$0xff] }
 0x339   :  { %v2805_v34 = vld [vmem:[%s10911_s5 + $0xd70] sm:$0xff] }
 0x33a   :  { %5879 = vmatpush2.bf16.msra.mxu1 %v7386_v21  ;;  %v2426_v21 = vld [vmem:[%s10911_s5 + $0x198] sm:$0xff]  ;;  %v7578_v39 = vcombine.low %v2801_v33, %v2805_v34  ;;  %v2785_v3 = vld [vmem:[%s10911_s5 + $0xcd0] sm:$0xff] }
 0x33b   :  { %5920 = vmatpush2.bf16.msra.mxu0 %v7514_v22  ;;  %5880 = vmatprep.subr.bf16.mxu1 %v7379_v23  ;;  %v2430_v22 = vld [vmem:[%s10911_s5 + $0x1b8] sm:$0xff]  ;;  %v7212_v23 = vcombine.low %v2434_v58, %v2438_v13  ;;  %v2789_v63 = vld [vmem:[%s10911_s5 + $0xcf0] sm:$0xff] }
 0x33c   :  { %5921 = vmatprep.subr.bf16.mxu0 %v7507_v25  ;;  %v7587_v25 = vcombine.high %v2809_v18, %v2813_v19  ;;  %v7204_v52 = vcombine.low %v2426_v21, %v2430_v22  ;;  %v2777_v55 = vld [vmem:[%s10911_s5 + $0xc90] sm:$0xff]  ;;  %v2394_v58 = vld [vmem:[%s10911_s5 + $0x98] sm:$0xff] }
 0x33d   :  { %v2781_v38 = vld [vmem:[%s10911_s5 + $0xcb0] sm:$0xff]  ;;  %v2398_v13 = vld [vmem:[%s10911_s5 + $0xb8] sm:$0xff] }
 0x33e   :  { %5881 = vmatpush2.bf16.msra.mxu1 %v7378_v31  ;;  %v7205_v31 = vcombine.high %v2426_v21, %v2430_v22  ;;  %v2769_v18 = vld [vmem:[%s10911_s5 + $0xc50] sm:$0xff]  ;;  %v2390_v21 = vld [vmem:[%s10911_s5 + $0x78] sm:$0xff]  ;;  %v7554_v22 = vcombine.low %v2777_v55, %v2781_v38 }
 0x33f   :  { %5922 = vmatpush2.bf16.msra.mxu0 %v7506_v54  ;;  %5882 = vmatprep.subr.bf16.mxu1 %v7371_v50  ;;  %v2418_v54 = vld [vmem:[%s10911_s5 + $0x158] sm:$0xff]  ;;  %v2773_v19 = vld [vmem:[%s10911_s5 + $0xc70] sm:$0xff] }
 0x340   :  { %5923 = vmatprep.subr.bf16.mxu0 %v7499_v51  ;;  %v2422_v50 = vld [vmem:[%s10911_s5 + $0x178] sm:$0xff] }
 0x342   :  { %5883 = vmatpush2.bf16.msra.mxu1 %v7370_v53  ;;  %v7579_v53 = vcombine.high %v2801_v33, %v2805_v34  ;;  %v2761_v34 = vld [vmem:[%s10911_s5 + $0xc10] sm:$0xff] }
 0x343   :  { %5924 = vmatpush2.bf16.msra.mxu0 %v7498_v45  ;;  %5884 = vmatprep.subr.bf16.mxu1 %v7363_v42  ;;  %v7197_v42 = vcombine.high %v2418_v54, %v2422_v50 }
 0x344   :  { %5925 = vmatprep.subr.bf16.mxu0 %v7491_v36  ;;  %v2797_v36 = vld [vmem:[%s10911_s5 + $0xd30] sm:$0xff] }
 0x346   :  { %5885 = vmatpush2.bf16.msra.mxu1 %v7362_v61 }
 0x347   :  { %5926 = vmatpush2.bf16.msra.mxu0 %v7490_v41  ;;  %5886 = vmatprep.subr.bf16.mxu1 %v7355_v60  ;;  %v7196_v41 = vcombine.low %v2418_v54, %v2422_v50  ;;  %v2382_v54 = vld [vmem:[%s10911_s5 + $0x38] sm:$0xff]  ;;  %v7546_v50 = vcombine.low %v2769_v18, %v2773_v19 }
 0x348   :  { %5927 = vmatprep.subr.bf16.mxu0 %v7483_v62 }
 0x34a   :  { %5887 = vmatpush2.bf16.msra.mxu1 %v7354_v5 }
 0x34b   :  { %5928 = vmatpush2.bf16.msra.mxu0 %v7482_v7  ;;  %5888 = vmatprep.subr.bf16.mxu1 %v7347_v10  ;;  %v7563_v10 = vcombine.high %v2785_v3, %v2789_v63 }
 0x34c   :  { %5929 = vmatprep.subr.bf16.mxu0 %v7475_v12  ;;  %v7181_v12 = vcombine.high %v2402_v1, %v2406_v2 }
 0x34e   :  { %5889 = vmatpush2.bf16.msra.mxu1 %v7346_v14  ;;  %v7562_v14 = vcombine.low %v2785_v3, %v2789_v63 }
 0x34f   :  { %5930 = vmatpush2.bf16.msra.mxu0 %v7474_v15  ;;  %5940 = vmatprep.subr.bf16.mxu1 %v7595_v16  ;;  %v7180_v15 = vcombine.low %v2402_v1, %v2406_v2  ;;  %v7555_v16 = vcombine.high %v2777_v55, %v2781_v38  ;;  %v2865_v1 = vld [vmem:[%s10911_s5 + $0xf50] sm:$0xff] }
 0x350   :  { %5981 = vmatprep.subr.bf16.mxu0 %v7213_v17  ;;  %v7173_v17 = vcombine.high %v2394_v58, %v2398_v13  ;;  %v2869_v2 = vld [vmem:[%s10911_s5 + $0xf70] sm:$0xff] }
 0x351   :  { %v10193_v27 = vpop.f32.mrf.mxu0  ;;  %5891 = vmatmul.mubr.bf16.vlgmr.msra.gmra.mxu1 %v9270_v47  ;;  %v5646_v30 = vpop.f32.mrf.mxu1  ;;  %v7643_v55 = vcombine.high %v2865_v1, %v2869_v2 }
 0x352   :  { %5932 = vmatmul.mubr.bf16.vlgmr.msra.gmra.mxu0 %v9460_v8  ;;  %v10204_v51 = vadd.f32 %v5646_v30, %v10000_v35  ;;  %5941 = vmatpush1.bf16.msra.mxu1 %v7594_v20  ;;  %v2793_v35 = vld [vmem:[%s10911_s5 + $0xd10] sm:$0xff]  ;;  %v2386_v20 = vld [vmem:[%s10911_s5 + $0x58] sm:$0xff] }
 0x353   :  { %5972 = vmatprep.mubr.bf16.mxu1 %v9576_v26  ;;  %5982 = vmatpush1.bf16.msra.mxu0 %v7212_v23  ;;  %v10207_v56 = vpop.f32.mrf.mxu0  ;;  %v5648_v57 = vpop.f32.mrf.mxu1  ;;  %v7571_v60 = vcombine.high %v2793_v35, %v2797_v36  ;;  %v7570_v5 = vcombine.low %v2793_v35, %v2797_v36  ;;  %v7172_v23 = vcombine.low %v2394_v58, %v2398_v13  ;;  %v2765_v30 = vld [vmem:[%s10911_s5 + $0xc30] sm:$0xff]  ;;  %v2498_v35 = vld [vmem:[%s10911_s5 + $0x3d8] sm:$0xff] }
 0x354   :  { %6013 = vmatprep.mubr.bf16.mxu0 %v9072_v4  ;;  %v10211_v45 = vadd.f32 %v5648_v57, %v10005_v48  ;;  %5942 = vmatprep.subr.bf16.mxu1 %v7587_v25  ;;  %v2410_v4 = vld [vmem:[%s10911_s5 + $0x118] sm:$0xff]  ;;  %v7547_v25 = vcombine.high %v2769_v18, %v2773_v19  ;;  %v7165_v33 = vcombine.high %v2386_v20, %v2390_v21  ;;  %v2857_v58 = vld [vmem:[%s10911_s5 + $0xf10] sm:$0xff] }
 0x355   :  { %v5691_v43 = vpop.f32.mrf.mxu0  ;;  %5983 = vmatprep.subr.bf16.mxu0 %v7205_v31  ;;  %v5650_v37 = vpop.f32.mrf.mxu1  ;;  %v2414_v48 = vld [vmem:[%s10911_s5 + $0x138] sm:$0xff]  ;;  %v7539_v57 = vcombine.high %v2761_v34, %v2765_v30  ;;  %v2861_v13 = vld [vmem:[%s10911_s5 + $0xf30] sm:$0xff] }
 0x356   :  { %5943 = vmatpush1.bf16.msra.mxu1 %v7586_v32  ;;  %v7189_v62 = vcombine.high %v2410_v4, %v2414_v48  ;;  %v7188_v7 = vcombine.low %v2410_v4, %v2414_v48  ;;  %v2378_v31 = vld [vmem:[%s10911_s5 + $0x18] sm:$0xff]  ;;  %v7164_v32 = vcombine.low %v2386_v20, %v2390_v21  ;;  %v7538_v43 = vcombine.low %v2761_v34, %v2765_v30  ;;  %v2849_v20 = vld [vmem:[%s10911_s5 + $0xed0] sm:$0xff] }
 0x357   :  { %5984 = vmatpush1.bf16.msra.mxu0 %v7204_v52  ;;  %v5692_v40 = vpop.f32.mrf.mxu0  ;;  %v5651_v61 = vpop.f32.mrf.mxu1  ;;  %5944 = vmatprep.subr.bf16.mxu1 %v7579_v53  ;;  %v7157_v52 = vcombine.high %v2378_v31, %v2382_v54  ;;  %v2881_v53 = vld [vmem:[%s10911_s5 + $0xfd0] sm:$0xff]  ;;  %v2502_v36 = vld [vmem:[%s10911_s5 + $0x3f8] sm:$0xff]  ;;  %v7156_v37 = vcombine.low %v2378_v31, %v2382_v54  ;;  %v7635_v18 = vcombine.high %v2857_v58, %v2861_v13 }
 0x358   :  { %5985 = vmatprep.subr.bf16.mxu0 %v7197_v42  ;;  %v2885_v42 = vld [vmem:[%s10911_s5 + $0xff0] sm:$0xff]  ;;  %v7277_v48 = vcombine.high %v2498_v35, %v2502_v36  ;;  %v2490_v61 = vld [vmem:[%s10911_s5 + $0x398] sm:$0xff] }
 0x359   :  { %v7659_v4 = vcombine.high %v2881_v53, %v2885_v42  ;;  %v2877_v40 = vld [vmem:[%s10911_s5 + $0xfb0] sm:$0xff] }
 0x35a   :  { %5945 = vmatpush1.bf16.msra.mxu1 %v7578_v39  ;;  %v2873_v39 = vld [vmem:[%s10911_s5 + $0xf90] sm:$0xff] }
 0x35b   :  { %5986 = vmatpush1.bf16.msra.mxu0 %v7196_v41  ;;  %5946 = vmatprep.subr.bf16.mxu1 %v7571_v60  ;;  %v2494_v41 = vld [vmem:[%s10911_s5 + $0x3b8] sm:$0xff]  ;;  %v7658_v60 = vcombine.low %v2881_v53, %v2885_v42  ;;  %v7651_v3 = vcombine.high %v2873_v39, %v2877_v40  ;;  %v2853_v21 = vld [vmem:[%s10911_s5 + $0xef0] sm:$0xff] }
 0x35c   :  { %5987 = vmatprep.subr.bf16.mxu0 %v7189_v62  ;;  %v7276_v62 = vcombine.low %v2498_v35, %v2502_v36  ;;  %v7269_v63 = vcombine.high %v2490_v61, %v2494_v41  ;;  %v7627_v34 = vcombine.high %v2849_v20, %v2853_v21  ;;  %v2841_v31 = vld [vmem:[%s10911_s5 + $0xe90] sm:$0xff] }
 0x35d   :  { %v2845_v54 = vld [vmem:[%s10911_s5 + $0xeb0] sm:$0xff] }
 0x35e   :  { %5947 = vmatpush1.bf16.msra.mxu1 %v7570_v5  ;;  %v2482_v5 = vld [vmem:[%s10911_s5 + $0x358] sm:$0xff]  ;;  %v7619_v53 = vcombine.high %v2841_v31, %v2845_v54  ;;  %v2833_v35 = vld [vmem:[%s10911_s5 + $0xe50] sm:$0xff] }
 0x35f   :  { %5988 = vmatpush1.bf16.msra.mxu0 %v7188_v7  ;;  %5948 = vmatprep.subr.bf16.mxu1 %v7563_v10  ;;  %v2486_v7 = vld [vmem:[%s10911_s5 + $0x378] sm:$0xff]  ;;  %v7650_v10 = vcombine.low %v2873_v39, %v2877_v40  ;;  %v2837_v36 = vld [vmem:[%s10911_s5 + $0xe70] sm:$0xff] }
 0x360   :  { %5989 = vmatprep.subr.bf16.mxu0 %v7181_v12  ;;  %v7268_v12 = vcombine.low %v2490_v61, %v2494_v41  ;;  %v7261_v38 = vcombine.high %v2482_v5, %v2486_v7  ;;  %v7611_v39 = vcombine.high %v2833_v35, %v2837_v36  ;;  %v2825_v61 = vld [vmem:[%s10911_s5 + $0xe10] sm:$0xff] }
 0x361   :  { %v2829_v41 = vld [vmem:[%s10911_s5 + $0xe30] sm:$0xff] }
 0x362   :  { %5949 = vmatpush1.bf16.msra.mxu1 %v7562_v14  ;;  %v2474_v14 = vld [vmem:[%s10911_s5 + $0x318] sm:$0xff] }
 0x363   :  { %5990 = vmatpush1.bf16.msra.mxu0 %v7180_v15  ;;  %5950 = vmatprep.subr.bf16.mxu1 %v7555_v16  ;;  %v2478_v15 = vld [vmem:[%s10911_s5 + $0x338] sm:$0xff]  ;;  %v7642_v16 = vcombine.low %v2865_v1, %v2869_v2  ;;  %v7603_v1 = vcombine.high %v2825_v61, %v2829_v41 }
 0x364   :  { %5991 = vmatprep.subr.bf16.mxu0 %v7173_v17  ;;  %v7260_v17 = vcombine.low %v2482_v5, %v2486_v7  ;;  %v7253_v19 = vcombine.high %v2474_v14, %v2478_v15  ;;  %v2562_v5 = vld [vmem:[%s10911_s5 + $0x5d8] sm:$0xff] }
 0x365   :  { %v2566_v7 = vld [vmem:[%s10911_s5 + $0x5f8] sm:$0xff] }
 0x366   :  { %5951 = vmatpush1.bf16.msra.mxu1 %v7554_v22  ;;  %v2466_v22 = vld [vmem:[%s10911_s5 + $0x2d8] sm:$0xff] }
 0x367   :  { %5992 = vmatpush1.bf16.msra.mxu0 %v7172_v23  ;;  %5952 = vmatprep.subr.bf16.mxu1 %v7547_v25  ;;  %v2470_v23 = vld [vmem:[%s10911_s5 + $0x2f8] sm:$0xff]  ;;  %v7634_v25 = vcombine.low %v2857_v58, %v2861_v13  ;;  %v7341_v58 = vcombine.high %v2562_v5, %v2566_v7  ;;  %v10384_v13 = vld [vmem:[%s10912_s6] sm:$0xff] }
 0x368   :  { %5993 = vmatprep.subr.bf16.mxu0 %v7165_v33  ;;  %v7252_v33 = vcombine.low %v2474_v14, %v2478_v15  ;;  %v7245_v30 = vcombine.high %v2466_v22, %v2470_v23  ;;  %v2900_v14 = vrot.slane %v10384_v13, %v8344_v46  ;;  %v2686_v46 = vld [vmem:[%s10911_s5 + $0x9b8] sm:$0xff] }
 0x36a   :  { %5953 = vmatpush1.bf16.msra.mxu1 %v7546_v50  ;;  %v2458_v50 = vld [vmem:[%s10911_s5 + $0x298] sm:$0xff] }
 0x36b   :  { %5994 = vmatpush1.bf16.msra.mxu0 %v7164_v32  ;;  %5954 = vmatprep.subr.bf16.mxu1 %v7539_v57  ;;  %v2462_v32 = vld [vmem:[%s10911_s5 + $0x2b8] sm:$0xff]  ;;  %v7626_v57 = vcombine.low %v2849_v20, %v2853_v21 }
 0x36c   :  { %5995 = vmatprep.subr.bf16.mxu0 %v7157_v52  ;;  %v7244_v52 = vcombine.low %v2466_v22, %v2470_v23  ;;  %v7237_v42 = vcombine.high %v2458_v50, %v2462_v32  ;;  %v2682_v20 = vld [vmem:[%s10911_s5 + $0x998] sm:$0xff]  ;;  %v5688_v22 = vadd.f32 %v10193_v27, %v2900_v14 }
 0x36d   :  { %v2678_v27 = vld [vmem:[%s10911_s5 + $0x978] sm:$0xff] }
 0x36e   :  { %5955 = vmatpush1.bf16.msra.mxu1 %v7538_v43  ;;  %v2450_v43 = vld [vmem:[%s10911_s5 + $0x258] sm:$0xff] }
 0x36f   :  { %5996 = vmatpush1.bf16.msra.mxu0 %v7156_v37  ;;  %5956 = vmatprep.subr.bf16.mxu1 %v7659_v4  ;;  %v2454_v37 = vld [vmem:[%s10911_s5 + $0x278] sm:$0xff]  ;;  %v7618_v4 = vcombine.low %v2841_v31, %v2845_v54 }
 0x370   :  { %5997 = vmatprep.subr.bf16.mxu0 %v7277_v48  ;;  %v7236_v48 = vcombine.low %v2458_v50, %v2462_v32  ;;  %v7229_v40 = vcombine.high %v2450_v43, %v2454_v37  ;;  %v2674_v31 = vld [vmem:[%s10911_s5 + $0x958] sm:$0xff] }
 0x371   :  { %v2654_v14 = vld [vmem:[%s10911_s5 + $0x8b8] sm:$0xff] }
 0x372   :  { %5957 = vmatpush2.bf16.msra.mxu1 %v7658_v60  ;;  %v2442_v60 = vld [vmem:[%s10911_s5 + $0x218] sm:$0xff] }
 0x373   :  { %5998 = vmatpush2.bf16.msra.mxu0 %v7276_v62  ;;  %5958 = vmatprep.subr.bf16.mxu1 %v7651_v3  ;;  %v2446_v62 = vld [vmem:[%s10911_s5 + $0x238] sm:$0xff]  ;;  %v7610_v3 = vcombine.low %v2833_v35, %v2837_v36 }
 0x374   :  { %5999 = vmatprep.subr.bf16.mxu0 %v7269_v63  ;;  %v7228_v63 = vcombine.low %v2450_v43, %v2454_v37  ;;  %v7221_v2 = vcombine.high %v2442_v60, %v2446_v62  ;;  %v7453_v43 = vcombine.high %v2674_v31, %v2678_v27 }
 0x376   :  { %5959 = vmatpush2.bf16.msra.mxu1 %v7650_v10  ;;  %v2690_v10 = vld [vmem:[%s10911_s5 + $0x9d8] sm:$0xff] }
 0x377   :  { %6000 = vmatpush2.bf16.msra.mxu0 %v7268_v12  ;;  %5960 = vmatprep.subr.bf16.mxu1 %v7643_v55  ;;  %v2694_v12 = vld [vmem:[%s10911_s5 + $0x9f8] sm:$0xff]  ;;  %v7602_v55 = vcombine.low %v2825_v61, %v2829_v41  ;;  %v7452_v41 = vcombine.low %v2674_v31, %v2678_v27 }
 0x378   :  { %6001 = vmatprep.subr.bf16.mxu0 %v7261_v38  ;;  %v7220_v38 = vcombine.low %v2442_v60, %v2446_v62  ;;  %v7469_v15 = vcombine.high %v2690_v10, %v2694_v12  ;;  %v7468_v21 = vcombine.low %v2690_v10, %v2694_v12  ;;  %v2638_v31 = vld [vmem:[%s10911_s5 + $0x838] sm:$0xff] }
 0x37a   :  { %5961 = vmatpush2.bf16.msra.mxu1 %v7642_v16  ;;  %v2554_v16 = vld [vmem:[%s10911_s5 + $0x598] sm:$0xff] }
 0x37b   :  { %6002 = vmatpush2.bf16.msra.mxu0 %v7260_v17  ;;  %5962 = vmatprep.subr.bf16.mxu1 %v7635_v18  ;;  %v2558_v17 = vld [vmem:[%s10911_s5 + $0x5b8] sm:$0xff]  ;;  %v2904_v18 = vrot.slane %v10384_v13, %v8353_v49 }
 0x37c   :  { %6003 = vmatprep.subr.bf16.mxu0 %v7253_v19  ;;  %v7340_v19 = vcombine.low %v2562_v5, %v2566_v7  ;;  %v7333_v23 = vcombine.high %v2554_v16, %v2558_v17  ;;  %v2546_v49 = vld [vmem:[%s10911_s5 + $0x558] sm:$0xff]  ;;  %v7332_v32 = vcombine.low %v2554_v16, %v2558_v17 }
 0x37d   :  { %v5690_v54 = vadd.f32 %v10207_v56, %v2904_v18 }
 0x37e   :  { %5963 = vmatpush2.bf16.msra.mxu1 %v7634_v25  ;;  %v2550_v25 = vld [vmem:[%s10911_s5 + $0x578] sm:$0xff] }
 0x37f   :  { %6004 = vmatpush2.bf16.msra.mxu0 %v7252_v33  ;;  %5964 = vmatprep.subr.bf16.mxu1 %v7627_v34 }
 0x380   :  { %6005 = vmatprep.subr.bf16.mxu0 %v7245_v30  ;;  %v7461_v30 = vcombine.high %v2682_v20, %v2686_v46 }
 0x382   :  { %5965 = vmatpush2.bf16.msra.mxu1 %v7626_v57 }
 0x383   :  { %6006 = vmatpush2.bf16.msra.mxu0 %v7244_v52  ;;  %5966 = vmatprep.subr.bf16.mxu1 %v7619_v53  ;;  %v7460_v53 = vcombine.low %v2682_v20, %v2686_v46  ;;  %v2518_v20 = vld [vmem:[%s10911_s5 + $0x478] sm:$0xff] }
 0x384   :  { %6007 = vmatprep.subr.bf16.mxu0 %v7237_v42  ;;  %v7325_v42 = vcombine.high %v2546_v49, %v2550_v25  ;;  %v2642_v46 = vld [vmem:[%s10911_s5 + $0x858] sm:$0xff] }
 0x386   :  { %5967 = vmatpush2.bf16.msra.mxu1 %v7618_v4  ;;  %v2666_v4 = vld [vmem:[%s10911_s5 + $0x918] sm:$0xff] }
 0x387   :  { %6008 = vmatpush2.bf16.msra.mxu0 %v7236_v48  ;;  %5968 = vmatprep.subr.bf16.mxu1 %v7611_v39  ;;  %v7324_v39 = vcombine.low %v2546_v49, %v2550_v25 }
 0x388   :  { %6009 = vmatprep.subr.bf16.mxu0 %v7229_v40 }
 0x38a   :  { %5969 = vmatpush2.bf16.msra.mxu1 %v7610_v3  ;;  %v2530_v3 = vld [vmem:[%s10911_s5 + $0x4d8] sm:$0xff] }
 0x38b   :  { %6010 = vmatpush2.bf16.msra.mxu0 %v7228_v63  ;;  %5970 = vmatprep.subr.bf16.mxu1 %v7603_v1  ;;  %v2534_v63 = vld [vmem:[%s10911_s5 + $0x4f8] sm:$0xff] }
 0x38c   :  { %6011 = vmatprep.subr.bf16.mxu0 %v7221_v2  ;;  %v2658_v1 = vld [vmem:[%s10911_s5 + $0x8d8] sm:$0xff]  ;;  %v7309_v10 = vcombine.high %v2530_v3, %v2534_v63 }
 0x38d   :  { %v2662_v2 = vld [vmem:[%s10911_s5 + $0x8f8] sm:$0xff] }
 0x38e   :  { %5971 = vmatpush2.bf16.msra.mxu1 %v7602_v55  ;;  %v7437_v12 = vcombine.high %v2658_v1, %v2662_v2  ;;  %v2522_v55 = vld [vmem:[%s10911_s5 + $0x498] sm:$0xff]  ;;  %v7436_v16 = vcombine.low %v2658_v1, %v2662_v2 }
 0x38f   :  { %6012 = vmatpush2.bf16.msra.mxu0 %v7220_v38  ;;  %6022 = vmatprep.subr.bf16.mxu1 %v7341_v58  ;;  %v2526_v38 = vld [vmem:[%s10911_s5 + $0x4b8] sm:$0xff] }
 0x390   :  { %6063 = vmatprep.subr.bf16.mxu0 %v7469_v15  ;;  %v2650_v58 = vld [vmem:[%s10911_s5 + $0x898] sm:$0xff]  ;;  %v7308_v15 = vcombine.low %v2530_v3, %v2534_v63  ;;  %v7301_v17 = vcombine.high %v2522_v55, %v2526_v38 }
 0x391   :  { %v5728_v33 = vpop.f32.mrf.mxu1  ;;  %v5769_v34 = vpop.f32.mrf.mxu0  ;;  %5973 = vmatmul.mubr.bf16.vlgmr.msra.gmra.mxu1 %v9578_v59  ;;  %v7429_v18 = vcombine.high %v2650_v58, %v2654_v14  ;;  %v2738_v3 = vld [vmem:[%s10911_s5 + $0xb58] sm:$0xff] }
 0x392   :  { %v5729_v50 = vadd.f32 %v5728_v33, %v5688_v22  ;;  %6014 = vmatmul.mubr.bf16.vlgmr.msra.gmra.mxu0 %v9237_v0  ;;  %6023 = vmatpush1.bf16.msra.mxu1 %v7340_v19  ;;  %v2538_v0 = vld [vmem:[%s10911_s5 + $0x518] sm:$0xff]  ;;  %v7300_v22 = vcombine.low %v2522_v55, %v2526_v38 }
 0x393   :  { %6054 = vmatprep.mubr.bf16.mxu1 %v9266_v29  ;;  %6064 = vmatpush1.bf16.msra.mxu0 %v7468_v21  ;;  %v5730_v57 = vpop.f32.mrf.mxu1  ;;  %v5771_v52 = vpop.f32.mrf.mxu0  ;;  %v2542_v29 = vld [vmem:[%s10911_s5 + $0x538] sm:$0xff] }
 0x394   :  { %v10419_v35 = vadd.f32 %v5769_v34, %v5729_v50  ;;  %6095 = vmatprep.mubr.bf16.mxu0 %v9458_v6  ;;  %v5731_v36 = vadd.f32 %v5730_v57, %v5690_v54  ;;  %6024 = vmatprep.subr.bf16.mxu1 %v7333_v23  ;;  %v2670_v6 = vld [vmem:[%s10911_s5 + $0x938] sm:$0xff]  ;;  %v7317_v60 = vcombine.high %v2538_v0, %v2542_v29 }
 0x395   :  { %v5732_v56 = vpop.f32.mrf.mxu1  ;;  %v5773_v37 = vpop.f32.mrf.mxu0  ;;  %6065 = vmatprep.subr.bf16.mxu0 %v7461_v30  ;;  %v7445_v62 = vcombine.high %v2666_v4, %v2670_v6  ;;  %v7316_v5 = vcombine.low %v2538_v0, %v2542_v29  ;;  %v7444_v7 = vcombine.low %v2666_v4, %v2670_v6  ;;  %v2514_v19 = vld [vmem:[%s10911_s5 + $0x458] sm:$0xff]  ;;  %v7428_v23 = vcombine.low %v2650_v58, %v2654_v14 }
 0x396   :  { %v10434_v48 = vadd.f32 %v5771_v52, %v5731_v36  ;;  %6025 = vmatpush1.bf16.msra.mxu1 %v7332_v32  ;;  %v2646_v21 = vld [vmem:[%s10911_s5 + $0x878] sm:$0xff]  ;;  %v7293_v49 = vcombine.high %v2514_v19, %v2518_v20  ;;  %v7292_v27 = vcombine.low %v2514_v19, %v2518_v20 }
 0x397   :  { %6066 = vmatpush1.bf16.msra.mxu0 %v7460_v53  ;;  %v5733_v40 = vpop.f32.mrf.mxu1  ;;  %v5774_v61 = vpop.f32.mrf.mxu0  ;;  %6026 = vmatprep.subr.bf16.mxu1 %v7325_v42  ;;  %v7421_v25 = vcombine.high %v2642_v46, %v2646_v21  ;;  %v2506_v33 = vld [vmem:[%s10911_s5 + $0x418] sm:$0xff]  ;;  %v7420_v54 = vcombine.low %v2642_v46, %v2646_v21 }
 0x398   :  { %6067 = vmatprep.subr.bf16.mxu0 %v7453_v43  ;;  %v2510_v34 = vld [vmem:[%s10911_s5 + $0x438] sm:$0xff] }
 0x399   :  { %v2634_v30 = vld [vmem:[%s10911_s5 + $0x818] sm:$0xff]  ;;  %v7285_v50 = vcombine.high %v2506_v33, %v2510_v34  ;;  %v7284_v36 = vcombine.low %v2506_v33, %v2510_v34 }
 0x39a   :  { %6027 = vmatpush1.bf16.msra.mxu1 %v7324_v39  ;;  %v7413_v32 = vcombine.high %v2634_v30, %v2638_v31  ;;  %v2626_v57 = vld [vmem:[%s10911_s5 + $0x7d8] sm:$0xff]  ;;  %v7412_v43 = vcombine.low %v2634_v30, %v2638_v31 }
 0x39b   :  { %6068 = vmatpush1.bf16.msra.mxu0 %v7452_v41  ;;  %6028 = vmatprep.subr.bf16.mxu1 %v7317_v60  ;;  %v2630_v52 = vld [vmem:[%s10911_s5 + $0x7f8] sm:$0xff] }
 0x39c   :  { %6069 = vmatprep.subr.bf16.mxu0 %v7445_v62  ;;  %v2754_v53 = vld [vmem:[%s10911_s5 + $0xbd8] sm:$0xff]  ;;  %v7405_v0 = vcombine.high %v2626_v57, %v2630_v52  ;;  %v7404_v39 = vcombine.low %v2626_v57, %v2630_v52 }
 0x39d   :  { %v2758_v42 = vld [vmem:[%s10911_s5 + $0xbf8] sm:$0xff] }
 0x39e   :  { %6029 = vmatpush1.bf16.msra.mxu1 %v7316_v5  ;;  %v7533_v29 = vcombine.high %v2754_v53, %v2758_v42  ;;  %v2618_v56 = vld [vmem:[%s10911_s5 + $0x798] sm:$0xff]  ;;  %v7532_v40 = vcombine.low %v2754_v53, %v2758_v42 }
 0x39f   :  { %6070 = vmatpush1.bf16.msra.mxu0 %v7444_v7  ;;  %6030 = vmatprep.subr.bf16.mxu1 %v7309_v10  ;;  %v2622_v37 = vld [vmem:[%s10911_s5 + $0x7b8] sm:$0xff] }
 0x3a0   :  { %6071 = vmatprep.subr.bf16.mxu0 %v7437_v12  ;;  %v2746_v4 = vld [vmem:[%s10911_s5 + $0xb98] sm:$0xff]  ;;  %v7397_v61 = vcombine.high %v2618_v56, %v2622_v37  ;;  %v7396_v1 = vcombine.low %v2618_v56, %v2622_v37 }
 0x3a1   :  { %v2750_v6 = vld [vmem:[%s10911_s5 + $0xbb8] sm:$0xff] }
 0x3a2   :  { %6031 = vmatpush1.bf16.msra.mxu1 %v7308_v15  ;;  %v7525_v41 = vcombine.high %v2746_v4, %v2750_v6  ;;  %v2610_v60 = vld [vmem:[%s10911_s5 + $0x758] sm:$0xff]  ;;  %v7524_v2 = vcombine.low %v2746_v4, %v2750_v6 }
 0x3a3   :  { %6072 = vmatpush1.bf16.msra.mxu0 %v7436_v16  ;;  %6032 = vmatprep.subr.bf16.mxu1 %v7301_v17  ;;  %v2614_v62 = vld [vmem:[%s10911_s5 + $0x778] sm:$0xff] }
 0x3a4   :  { %6073 = vmatprep.subr.bf16.mxu0 %v7429_v18  ;;  %v2742_v63 = vld [vmem:[%s10911_s5 + $0xb78] sm:$0xff]  ;;  %v7389_v5 = vcombine.high %v2610_v60, %v2614_v62  ;;  %v7388_v58 = vcombine.low %v2610_v60, %v2614_v62 }
 0x3a5   :  { %v7517_v7 = vcombine.high %v2738_v3, %v2742_v63  ;;  %v2602_v10 = vld [vmem:[%s10911_s5 + $0x718] sm:$0xff]  ;;  %v7516_v14 = vcombine.low %v2738_v3, %v2742_v63 }
 0x3a6   :  { %6033 = vmatpush1.bf16.msra.mxu1 %v7300_v22  ;;  %v2606_v12 = vld [vmem:[%s10911_s5 + $0x738] sm:$0xff] }
 0x3a7   :  { %6074 = vmatpush1.bf16.msra.mxu0 %v7428_v23  ;;  %6034 = vmatprep.subr.bf16.mxu1 %v7293_v49  ;;  %v2730_v55 = vld [vmem:[%s10911_s5 + $0xb18] sm:$0xff]  ;;  %v7381_v15 = vcombine.high %v2602_v10, %v2606_v12  ;;  %v7380_v46 = vcombine.low %v2602_v10, %v2606_v12 }
 0x3a8   :  { %6075 = vmatprep.subr.bf16.mxu0 %v7421_v25  ;;  %v2734_v38 = vld [vmem:[%s10911_s5 + $0xb38] sm:$0xff] }
 0x3a9   :  { %v7509_v16 = vcombine.high %v2730_v55, %v2734_v38  ;;  %v2594_v17 = vld [vmem:[%s10911_s5 + $0x6d8] sm:$0xff]  ;;  %v7508_v21 = vcombine.low %v2730_v55, %v2734_v38 }
 0x3aa   :  { %6035 = vmatpush1.bf16.msra.mxu1 %v7292_v27  ;;  %v2598_v18 = vld [vmem:[%s10911_s5 + $0x6f8] sm:$0xff] }
 0x3ab   :  { %6076 = vmatpush1.bf16.msra.mxu0 %v7420_v54  ;;  %6036 = vmatprep.subr.bf16.mxu1 %v7285_v50  ;;  %v2722_v19 = vld [vmem:[%s10911_s5 + $0xad8] sm:$0xff]  ;;  %v7373_v22 = vcombine.high %v2594_v17, %v2598_v18  ;;  %v7372_v30 = vcombine.low %v2594_v17, %v2598_v18 }
 0x3ac   :  { %6077 = vmatprep.subr.bf16.mxu0 %v7413_v32  ;;  %v2726_v20 = vld [vmem:[%s10911_s5 + $0xaf8] sm:$0xff] }
 0x3ad   :  { %v7501_v23 = vcombine.high %v2722_v19, %v2726_v20  ;;  %v2586_v49 = vld [vmem:[%s10911_s5 + $0x698] sm:$0xff]  ;;  %v7500_v31 = vcombine.low %v2722_v19, %v2726_v20 }
 0x3ae   :  { %6037 = vmatpush1.bf16.msra.mxu1 %v7284_v36  ;;  %v2590_v25 = vld [vmem:[%s10911_s5 + $0x6b8] sm:$0xff] }
 0x3af   :  { %6078 = vmatpush1.bf16.msra.mxu0 %v7412_v43  ;;  %6038 = vmatprep.subr.bf16.mxu1 %v7405_v0  ;;  %v2714_v33 = vld [vmem:[%s10911_s5 + $0xa98] sm:$0xff]  ;;  %v7365_v27 = vcombine.high %v2586_v49, %v2590_v25  ;;  %v7364_v53 = vcombine.low %v2586_v49, %v2590_v25  ;;  %v7872_v49 = vld [vmem:[%s10913_s7 + $0x28] sm:$0xff]  }
 0x3b0   :  { %6079 = vmatprep.subr.bf16.mxu0 %v7533_v29  ;;  %v2718_v34 = vld [vmem:[%s10911_s5 + $0xab8] sm:$0xff] }
 0x3b1   :  { %v7493_v54 = vcombine.high %v2714_v33, %v2718_v34  ;;  %v2578_v50 = vld [vmem:[%s10911_s5 + $0x658] sm:$0xff]  ;;  %v7492_v42 = vcombine.low %v2714_v33, %v2718_v34  ;;  %v7873_v34 = vld [vmem:[%s10913_s7 + $0x60] sm:$0xff]  }
 0x3b2   :  { %6039 = vmatpush2.bf16.msra.mxu1 %v7404_v39  ;;  %v2582_v32 = vld [vmem:[%s10911_s5 + $0x678] sm:$0xff] }
 0x3b3   :  { %6080 = vmatpush2.bf16.msra.mxu0 %v7532_v40  ;;  %6040 = vmatprep.subr.bf16.mxu1 %v7397_v61  ;;  %v2706_v57 = vld [vmem:[%s10911_s5 + $0xa58] sm:$0xff]  ;;  %v7357_v36 = vcombine.high %v2578_v50, %v2582_v32  ;;  %v7356_v4 = vcombine.low %v2578_v50, %v2582_v32 }
 0x3b4   :  { %6081 = vmatprep.subr.bf16.mxu0 %v7525_v41  ;;  %v2710_v52 = vld [vmem:[%s10911_s5 + $0xa78] sm:$0xff] }
 0x3b5   :  { %v7485_v43 = vcombine.high %v2706_v57, %v2710_v52  ;;  %v2570_v0 = vld [vmem:[%s10911_s5 + $0x618] sm:$0xff]  ;;  %v7484_v6 = vcombine.low %v2706_v57, %v2710_v52 }
 0x3b6   :  { %6041 = vmatpush2.bf16.msra.mxu1 %v7396_v1  ;;  %v2574_v29 = vld [vmem:[%s10911_s5 + $0x638] sm:$0xff] }
 0x3b7   :  { %6082 = vmatpush2.bf16.msra.mxu0 %v7524_v2  ;;  %6042 = vmatprep.subr.bf16.mxu1 %v7389_v5  ;;  %v2698_v56 = vld [vmem:[%s10911_s5 + $0xa18] sm:$0xff]  ;;  %v7349_v39 = vcombine.high %v2570_v0, %v2574_v29  ;;  %v7348_v60 = vcombine.low %v2570_v0, %v2574_v29  ;;  %v6146_v5 = vmax.f32 %v10211_v45, 0.0  ;;  %v7869_v45 = vld [vmem:[%s10913_s7 + $0x70] sm:$0xff]  }
 0x3b8   :  { %6083 = vmatprep.subr.bf16.mxu0 %v7517_v7  ;;  %v2702_v37 = vld [vmem:[%s10911_s5 + $0xa38] sm:$0xff] }
 0x3b9   :  { %v7477_v40 = vcombine.high %v2698_v56, %v2702_v37  ;;  %v2818_v61 = vld [vmem:[%s10911_s5 + $0xdd8] sm:$0xff]  ;;  %v7476_v62 = vcombine.low %v2698_v56, %v2702_v37  ;;  %v7878_v37 = vld [vmem:[%s10913_s7 + $0x10] sm:$0xff]  }
 0x3ba   :  { %6043 = vmatpush2.bf16.msra.mxu1 %v7388_v58  ;;  %v2822_v41 = vld [vmem:[%s10911_s5 + $0xdf8] sm:$0xff] }
 0x3bb   :  { %6084 = vmatpush2.bf16.msra.mxu0 %v7516_v14  ;;  %6044 = vmatprep.subr.bf16.mxu1 %v7381_v15  ;;  %v7597_v3 = vcombine.high %v2818_v61, %v2822_v41  ;;  %v7867_v63 = vld [vmem:[%s10913_s7 + $0x78] sm:$0xff]   ;;  %v7596_v7 = vcombine.low %v2818_v61, %v2822_v41  ;;  %v6154_v14 = vpack.c.bf16 %v6146_v5, %v6146_v5  ;;  %v7880_v41 = vld [vmem:[%s10913_s7 + $0x8] sm:$0xff]  }
 0x3bc   :  { %6085 = vmatprep.subr.bf16.mxu0 %v7509_v16  ;;  %v2810_v1 = vld [vmem:[%s10911_s5 + $0xd98] sm:$0xff] }
 0x3bd   :  { %v2814_v2 = vld [vmem:[%s10911_s5 + $0xdb8] sm:$0xff] }
 0x3be   :  { %6045 = vmatpush2.bf16.msra.mxu1 %v7380_v46  ;;  %v7868_v10 = vld [vmem:[%s10913_s7 + $0x38] sm:$0xff]   ;;  %v7589_v12 = vcombine.high %v2810_v1, %v2814_v2  ;;  %v7588_v17 = vcombine.low %v2810_v1, %v2814_v2  ;;  %v7882_v2 = vld [vmem:[%s10913_s7] sm:$0xff]  }
 0x3bf   :  { %6086 = vmatpush2.bf16.msra.mxu0 %v7508_v21  ;;  %6046 = vmatprep.subr.bf16.mxu1 %v7373_v22  ;;  %v2802_v55 = vld [vmem:[%s10911_s5 + $0xd58] sm:$0xff] }
 0x3c0   :  { %6087 = vmatprep.subr.bf16.mxu0 %v7501_v23  ;;  %v2806_v38 = vld [vmem:[%s10911_s5 + $0xd78] sm:$0xff] }
 0x3c1   :  { %v7581_v19 = vcombine.high %v2802_v55, %v2806_v38  ;;  %v7580_v22 = vcombine.low %v2802_v55, %v2806_v38  ;;  %v7875_v32 = vld [vmem:[%s10913_s7 + $0x58] sm:$0xff]  }
 0x3c2   :  { %6047 = vmatpush2.bf16.msra.mxu1 %v7372_v30  ;;  %v2786_v30 = vld [vmem:[%s10911_s5 + $0xcd8] sm:$0xff] }
 0x3c3   :  { %6088 = vmatpush2.bf16.msra.mxu0 %v7500_v31  ;;  %6048 = vmatprep.subr.bf16.mxu1 %v7365_v27  ;;  %v2790_v31 = vld [vmem:[%s10911_s5 + $0xcf8] sm:$0xff] }
 0x3c4   :  { %6089 = vmatprep.subr.bf16.mxu0 %v7493_v54  ;;  %v7874_v54 = vld [vmem:[%s10913_s7 + $0x20] sm:$0xff]   ;;  %v7565_v50 = vcombine.high %v2786_v30, %v2790_v31  ;;  %v2778_v57 = vld [vmem:[%s10911_s5 + $0xc98] sm:$0xff] }
 0x3c5   :  { %v2782_v52 = vld [vmem:[%s10911_s5 + $0xcb8] sm:$0xff] }
 0x3c6   :  { %6049 = vmatpush2.bf16.msra.mxu1 %v7364_v53  ;;  %v7564_v53 = vcombine.low %v2786_v30, %v2790_v31  ;;  %v2770_v0 = vld [vmem:[%s10911_s5 + $0xc58] sm:$0xff]  ;;  %v7556_v56 = vcombine.low %v2778_v57, %v2782_v52 }
 0x3c7   :  { %6090 = vmatpush2.bf16.msra.mxu0 %v7492_v42  ;;  %6050 = vmatprep.subr.bf16.mxu1 %v7357_v36  ;;  %v7876_v42 = vld [vmem:[%s10913_s7 + $0x18] sm:$0xff]   ;;  %v7557_v36 = vcombine.high %v2778_v57, %v2782_v52 }
 0x3c8   :  { %6091 = vmatprep.subr.bf16.mxu0 %v7485_v43  ;;  %v7877_v43 = vld [vmem:[%s10913_s7 + $0x50] sm:$0xff]   ;;  %v2774_v29 = vld [vmem:[%s10911_s5 + $0xc78] sm:$0xff] }
 0x3c9   :  { %v7548_v61 = vcombine.low %v2770_v0, %v2774_v29  ;;  %v7899_v55 = vld [vmem:[%s10913_s7 + $0x178] sm:$0xff]  }
 0x3ca   :  { %6051 = vmatpush2.bf16.msra.mxu1 %v7356_v4  ;;  %v7549_v4 = vcombine.high %v2770_v0, %v2774_v29 }
 0x3cb   :  { %6092 = vmatpush2.bf16.msra.mxu0 %v7484_v6  ;;  %6052 = vmatprep.subr.bf16.mxu1 %v7349_v39  ;;  %v7879_v6 = vld [vmem:[%s10913_s7 + $0x48] sm:$0xff]   ;;  %v2762_v39 = vld [vmem:[%s10911_s5 + $0xc18] sm:$0xff] }
 0x3cc   :  { %6093 = vmatprep.subr.bf16.mxu0 %v7477_v40  ;;  %v2766_v40 = vld [vmem:[%s10911_s5 + $0xc38] sm:$0xff] }
 0x3cd   :  { %v7540_v1 = vcombine.low %v2762_v39, %v2766_v40 }
 0x3ce   :  { %6053 = vmatpush2.bf16.msra.mxu1 %v7348_v60  ;;  %v7541_v60 = vcombine.high %v2762_v39, %v2766_v40 }
 0x3cf   :  { %6094 = vmatpush2.bf16.msra.mxu0 %v7476_v62  ;;  %6104 = vmatprep.subr.bf16.mxu1 %v7597_v3  ;;  %v7881_v62 = vld [vmem:[%s10913_s7 + $0x40] sm:$0xff]   ;;  %v2882_v3 = vld [vmem:[%s10911_s5 + $0xfd8] sm:$0xff] }
 0x3d0   :  { %7727 = vmatprep.subr.bf16.mxu0 %v7867_v63  ;;  %v2886_v63 = vld [vmem:[%s10911_s5 + $0xff8] sm:$0xff] }
 0x3d1   :  { %v5810_v58 = vpop.f32.mrf.mxu1  ;;  %6055 = vmatmul.mubr.bf16.vlgmr.msra.gmra.mxu1 %v9270_v47  ;;  %v7870_v47 = vld [vmem:[%s10913_s7 + $0x30] sm:$0xff]   ;;  %v7661_v5 = vcombine.high %v2882_v3, %v2886_v63  ;;  %v7660_v38 = vcombine.low %v2882_v3, %v2886_v63  ;;  %v7883_v3 = vld [vmem:[%s10913_s7 + $0xf8] sm:$0xff]   ;;  %v7914_v63 = vld [vmem:[%s10913_s7 + $0x100] sm:$0xff]  }
 0x3d2   :  { %v10610_v15 = vadd.f32 %v5810_v58, %v10419_v35  ;;  %v10612_v16 = vpop.f32.mrf.mxu0  ;;  %6096 = vmatmul.mubr.bf16.vlgmr.msra.gmra.mxu0 %v9460_v8  ;;  %6105 = vmatpush1.bf16.msra.mxu1 %v7596_v7  ;;  %v7871_v8 = vld [vmem:[%s10913_s7 + $0x68] sm:$0xff]   ;;  %v2798_v35 = vld [vmem:[%s10911_s5 + $0xd38] sm:$0xff]  ;;  %v6145_v7 = vmax.f32 %v10204_v51, 0.0 }
 0x3d3   :  { %6136 = vmatprep.mubr.bf16.mxu1 %v9576_v26  ;;  %7728 = vmatpush3.bf16.msra.mxu0 %v7868_v10  ;;  %v10616_v18 = vpop.f32.mrf.mxu1  ;;  %v2794_v26 = vld [vmem:[%s10911_s5 + $0xd18] sm:$0xff] }
 0x3d4   :  { %6712 = vmatprep.mubr.bf16.mxu0 %v6154_v14  ;;  %v10621_v20 = vpop.f32.mrf.mxu0  ;;  %6106 = vmatprep.subr.bf16.mxu1 %v7589_v12  ;;  %v7573_v25 = vcombine.high %v2794_v26, %v2798_v35  ;;  %v7572_v27 = vcombine.low %v2794_v26, %v2798_v35  ;;  %v2874_v10 = vld [vmem:[%s10911_s5 + $0xf98] sm:$0xff]  ;;  %v7902_v26 = vld [vmem:[%s10913_s7 + $0x130] sm:$0xff]  }
 0x3d5   :  { %v5814_v46 = vpop.f32.mrf.mxu1  ;;  %7729 = vmatprep.subr.bf16.mxu0 %v7869_v45  ;;  %v2878_v12 = vld [vmem:[%s10911_s5 + $0xfb8] sm:$0xff]  ;;  %v6153_v45 = vpack.c.bf16 %v6145_v7, %v6145_v7 }
 0x3d6   :  { %v5855_v21 = vpop.f32.mrf.mxu0  ;;  %6107 = vmatpush1.bf16.msra.mxu1 %v7588_v17  ;;  %v7653_v58 = vcombine.high %v2874_v10, %v2878_v12  ;;  %v7900_v51 = vld [vmem:[%s10913_s7 + $0x138] sm:$0xff]  }
 0x3d7   :  { %7730 = vmatpush3.bf16.msra.mxu0 %v7870_v47  ;;  %v5815_v23 = vpop.f32.mrf.mxu1  ;;  %6108 = vmatprep.subr.bf16.mxu1 %v7581_v19  ;;  %v2866_v14 = vld [vmem:[%s10911_s5 + $0xf58] sm:$0xff]  ;;  %v7901_v47 = vld [vmem:[%s10913_s7 + $0x170] sm:$0xff]   ;;  %v7652_v19 = vcombine.low %v2874_v10, %v2878_v12  ;;  %v7903_v21 = vld [vmem:[%s10913_s7 + $0x168] sm:$0xff]  }
 0x3d8   :  { %v5856_v33 = vpop.f32.mrf.mxu0  ;;  %7731 = vmatprep.subr.bf16.mxu0 %v7871_v8  ;;  %v2870_v17 = vld [vmem:[%s10911_s5 + $0xf78] sm:$0xff] }
 0x3d9   :  { %v7645_v8 = vcombine.high %v2866_v14, %v2870_v17  ;;  %v2858_v35 = vld [vmem:[%s10911_s5 + $0xf18] sm:$0xff] }
 0x3da   :  { %6109 = vmatpush1.bf16.msra.mxu1 %v7580_v22  ;;  %v2862_v46 = vld [vmem:[%s10911_s5 + $0xf38] sm:$0xff]  ;;  %v7644_v22 = vcombine.low %v2866_v14, %v2870_v17 }
 0x3db   :  { %7732 = vmatpush3.bf16.msra.mxu0 %v7872_v49  ;;  %6110 = vmatprep.subr.bf16.mxu1 %v7573_v25  ;;  %v7637_v23 = vcombine.high %v2858_v35, %v2862_v46  ;;  %v7904_v49 = vld [vmem:[%s10913_s7 + $0x128] sm:$0xff]   ;;  %v2850_v25 = vld [vmem:[%s10911_s5 + $0xed8] sm:$0xff]  ;;  %v7636_v30 = vcombine.low %v2858_v35, %v2862_v46  ;;  %v7893_v46 = vld [vmem:[%s10913_s7 + $0xd0] sm:$0xff]  }
 0x3dc   :  { %7733 = vmatprep.subr.bf16.mxu0 %v7873_v34  ;;  %v2854_v33 = vld [vmem:[%s10911_s5 + $0xef8] sm:$0xff]  ;;  %v7905_v34 = vld [vmem:[%s10913_s7 + $0x160] sm:$0xff]  }
 0x3dd   :  { %v7629_v31 = vcombine.high %v2850_v25, %v2854_v33  ;;  %v7628_v57 = vcombine.low %v2850_v25, %v2854_v33  ;;  %v7892_v35 = vld [vmem:[%s10913_s7 + $0x98] sm:$0xff]   ;;  %v7898_v25 = vld [vmem:[%s10913_s7 + $0x80] sm:$0xff]   ;;  %v6147_v33 = vmax.f32 %v10610_v15, 0.0  ;;  %v7918_v15 = vld [vmem:[%s10913_s7 + $0x1b0] sm:$0xff]  }
 0x3de   :  { %6111 = vmatpush1.bf16.msra.mxu1 %v7572_v27  ;;  %v7906_v27 = vld [vmem:[%s10913_s7 + $0x120] sm:$0xff]  }
 0x3df   :  { %7734 = vmatpush3.bf16.msra.mxu0 %v7874_v54  ;;  %6112 = vmatprep.subr.bf16.mxu1 %v7565_v50  ;;  %v2842_v54 = vld [vmem:[%s10911_s5 + $0xe98] sm:$0xff] }
 0x3e0   :  { %7735 = vmatprep.subr.bf16.mxu0 %v7875_v32  ;;  %v2846_v50 = vld [vmem:[%s10911_s5 + $0xeb8] sm:$0xff] }
 0x3e1   :  { %v7907_v32 = vld [vmem:[%s10913_s7 + $0x158] sm:$0xff]   ;;  %v7621_v52 = vcombine.high %v2842_v54, %v2846_v50  ;;  %v7620_v0 = vcombine.low %v2842_v54, %v2846_v50  ;;  %v7919_v54 = vld [vmem:[%s10913_s7 + $0x1e8] sm:$0xff]  }
 0x3e2   :  { %6113 = vmatpush1.bf16.msra.mxu1 %v7564_v53  ;;  %v7908_v53 = vld [vmem:[%s10913_s7 + $0x118] sm:$0xff]   ;;  %v7920_v50 = vld [vmem:[%s10913_s7 + $0x1a8] sm:$0xff]  }
 0x3e3   :  { %7736 = vmatpush3.bf16.msra.mxu0 %v7876_v42  ;;  %6114 = vmatprep.subr.bf16.mxu1 %v7557_v36  ;;  %v2834_v42 = vld [vmem:[%s10911_s5 + $0xe58] sm:$0xff] }
 0x3e4   :  { %7737 = vmatprep.subr.bf16.mxu0 %v7877_v43  ;;  %v2838_v36 = vld [vmem:[%s10911_s5 + $0xe78] sm:$0xff]  ;;  %v7909_v43 = vld [vmem:[%s10913_s7 + $0x150] sm:$0xff]  }
 0x3e5   :  { %v7613_v29 = vcombine.high %v2834_v42, %v2838_v36  ;;  %v7612_v39 = vcombine.low %v2834_v42, %v2838_v36  ;;  %v2912_v42 = vrot.slane %v10384_v13, %v733_v28  ;;  %v7925_v36 = vld [vmem:[%s10913_s7 + $0x1d0] sm:$0xff]  }
 0x3e6   :  { %6115 = vmatpush1.bf16.msra.mxu1 %v7556_v56  ;;  %v7910_v56 = vld [vmem:[%s10913_s7 + $0x110] sm:$0xff]  }
 0x3e7   :  { %7738 = vmatpush3.bf16.msra.mxu0 %v7878_v37  ;;  %6116 = vmatprep.subr.bf16.mxu1 %v7549_v4  ;;  %v2826_v37 = vld [vmem:[%s10911_s5 + $0xe18] sm:$0xff] }
 0x3e8   :  { %7739 = vmatprep.subr.bf16.mxu0 %v7879_v6  ;;  %v2830_v4 = vld [vmem:[%s10911_s5 + $0xe38] sm:$0xff]  ;;  %v7911_v6 = vld [vmem:[%s10913_s7 + $0x148] sm:$0xff]  }
 0x3e9   :  { %v7605_v40 = vcombine.high %v2826_v37, %v2830_v4 }
 0x3ea   :  { %6117 = vmatpush1.bf16.msra.mxu1 %v7548_v61  ;;  %v7912_v61 = vld [vmem:[%s10913_s7 + $0x108] sm:$0xff]  }
 0x3eb   :  { %7740 = vmatpush3.bf16.msra.mxu0 %v7880_v41  ;;  %6118 = vmatprep.subr.bf16.mxu1 %v7541_v60  ;;  %v5813_v41 = vadd.f32 %v10616_v18, %v10434_v48  ;;  %v7913_v60 = vld [vmem:[%s10913_s7 + $0x140] sm:$0xff]   ;;  %v2908_v48 = vrot.slane %v10384_v13, %v729_v24 }
 0x3ec   :  { %7741 = vmatprep.subr.bf16.mxu0 %v7881_v62  ;;  %v7604_v62 = vcombine.low %v2826_v37, %v2830_v4 }
 0x3ed   :  { %v6148_v18 = vmax.f32 %v5813_v41, 0.0  ;;  %v7928_v41 = vld [vmem:[%s10913_s7 + $0x188] sm:$0xff]  }
 0x3ee   :  { %6119 = vmatpush1.bf16.msra.mxu1 %v7540_v1  ;;  %v7884_v1 = vld [vmem:[%s10913_s7 + $0xb8] sm:$0xff]  }
 0x3ef   :  { %7742 = vmatpush3.bf16.msra.mxu0 %v7882_v2  ;;  %6120 = vmatprep.subr.bf16.mxu1 %v7661_v5  ;;  %v7885_v2 = vld [vmem:[%s10913_s7 + $0xf0] sm:$0xff]   ;;  %v5852_v5 = vadd.f32 %v10612_v16, %v2908_v48  ;;  %v6156_v7 = vpack.c.bf16 %v6148_v18, %v6148_v18  ;;  %v7929_v48 = vld [vmem:[%s10913_s7 + $0x1c0] sm:$0xff]  }
 0x3f0   :  { %7771 = vmatprep.subr.bf16.mxu0 %v7899_v55  ;;  %v7886_v55 = vld [vmem:[%s10913_s7 + $0xb0] sm:$0xff]  }
 0x3f2   :  { %6713 = vmatmul.mubr.bf16.vlgmr.msra.gmra.mxu0 %v6153_v45  ;;  %6121 = vmatpush2.bf16.msra.mxu1 %v7660_v38 }
 0x3f3   :  { %6122 = vmatprep.subr.bf16.mxu1 %v7653_v58  ;;  %7772 = vmatpush3.bf16.msra.mxu0 %v7900_v51  ;;  %v7887_v58 = vld [vmem:[%s10913_s7 + $0xe8] sm:$0xff]  }
 0x3f4   :  { %7773 = vmatprep.subr.bf16.mxu0 %v7901_v47  ;;  %v7889_v47 = vld [vmem:[%s10913_s7 + $0xe0] sm:$0xff]  }
 0x3f6   :  { %6123 = vmatpush2.bf16.msra.mxu1 %v7652_v19 }
 0x3f7   :  { %6124 = vmatprep.subr.bf16.mxu1 %v7645_v8  ;;  %7774 = vmatpush3.bf16.msra.mxu0 %v7902_v26  ;;  %v7890_v8 = vld [vmem:[%s10913_s7 + $0xa0] sm:$0xff]   ;;  %v7891_v26 = vld [vmem:[%s10913_s7 + $0xd8] sm:$0xff]  }
 0x3f8   :  { %7775 = vmatprep.subr.bf16.mxu0 %v7903_v21  ;;  %v7894_v21 = vld [vmem:[%s10913_s7 + $0x90] sm:$0xff]  }
 0x3fa   :  { %6125 = vmatpush2.bf16.msra.mxu1 %v7644_v22  ;;  %v7895_v22 = vld [vmem:[%s10913_s7 + $0xc8] sm:$0xff]  }
 0x3fb   :  { %6126 = vmatprep.subr.bf16.mxu1 %v7637_v23  ;;  %7776 = vmatpush3.bf16.msra.mxu0 %v7904_v49  ;;  %v7896_v23 = vld [vmem:[%s10913_s7 + $0x88] sm:$0xff]   ;;  %v7897_v49 = vld [vmem:[%s10913_s7 + $0xc0] sm:$0xff]  }
 0x3fc   :  { %7777 = vmatprep.subr.bf16.mxu0 %v7905_v34  ;;  %v6155_v34 = vpack.c.bf16 %v6147_v33, %v6147_v33 }
 0x3fe   :  { %6127 = vmatpush2.bf16.msra.mxu1 %v7636_v30  ;;  %v7915_v30 = vld [vmem:[%s10913_s7 + $0x1f8] sm:$0xff]  }
 0x3ff   :  { %6128 = vmatprep.subr.bf16.mxu1 %v7629_v31  ;;  %7778 = vmatpush3.bf16.msra.mxu0 %v7906_v27  ;;  %v7916_v31 = vld [vmem:[%s10913_s7 + $0x1b8] sm:$0xff]   ;;  %v7917_v27 = vld [vmem:[%s10913_s7 + $0x1f0] sm:$0xff]  }
 0x400   :  { %7779 = vmatprep.subr.bf16.mxu0 %v7907_v32  ;;  %v7921_v32 = vld [vmem:[%s10913_s7 + $0x1e0] sm:$0xff]  }
 0x402   :  { %6129 = vmatpush2.bf16.msra.mxu1 %v7628_v57  ;;  %v7922_v57 = vld [vmem:[%s10913_s7 + $0x1a0] sm:$0xff]  }
 0x403   :  { %6130 = vmatprep.subr.bf16.mxu1 %v7621_v52  ;;  %7780 = vmatpush3.bf16.msra.mxu0 %v7908_v53  ;;  %v7923_v52 = vld [vmem:[%s10913_s7 + $0x1d8] sm:$0xff]  }
 0x404   :  { %7781 = vmatprep.subr.bf16.mxu0 %v7909_v43  ;;  %v7924_v53 = vld [vmem:[%s10913_s7 + $0x198] sm:$0xff]   ;;  %v7926_v43 = vld [vmem:[%s10913_s7 + $0x190] sm:$0xff]  }
 0x406   :  { %6131 = vmatpush2.bf16.msra.mxu1 %v7620_v0  ;;  %v5854_v0 = vadd.f32 %v10621_v20, %v2912_v42 }
 0x407   :  { %6132 = vmatprep.subr.bf16.mxu1 %v7613_v29  ;;  %7782 = vmatpush3.bf16.msra.mxu0 %v7910_v56 }
 0x408   :  { %7783 = vmatprep.subr.bf16.mxu0 %v7911_v6 }
 0x40a   :  { %6133 = vmatpush2.bf16.msra.mxu1 %v7612_v39  ;;  %v7927_v39 = vld [vmem:[%s10913_s7 + $0x1c8] sm:$0xff]  }
 0x40b   :  { %6134 = vmatprep.subr.bf16.mxu1 %v7605_v40  ;;  %7784 = vmatpush3.bf16.msra.mxu0 %v7912_v61 }
 0x40c   :  { %7785 = vmatprep.subr.bf16.mxu0 %v7913_v60 }
 0x40e   :  { %6135 = vmatpush2.bf16.msra.mxu1 %v7604_v62 }
 0x40f   :  { %7749 = vmatprep.subr.bf16.mxu1 %v7883_v3  ;;  %7786 = vmatpush3.bf16.msra.mxu0 %v7914_v63 }
 0x411   :  { %v5892_v10 = vpop.f32.mrf.mxu1  ;;  %6137 = vmatmul.mubr.bf16.vlgmr.msra.gmra.mxu1 %v9578_v59  ;;  %v7888_v59 = vld [vmem:[%s10913_s7 + $0xa8] sm:$0xff]  }
 0x412   :  { %v5893_v24 = vadd.f32 %v5892_v10, %v5852_v5  ;;  %v5933_v12 = vpop.f32.mrf.mxu0  ;;  %7750 = vmatpush3.bf16.msra.mxu1 %v7884_v1  ;;  %6752 = vmatprep.mubr.bf16.mxu1 %v6156_v7  ;;  %v2916_v7 = vrot.slane %v10384_v13, %v737_v9  ;;  %v2920_v9 = vrot.slane %v10384_v13, %v741_v11 }
 0x413   :  { %v5894_v38 = vpop.f32.mrf.mxu1  ;;  %7751 = vmatprep.subr.bf16.mxu1 %v7885_v2  ;;  %v7930_v2 = vld [vmem:[%s10913_s7 + $0x180] sm:$0xff]  }
 0x414   :  { %v5934_v51 = vadd.f32 %v5933_v12, %v5893_v24  ;;  %v5935_v16 = vpop.f32.mrf.mxu0  ;;  %v5895_v29 = vadd.f32 %v5894_v38, %v5854_v0 }
 0x415   :  { %v5896_v45 = vpop.f32.mrf.mxu1 }
 0x416   :  { %v5937_v14 = vpop.f32.mrf.mxu0  ;;  %7752 = vmatpush3.bf16.msra.mxu1 %v7886_v55  ;;  %v5936_v37 = vadd.f32 %v5935_v16, %v5895_v29 }
 0x417   :  { %v5897_v17 = vpop.f32.mrf.mxu1  ;;  %7753 = vmatprep.subr.bf16.mxu1 %v7887_v58 }
 0x418   :  { %v5938_v19 = vpop.f32.mrf.mxu0 }
 0x41a   :  { %7754 = vmatpush3.bf16.msra.mxu1 %v7888_v59 }
 0x41b   :  { %7755 = vmatprep.subr.bf16.mxu1 %v7889_v47 }
 0x41e   :  { %7756 = vmatpush3.bf16.msra.mxu1 %v7890_v8 }
 0x41f   :  { %7757 = vmatprep.subr.bf16.mxu1 %v7891_v26 }
 0x422   :  { %7758 = vmatpush3.bf16.msra.mxu1 %v7892_v35 }
 0x423   :  { %7759 = vmatprep.subr.bf16.mxu1 %v7893_v46 }
 0x426   :  { %7760 = vmatpush3.bf16.msra.mxu1 %v7894_v21 }
 0x427   :  { %7761 = vmatprep.subr.bf16.mxu1 %v7895_v22 }
 0x42a   :  { %7762 = vmatpush3.bf16.msra.mxu1 %v7896_v23 }
 0x42b   :  { %7763 = vmatprep.subr.bf16.mxu1 %v7897_v49 }
 0x42e   :  { %7764 = vmatpush3.bf16.msra.mxu1 %v7898_v25 }
 0x42f   :  { %7793 = vmatprep.subr.bf16.mxu1 %v7915_v30 }
 0x431   :  { %6753 = vmatmul.mubr.bf16.vlgmr.msra.gmra.mxu1 %v6155_v34 }
 0x432   :  { %7794 = vmatpush3.bf16.msra.mxu1 %v7916_v31 }
 0x433   :  { %7795 = vmatprep.subr.bf16.mxu1 %v7917_v27 }
 0x436   :  { %7796 = vmatpush3.bf16.msra.mxu1 %v7918_v15 }
 0x437   :  { %7797 = vmatprep.subr.bf16.mxu1 %v7919_v54 }
 0x43a   :  { %7798 = vmatpush3.bf16.msra.mxu1 %v7920_v50 }
 0x43b   :  { %7799 = vmatprep.subr.bf16.mxu1 %v7921_v32 }
 0x43e   :  { %7800 = vmatpush3.bf16.msra.mxu1 %v7922_v57 }
 0x43f   :  { %7801 = vmatprep.subr.bf16.mxu1 %v7923_v52 }
 0x442   :  { %7802 = vmatpush3.bf16.msra.mxu1 %v7924_v53 }
 0x443   :  { %7803 = vmatprep.subr.bf16.mxu1 %v7925_v36 }
 0x446   :  { %7804 = vmatpush3.bf16.msra.mxu1 %v7926_v43 }
 0x447   :  { %7805 = vmatprep.subr.bf16.mxu1 %v7927_v39 }
 0x44a   :  { %7806 = vmatpush3.bf16.msra.mxu1 %v7928_v41 }
 0x44b   :  { %7807 = vmatprep.subr.bf16.mxu1 %v7929_v48 }
 0x44e   :  { %7808 = vmatpush3.bf16.msra.mxu1 %v7930_v2 }
 0x451   :  { %v5974_v56 = vpop.f32.mrf.mxu1 }
 0x452   :  { %v5975_v4 = vadd.f32 %v5974_v56, %v5934_v51  ;;  %v6015_v6 = vpop.f32.mrf.mxu0 }
 0x453   :  { %v5976_v28 = vpop.f32.mrf.mxu1  ;;  %v6016_v10 = vadd.f32 %v6015_v6, %v2916_v7 }
 0x454   :  { %v5977_v40 = vadd.f32 %v5976_v28, %v5936_v37  ;;  %v6017_v61 = vpop.f32.mrf.mxu0  ;;  %v6149_v60 = vmax.f32 %v5975_v4, 0.0 }
 0x455   :  { %v5978_v20 = vpop.f32.mrf.mxu1  ;;  %v6018_v35 = vadd.f32 %v6017_v61, %v2920_v9 }
 0x456   :  { %v6150_v62 = vmax.f32 %v5977_v40, 0.0  ;;  %v6019_v3 = vpop.f32.mrf.mxu0  ;;  %v6157_v5 = vpack.c.bf16 %v6149_v60, %v6149_v60 }
 0x457   :  { %v5979_v63 = vpop.f32.mrf.mxu1 }
 0x458   :  { %v6158_v18 = vpack.c.bf16 %v6150_v62, %v6150_v62  ;;  %v6020_v1 = vpop.f32.mrf.mxu0 }
 0x45a   :  { %6792 = vmatprep.mubr.bf16.mxu0 %v6158_v18 }
 0x45b   :  { %6793 = vmatmul.mubr.bf16.vlgmr.msra.gmra.mxu0 %v6157_v5 }
 0x491   :  { %v6056_v24 = vpop.f32.mrf.mxu1 }
 0x492   :  { %v6057_v12 = vadd.f32 %v6056_v24, %v6016_v10  ;;  %v6097_v55 = vpop.f32.mrf.mxu0 }
 0x493   :  { %v6058_v38 = vpop.f32.mrf.mxu1 }
 0x494   :  { %v6098_v58 = vadd.f32 %v6097_v55, %v6057_v12  ;;  %v6099_v51 = vpop.f32.mrf.mxu0  ;;  %v6059_v46 = vadd.f32 %v6058_v38, %v6018_v35 }
 0x495   :  { %v6060_v16 = vpop.f32.mrf.mxu1 }
 0x496   :  { %v6101_v45 = vpop.f32.mrf.mxu0  ;;  %v6100_v22 = vadd.f32 %v6099_v51, %v6059_v46 }
 0x497   :  { %v6061_v14 = vpop.f32.mrf.mxu1 }
 0x498   :  { %v6102_v59 = vpop.f32.mrf.mxu0 }
 0x4b2   :  { %v7743_v17 = vpop.f32.mrf.mxu0 }
 0x4b4   :  { %v7744_v47 = vpop.f32.mrf.mxu0 }
 0x4b5   :  { %v7745_v19 = vadd.f32 %v7744_v47, %v7743_v17 }
 0x4b6   :  { %v7746_v8 = vpop.f32.mrf.mxu0 }
 0x4b7   :  { %v6715_v54 = vadd.f32 %v7745_v19, %v7662_v44 }
 0x4b8   :  { %v7747_v26 = vpop.f32.mrf.mxu0 }
 0x4d1   :  { %v6138_v21 = vpop.f32.mrf.mxu1 }
 0x4d2   :  { %v6139_v23 = vadd.f32 %v6138_v21, %v6098_v58 }
 0x4d3   :  { %v6140_v49 = vpop.f32.mrf.mxu1 }
 0x4d4   :  { %v6141_v25 = vadd.f32 %v6140_v49, %v6100_v22  ;;  %v6151_v33 = vmax.f32 %v6139_v23, 0.0 }
 0x4d5   :  { %v6142_v34 = vpop.f32.mrf.mxu1 }
 0x4d6   :  { %v6152_v30 = vmax.f32 %v6141_v25, 0.0  ;;  %v6159_v15 = vpack.c.bf16 %v6151_v33, %v6151_v33 }
 0x4d7   :  { %v6143_v31 = vpop.f32.mrf.mxu1 }
 0x4d8   :  { %v6160_v27 = vpack.c.bf16 %v6152_v30, %v6152_v30 }
 0x4da   :  { %6832 = vmatprep.mubr.bf16.mxu1 %v6160_v27 }
 0x4db   :  { %6833 = vmatmul.mubr.bf16.vlgmr.msra.gmra.mxu1 %v6159_v15 }
 0x4f1   :  { %v7765_v11 = vpop.f32.mrf.mxu1 }
 0x4f3   :  { %v7766_v13 = vpop.f32.mrf.mxu1 }
 0x4f4   :  { %v7767_v50 = vadd.f32 %v7766_v13, %v7765_v11 }
 0x4f5   :  { %v7768_v32 = vpop.f32.mrf.mxu1 }
 0x4f6   :  { %v6755_v57 = vadd.f32 %v7767_v50, %v6715_v54 }
 0x4f7   :  { %v7769_v52 = vpop.f32.mrf.mxu1 }
 0x51b   :  { %v7787_v53 = vpop.f32.mrf.mxu0 }
 0x51d   :  { %v7788_v42 = vpop.f32.mrf.mxu0 }
 0x51e   :  { %v7789_v36 = vadd.f32 %v7788_v42, %v7787_v53 }
 0x51f   :  { %v7790_v43 = vpop.f32.mrf.mxu0 }
 0x520   :  { %v6795_v0 = vadd.f32 %v7789_v36, %v6755_v57 }
 0x521   :  { %v7791_v29 = vpop.f32.mrf.mxu0 }
 0x59b   :  { %v7809_v56 = vpop.f32.mrf.mxu1 }
 0x59d   :  { %v7810_v37 = vpop.f32.mrf.mxu1 }
 0x59e   :  { %v7811_v4 = vadd.f32 %v7810_v37, %v7809_v56 }
 0x59f   :  { %v7812_v6 = vpop.f32.mrf.mxu1 }
 0x5a0   :  { %v6835_v28 = vadd.f32 %v7811_v4, %v6795_v0 }
 0x5a1   :  { %v7813_v39 = vpop.f32.mrf.mxu1 }
 0x5a2   :  { %6841 = vst.msk [vmem:[#allocation2] sm:$0x3] %vm6840_vm1, %v6835_v28 }
 0x5a3   :  { %7944 = shalt.err (!%p7941_p4)
}
 0x5a4   :  { %6853 = dma.vmem_to_hbm [thread:$0]  %s6851_s19, 32, %s10916_s10, [#allocation3]  }
 0x5a5   :  { %7953 = dma.done.wait [#allocation3], 32  }
 0x5a6   :  { %7954 = vsyncadd [#allocation3], 4294967264 }
 0x5a7   :  { %6859 = vsyncpa [#allocation3], 1 }

</bundles_post_ra>
